<compile_context>
chip_gen: v7x
topology: tpu7x:2x2x1
jax: 0.10.0
libtpu: 0.0.40
codegen_flags: <defaults>
</compile_context>

<pallas_src>
import functools

import jax
import jax.numpy as jnp
import numpy as np
from jax.experimental import pallas as pl
from jax.experimental.pallas import tpu as pltpu

_TILE_R = 512    # rows  = candidate positives (sublane axis)
_TILE_C = 2048   # cols  = candidate negatives (lane axis)
_NEG = -1e30     # large finite sentinel (never -inf: avoids inf-inf NaNs)


def _aucpr_hinge_kernel(col_ref, row_ref, out_ref, acc_ref):
    """Accumulate sum(relu(col + row)) over one (TILE_R, TILE_C) pairwise tile."""
    j = pl.program_id(1)

    @pl.when(j == 0)
    def _():
        acc_ref[...] = jnp.zeros_like(acc_ref)

    c = col_ref[...]                       # (TILE_R, 1)   margin - pos_pred (or sentinel)
    r = row_ref[...]                       # (1, TILE_C)   neg_pred          (or sentinel)
    h = jnp.maximum(c + r, 0.0)            # (TILE_R, TILE_C) hinge; 0 for masked/padded pairs

    # Fold rows in sublane-tile (8-row) groups: pure VPU adds on layout-aligned slices.
    part = h[0:8, :]
    for rb in range(1, _TILE_R // 8):
        part = part + h[rb * 8:(rb + 1) * 8, :]
    acc_ref[...] += part                   # (8, TILE_C)

    # Finalize this row tile: fold lane tiles and emit one lane-dense (8, 128) partial block.
    @pl.when(j == pl.num_programs(1) - 1)
    def _():
        acc = acc_ref[...]                 # (8, TILE_C)
        folded = acc[:, 0:128]
        for lb in range(1, _TILE_C // 128):
            folded = folded + acc[:, lb * 128:(lb + 1) * 128]
        out_ref[...] = folded              # (8, 128)


@functools.partial(jax.jit, static_argnames=("margin",))
def aucpr_hinge_loss(y_pred, y_true, margin=1.0):
    """JAX/Pallas equivalent of AUCPRHingeLoss.forward (float32 scalar result)."""
    # TODO(synk): the PyTorch module asserts y_true is binary; there is no device-side
    # assert here -- labels outside {0, 1} silently fall into neither class.
    y_pred = jnp.asarray(y_pred, dtype=jnp.float32).reshape(-1)
    y_true = jnp.asarray(y_true).reshape(-1)
    n = y_pred.shape[0]

    pos_mask = (y_true == 1)
    neg_mask = (y_true == 0)

    # Fold masks + margin into the operands (see header).
    col_vals = jnp.where(pos_mask, jnp.float32(margin) - y_pred, jnp.float32(_NEG))
    row_vals = jnp.where(neg_mask, y_pred, jnp.float32(_NEG))

    n_r = ((n + _TILE_R - 1) // _TILE_R) * _TILE_R
    n_c = ((n + _TILE_C - 1) // _TILE_C) * _TILE_C
    col_p = jnp.pad(col_vals, (0, n_r - n), constant_values=_NEG).reshape(n_r, 1)
    row_p = jnp.pad(row_vals, (0, n_c - n), constant_values=_NEG).reshape(1, n_c)

    grid_r = n_r // _TILE_R
    grid_c = n_c // _TILE_C

    partials = pl.pallas_call(
        _aucpr_hinge_kernel,
        out_shape=jax.ShapeDtypeStruct((grid_r * 8, 128), jnp.float32),
        grid_spec=pltpu.PrefetchScalarGridSpec(
            num_scalar_prefetch=0,
            grid=(grid_r, grid_c),
            in_specs=[
                pl.BlockSpec((_TILE_R, 1), lambda i, j: (i, 0)),   # col operand (positives)
                pl.BlockSpec((1, _TILE_C), lambda i, j: (0, j)),   # row operand (negatives)
            ],
            out_specs=pl.BlockSpec((8, 128), lambda i, j: (i, 0)),  # one partial block / row tile
            scratch_shapes=[pltpu.VMEM((8, _TILE_C), jnp.float32)],
        ),
        compiler_params=pltpu.CompilerParams(
            dimension_semantics=("parallel", "arbitrary"),
            vmem_limit_bytes=48 * 1024 * 1024,
        ),
        cost_estimate=pl.CostEstimate(
            flops=3 * n_r * n_c,
            transcendentals=0,
            bytes_accessed=4 * (n_r + n_c * grid_r + grid_r * 8 * 128),
        ),
    )(col_p, row_p)

    hinge_sum = jnp.sum(partials, dtype=jnp.float32)
    n_pos = jnp.sum(pos_mask.astype(jnp.float32))
    n_neg = jnp.sum(neg_mask.astype(jnp.float32))
    n_pairs = n_pos * n_neg
    # PyTorch module returns 0.0 when either class is empty.
    loss = jnp.where(n_pairs > 0, hinge_sum / jnp.maximum(n_pairs, 1.0), 0.0)
    return loss.astype(jnp.float32)


def _reference_loss(y_pred, y_true, margin=1.0):
    y_pred = np.asarray(y_pred, dtype=np.float32).reshape(-1)
    y_true = np.asarray(y_true).reshape(-1)
    pos = y_pred[y_true == 1]
    neg = y_pred[y_true == 0]
    if pos.size == 0 or neg.size == 0:
        return np.float32(0.0)
    diff = neg[None, :] - pos[:, None]
    return np.float32(np.mean(np.maximum(margin + diff, 0.0)))


if __name__ == "__main__":
    key = jax.random.PRNGKey(0)
    k_pred, k_true = jax.random.split(key)

    # Small synthetic inputs consistent with the module: binary classification scores.
    batch, dim = 2, 128  # flattened N = 256
    y_pred = jax.random.normal(k_pred, (batch, dim), dtype=jnp.float32)
    y_true = jax.random.bernoulli(k_true, p=0.4, shape=(batch, dim)).astype(jnp.int32)
    # Make sure both classes are present.
    y_true = y_true.at[0, 0].set(1).at[0, 1].set(0)

    loss = jax.block_until_ready(aucpr_hinge_loss(y_pred, y_true, margin=1.0))
    ref = _reference_loss(np.array(y_pred), np.array(y_true), margin=1.0)
    np.testing.assert_allclose(np.array(loss), ref, rtol=1e-5, atol=1e-6)

    # Second check: odd length exercising padding and a multi-row-tile grid.
    n2 = 700
    y_pred2 = jax.random.normal(jax.random.PRNGKey(1), (n2,), dtype=jnp.float32)
    y_true2 = jax.random.bernoulli(jax.random.PRNGKey(2), p=0.3, shape=(n2,)).astype(jnp.int32)
    loss2 = jax.block_until_ready(aucpr_hinge_loss(y_pred2, y_true2, margin=0.7))
    ref2 = _reference_loss(np.array(y_pred2), np.array(y_true2), margin=0.7)
    np.testing.assert_allclose(np.array(loss2), ref2, rtol=1e-5, atol=1e-6)

    print("KERNEL_OK")
</pallas_src>

<mosaic_0001>
module attributes {stable_mosaic.version = 11 : i64} {
  func.func @_aucpr_hinge_kernel(%arg0: i32, %arg1: i32, %arg2: memref<512x1xf32, #tpu.memory_space<vmem>>, %arg3: memref<1x2048xf32, #tpu.memory_space<vmem>>, %arg4: memref<8x128xf32, #tpu.memory_space<vmem>>, %arg5: memref<8x2048xf32, #tpu.memory_space<vmem>>) attributes {dimension_semantics = [#tpu.dimension_semantics<parallel>, #tpu.dimension_semantics<arbitrary>], iteration_bounds = array<i64: 1, 1>, scalar_prefetch = 0 : i64, scratch_operands = 1 : i64, tpu.core_type = #tpu.core_type<tc>, window_params = [{transform_indices = @transform_0, window_bounds = array<i64: 512, 1>}, {transform_indices = @transform_1, window_bounds = array<i64: 1, 2048>}, {transform_indices = @transform_2, window_bounds = array<i64: 8, 128>}]} {
    %c0_i32 = arith.constant 0 : i32
    %0 = arith.cmpi eq, %arg1, %c0_i32 : i32
    %1 = arith.extui %0 : i1 to i32
    %c0_i32_0 = arith.constant 0 : i32
    %2 = arith.cmpi ne, %1, %c0_i32_0 : i32
    scf.if %2 {
      %cst_10 = arith.constant 0.000000e+00 : f32
      %143 = vector.broadcast %cst_10 : f32 to vector<8x2048xf32>
      %c0_11 = arith.constant 0 : index
      %c0_12 = arith.constant 0 : index
      %144 = vector.load %arg5[%c0_11, %c0_12] : memref<8x2048xf32, #tpu.memory_space<vmem>>, vector<8x2048xf32>
      tpu.vector_store %arg5[%c0_11, %c0_12], %143 {strides = array<i32>} : memref<8x2048xf32, #tpu.memory_space<vmem>>, vector<8x2048xf32>,
    } else {
    }
    %c0 = arith.constant 0 : index
    %c0_1 = arith.constant 0 : index
    %3 = vector.load %arg2[%c0, %c0_1] : memref<512x1xf32, #tpu.memory_space<vmem>>, vector<512x1xf32>
    %c0_2 = arith.constant 0 : index
    %c0_3 = arith.constant 0 : index
    %4 = vector.load %arg3[%c0_2, %c0_3] : memref<1x2048xf32, #tpu.memory_space<vmem>>, vector<1x2048xf32>
    %5 = vector.broadcast %3 : vector<512x1xf32> to vector<512x2048xf32>
    %6 = vector.broadcast %4 : vector<1x2048xf32> to vector<512x2048xf32>
    %7 = arith.addf %5, %6 : vector<512x2048xf32>
    %cst = arith.constant 0.000000e+00 : f32
    %8 = vector.broadcast %cst : f32 to vector<512x2048xf32>
    %9 = arith.maximumf %7, %8 : vector<512x2048xf32>
    %10 = vector.extract_strided_slice %9 {offsets = [0, 0], sizes = [8, 2048], strides = [1, 1]} : vector<512x2048xf32> to vector<8x2048xf32>
    %11 = vector.extract_strided_slice %9 {offsets = [8, 0], sizes = [8, 2048], strides = [1, 1]} : vector<512x2048xf32> to vector<8x2048xf32>
    %12 = arith.addf %10, %11 : vector<8x2048xf32>
    %13 = vector.extract_strided_slice %9 {offsets = [16, 0], sizes = [8, 2048], strides = [1, 1]} : vector<512x2048xf32> to vector<8x2048xf32>
    %14 = arith.addf %12, %13 : vector<8x2048xf32>
    %15 = vector.extract_strided_slice %9 {offsets = [24, 0], sizes = [8, 2048], strides = [1, 1]} : vector<512x2048xf32> to vector<8x2048xf32>
    %16 = arith.addf %14, %15 : vector<8x2048xf32>
    %17 = vector.extract_strided_slice %9 {offsets = [32, 0], sizes = [8, 2048], strides = [1, 1]} : vector<512x2048xf32> to vector<8x2048xf32>
    %18 = arith.addf %16, %17 : vector<8x2048xf32>
    %19 = vector.extract_strided_slice %9 {offsets = [40, 0], sizes = [8, 2048], strides = [1, 1]} : vector<512x2048xf32> to vector<8x2048xf32>
    %20 = arith.addf %18, %19 : vector<8x2048xf32>
    %21 = vector.extract_strided_slice %9 {offsets = [48, 0], sizes = [8, 2048], strides = [1, 1]} : vector<512x2048xf32> to vector<8x2048xf32>
    %22 = arith.addf %20, %21 : vector<8x2048xf32>
    %23 = vector.extract_strided_slice %9 {offsets = [56, 0], sizes = [8, 2048], strides = [1, 1]} : vector<512x2048xf32> to vector<8x2048xf32>
    %24 = arith.addf %22, %23 : vector<8x2048xf32>
    %25 = vector.extract_strided_slice %9 {offsets = [64, 0], sizes = [8, 2048], strides = [1, 1]} : vector<512x2048xf32> to vector<8x2048xf32>
    %26 = arith.addf %24, %25 : vector<8x2048xf32>
    %27 = vector.extract_strided_slice %9 {offsets = [72, 0], sizes = [8, 2048], strides = [1, 1]} : vector<512x2048xf32> to vector<8x2048xf32>
    %28 = arith.addf %26, %27 : vector<8x2048xf32>
    %29 = vector.extract_strided_slice %9 {offsets = [80, 0], sizes = [8, 2048], strides = [1, 1]} : vector<512x2048xf32> to vector<8x2048xf32>
    %30 = arith.addf %28, %29 : vector<8x2048xf32>
    %31 = vector.extract_strided_slice %9 {offsets = [88, 0], sizes = [8, 2048], strides = [1, 1]} : vector<512x2048xf32> to vector<8x2048xf32>
    %32 = arith.addf %30, %31 : vector<8x2048xf32>
    %33 = vector.extract_strided_slice %9 {offsets = [96, 0], sizes = [8, 2048], strides = [1, 1]} : vector<512x2048xf32> to vector<8x2048xf32>
    %34 = arith.addf %32, %33 : vector<8x2048xf32>
    %35 = vector.extract_strided_slice %9 {offsets = [104, 0], sizes = [8, 2048], strides = [1, 1]} : vector<512x2048xf32> to vector<8x2048xf32>
    %36 = arith.addf %34, %35 : vector<8x2048xf32>
    %37 = vector.extract_strided_slice %9 {offsets = [112, 0], sizes = [8, 2048], strides = [1, 1]} : vector<512x2048xf32> to vector<8x2048xf32>
    %38 = arith.addf %36, %37 : vector<8x2048xf32>
    %39 = vector.extract_strided_slice %9 {offsets = [120, 0], sizes = [8, 2048], strides = [1, 1]} : vector<512x2048xf32> to vector<8x2048xf32>
    %40 = arith.addf %38, %39 : vector<8x2048xf32>
    %41 = vector.extract_strided_slice %9 {offsets = [128, 0], sizes = [8, 2048], strides = [1, 1]} : vector<512x2048xf32> to vector<8x2048xf32>
    %42 = arith.addf %40, %41 : vector<8x2048xf32>
    %43 = vector.extract_strided_slice %9 {offsets = [136, 0], sizes = [8, 2048], strides = [1, 1]} : vector<512x2048xf32> to vector<8x2048xf32>
    %44 = arith.addf %42, %43 : vector<8x2048xf32>
    %45 = vector.extract_strided_slice %9 {offsets = [144, 0], sizes = [8, 2048], strides = [1, 1]} : vector<512x2048xf32> to vector<8x2048xf32>
    %46 = arith.addf %44, %45 : vector<8x2048xf32>
    %47 = vector.extract_strided_slice %9 {offsets = [152, 0], sizes = [8, 2048], strides = [1, 1]} : vector<512x2048xf32> to vector<8x2048xf32>
    %48 = arith.addf %46, %47 : vector<8x2048xf32>
    %49 = vector.extract_strided_slice %9 {offsets = [160, 0], sizes = [8, 2048], strides = [1, 1]} : vector<512x2048xf32> to vector<8x2048xf32>
    %50 = arith.addf %48, %49 : vector<8x2048xf32>
    %51 = vector.extract_strided_slice %9 {offsets = [168, 0], sizes = [8, 2048], strides = [1, 1]} : vector<512x2048xf32> to vector<8x2048xf32>
    %52 = arith.addf %50, %51 : vector<8x2048xf32>
    %53 = vector.extract_strided_slice %9 {offsets = [176, 0], sizes = [8, 2048], strides = [1, 1]} : vector<512x2048xf32> to vector<8x2048xf32>
    %54 = arith.addf %52, %53 : vector<8x2048xf32>
    %55 = vector.extract_strided_slice %9 {offsets = [184, 0], sizes = [8, 2048], strides = [1, 1]} : vector<512x2048xf32> to vector<8x2048xf32>
    %56 = arith.addf %54, %55 : vector<8x2048xf32>
    %57 = vector.extract_strided_slice %9 {offsets = [192, 0], sizes = [8, 2048], strides = [1, 1]} : vector<512x2048xf32> to vector<8x2048xf32>
    %58 = arith.addf %56, %57 : vector<8x2048xf32>
    %59 = vector.extract_strided_slice %9 {offsets = [200, 0], sizes = [8, 2048], strides = [1, 1]} : vector<512x2048xf32> to vector<8x2048xf32>
    %60 = arith.addf %58, %59 : vector<8x2048xf32>
    %61 = vector.extract_strided_slice %9 {offsets = [208, 0], sizes = [8, 2048], strides = [1, 1]} : vector<512x2048xf32> to vector<8x2048xf32>
    %62 = arith.addf %60, %61 : vector<8x2048xf32>
    %63 = vector.extract_strided_slice %9 {offsets = [216, 0], sizes = [8, 2048], strides = [1, 1]} : vector<512x2048xf32> to vector<8x2048xf32>
    %64 = arith.addf %62, %63 : vector<8x2048xf32>
    %65 = vector.extract_strided_slice %9 {offsets = [224, 0], sizes = [8, 2048], strides = [1, 1]} : vector<512x2048xf32> to vector<8x2048xf32>
    %66 = arith.addf %64, %65 : vector<8x2048xf32>
    %67 = vector.extract_strided_slice %9 {offsets = [232, 0], sizes = [8, 2048], strides = [1, 1]} : vector<512x2048xf32> to vector<8x2048xf32>
    %68 = arith.addf %66, %67 : vector<8x2048xf32>
    %69 = vector.extract_strided_slice %9 {offsets = [240, 0], sizes = [8, 2048], strides = [1, 1]} : vector<512x2048xf32> to vector<8x2048xf32>
    %70 = arith.addf %68, %69 : vector<8x2048xf32>
    %71 = vector.extract_strided_slice %9 {offsets = [248, 0], sizes = [8, 2048], strides = [1, 1]} : vector<512x2048xf32> to vector<8x2048xf32>
    %72 = arith.addf %70, %71 : vector<8x2048xf32>
    %73 = vector.extract_strided_slice %9 {offsets = [256, 0], sizes = [8, 2048], strides = [1, 1]} : vector<512x2048xf32> to vector<8x2048xf32>
    %74 = arith.addf %72, %73 : vector<8x2048xf32>
    %75 = vector.extract_strided_slice %9 {offsets = [264, 0], sizes = [8, 2048], strides = [1, 1]} : vector<512x2048xf32> to vector<8x2048xf32>
    %76 = arith.addf %74, %75 : vector<8x2048xf32>
    %77 = vector.extract_strided_slice %9 {offsets = [272, 0], sizes = [8, 2048], strides = [1, 1]} : vector<512x2048xf32> to vector<8x2048xf32>
    %78 = arith.addf %76, %77 : vector<8x2048xf32>
    %79 = vector.extract_strided_slice %9 {offsets = [280, 0], sizes = [8, 2048], strides = [1, 1]} : vector<512x2048xf32> to vector<8x2048xf32>
    %80 = arith.addf %78, %79 : vector<8x2048xf32>
    %81 = vector.extract_strided_slice %9 {offsets = [288, 0], sizes = [8, 2048], strides = [1, 1]} : vector<512x2048xf32> to vector<8x2048xf32>
    %82 = arith.addf %80, %81 : vector<8x2048xf32>
    %83 = vector.extract_strided_slice %9 {offsets = [296, 0], sizes = [8, 2048], strides = [1, 1]} : vector<512x2048xf32> to vector<8x2048xf32>
    %84 = arith.addf %82, %83 : vector<8x2048xf32>
    %85 = vector.extract_strided_slice %9 {offsets = [304, 0], sizes = [8, 2048], strides = [1, 1]} : vector<512x2048xf32> to vector<8x2048xf32>
    %86 = arith.addf %84, %85 : vector<8x2048xf32>
    %87 = vector.extract_strided_slice %9 {offsets = [312, 0], sizes = [8, 2048], strides = [1, 1]} : vector<512x2048xf32> to vector<8x2048xf32>
    %88 = arith.addf %86, %87 : vector<8x2048xf32>
    %89 = vector.extract_strided_slice %9 {offsets = [320, 0], sizes = [8, 2048], strides = [1, 1]} : vector<512x2048xf32> to vector<8x2048xf32>
    %90 = arith.addf %88, %89 : vector<8x2048xf32>
    %91 = vector.extract_strided_slice %9 {offsets = [328, 0], sizes = [8, 2048], strides = [1, 1]} : vector<512x2048xf32> to vector<8x2048xf32>
    %92 = arith.addf %90, %91 : vector<8x2048xf32>
    %93 = vector.extract_strided_slice %9 {offsets = [336, 0], sizes = [8, 2048], strides = [1, 1]} : vector<512x2048xf32> to vector<8x2048xf32>
    %94 = arith.addf %92, %93 : vector<8x2048xf32>
    %95 = vector.extract_strided_slice %9 {offsets = [344, 0], sizes = [8, 2048], strides = [1, 1]} : vector<512x2048xf32> to vector<8x2048xf32>
    %96 = arith.addf %94, %95 : vector<8x2048xf32>
    %97 = vector.extract_strided_slice %9 {offsets = [352, 0], sizes = [8, 2048], strides = [1, 1]} : vector<512x2048xf32> to vector<8x2048xf32>
    %98 = arith.addf %96, %97 : vector<8x2048xf32>
    %99 = vector.extract_strided_slice %9 {offsets = [360, 0], sizes = [8, 2048], strides = [1, 1]} : vector<512x2048xf32> to vector<8x2048xf32>
    %100 = arith.addf %98, %99 : vector<8x2048xf32>
    %101 = vector.extract_strided_slice %9 {offsets = [368, 0], sizes = [8, 2048], strides = [1, 1]} : vector<512x2048xf32> to vector<8x2048xf32>
    %102 = arith.addf %100, %101 : vector<8x2048xf32>
    %103 = vector.extract_strided_slice %9 {offsets = [376, 0], sizes = [8, 2048], strides = [1, 1]} : vector<512x2048xf32> to vector<8x2048xf32>
    %104 = arith.addf %102, %103 : vector<8x2048xf32>
    %105 = vector.extract_strided_slice %9 {offsets = [384, 0], sizes = [8, 2048], strides = [1, 1]} : vector<512x2048xf32> to vector<8x2048xf32>
    %106 = arith.addf %104, %105 : vector<8x2048xf32>
    %107 = vector.extract_strided_slice %9 {offsets = [392, 0], sizes = [8, 2048], strides = [1, 1]} : vector<512x2048xf32> to vector<8x2048xf32>
    %108 = arith.addf %106, %107 : vector<8x2048xf32>
    %109 = vector.extract_strided_slice %9 {offsets = [400, 0], sizes = [8, 2048], strides = [1, 1]} : vector<512x2048xf32> to vector<8x2048xf32>
    %110 = arith.addf %108, %109 : vector<8x2048xf32>
    %111 = vector.extract_strided_slice %9 {offsets = [408, 0], sizes = [8, 2048], strides = [1, 1]} : vector<512x2048xf32> to vector<8x2048xf32>
    %112 = arith.addf %110, %111 : vector<8x2048xf32>
    %113 = vector.extract_strided_slice %9 {offsets = [416, 0], sizes = [8, 2048], strides = [1, 1]} : vector<512x2048xf32> to vector<8x2048xf32>
    %114 = arith.addf %112, %113 : vector<8x2048xf32>
    %115 = vector.extract_strided_slice %9 {offsets = [424, 0], sizes = [8, 2048], strides = [1, 1]} : vector<512x2048xf32> to vector<8x2048xf32>
    %116 = arith.addf %114, %115 : vector<8x2048xf32>
    %117 = vector.extract_strided_slice %9 {offsets = [432, 0], sizes = [8, 2048], strides = [1, 1]} : vector<512x2048xf32> to vector<8x2048xf32>
    %118 = arith.addf %116, %117 : vector<8x2048xf32>
    %119 = vector.extract_strided_slice %9 {offsets = [440, 0], sizes = [8, 2048], strides = [1, 1]} : vector<512x2048xf32> to vector<8x2048xf32>
    %120 = arith.addf %118, %119 : vector<8x2048xf32>
    %121 = vector.extract_strided_slice %9 {offsets = [448, 0], sizes = [8, 2048], strides = [1, 1]} : vector<512x2048xf32> to vector<8x2048xf32>
    %122 = arith.addf %120, %121 : vector<8x2048xf32>
    %123 = vector.extract_strided_slice %9 {offsets = [456, 0], sizes = [8, 2048], strides = [1, 1]} : vector<512x2048xf32> to vector<8x2048xf32>
    %124 = arith.addf %122, %123 : vector<8x2048xf32>
    %125 = vector.extract_strided_slice %9 {offsets = [464, 0], sizes = [8, 2048], strides = [1, 1]} : vector<512x2048xf32> to vector<8x2048xf32>
    %126 = arith.addf %124, %125 : vector<8x2048xf32>
    %127 = vector.extract_strided_slice %9 {offsets = [472, 0], sizes = [8, 2048], strides = [1, 1]} : vector<512x2048xf32> to vector<8x2048xf32>
    %128 = arith.addf %126, %127 : vector<8x2048xf32>
    %129 = vector.extract_strided_slice %9 {offsets = [480, 0], sizes = [8, 2048], strides = [1, 1]} : vector<512x2048xf32> to vector<8x2048xf32>
    %130 = arith.addf %128, %129 : vector<8x2048xf32>
    %131 = vector.extract_strided_slice %9 {offsets = [488, 0], sizes = [8, 2048], strides = [1, 1]} : vector<512x2048xf32> to vector<8x2048xf32>
    %132 = arith.addf %130, %131 : vector<8x2048xf32>
    %133 = vector.extract_strided_slice %9 {offsets = [496, 0], sizes = [8, 2048], strides = [1, 1]} : vector<512x2048xf32> to vector<8x2048xf32>
    %134 = arith.addf %132, %133 : vector<8x2048xf32>
    %135 = vector.extract_strided_slice %9 {offsets = [504, 0], sizes = [8, 2048], strides = [1, 1]} : vector<512x2048xf32> to vector<8x2048xf32>
    %136 = arith.addf %134, %135 : vector<8x2048xf32>
    %c0_4 = arith.constant 0 : index
    %c0_5 = arith.constant 0 : index
    %137 = vector.load %arg5[%c0_4, %c0_5] : memref<8x2048xf32, #tpu.memory_space<vmem>>, vector<8x2048xf32>
    %138 = arith.addf %137, %136 : vector<8x2048xf32>
    %c0_6 = arith.constant 0 : index
    %c0_7 = arith.constant 0 : index
    %139 = vector.load %arg5[%c0_6, %c0_7] : memref<8x2048xf32, #tpu.memory_space<vmem>>, vector<8x2048xf32>
    tpu.vector_store %arg5[%c0_6, %c0_7], %138 {strides = array<i32>} : memref<8x2048xf32, #tpu.memory_space<vmem>>, vector<8x2048xf32>,
    %c0_i32_8 = arith.constant 0 : i32
    %140 = arith.cmpi eq, %arg1, %c0_i32_8 : i32
    %141 = arith.extui %140 : i1 to i32
    %c0_i32_9 = arith.constant 0 : i32
    %142 = arith.cmpi ne, %141, %c0_i32_9 : i32
    scf.if %142 {
      %c0_10 = arith.constant 0 : index
      %c0_11 = arith.constant 0 : index
      %143 = vector.load %arg5[%c0_10, %c0_11] : memref<8x2048xf32, #tpu.memory_space<vmem>>, vector<8x2048xf32>
      %144 = vector.extract_strided_slice %143 {offsets = [0, 0], sizes = [8, 128], strides = [1, 1]} : vector<8x2048xf32> to vector<8x128xf32>
      %145 = vector.extract_strided_slice %143 {offsets = [0, 128], sizes = [8, 128], strides = [1, 1]} : vector<8x2048xf32> to vector<8x128xf32>
      %146 = arith.addf %144, %145 : vector<8x128xf32>
      %147 = vector.extract_strided_slice %143 {offsets = [0, 256], sizes = [8, 128], strides = [1, 1]} : vector<8x2048xf32> to vector<8x128xf32>
      %148 = arith.addf %146, %147 : vector<8x128xf32>
      %149 = vector.extract_strided_slice %143 {offsets = [0, 384], sizes = [8, 128], strides = [1, 1]} : vector<8x2048xf32> to vector<8x128xf32>
      %150 = arith.addf %148, %149 : vector<8x128xf32>
      %151 = vector.extract_strided_slice %143 {offsets = [0, 512], sizes = [8, 128], strides = [1, 1]} : vector<8x2048xf32> to vector<8x128xf32>
      %152 = arith.addf %150, %151 : vector<8x128xf32>
      %153 = vector.extract_strided_slice %143 {offsets = [0, 640], sizes = [8, 128], strides = [1, 1]} : vector<8x2048xf32> to vector<8x128xf32>
      %154 = arith.addf %152, %153 : vector<8x128xf32>
      %155 = vector.extract_strided_slice %143 {offsets = [0, 768], sizes = [8, 128], strides = [1, 1]} : vector<8x2048xf32> to vector<8x128xf32>
      %156 = arith.addf %154, %155 : vector<8x128xf32>
      %157 = vector.extract_strided_slice %143 {offsets = [0, 896], sizes = [8, 128], strides = [1, 1]} : vector<8x2048xf32> to vector<8x128xf32>
      %158 = arith.addf %156, %157 : vector<8x128xf32>
      %159 = vector.extract_strided_slice %143 {offsets = [0, 1024], sizes = [8, 128], strides = [1, 1]} : vector<8x2048xf32> to vector<8x128xf32>
      %160 = arith.addf %158, %159 : vector<8x128xf32>
      %161 = vector.extract_strided_slice %143 {offsets = [0, 1152], sizes = [8, 128], strides = [1, 1]} : vector<8x2048xf32> to vector<8x128xf32>
      %162 = arith.addf %160, %161 : vector<8x128xf32>
      %163 = vector.extract_strided_slice %143 {offsets = [0, 1280], sizes = [8, 128], strides = [1, 1]} : vector<8x2048xf32> to vector<8x128xf32>
      %164 = arith.addf %162, %163 : vector<8x128xf32>
      %165 = vector.extract_strided_slice %143 {offsets = [0, 1408], sizes = [8, 128], strides = [1, 1]} : vector<8x2048xf32> to vector<8x128xf32>
      %166 = arith.addf %164, %165 : vector<8x128xf32>
      %167 = vector.extract_strided_slice %143 {offsets = [0, 1536], sizes = [8, 128], strides = [1, 1]} : vector<8x2048xf32> to vector<8x128xf32>
      %168 = arith.addf %166, %167 : vector<8x128xf32>
      %169 = vector.extract_strided_slice %143 {offsets = [0, 1664], sizes = [8, 128], strides = [1, 1]} : vector<8x2048xf32> to vector<8x128xf32>
      %170 = arith.addf %168, %169 : vector<8x128xf32>
      %171 = vector.extract_strided_slice %143 {offsets = [0, 1792], sizes = [8, 128], strides = [1, 1]} : vector<8x2048xf32> to vector<8x128xf32>
      %172 = arith.addf %170, %171 : vector<8x128xf32>
      %173 = vector.extract_strided_slice %143 {offsets = [0, 1920], sizes = [8, 128], strides = [1, 1]} : vector<8x2048xf32> to vector<8x128xf32>
      %174 = arith.addf %172, %173 : vector<8x128xf32>
      %c0_12 = arith.constant 0 : index
      %c0_13 = arith.constant 0 : index
      %175 = vector.load %arg4[%c0_12, %c0_13] : memref<8x128xf32, #tpu.memory_space<vmem>>, vector<8x128xf32>
      tpu.vector_store %arg4[%c0_12, %c0_13], %174 {strides = array<i32>} : memref<8x128xf32, #tpu.memory_space<vmem>>, vector<8x128xf32>,
    } else {
    }
    return
  }
  func.func @transform_0(%arg0: i32, %arg1: i32) -> (i32, i32) {
    %c0_i32 = arith.constant 0 : i32
    %c0_i32_0 = arith.constant 0 : i32
    return %arg0, %c0_i32 : i32, i32
  }
  func.func @transform_1(%arg0: i32, %arg1: i32) -> (i32, i32) {
    %c0_i32 = arith.constant 0 : i32
    %c0_i32_0 = arith.constant 0 : i32
    return %c0_i32, %arg1 : i32, i32
  }
  func.func @transform_2(%arg0: i32, %arg1: i32) -> (i32, i32) {
    %c0_i32 = arith.constant 0 : i32
    %c0_i32_0 = arith.constant 0 : i32
    return %arg0, %c0_i32 : i32, i32
  }
}

</mosaic_0001>

<bundles_post_ra>
// kernel: aucpr_hinge_loss.1
= control target key start
LH: loop header
LB: loop body
LE: loop exit
PB: predicated region body
PF: predicated region fallthrough
CT: control target
= control target key end

     0   :  { %v3645_v0 = vmov 0   ;;  %s7784_s0 = inlined_call_operand.vmem [shape: f32[512,1], index: 0, kind: input, shape index: {}]   ;;  %s7785_s1 = inlined_call_operand.vmem [shape: f32[1,2048], index: 1, kind: input, shape index: {}]   ;;  %s7786_s2 = inlined_call_operand.vmem [shape: f32[8,128], index: 2, kind: output, shape index: {}]  }
   0x1   :  { %3644 = vset.pattern.permute.xlu1 %v3645_v0  ;;  %3643 = vset.pattern.permute.xlu0 %v3645_v0  ;;  %v33_v1 = vld [vmem:[%s7784_s0 + $0x10] sm:$0xff]  ;;  %v31_v2 = vld [vmem:[%s7784_s0] sm:$0xff]  ;;  %v34_v3 = vld [vmem:[%s7784_s0 + $0x18] sm:$0xff] }
   0x2   :  { %109 = vperm.xlu1 %3644, %v33_v1   ;;  %99 = vperm.xlu0 %3643, %v31_v2   ;;  %v32_v4 = vld [vmem:[%s7784_s0 + $0x8] sm:$0xff]  ;;  %v35_v6 = vld [vmem:[%s7784_s0 + $0x20] sm:$0xff]  ;;  %v38_v7 = vld [vmem:[%s7784_s0 + $0x38] sm:$0xff]  ;;  %v419_v1 = vlaneseq }
   0x3   :  { %v36_v5 = vld [vmem:[%s7784_s0 + $0x28] sm:$0xff]  ;;  %v37_v8 = vld [vmem:[%s7784_s0 + $0x30] sm:$0xff]  ;;  %v39_v10 = vld [vmem:[%s7784_s0 + $0x40] sm:$0xff] }
   0x4   :  { %v40_v9 = vld [vmem:[%s7784_s0 + $0x48] sm:$0xff]  ;;  %v42_v11 = vld [vmem:[%s7784_s0 + $0x58] sm:$0xff]  ;;  %v41_v12 = vld [vmem:[%s7784_s0 + $0x50] sm:$0xff]  ;;  %v420_v2 = vshrl.u32 %v419_v1, 7 }
   0x5   :  { %v44_v13 = vld [vmem:[%s7784_s0 + $0x68] sm:$0xff]  ;;  %v43_v14 = vld [vmem:[%s7784_s0 + $0x60] sm:$0xff]  ;;  %v46_v15 = vld [vmem:[%s7784_s0 + $0x78] sm:$0xff] }
   0x6   :  { %114 = vperm.xlu1 %3644, %v34_v3   ;;  %104 = vperm.xlu0 %3643, %v32_v4   ;;  %v45_v16 = vld [vmem:[%s7784_s0 + $0x70] sm:$0xff]  ;;  %v48_v17 = vld [vmem:[%s7784_s0 + $0x88] sm:$0xff]  ;;  %v47_v18 = vld [vmem:[%s7784_s0 + $0x80] sm:$0xff]  ;;  %v421_v3 = vsub.s32 0, %v420_v2  ;;  %v425_v4 = vsub.s32 1, %v420_v2 }
   0x7   :  { %v50_v19 = vld [vmem:[%s7784_s0 + $0x98] sm:$0xff]  ;;  %v49_v20 = vld [vmem:[%s7784_s0 + $0x90] sm:$0xff]  ;;  %v52_v21 = vld [vmem:[%s7784_s0 + $0xa8] sm:$0xff] }
   0x8   :  { %v51_v22 = vld [vmem:[%s7784_s0 + $0xa0] sm:$0xff]  ;;  %v54_v23 = vld [vmem:[%s7784_s0 + $0xb8] sm:$0xff]  ;;  %v53_v24 = vld [vmem:[%s7784_s0 + $0xb0] sm:$0xff] }
   0x9   :  { %v56_v25 = vld [vmem:[%s7784_s0 + $0xc8] sm:$0xff]  ;;  %v55_v26 = vld [vmem:[%s7784_s0 + $0xc0] sm:$0xff]  ;;  %v58_v27 = vld [vmem:[%s7784_s0 + $0xd8] sm:$0xff] }
   0xa   :  { %124 = vperm.xlu1 %3644, %v36_v5   ;;  %119 = vperm.xlu0 %3643, %v35_v6   ;;  %v57_v28 = vld [vmem:[%s7784_s0 + $0xd0] sm:$0xff]  ;;  %v60_v29 = vld [vmem:[%s7784_s0 + $0xe8] sm:$0xff]  ;;  %v59_v30 = vld [vmem:[%s7784_s0 + $0xe0] sm:$0xff]  ;;  %v429_v5 = vsub.s32 2, %v420_v2  ;;  %v433_v6 = vsub.s32 3, %v420_v2 }
   0xb   :  { %v62_v31 = vld [vmem:[%s7784_s0 + $0xf8] sm:$0xff]  ;;  %v61_v32 = vld [vmem:[%s7784_s0 + $0xf0] sm:$0xff]  ;;  %v64_v33 = vld [vmem:[%s7784_s0 + $0x108] sm:$0xff] }
   0xc   :  { %v63_v34 = vld [vmem:[%s7784_s0 + $0x100] sm:$0xff]  ;;  %v66_v35 = vld [vmem:[%s7784_s0 + $0x118] sm:$0xff]  ;;  %v65_v36 = vld [vmem:[%s7784_s0 + $0x110] sm:$0xff] }
   0xd   :  { %v68_v37 = vld [vmem:[%s7784_s0 + $0x128] sm:$0xff]  ;;  %v67_v38 = vld [vmem:[%s7784_s0 + $0x120] sm:$0xff]  ;;  %v70_v39 = vld [vmem:[%s7784_s0 + $0x138] sm:$0xff] }
   0xe   :  { %134 = vperm.xlu1 %3644, %v38_v7   ;;  %129 = vperm.xlu0 %3643, %v37_v8   ;;  %v69_v40 = vld [vmem:[%s7784_s0 + $0x130] sm:$0xff]  ;;  %v72_v41 = vld [vmem:[%s7784_s0 + $0x148] sm:$0xff]  ;;  %v71_v42 = vld [vmem:[%s7784_s0 + $0x140] sm:$0xff]  ;;  %v437_v8 = vsub.s32 4, %v420_v2 }
   0xf   :  { %v74_v43 = vld [vmem:[%s7784_s0 + $0x158] sm:$0xff]  ;;  %v73_v44 = vld [vmem:[%s7784_s0 + $0x150] sm:$0xff]  ;;  %v76_v45 = vld [vmem:[%s7784_s0 + $0x168] sm:$0xff] }
  0x10   :  { %v75_v46 = vld [vmem:[%s7784_s0 + $0x160] sm:$0xff]  ;;  %v78_v47 = vld [vmem:[%s7784_s0 + $0x178] sm:$0xff]  ;;  %v77_v48 = vld [vmem:[%s7784_s0 + $0x170] sm:$0xff] }
  0x11   :  { %v80_v49 = vld [vmem:[%s7784_s0 + $0x188] sm:$0xff]  ;;  %v79_v50 = vld [vmem:[%s7784_s0 + $0x180] sm:$0xff]  ;;  %v82_v51 = vld [vmem:[%s7784_s0 + $0x198] sm:$0xff] }
  0x12   :  { %144 = vperm.xlu1 %3644, %v40_v9   ;;  %139 = vperm.xlu0 %3643, %v39_v10   ;;  %v81_v52 = vld [vmem:[%s7784_s0 + $0x190] sm:$0xff]  ;;  %v84_v53 = vld [vmem:[%s7784_s0 + $0x1a8] sm:$0xff]  ;;  %v83_v54 = vld [vmem:[%s7784_s0 + $0x1a0] sm:$0xff]  ;;  %v441_v9 = vsub.s32 5, %v420_v2  ;;  %v445_v10 = vsub.s32 6, %v420_v2 }
  0x13   :  { %v86_v55 = vld [vmem:[%s7784_s0 + $0x1b8] sm:$0xff]  ;;  %v85_v56 = vld [vmem:[%s7784_s0 + $0x1b0] sm:$0xff]  ;;  %v88_v57 = vld [vmem:[%s7784_s0 + $0x1c8] sm:$0xff] }
  0x14   :  { %v87_v58 = vld [vmem:[%s7784_s0 + $0x1c0] sm:$0xff]  ;;  %v90_v59 = vld [vmem:[%s7784_s0 + $0x1d8] sm:$0xff]  ;;  %v89_v60 = vld [vmem:[%s7784_s0 + $0x1d0] sm:$0xff] }
  0x15   :  { %v92_v61 = vld [vmem:[%s7784_s0 + $0x1e8] sm:$0xff]  ;;  %v91_v62 = vld [vmem:[%s7784_s0 + $0x1e0] sm:$0xff]  ;;  %v94_v63 = vld [vmem:[%s7784_s0 + $0x1f8] sm:$0xff] }
  0x16   :  { %154 = vperm.xlu1 %3644, %v42_v11   ;;  %149 = vperm.xlu0 %3643, %v41_v12   ;;  %v93_v0 = vld [vmem:[%s7784_s0 + $0x1f0] sm:$0xff]  ;;  %v95_v7 = vld [vmem:[%s7785_s1] sm:$0xff]  ;;  %v449_v11 = vsub.s32 7, %v420_v2  ;;  %v96_v12 = vld [vmem:[%s7785_s1 + $0x8] sm:$0xff] }
  0x1a   :  { %164 = vperm.xlu1 %3644, %v44_v13   ;;  %159 = vperm.xlu0 %3643, %v43_v14   ;;  %v3859_v13 = vrot.slane %v95_v7, %v421_v3  ;;  %v3861_v14 = vrot.slane %v95_v7, %v425_v4 }
  0x1e   :  { %174 = vperm.xlu1 %3644, %v46_v15   ;;  %169 = vperm.xlu0 %3643, %v45_v16   ;;  %v3863_v15 = vrot.slane %v95_v7, %v429_v5  ;;  %v3865_v16 = vrot.slane %v95_v7, %v433_v6 }
  0x22   :  { %184 = vperm.xlu1 %3644, %v48_v17   ;;  %179 = vperm.xlu0 %3643, %v47_v18   ;;  %v3867_v17 = vrot.slane %v95_v7, %v437_v8  ;;  %v3869_v18 = vrot.slane %v95_v7, %v441_v9 }
  0x26   :  { %194 = vperm.xlu1 %3644, %v50_v19   ;;  %189 = vperm.xlu0 %3643, %v49_v20   ;;  %v3871_v19 = vrot.slane %v95_v7, %v445_v10  ;;  %v3873_v20 = vrot.slane %v95_v7, %v449_v11 }
  0x28   :  { %8426 = vst [vmem:[#allocation3_spill] sm:$0xff] %v3873_v20 }
  0x2a   :  { %204 = vperm.xlu1 %3644, %v52_v21   ;;  %199 = vperm.xlu0 %3643, %v51_v22   ;;  %v3875_v21 = vrot.slane %v96_v12, %v421_v3  ;;  %v3877_v22 = vrot.slane %v96_v12, %v425_v4 }
  0x2c   :  { %8427 = vst [vmem:[#allocation4_spill] sm:$0xff] %v3875_v21  ;;  %8428 = vst [vmem:[#allocation5_spill] sm:$0xff] %v3877_v22 }
  0x2e   :  { %214 = vperm.xlu1 %3644, %v54_v23   ;;  %209 = vperm.xlu0 %3643, %v53_v24   ;;  %v3879_v23 = vrot.slane %v96_v12, %v429_v5  ;;  %v3881_v24 = vrot.slane %v96_v12, %v433_v6 }
  0x30   :  { %8429 = vst [vmem:[#allocation6_spill] sm:$0xff] %v3879_v23  ;;  %8430 = vst [vmem:[#allocation7_spill] sm:$0xff] %v3881_v24 }
  0x32   :  { %224 = vperm.xlu1 %3644, %v56_v25   ;;  %219 = vperm.xlu0 %3643, %v55_v26   ;;  %v3883_v25 = vrot.slane %v96_v12, %v437_v8  ;;  %v3885_v26 = vrot.slane %v96_v12, %v441_v9 }
  0x34   :  { %8431 = vst [vmem:[#allocation8_spill] sm:$0xff] %v3883_v25  ;;  %8432 = vst [vmem:[#allocation9_spill] sm:$0xff] %v3885_v26 }
  0x36   :  { %234 = vperm.xlu1 %3644, %v58_v27   ;;  %229 = vperm.xlu0 %3643, %v57_v28   ;;  %v3887_v27 = vrot.slane %v96_v12, %v445_v10  ;;  %v3889_v28 = vrot.slane %v96_v12, %v449_v11 }
  0x38   :  { %8433 = vst [vmem:[#allocation10_spill] sm:$0xff] %v3887_v27  ;;  %8434 = vst [vmem:[#allocation11_spill] sm:$0xff] %v3889_v28 }
  0x3a   :  { %244 = vperm.xlu1 %3644, %v60_v29   ;;  %239 = vperm.xlu0 %3643, %v59_v30  }
  0x3e   :  { %254 = vperm.xlu1 %3644, %v62_v31   ;;  %249 = vperm.xlu0 %3643, %v61_v32  }
  0x42   :  { %264 = vperm.xlu1 %3644, %v64_v33   ;;  %259 = vperm.xlu0 %3643, %v63_v34  }
  0x46   :  { %274 = vperm.xlu1 %3644, %v66_v35   ;;  %269 = vperm.xlu0 %3643, %v65_v36  }
  0x4a   :  { %284 = vperm.xlu1 %3644, %v68_v37   ;;  %279 = vperm.xlu0 %3643, %v67_v38  }
  0x4e   :  { %294 = vperm.xlu1 %3644, %v70_v39   ;;  %289 = vperm.xlu0 %3643, %v69_v40  }
  0x52   :  { %304 = vperm.xlu1 %3644, %v72_v41   ;;  %299 = vperm.xlu0 %3643, %v71_v42  }
  0x56   :  { %314 = vperm.xlu1 %3644, %v74_v43   ;;  %309 = vperm.xlu0 %3643, %v73_v44  }
  0x5a   :  { %324 = vperm.xlu1 %3644, %v76_v45   ;;  %319 = vperm.xlu0 %3643, %v75_v46  }
  0x5e   :  { %334 = vperm.xlu1 %3644, %v78_v47   ;;  %329 = vperm.xlu0 %3643, %v77_v48  }
  0x62   :  { %344 = vperm.xlu1 %3644, %v80_v49   ;;  %339 = vperm.xlu0 %3643, %v79_v50  }
  0x66   :  { %354 = vperm.xlu1 %3644, %v82_v51   ;;  %349 = vperm.xlu0 %3643, %v81_v52  }
  0x6a   :  { %364 = vperm.xlu1 %3644, %v84_v53   ;;  %359 = vperm.xlu0 %3643, %v83_v54  }
  0x6e   :  { %374 = vperm.xlu1 %3644, %v86_v55   ;;  %369 = vperm.xlu0 %3643, %v85_v56  }
  0x72   :  { %384 = vperm.xlu1 %3644, %v88_v57   ;;  %379 = vperm.xlu0 %3643, %v87_v58  }
  0x76   :  { %394 = vperm.xlu1 %3644, %v90_v59   ;;  %389 = vperm.xlu0 %3643, %v89_v60  }
  0x7a   :  { %404 = vperm.xlu1 %3644, %v92_v61   ;;  %399 = vperm.xlu0 %3643, %v91_v62  }
  0x7e   :  { %414 = vperm.xlu1 %3644, %v94_v63   ;;  %409 = vperm.xlu0 %3643, %v93_v0  }
  0x81   :  { %v110_v29 = vpop.permute.xlu1 %109  ;;  %v100_v54 = vpop.permute.xlu0 %99 }
  0x82   :  { %v3892_v30 = vadd.f32 %v3859_v13, %v110_v29  ;;  %v3895_v31 = vadd.f32 %v3861_v14, %v110_v29  ;;  %v3898_v32 = vadd.f32 %v3863_v15, %v110_v29  ;;  %v3901_v33 = vadd.f32 %v3865_v16, %v110_v29 }
  0x83   :  { %v3904_v34 = vadd.f32 %v3867_v17, %v110_v29  ;;  %v3907_v35 = vadd.f32 %v3869_v18, %v110_v29  ;;  %v3910_v36 = vadd.f32 %v3871_v19, %v110_v29  ;;  %v3913_v37 = vadd.f32 %v3873_v20, %v110_v29 }
  0x84   :  { %v3916_v38 = vadd.f32 %v3875_v21, %v110_v29  ;;  %v3919_v39 = vadd.f32 %v3877_v22, %v110_v29  ;;  %v3922_v40 = vadd.f32 %v3879_v23, %v110_v29  ;;  %v3925_v41 = vadd.f32 %v3881_v24, %v110_v29 }
  0x85   :  { %8435 = vst [vmem:[#allocation12_spill] sm:$0xff] %v3907_v35  ;;  %8436 = vst [vmem:[#allocation13_spill] sm:$0xff] %v3910_v36  ;;  %v3928_v42 = vadd.f32 %v3883_v25, %v110_v29  ;;  %v3931_v43 = vadd.f32 %v3885_v26, %v110_v29  ;;  %v3934_v44 = vadd.f32 %v3887_v27, %v110_v29  ;;  %v115_v52 = vpop.permute.xlu1 %114  ;;  %v105_v36 = vpop.permute.xlu0 %104 }
  0x86   :  { %8437 = vst [vmem:[#allocation14_spill] sm:$0xff] %v3913_v37  ;;  %8438 = vst [vmem:[#allocation15_spill] sm:$0xff] %v3916_v38  ;;  %v3937_v45 = vadd.f32 %v3889_v28, %v110_v29  ;;  %v3956_v63 = vadd.f32 %v3859_v13, %v100_v54  ;;  %v3959_v0 = vadd.f32 %v3861_v14, %v100_v54 }
  0x87   :  { %8439 = vst [vmem:[#allocation16_spill] sm:$0xff] %v3919_v39  ;;  %8440 = vst [vmem:[#allocation17_spill] sm:$0xff] %v3922_v40  ;;  %v3962_v1 = vadd.f32 %v3863_v15, %v100_v54  ;;  %v3965_v2 = vadd.f32 %v3865_v16, %v100_v54  ;;  %v3968_v3 = vadd.f32 %v3867_v17, %v100_v54 }
  0x88   :  { %8441 = vst [vmem:[#allocation18_spill] sm:$0xff] %v3925_v41  ;;  %8442 = vst [vmem:[#allocation19_spill] sm:$0xff] %v3928_v42  ;;  %v3971_v4 = vadd.f32 %v3869_v18, %v100_v54  ;;  %v3974_v5 = vadd.f32 %v3871_v19, %v100_v54  ;;  %v3977_v6 = vadd.f32 %v3873_v20, %v100_v54 }
  0x89   :  { %8443 = vst [vmem:[#allocation20_spill] sm:$0xff] %v3931_v43  ;;  %8444 = vst [vmem:[#allocation21_spill] sm:$0xff] %v3934_v44  ;;  %v3980_v7 = vadd.f32 %v3875_v21, %v100_v54  ;;  %v3983_v8 = vadd.f32 %v3877_v22, %v100_v54  ;;  %v3986_v9 = vadd.f32 %v3879_v23, %v100_v54 }
  0x8a   :  { %8445 = vst [vmem:[#allocation22_spill] sm:$0xff] %v3937_v45  ;;  %v3989_v10 = vadd.f32 %v3881_v24, %v100_v54  ;;  %v3992_v11 = vadd.f32 %v3883_v25, %v100_v54  ;;  %v3995_v12 = vadd.f32 %v3885_v26, %v100_v54  ;;  %v3998_v29 = vadd.f32 %v3887_v27, %v100_v54 }
  0x8b   :  { %v4001_v62 = vadd.f32 %v3889_v28, %v100_v54  ;;  %v4020_v55 = vadd.f32 %v3859_v13, %v115_v52  ;;  %v4023_v53 = vadd.f32 %v3861_v14, %v115_v52  ;;  %v4026_v51 = vadd.f32 %v3863_v15, %v115_v52 }
  0x8c   :  { %v4029_v50 = vadd.f32 %v3865_v16, %v115_v52  ;;  %v4032_v48 = vadd.f32 %v3867_v17, %v115_v52  ;;  %v4035_v47 = vadd.f32 %v3869_v18, %v115_v52  ;;  %v4038_v56 = vadd.f32 %v3871_v19, %v115_v52 }
  0x8d   :  { %8446 = vst [vmem:[#allocation23_spill] sm:$0xff] %v4020_v55  ;;  %8447 = vst [vmem:[#allocation24_spill] sm:$0xff] %v4023_v53  ;;  %v4041_v46 = vadd.f32 %v3873_v20, %v115_v52  ;;  %v4044_v49 = vadd.f32 %v3875_v21, %v115_v52  ;;  %v4047_v54 = vadd.f32 %v3877_v22, %v115_v52 }
  0x8e   :  { %8448 = vst [vmem:[#allocation25_spill] sm:$0xff] %v4026_v51  ;;  %8449 = vst [vmem:[#allocation26_spill] sm:$0xff] %v4029_v50  ;;  %v4050_v57 = vadd.f32 %v3879_v23, %v115_v52  ;;  %v4053_v58 = vadd.f32 %v3881_v24, %v115_v52  ;;  %v4056_v59 = vadd.f32 %v3883_v25, %v115_v52 }
  0x8f   :  { %8450 = vst [vmem:[#allocation27_spill] sm:$0xff] %v4032_v48  ;;  %8451 = vst [vmem:[#allocation28_spill] sm:$0xff] %v4035_v47  ;;  %v4059_v60 = vadd.f32 %v3885_v26, %v115_v52  ;;  %v4062_v61 = vadd.f32 %v3887_v27, %v115_v52  ;;  %v4065_v45 = vadd.f32 %v3889_v28, %v115_v52 }
  0x90   :  { %8452 = vst [vmem:[#allocation29_spill] sm:$0xff] %v4038_v56  ;;  %8453 = vst [vmem:[#allocation30_spill] sm:$0xff] %v4041_v46  ;;  %v515_v38 = vadd.f32 %v3859_v13, %v105_v36  ;;  %v516_v37 = vadd.f32 %v3861_v14, %v105_v36  ;;  %v517_v52 = vadd.f32 %v3863_v15, %v105_v36 }
  0x91   :  { %8454 = vst [vmem:[#allocation31_spill] sm:$0xff] %v4044_v49  ;;  %8455 = vst [vmem:[#allocation32_spill] sm:$0xff] %v4047_v54  ;;  %v518_v35 = vadd.f32 %v3865_v16, %v105_v36  ;;  %v519_v44 = vadd.f32 %v3867_v17, %v105_v36  ;;  %v520_v43 = vadd.f32 %v3869_v18, %v105_v36 }
  0x92   :  { %8456 = vst [vmem:[#allocation33_spill] sm:$0xff] %v4050_v57  ;;  %8457 = vst [vmem:[#allocation34_spill] sm:$0xff] %v4053_v58  ;;  %v521_v42 = vadd.f32 %v3871_v19, %v105_v36  ;;  %v522_v41 = vadd.f32 %v3873_v20, %v105_v36  ;;  %v523_v40 = vadd.f32 %v3875_v21, %v105_v36  ;;  %v1539_v54 = vmax.f32 %v515_v38, 0.0 }
  0x93   :  { %8458 = vst [vmem:[#allocation35_spill] sm:$0xff] %v4056_v59  ;;  %8459 = vst [vmem:[#allocation36_spill] sm:$0xff] %v4059_v60  ;;  %v524_v39 = vadd.f32 %v3877_v22, %v105_v36  ;;  %v527_v60 = vadd.f32 %v3883_v25, %v105_v36  ;;  %v528_v59 = vadd.f32 %v3885_v26, %v105_v36  ;;  %v1540_v49 = vmax.f32 %v516_v37, 0.0 }
  0x94   :  { %8460 = vst [vmem:[#allocation37_spill] sm:$0xff] %v4062_v61  ;;  %8461 = vst [vmem:[#allocation38_spill] sm:$0xff] %v4065_v45  ;;  %v525_v45 = vadd.f32 %v3879_v23, %v105_v36  ;;  %v526_v61 = vadd.f32 %v3881_v24, %v105_v36  ;;  %v529_v58 = vadd.f32 %v3887_v27, %v105_v36  ;;  %v1541_v46 = vmax.f32 %v517_v52, 0.0  ;;  %v8491_v52 = vld [vmem:[#allocation16_spill] sm:$0xff] }
  0x95   :  { %v530_v57 = vadd.f32 %v3889_v28, %v105_v36  ;;  %v1542_v56 = vmax.f32 %v518_v35, 0.0  ;;  %v1543_v47 = vmax.f32 %v519_v44, 0.0  ;;  %v1544_v48 = vmax.f32 %v520_v43, 0.0 }
  0x96   :  { %v1545_v50 = vmax.f32 %v521_v42, 0.0  ;;  %v1546_v51 = vmax.f32 %v522_v41, 0.0  ;;  %v1547_v53 = vmax.f32 %v523_v40, 0.0  ;;  %v1548_v55 = vmax.f32 %v524_v39, 0.0 }
  0x97   :  { %v1549_v23 = vmax.f32 %v525_v45, 0.0  ;;  %v1550_v24 = vmax.f32 %v526_v61, 0.0  ;;  %v1551_v22 = vmax.f32 %v527_v60, 0.0  ;;  %v1552_v25 = vmax.f32 %v528_v59, 0.0 }
  0x98   :  { %v1553_v21 = vmax.f32 %v529_v58, 0.0  ;;  %v1554_v26 = vmax.f32 %v530_v57, 0.0  ;;  %v8462_v27 = vmax.f32 %v3956_v63, 0.0  ;;  %v8463_v36 = vmax.f32 %v3959_v0, 0.0 }
  0x99   :  { %v8464_v35 = vmax.f32 %v3962_v1, 0.0  ;;  %v8465_v42 = vmax.f32 %v3965_v2, 0.0  ;;  %v8466_v39 = vmax.f32 %v3968_v3, 0.0  ;;  %v8467_v43 = vmax.f32 %v3971_v4, 0.0 }
  0x9a   :  { %v2547_v20 = vadd.f32 %v1539_v54, %v8462_v27  ;;  %v2548_v37 = vadd.f32 %v1540_v49, %v8463_v36  ;;  %v8468_v45 = vmax.f32 %v3974_v5, 0.0  ;;  %v8469_v27 = vmax.f32 %v3977_v6, 0.0 }
  0x9b   :  { %v2549_v38 = vadd.f32 %v1541_v46, %v8464_v35  ;;  %v2550_v41 = vadd.f32 %v1542_v56, %v8465_v42  ;;  %v2551_v40 = vadd.f32 %v1543_v47, %v8466_v39  ;;  %v2552_v44 = vadd.f32 %v1544_v48, %v8467_v43  ;;  %v8497_v39 = vld [vmem:[#allocation19_spill] sm:$0xff] }
  0x9c   :  { %v2553_v57 = vadd.f32 %v1545_v50, %v8468_v45  ;;  %v2554_v58 = vadd.f32 %v1546_v51, %v8469_v27  ;;  %v8470_v49 = vmax.f32 %v3980_v7, 0.0  ;;  %v8471_v46 = vmax.f32 %v3983_v8, 0.0  ;;  %v8501_v27 = vld [vmem:[#allocation21_spill] sm:$0xff] }
  0x9d   :  { %v8472_v56 = vmax.f32 %v3986_v9, 0.0  ;;  %v8473_v47 = vmax.f32 %v3989_v10, 0.0  ;;  %v8474_v48 = vmax.f32 %v3992_v11, 0.0  ;;  %v8475_v50 = vmax.f32 %v3995_v12, 0.0  ;;  %v8483_v9 = vld [vmem:[#allocation12_spill] sm:$0xff] }
  0x9e   :  { %v2555_v59 = vadd.f32 %v1547_v53, %v8470_v49  ;;  %v2556_v60 = vadd.f32 %v1548_v55, %v8471_v46  ;;  %v8476_v51 = vmax.f32 %v3998_v29, 0.0  ;;  %v8477_v53 = vmax.f32 %v4001_v62, 0.0  ;;  %v8485_v62 = vld [vmem:[#allocation13_spill] sm:$0xff]  ;;  %v8489_v29 = vld [vmem:[#allocation15_spill] sm:$0xff]  ;;  %v8503_v46 = vld [vmem:[#allocation22_spill] sm:$0xff] }
  0x9f   :  { %v2557_v61 = vadd.f32 %v1549_v23, %v8472_v56  ;;  %v2558_v63 = vadd.f32 %v1550_v24, %v8473_v47  ;;  %v2559_v0 = vadd.f32 %v1551_v22, %v8474_v48  ;;  %v2560_v1 = vadd.f32 %v1552_v25, %v8475_v50 }
  0xa0   :  { %v2561_v2 = vadd.f32 %v1553_v21, %v8476_v51  ;;  %v2562_v3 = vadd.f32 %v1554_v26, %v8477_v53  ;;  %v8478_v55 = vmax.f32 %v3892_v30, 0.0  ;;  %v8479_v23 = vmax.f32 %v3895_v31, 0.0  ;;  %v8487_v30 = vld [vmem:[#allocation14_spill] sm:$0xff]  ;;  %v125_v31 = vpop.permute.xlu1 %124 }
  0xa1   :  { %v8480_v24 = vmax.f32 %v3898_v32, 0.0  ;;  %v8481_v22 = vmax.f32 %v3901_v33, 0.0  ;;  %v8482_v25 = vmax.f32 %v3904_v34, 0.0  ;;  %v8484_v21 = vmax.f32 %v8483_v9, 0.0  ;;  %v8522_v9 = vld [vmem:[#allocation8_spill] sm:$0xff] }
  0xa2   :  { %v2563_v4 = vadd.f32 %v2547_v20, %v8478_v55  ;;  %v2564_v5 = vadd.f32 %v2548_v37, %v8479_v23  ;;  %v8486_v26 = vmax.f32 %v8485_v62, 0.0  ;;  %v8488_v20 = vmax.f32 %v8487_v30, 0.0  ;;  %v8493_v37 = vld [vmem:[#allocation17_spill] sm:$0xff]  ;;  %v8518_v23 = vld [vmem:[#allocation6_spill] sm:$0xff] }
  0xa3   :  { %v2565_v6 = vadd.f32 %v2549_v38, %v8480_v24  ;;  %v2566_v7 = vadd.f32 %v2550_v41, %v8481_v22  ;;  %v2567_v8 = vadd.f32 %v2551_v40, %v8482_v25  ;;  %v2568_v10 = vadd.f32 %v2552_v44, %v8484_v21  ;;  %v8495_v38 = vld [vmem:[#allocation18_spill] sm:$0xff]  ;;  %v8499_v44 = vld [vmem:[#allocation20_spill] sm:$0xff]  ;;  %v8520_v22 = vld [vmem:[#allocation7_spill] sm:$0xff] }
  0xa4   :  { %v2569_v11 = vadd.f32 %v2553_v57, %v8486_v26  ;;  %v2570_v12 = vadd.f32 %v2554_v58, %v8488_v20  ;;  %v8490_v54 = vmax.f32 %v8489_v29, 0.0  ;;  %v8492_v36 = vmax.f32 %v8491_v52, 0.0  ;;  %v8524_v62 = vld [vmem:[#allocation9_spill] sm:$0xff]  ;;  %v8526_v30 = vld [vmem:[#allocation10_spill] sm:$0xff] }
  0xa5   :  { %v8494_v35 = vmax.f32 %v8493_v37, 0.0  ;;  %v8496_v42 = vmax.f32 %v8495_v38, 0.0  ;;  %v8498_v40 = vmax.f32 %v8497_v39, 0.0  ;;  %v8500_v45 = vmax.f32 %v8499_v44, 0.0  ;;  %v8529_v38 = vld [vmem:[#allocation23_spill] sm:$0xff]  ;;  %v8531_v39 = vld [vmem:[#allocation24_spill] sm:$0xff] }
  0xa6   :  { %v2571_v32 = vadd.f32 %v2555_v59, %v8490_v54  ;;  %v2572_v33 = vadd.f32 %v2556_v60, %v8492_v36  ;;  %v8502_v58 = vmax.f32 %v8501_v27, 0.0  ;;  %v8504_v59 = vmax.f32 %v8503_v46, 0.0  ;;  %v8533_v36 = vld [vmem:[#allocation25_spill] sm:$0xff]  ;;  %v8535_v44 = vld [vmem:[#allocation26_spill] sm:$0xff] }
  0xa7   :  { %v2573_v34 = vadd.f32 %v2557_v61, %v8494_v35  ;;  %v2574_v41 = vadd.f32 %v2558_v63, %v8496_v42  ;;  %v2575_v43 = vadd.f32 %v2559_v0, %v8498_v40  ;;  %v2576_v57 = vadd.f32 %v2560_v1, %v8500_v45  ;;  %v8512_v1 = vld [vmem:[#allocation3_spill] sm:$0xff] }
  0xa8   :  { %v2577_v49 = vadd.f32 %v2561_v2, %v8502_v58  ;;  %v2578_v56 = vadd.f32 %v2562_v3, %v8504_v59  ;;  %v4164_v60 = vadd.f32 %v3859_v13, %v125_v31  ;;  %v4167_v61 = vadd.f32 %v3861_v14, %v125_v31  ;;  %v8514_v2 = vld [vmem:[#allocation4_spill] sm:$0xff]  ;;  %v8516_v3 = vld [vmem:[#allocation5_spill] sm:$0xff] }
  0xa9   :  { %v4170_v47 = vadd.f32 %v3863_v15, %v125_v31  ;;  %v4173_v63 = vadd.f32 %v3865_v16, %v125_v31  ;;  %v4176_v48 = vadd.f32 %v3867_v17, %v125_v31  ;;  %v4179_v0 = vadd.f32 %v3869_v18, %v125_v31  ;;  %v8539_v58 = vld [vmem:[#allocation28_spill] sm:$0xff] }
  0xaa   :  { %8505 = vst [vmem:[#allocation12_spill] sm:$0xff] %v4164_v60  ;;  %8506 = vst [vmem:[#allocation13_spill] sm:$0xff] %v4167_v61  ;;  %v4182_v50 = vadd.f32 %v3871_v19, %v125_v31  ;;  %v4185_v51 = vadd.f32 %v8512_v1, %v125_v31  ;;  %v4188_v53 = vadd.f32 %v8514_v2, %v125_v31  ;;  %v8530_v42 = vmax.f32 %v8529_v38, 0.0  ;;  %v8543_v38 = vld [vmem:[#allocation30_spill] sm:$0xff] }
  0xab   :  { %8507 = vst [vmem:[#allocation14_spill] sm:$0xff] %v4170_v47  ;;  %8508 = vst [vmem:[#allocation15_spill] sm:$0xff] %v4173_v63  ;;  %v4191_v55 = vadd.f32 %v8516_v3, %v125_v31  ;;  %v4194_v24 = vadd.f32 %v8518_v23, %v125_v31  ;;  %v4197_v25 = vadd.f32 %v8520_v22, %v125_v31  ;;  %v8532_v37 = vmax.f32 %v8531_v39, 0.0  ;;  %v120_v39 = vpop.permute.xlu0 %119 }
  0xac   :  { %8509 = vst [vmem:[#allocation16_spill] sm:$0xff] %v4176_v48  ;;  %8510 = vst [vmem:[#allocation17_spill] sm:$0xff] %v4179_v0  ;;  %v4200_v21 = vadd.f32 %v8522_v9, %v125_v31  ;;  %v4203_v26 = vadd.f32 %v8524_v62, %v125_v31  ;;  %v4206_v20 = vadd.f32 %v8526_v30, %v125_v31  ;;  %v8536_v54 = vmax.f32 %v8535_v44, 0.0 }
  0xad   :  { %8511 = vst [vmem:[#allocation18_spill] sm:$0xff] %v4182_v50  ;;  %8513 = vst [vmem:[#allocation19_spill] sm:$0xff] %v4185_v51  ;;  %v4209_v29 = vadd.f32 %v3889_v28, %v125_v31  ;;  %v2579_v35 = vadd.f32 %v2563_v4, %v8530_v42  ;;  %v2580_v40 = vadd.f32 %v2564_v5, %v8532_v37  ;;  %v8534_v31 = vmax.f32 %v8533_v36, 0.0  ;;  %v8545_v5 = vld [vmem:[#allocation31_spill] sm:$0xff] }
  0xae   :  { %8515 = vst [vmem:[#allocation20_spill] sm:$0xff] %v4188_v53  ;;  %8517 = vst [vmem:[#allocation21_spill] sm:$0xff] %v4191_v55  ;;  %v2582_v45 = vadd.f32 %v2566_v7, %v8536_v54  ;;  %v8544_v4 = vmax.f32 %v8543_v38, 0.0  ;;  %v8546_v37 = vmax.f32 %v8545_v5, 0.0  ;;  %v8549_v7 = vld [vmem:[#allocation33_spill] sm:$0xff]  ;;  %v8559_v5 = vld [vmem:[#allocation38_spill] sm:$0xff] }
  0xaf   :  { %8519 = vst [vmem:[#allocation22_spill] sm:$0xff] %v4194_v24  ;;  %8521 = vst [vmem:[#allocation3_spill] sm:$0xff] %v4197_v25  ;;  %v2581_v52 = vadd.f32 %v2565_v6, %v8534_v31  ;;  %v8537_v25 = vld [vmem:[#allocation27_spill] sm:$0xff]  ;;  %v8547_v6 = vld [vmem:[#allocation32_spill] sm:$0xff]  ;;  %v8550_v54 = vmax.f32 %v8549_v7, 0.0  ;;  %v570_v7 = vadd.f32 %v8512_v1, %v120_v39 }
  0xb0   :  { %8523 = vst [vmem:[#allocation4_spill] sm:$0xff] %v4200_v21  ;;  %8525 = vst [vmem:[#allocation39_spill] sm:$0xff] %v4203_v26  ;;  %v8538_v27 = vmax.f32 %v8537_v25, 0.0  ;;  %v8540_v26 = vmax.f32 %v8539_v58, 0.0  ;;  %v2586_v42 = vadd.f32 %v2570_v12, %v8544_v4  ;;  %v2587_v36 = vadd.f32 %v2571_v32, %v8546_v37  ;;  %v8557_v12 = vld [vmem:[#allocation37_spill] sm:$0xff] }
  0xb1   :  { %8527 = vst [vmem:[#allocation40_spill] sm:$0xff] %v4206_v20  ;;  %8528 = vst [vmem:[#allocation41_spill] sm:$0xff] %v4209_v29  ;;  %v8541_v20 = vld [vmem:[#allocation29_spill] sm:$0xff]  ;;  %v8548_v31 = vmax.f32 %v8547_v6, 0.0  ;;  %v2589_v25 = vadd.f32 %v2573_v34, %v8550_v54  ;;  %v8558_v4 = vmax.f32 %v8557_v12, 0.0  ;;  %v8560_v32 = vmax.f32 %v8559_v5, 0.0 }
  0xb2   :  { %v2583_v21 = vadd.f32 %v2567_v8, %v8538_v27  ;;  %v2584_v46 = vadd.f32 %v2568_v10, %v8540_v26  ;;  %v8542_v59 = vmax.f32 %v8541_v20, 0.0  ;;  %v8551_v8 = vld [vmem:[#allocation34_spill] sm:$0xff]  ;;  %v8553_v10 = vld [vmem:[#allocation35_spill] sm:$0xff]  ;;  %v564_v6 = vadd.f32 %v3861_v14, %v120_v39 }
  0xb3   :  { %v2588_v44 = vadd.f32 %v2572_v33, %v8548_v31  ;;  %v8552_v27 = vmax.f32 %v8551_v8, 0.0  ;;  %v8554_v26 = vmax.f32 %v8553_v10, 0.0  ;;  %v2593_v24 = vadd.f32 %v2577_v49, %v8558_v4 }
  0xb4   :  { %v2585_v29 = vadd.f32 %v2569_v11, %v8542_v59  ;;  %v8555_v11 = vld [vmem:[#allocation36_spill] sm:$0xff]  ;;  %v2594_v37 = vadd.f32 %v2578_v56, %v8560_v32  ;;  %v563_v33 = vadd.f32 %v3859_v13, %v120_v39  ;;  %v565_v34 = vadd.f32 %v3863_v15, %v120_v39 }
  0xb5   :  { %v2590_v58 = vadd.f32 %v2574_v41, %v8552_v27  ;;  %v2591_v20 = vadd.f32 %v2575_v43, %v8554_v26  ;;  %v8556_v59 = vmax.f32 %v8555_v11, 0.0  ;;  %v566_v41 = vadd.f32 %v3865_v16, %v120_v39 }
  0xb6   :  { %v567_v31 = vadd.f32 %v3867_v17, %v120_v39  ;;  %v568_v43 = vadd.f32 %v3869_v18, %v120_v39  ;;  %v571_v49 = vadd.f32 %v8514_v2, %v120_v39  ;;  %v572_v56 = vadd.f32 %v8516_v3, %v120_v39 }
  0xb7   :  { %v2592_v38 = vadd.f32 %v2576_v57, %v8556_v59  ;;  %v569_v57 = vadd.f32 %v3871_v19, %v120_v39  ;;  %v573_v54 = vadd.f32 %v8518_v23, %v120_v39  ;;  %v574_v8 = vadd.f32 %v8520_v22, %v120_v39 }
  0xb8   :  { %v575_v27 = vadd.f32 %v8522_v9, %v120_v39  ;;  %v576_v10 = vadd.f32 %v8524_v62, %v120_v39  ;;  %v577_v26 = vadd.f32 %v8526_v30, %v120_v39  ;;  %v578_v11 = vadd.f32 %v3889_v28, %v120_v39 }
  0xb9   :  { %v1587_v59 = vmax.f32 %v563_v33, 0.0  ;;  %v1588_v12 = vmax.f32 %v564_v6, 0.0  ;;  %v1589_v4 = vmax.f32 %v565_v34, 0.0  ;;  %v1590_v5 = vmax.f32 %v566_v41, 0.0 }
  0xba   :  { %v1591_v32 = vmax.f32 %v567_v31, 0.0  ;;  %v1592_v55 = vmax.f32 %v568_v43, 0.0  ;;  %v1593_v53 = vmax.f32 %v569_v57, 0.0  ;;  %v1594_v51 = vmax.f32 %v570_v7, 0.0  ;;  %v135_v31 = vpop.permute.xlu1 %134 }
  0xbb   :  { %v1595_v50 = vmax.f32 %v571_v49, 0.0  ;;  %v1596_v0 = vmax.f32 %v572_v56, 0.0  ;;  %v1597_v48 = vmax.f32 %v573_v54, 0.0  ;;  %v1598_v63 = vmax.f32 %v574_v8, 0.0 }
  0xbc   :  { %v1599_v47 = vmax.f32 %v575_v27, 0.0  ;;  %v1600_v61 = vmax.f32 %v576_v10, 0.0  ;;  %v1601_v60 = vmax.f32 %v577_v26, 0.0  ;;  %v1602_v62 = vmax.f32 %v578_v11, 0.0 }
  0xbd   :  { %v2595_v9 = vadd.f32 %v2579_v35, %v1587_v59  ;;  %v2596_v30 = vadd.f32 %v2580_v40, %v1588_v12  ;;  %v2597_v22 = vadd.f32 %v2581_v52, %v1589_v4  ;;  %v2598_v39 = vadd.f32 %v2582_v45, %v1590_v5  ;;  %v8578_v40 = vld [vmem:[#allocation10_spill] sm:$0xff]  ;;  %v8587_v59 = vld [vmem:[#allocation15_spill] sm:$0xff]  ;;  %v8591_v5 = vld [vmem:[#allocation17_spill] sm:$0xff] }
  0xbe   :  { %v2599_v33 = vadd.f32 %v2583_v21, %v1591_v32  ;;  %v2600_v6 = vadd.f32 %v2584_v46, %v1592_v55  ;;  %v2601_v34 = vadd.f32 %v2585_v29, %v1593_v53  ;;  %v2602_v41 = vadd.f32 %v2586_v42, %v1594_v51  ;;  %v8572_v53 = vld [vmem:[#allocation7_spill] sm:$0xff]  ;;  %v8576_v29 = vld [vmem:[#allocation9_spill] sm:$0xff] }
  0xbf   :  { %v2603_v43 = vadd.f32 %v2587_v36, %v1595_v50  ;;  %v2604_v57 = vadd.f32 %v2588_v44, %v1596_v0  ;;  %v2605_v7 = vadd.f32 %v2589_v25, %v1597_v48  ;;  %v2606_v49 = vadd.f32 %v2590_v58, %v1598_v63  ;;  %v8585_v44 = vld [vmem:[#allocation14_spill] sm:$0xff] }
  0xc0   :  { %v2607_v56 = vadd.f32 %v2591_v20, %v1599_v47  ;;  %v2608_v54 = vadd.f32 %v2592_v38, %v1600_v61  ;;  %v2609_v8 = vadd.f32 %v2593_v24, %v1601_v60  ;;  %v2610_v27 = vadd.f32 %v2594_v37, %v1602_v62  ;;  %v8574_v24 = vld [vmem:[#allocation8_spill] sm:$0xff]  ;;  %v8583_v37 = vld [vmem:[#allocation13_spill] sm:$0xff] }
  0xc1   :  { %v4276_v10 = vadd.f32 %v3859_v13, %v135_v31  ;;  %v4279_v35 = vadd.f32 %v3861_v14, %v135_v31  ;;  %v4282_v21 = vadd.f32 %v3863_v15, %v135_v31  ;;  %v4285_v51 = vadd.f32 %v3865_v16, %v135_v31  ;;  %v8581_v20 = vld [vmem:[#allocation12_spill] sm:$0xff] }
  0xc2   :  { %v4288_v0 = vadd.f32 %v3867_v17, %v135_v31  ;;  %v4291_v47 = vadd.f32 %v3869_v18, %v135_v31  ;;  %v4294_v60 = vadd.f32 %v3871_v19, %v135_v31  ;;  %v4297_v61 = vadd.f32 %v8512_v1, %v135_v31 }
  0xc3   :  { %8561 = vst [vmem:[#allocation23_spill] sm:$0xff] %v4276_v10  ;;  %8562 = vst [vmem:[#allocation24_spill] sm:$0xff] %v4279_v35  ;;  %v4300_v63 = vadd.f32 %v8514_v2, %v135_v31  ;;  %v4303_v48 = vadd.f32 %v8516_v3, %v135_v31  ;;  %v4306_v50 = vadd.f32 %v8518_v23, %v135_v31  ;;  %v8582_v38 = vmax.f32 %v8581_v20, 0.0  ;;  %v8595_v20 = vld [vmem:[#allocation19_spill] sm:$0xff] }
  0xc4   :  { %8563 = vst [vmem:[#allocation25_spill] sm:$0xff] %v4282_v21  ;;  %8564 = vst [vmem:[#allocation26_spill] sm:$0xff] %v4285_v51  ;;  %v4309_v55 = vadd.f32 %v8572_v53, %v135_v31  ;;  %v4312_v62 = vadd.f32 %v8574_v24, %v135_v31  ;;  %v4315_v52 = vadd.f32 %v8576_v29, %v135_v31  ;;  %v8584_v25 = vmax.f32 %v8583_v37, 0.0  ;;  %v130_v37 = vpop.permute.xlu0 %129 }
  0xc5   :  { %8565 = vst [vmem:[#allocation27_spill] sm:$0xff] %v4288_v0  ;;  %8566 = vst [vmem:[#allocation28_spill] sm:$0xff] %v4291_v47  ;;  %v4318_v45 = vadd.f32 %v8578_v40, %v135_v31  ;;  %v4321_v46 = vadd.f32 %v3889_v28, %v135_v31  ;;  %v2611_v58 = vadd.f32 %v2595_v9, %v8582_v38  ;;  %v8586_v11 = vmax.f32 %v8585_v44, 0.0 }
  0xc6   :  { %8567 = vst [vmem:[#allocation29_spill] sm:$0xff] %v4294_v60  ;;  %8568 = vst [vmem:[#allocation30_spill] sm:$0xff] %v4297_v61  ;;  %v2612_v26 = vadd.f32 %v2596_v30, %v8584_v25  ;;  %v8588_v42 = vmax.f32 %v8587_v59, 0.0  ;;  %v8596_v9 = vmax.f32 %v8595_v20, 0.0  ;;  %v8597_v30 = vld [vmem:[#allocation20_spill] sm:$0xff] }
  0xc7   :  { %8569 = vst [vmem:[#allocation31_spill] sm:$0xff] %v4300_v63  ;;  %8570 = vst [vmem:[#allocation32_spill] sm:$0xff] %v4303_v48  ;;  %v2613_v36 = vadd.f32 %v2597_v22, %v8586_v11  ;;  %v8598_v25 = vmax.f32 %v8597_v30, 0.0  ;;  %v8599_v22 = vld [vmem:[#allocation21_spill] sm:$0xff] }
  0xc8   :  { %8571 = vst [vmem:[#allocation33_spill] sm:$0xff] %v4306_v50  ;;  %8573 = vst [vmem:[#allocation34_spill] sm:$0xff] %v4309_v55  ;;  %v2614_v12 = vadd.f32 %v2598_v39, %v8588_v42  ;;  %v8589_v55 = vld [vmem:[#allocation16_spill] sm:$0xff]  ;;  %v2618_v38 = vadd.f32 %v2602_v41, %v8596_v9  ;;  %v8600_v11 = vmax.f32 %v8599_v22, 0.0  ;;  %v8601_v39 = vld [vmem:[#allocation22_spill] sm:$0xff]  ;;  %v596_v22 = vadd.f32 %v3861_v14, %v130_v37 }
  0xc9   :  { %8575 = vst [vmem:[#allocation35_spill] sm:$0xff] %v4312_v62  ;;  %8577 = vst [vmem:[#allocation36_spill] sm:$0xff] %v4315_v52  ;;  %v8590_v4 = vmax.f32 %v8589_v55, 0.0  ;;  %v8592_v52 = vmax.f32 %v8591_v5, 0.0  ;;  %v2619_v44 = vadd.f32 %v2603_v43, %v8598_v25  ;;  %v8602_v42 = vmax.f32 %v8601_v39, 0.0  ;;  %v8609_v41 = vld [vmem:[#allocation40_spill] sm:$0xff] }
  0xca   :  { %8579 = vst [vmem:[#allocation37_spill] sm:$0xff] %v4318_v45  ;;  %8580 = vst [vmem:[#allocation38_spill] sm:$0xff] %v4321_v46  ;;  %v8593_v45 = vld [vmem:[#allocation18_spill] sm:$0xff]  ;;  %v2620_v59 = vadd.f32 %v2604_v57, %v8600_v11  ;;  %v8610_v9 = vmax.f32 %v8609_v41, 0.0  ;;  %v8611_v30 = vld [vmem:[#allocation41_spill] sm:$0xff]  ;;  %v595_v57 = vadd.f32 %v3859_v13, %v130_v37  ;;  %v599_v11 = vadd.f32 %v3867_v17, %v130_v37 }
  0xcb   :  { %v2615_v62 = vadd.f32 %v2599_v33, %v8590_v4  ;;  %v2616_v32 = vadd.f32 %v2600_v6, %v8592_v52  ;;  %v8594_v31 = vmax.f32 %v8593_v45, 0.0  ;;  %v2621_v55 = vadd.f32 %v2605_v7, %v8602_v42  ;;  %v8603_v33 = vld [vmem:[#allocation3_spill] sm:$0xff]  ;;  %v8605_v6 = vld [vmem:[#allocation4_spill] sm:$0xff] }
  0xcc   :  { %v8604_v4 = vmax.f32 %v8603_v33, 0.0  ;;  %v8606_v52 = vmax.f32 %v8605_v6, 0.0  ;;  %v2625_v50 = vadd.f32 %v2609_v8, %v8610_v9  ;;  %v8612_v43 = vmax.f32 %v8611_v30, 0.0 }
  0xcd   :  { %v2617_v46 = vadd.f32 %v2601_v34, %v8594_v31  ;;  %v8607_v34 = vld [vmem:[#allocation39_spill] sm:$0xff]  ;;  %v597_v7 = vadd.f32 %v3863_v15, %v130_v37  ;;  %v602_v39 = vadd.f32 %v8512_v1, %v130_v37  ;;  %v603_v8 = vadd.f32 %v8514_v2, %v130_v37 }
  0xce   :  { %v2622_v5 = vadd.f32 %v2606_v49, %v8604_v4  ;;  %v2623_v45 = vadd.f32 %v2607_v56, %v8606_v52  ;;  %v8608_v31 = vmax.f32 %v8607_v34, 0.0  ;;  %v2626_v25 = vadd.f32 %v2610_v27, %v8612_v43 }
  0xcf   :  { %v598_v49 = vadd.f32 %v3865_v16, %v130_v37  ;;  %v600_v56 = vadd.f32 %v3869_v18, %v130_v37  ;;  %v604_v27 = vadd.f32 %v8516_v3, %v130_v37  ;;  %v605_v42 = vadd.f32 %v8518_v23, %v130_v37 }
  0xd0   :  { %v2624_v20 = vadd.f32 %v2608_v54, %v8608_v31  ;;  %v601_v54 = vadd.f32 %v3871_v19, %v130_v37  ;;  %v606_v33 = vadd.f32 %v8572_v53, %v130_v37  ;;  %v607_v4 = vadd.f32 %v8574_v24, %v130_v37 }
  0xd1   :  { %v608_v6 = vadd.f32 %v8576_v29, %v130_v37  ;;  %v609_v52 = vadd.f32 %v8578_v40, %v130_v37  ;;  %v610_v34 = vadd.f32 %v3889_v28, %v130_v37  ;;  %v1619_v31 = vmax.f32 %v595_v57, 0.0 }
  0xd2   :  { %v1620_v41 = vmax.f32 %v596_v22, 0.0  ;;  %v1621_v9 = vmax.f32 %v597_v7, 0.0  ;;  %v1622_v30 = vmax.f32 %v598_v49, 0.0  ;;  %v1623_v43 = vmax.f32 %v599_v11, 0.0  ;;  %v145_v11 = vpop.permute.xlu1 %144 }
  0xd3   :  { %v1624_v48 = vmax.f32 %v600_v56, 0.0  ;;  %v1625_v63 = vmax.f32 %v601_v54, 0.0  ;;  %v1626_v61 = vmax.f32 %v602_v39, 0.0  ;;  %v1627_v60 = vmax.f32 %v603_v8, 0.0 }
  0xd4   :  { %v1628_v47 = vmax.f32 %v604_v27, 0.0  ;;  %v1629_v0 = vmax.f32 %v605_v42, 0.0  ;;  %v1630_v51 = vmax.f32 %v606_v33, 0.0  ;;  %v1631_v21 = vmax.f32 %v607_v4, 0.0 }
  0xd5   :  { %v1632_v35 = vmax.f32 %v608_v6, 0.0  ;;  %v1633_v10 = vmax.f32 %v609_v52, 0.0  ;;  %v1634_v29 = vmax.f32 %v610_v34, 0.0  ;;  %v2627_v24 = vadd.f32 %v2611_v58, %v1619_v31  ;;  %v8639_v31 = vld [vmem:[#allocation26_spill] sm:$0xff] }
  0xd6   :  { %v2628_v40 = vadd.f32 %v2612_v26, %v1620_v41  ;;  %v2629_v53 = vadd.f32 %v2613_v36, %v1621_v9  ;;  %v2630_v37 = vadd.f32 %v2614_v12, %v1622_v30  ;;  %v2631_v57 = vadd.f32 %v2615_v62, %v1623_v43  ;;  %v8630_v26 = vld [vmem:[#allocation10_spill] sm:$0xff]  ;;  %v8643_v30 = vld [vmem:[#allocation28_spill] sm:$0xff] }
  0xd7   :  { %v2632_v22 = vadd.f32 %v2616_v32, %v1624_v48  ;;  %v2633_v7 = vadd.f32 %v2617_v46, %v1625_v63  ;;  %v2634_v49 = vadd.f32 %v2618_v38, %v1626_v61  ;;  %v2635_v56 = vadd.f32 %v2619_v44, %v1627_v60  ;;  %v8624_v63 = vld [vmem:[#allocation7_spill] sm:$0xff]  ;;  %v8628_v46 = vld [vmem:[#allocation9_spill] sm:$0xff] }
  0xd8   :  { %v2636_v54 = vadd.f32 %v2620_v59, %v1628_v47  ;;  %v2637_v39 = vadd.f32 %v2621_v55, %v1629_v0  ;;  %v2638_v8 = vadd.f32 %v2622_v5, %v1630_v51  ;;  %v2639_v27 = vadd.f32 %v2623_v45, %v1631_v21  ;;  %v8633_v45 = vld [vmem:[#allocation23_spill] sm:$0xff]  ;;  %v8637_v59 = vld [vmem:[#allocation25_spill] sm:$0xff] }
  0xd9   :  { %v2640_v42 = vadd.f32 %v2624_v20, %v1632_v35  ;;  %v2641_v33 = vadd.f32 %v2625_v50, %v1633_v10  ;;  %v2642_v4 = vadd.f32 %v2626_v25, %v1634_v29  ;;  %v4388_v6 = vadd.f32 %v3859_v13, %v145_v11  ;;  %v8626_v50 = vld [vmem:[#allocation8_spill] sm:$0xff] }
  0xda   :  { %v4391_v58 = vadd.f32 %v3861_v14, %v145_v11  ;;  %v4394_v62 = vadd.f32 %v3863_v15, %v145_v11  ;;  %v4397_v61 = vadd.f32 %v3865_v16, %v145_v11  ;;  %v4400_v47 = vadd.f32 %v3867_v17, %v145_v11  ;;  %v8635_v25 = vld [vmem:[#allocation24_spill] sm:$0xff] }
  0xdb   :  { %8613 = vst [vmem:[#allocation12_spill] sm:$0xff] %v4388_v6  ;;  %v4403_v21 = vadd.f32 %v3869_v18, %v145_v11  ;;  %v4406_v10 = vadd.f32 %v3871_v19, %v145_v11  ;;  %v4409_v35 = vadd.f32 %v8512_v1, %v145_v11  ;;  %v4412_v51 = vadd.f32 %v8514_v2, %v145_v11 }
  0xdc   :  { %8614 = vst [vmem:[#allocation13_spill] sm:$0xff] %v4391_v58  ;;  %8615 = vst [vmem:[#allocation14_spill] sm:$0xff] %v4394_v62  ;;  %v4415_v0 = vadd.f32 %v8516_v3, %v145_v11  ;;  %v4418_v60 = vadd.f32 %v8518_v23, %v145_v11  ;;  %v4421_v48 = vadd.f32 %v8624_v63, %v145_v11  ;;  %v8634_v20 = vmax.f32 %v8633_v45, 0.0  ;;  %v8647_v45 = vld [vmem:[#allocation30_spill] sm:$0xff] }
  0xdd   :  { %8616 = vst [vmem:[#allocation15_spill] sm:$0xff] %v4397_v61  ;;  %8617 = vst [vmem:[#allocation16_spill] sm:$0xff] %v4400_v47  ;;  %v4424_v29 = vadd.f32 %v8626_v50, %v145_v11  ;;  %v4427_v36 = vadd.f32 %v8628_v46, %v145_v11  ;;  %v4430_v12 = vadd.f32 %v8630_v26, %v145_v11  ;;  %v8636_v55 = vmax.f32 %v8635_v25, 0.0  ;;  %v140_v25 = vpop.permute.xlu0 %139 }
  0xde   :  { %8618 = vst [vmem:[#allocation17_spill] sm:$0xff] %v4403_v21  ;;  %8619 = vst [vmem:[#allocation18_spill] sm:$0xff] %v4406_v10  ;;  %v4433_v32 = vadd.f32 %v3889_v28, %v145_v11  ;;  %v2643_v5 = vadd.f32 %v2627_v24, %v8634_v20  ;;  %v8638_v34 = vmax.f32 %v8637_v59, 0.0  ;;  %v8640_v38 = vmax.f32 %v8639_v31, 0.0 }
  0xdf   :  { %8620 = vst [vmem:[#allocation19_spill] sm:$0xff] %v4409_v35  ;;  %8621 = vst [vmem:[#allocation20_spill] sm:$0xff] %v4412_v51  ;;  %v2644_v52 = vadd.f32 %v2628_v40, %v8636_v55  ;;  %v8648_v24 = vmax.f32 %v8647_v45, 0.0  ;;  %v8649_v40 = vld [vmem:[#allocation31_spill] sm:$0xff] }
  0xe0   :  { %8622 = vst [vmem:[#allocation21_spill] sm:$0xff] %v4415_v0  ;;  %8623 = vst [vmem:[#allocation22_spill] sm:$0xff] %v4418_v60  ;;  %v2645_v44 = vadd.f32 %v2629_v53, %v8638_v34  ;;  %v2646_v41 = vadd.f32 %v2630_v37, %v8640_v38  ;;  %v8650_v55 = vmax.f32 %v8649_v40, 0.0  ;;  %v8651_v53 = vld [vmem:[#allocation32_spill] sm:$0xff]  ;;  %v8653_v37 = vld [vmem:[#allocation33_spill] sm:$0xff] }
  0xe1   :  { %8625 = vst [vmem:[#allocation3_spill] sm:$0xff] %v4421_v48  ;;  %8627 = vst [vmem:[#allocation4_spill] sm:$0xff] %v4424_v29  ;;  %v8641_v48 = vld [vmem:[#allocation27_spill] sm:$0xff]  ;;  %v2650_v20 = vadd.f32 %v2634_v49, %v8648_v24  ;;  %v8652_v34 = vmax.f32 %v8651_v53, 0.0  ;;  %v8654_v38 = vmax.f32 %v8653_v37, 0.0  ;;  %v8661_v49 = vld [vmem:[#allocation37_spill] sm:$0xff]  ;;  %v628_v53 = vadd.f32 %v3861_v14, %v140_v25 }
  0xe2   :  { %8629 = vst [vmem:[#allocation39_spill] sm:$0xff] %v4427_v36  ;;  %8631 = vst [vmem:[#allocation40_spill] sm:$0xff] %v4430_v12  ;;  %v8642_v9 = vmax.f32 %v8641_v48, 0.0  ;;  %v8644_v36 = vmax.f32 %v8643_v30, 0.0  ;;  %v8645_v12 = vld [vmem:[#allocation29_spill] sm:$0xff]  ;;  %v2651_v59 = vadd.f32 %v2635_v56, %v8650_v55  ;;  %v8662_v24 = vmax.f32 %v8661_v49, 0.0 }
  0xe3   :  { %8632 = vst [vmem:[#allocation41_spill] sm:$0xff] %v4433_v32  ;;  %v8646_v11 = vmax.f32 %v8645_v12, 0.0  ;;  %v2652_v31 = vadd.f32 %v2636_v54, %v8652_v34  ;;  %v2653_v48 = vadd.f32 %v2637_v39, %v8654_v38  ;;  %v8663_v40 = vld [vmem:[#allocation38_spill] sm:$0xff]  ;;  %v627_v54 = vadd.f32 %v3859_v13, %v140_v25 }
  0xe4   :  { %v2647_v29 = vadd.f32 %v2631_v57, %v8642_v9  ;;  %v2648_v43 = vadd.f32 %v2632_v22, %v8644_v36  ;;  %v8655_v57 = vld [vmem:[#allocation34_spill] sm:$0xff]  ;;  %v8657_v22 = vld [vmem:[#allocation35_spill] sm:$0xff]  ;;  %v2657_v60 = vadd.f32 %v2641_v33, %v8662_v24  ;;  %v8664_v56 = vmax.f32 %v8663_v40, 0.0 }
  0xe5   :  { %v2649_v32 = vadd.f32 %v2633_v7, %v8646_v11  ;;  %v8656_v9 = vmax.f32 %v8655_v57, 0.0  ;;  %v8658_v36 = vmax.f32 %v8657_v22, 0.0  ;;  %v8659_v7 = vld [vmem:[#allocation36_spill] sm:$0xff]  ;;  %v629_v39 = vadd.f32 %v3863_v15, %v140_v25 }
  0xe6   :  { %v8660_v11 = vmax.f32 %v8659_v7, 0.0  ;;  %v2658_v55 = vadd.f32 %v2642_v4, %v8664_v56  ;;  %v631_v34 = vadd.f32 %v3867_v17, %v140_v25  ;;  %v634_v37 = vadd.f32 %v8512_v1, %v140_v25 }
  0xe7   :  { %v2654_v30 = vadd.f32 %v2638_v8, %v8656_v9  ;;  %v2655_v12 = vadd.f32 %v2639_v27, %v8658_v36  ;;  %v630_v8 = vadd.f32 %v3865_v16, %v140_v25  ;;  %v632_v27 = vadd.f32 %v3869_v18, %v140_v25 }
  0xe8   :  { %v2656_v45 = vadd.f32 %v2640_v42, %v8660_v11  ;;  %v633_v42 = vadd.f32 %v3871_v19, %v140_v25  ;;  %v635_v33 = vadd.f32 %v8514_v2, %v140_v25  ;;  %v636_v4 = vadd.f32 %v8516_v3, %v140_v25 }
  0xe9   :  { %v637_v38 = vadd.f32 %v8518_v23, %v140_v25  ;;  %v638_v57 = vadd.f32 %v8624_v63, %v140_v25  ;;  %v639_v9 = vadd.f32 %v8626_v50, %v140_v25  ;;  %v640_v22 = vadd.f32 %v8628_v46, %v140_v25 }
  0xea   :  { %v641_v36 = vadd.f32 %v8630_v26, %v140_v25  ;;  %v642_v7 = vadd.f32 %v3889_v28, %v140_v25  ;;  %v1651_v11 = vmax.f32 %v627_v54, 0.0  ;;  %v1652_v49 = vmax.f32 %v628_v53, 0.0 }
  0xeb   :  { %v1653_v24 = vmax.f32 %v629_v39, 0.0  ;;  %v1654_v40 = vmax.f32 %v630_v8, 0.0  ;;  %v1655_v56 = vmax.f32 %v631_v34, 0.0  ;;  %v1656_v0 = vmax.f32 %v632_v27, 0.0  ;;  %v155_v34 = vpop.permute.xlu1 %154 }
  0xec   :  { %v1657_v51 = vmax.f32 %v633_v42, 0.0  ;;  %v1658_v35 = vmax.f32 %v634_v37, 0.0  ;;  %v1659_v10 = vmax.f32 %v635_v33, 0.0  ;;  %v1660_v21 = vmax.f32 %v636_v4, 0.0 }
  0xed   :  { %v1661_v47 = vmax.f32 %v637_v38, 0.0  ;;  %v1662_v61 = vmax.f32 %v638_v57, 0.0  ;;  %v1663_v62 = vmax.f32 %v639_v9, 0.0  ;;  %v1664_v58 = vmax.f32 %v640_v22, 0.0 }
  0xee   :  { %v1665_v6 = vmax.f32 %v641_v36, 0.0  ;;  %v1666_v46 = vmax.f32 %v642_v7, 0.0  ;;  %v2659_v50 = vadd.f32 %v2643_v5, %v1651_v11  ;;  %v2660_v26 = vadd.f32 %v2644_v52, %v1652_v49  ;;  %v8682_v52 = vld [vmem:[#allocation10_spill] sm:$0xff]  ;;  %v8691_v11 = vld [vmem:[#allocation15_spill] sm:$0xff] }
  0xef   :  { %v2661_v63 = vadd.f32 %v2645_v44, %v1653_v24  ;;  %v2662_v25 = vadd.f32 %v2646_v41, %v1654_v40  ;;  %v2663_v54 = vadd.f32 %v2647_v29, %v1655_v56  ;;  %v2664_v53 = vadd.f32 %v2648_v43, %v1656_v0  ;;  %v8695_v40 = vld [vmem:[#allocation17_spill] sm:$0xff] }
  0xf0   :  { %v2665_v39 = vadd.f32 %v2649_v32, %v1657_v51  ;;  %v2666_v8 = vadd.f32 %v2650_v20, %v1658_v35  ;;  %v2667_v27 = vadd.f32 %v2651_v59, %v1659_v10  ;;  %v2668_v42 = vadd.f32 %v2652_v31, %v1660_v21  ;;  %v8676_v51 = vld [vmem:[#allocation7_spill] sm:$0xff]  ;;  %v8680_v32 = vld [vmem:[#allocation9_spill] sm:$0xff]  ;;  %v8689_v31 = vld [vmem:[#allocation14_spill] sm:$0xff] }
  0xf1   :  { %v2669_v37 = vadd.f32 %v2653_v48, %v1661_v47  ;;  %v2670_v33 = vadd.f32 %v2654_v30, %v1662_v61  ;;  %v2671_v4 = vadd.f32 %v2655_v12, %v1663_v62  ;;  %v2672_v38 = vadd.f32 %v2656_v45, %v1664_v58  ;;  %v8685_v12 = vld [vmem:[#allocation12_spill] sm:$0xff] }
  0xf2   :  { %v2673_v57 = vadd.f32 %v2657_v60, %v1665_v6  ;;  %v2674_v9 = vadd.f32 %v2658_v55, %v1666_v46  ;;  %v4500_v22 = vadd.f32 %v3859_v13, %v155_v34  ;;  %v4503_v5 = vadd.f32 %v3861_v14, %v155_v34  ;;  %v8678_v60 = vld [vmem:[#allocation8_spill] sm:$0xff]  ;;  %v8687_v55 = vld [vmem:[#allocation13_spill] sm:$0xff] }
  0xf3   :  { %v4506_v29 = vadd.f32 %v3863_v15, %v155_v34  ;;  %v4509_v35 = vadd.f32 %v3865_v16, %v155_v34  ;;  %v4512_v21 = vadd.f32 %v3867_v17, %v155_v34  ;;  %v4515_v62 = vadd.f32 %v3869_v18, %v155_v34 }
  0xf4   :  { %8665 = vst [vmem:[#allocation23_spill] sm:$0xff] %v4500_v22  ;;  %8666 = vst [vmem:[#allocation24_spill] sm:$0xff] %v4503_v5  ;;  %v4518_v6 = vadd.f32 %v3871_v19, %v155_v34  ;;  %v4521_v58 = vadd.f32 %v8512_v1, %v155_v34  ;;  %v4524_v61 = vadd.f32 %v8514_v2, %v155_v34  ;;  %v8686_v45 = vmax.f32 %v8685_v12, 0.0  ;;  %v8699_v12 = vld [vmem:[#allocation19_spill] sm:$0xff] }
  0xf5   :  { %8667 = vst [vmem:[#allocation25_spill] sm:$0xff] %v4506_v29  ;;  %8668 = vst [vmem:[#allocation26_spill] sm:$0xff] %v4509_v35  ;;  %v4527_v47 = vadd.f32 %v8516_v3, %v155_v34  ;;  %v4530_v10 = vadd.f32 %v8518_v23, %v155_v34  ;;  %v4533_v0 = vadd.f32 %v8676_v51, %v155_v34  ;;  %v8688_v48 = vmax.f32 %v8687_v55, 0.0  ;;  %v150_v55 = vpop.permute.xlu0 %149 }
  0xf6   :  { %8669 = vst [vmem:[#allocation27_spill] sm:$0xff] %v4512_v21  ;;  %8670 = vst [vmem:[#allocation28_spill] sm:$0xff] %v4515_v62  ;;  %v4536_v46 = vadd.f32 %v8678_v60, %v155_v34  ;;  %v4539_v44 = vadd.f32 %v8680_v32, %v155_v34  ;;  %v4542_v41 = vadd.f32 %v8682_v52, %v155_v34  ;;  %v8690_v7 = vmax.f32 %v8689_v31, 0.0 }
  0xf7   :  { %8671 = vst [vmem:[#allocation29_spill] sm:$0xff] %v4518_v6  ;;  %8672 = vst [vmem:[#allocation30_spill] sm:$0xff] %v4521_v58  ;;  %v4545_v43 = vadd.f32 %v3889_v28, %v155_v34  ;;  %v2675_v30 = vadd.f32 %v2659_v50, %v8686_v45  ;;  %v2676_v36 = vadd.f32 %v2660_v26, %v8688_v48  ;;  %v8692_v20 = vmax.f32 %v8691_v11, 0.0  ;;  %v8701_v26 = vld [vmem:[#allocation20_spill] sm:$0xff] }
  0xf8   :  { %8673 = vst [vmem:[#allocation31_spill] sm:$0xff] %v4524_v61  ;;  %8674 = vst [vmem:[#allocation32_spill] sm:$0xff] %v4527_v47  ;;  %v2677_v59 = vadd.f32 %v2661_v63, %v8690_v7  ;;  %v8700_v50 = vmax.f32 %v8699_v12, 0.0  ;;  %v8702_v48 = vmax.f32 %v8701_v26, 0.0  ;;  %v8703_v63 = vld [vmem:[#allocation21_spill] sm:$0xff] }
  0xf9   :  { %8675 = vst [vmem:[#allocation33_spill] sm:$0xff] %v4530_v10  ;;  %8677 = vst [vmem:[#allocation34_spill] sm:$0xff] %v4533_v0  ;;  %v2678_v49 = vadd.f32 %v2662_v25, %v8692_v20  ;;  %v8693_v0 = vld [vmem:[#allocation16_spill] sm:$0xff]  ;;  %v8704_v7 = vmax.f32 %v8703_v63, 0.0  ;;  %v8705_v25 = vld [vmem:[#allocation22_spill] sm:$0xff]  ;;  %v660_v63 = vadd.f32 %v3861_v14, %v150_v55 }
  0xfa   :  { %8679 = vst [vmem:[#allocation35_spill] sm:$0xff] %v4536_v46  ;;  %8681 = vst [vmem:[#allocation36_spill] sm:$0xff] %v4539_v44  ;;  %v8694_v24 = vmax.f32 %v8693_v0, 0.0  ;;  %v8696_v44 = vmax.f32 %v8695_v40, 0.0  ;;  %v2682_v45 = vadd.f32 %v2666_v8, %v8700_v50  ;;  %v2683_v31 = vadd.f32 %v2667_v27, %v8702_v48  ;;  %v8713_v8 = vld [vmem:[#allocation40_spill] sm:$0xff]  ;;  %v8715_v26 = vld [vmem:[#allocation41_spill] sm:$0xff] }
  0xfb   :  { %8683 = vst [vmem:[#allocation37_spill] sm:$0xff] %v4542_v41  ;;  %8684 = vst [vmem:[#allocation38_spill] sm:$0xff] %v4545_v43  ;;  %v8697_v41 = vld [vmem:[#allocation18_spill] sm:$0xff]  ;;  %v2684_v11 = vadd.f32 %v2668_v42, %v8704_v7  ;;  %v8706_v20 = vmax.f32 %v8705_v25, 0.0  ;;  %v8714_v50 = vmax.f32 %v8713_v8, 0.0  ;;  %v8716_v27 = vmax.f32 %v8715_v26, 0.0 }
  0xfc   :  { %v2679_v46 = vadd.f32 %v2663_v54, %v8694_v24  ;;  %v2680_v56 = vadd.f32 %v2664_v53, %v8696_v44  ;;  %v8698_v34 = vmax.f32 %v8697_v41, 0.0  ;;  %v8707_v54 = vld [vmem:[#allocation3_spill] sm:$0xff]  ;;  %v8709_v53 = vld [vmem:[#allocation4_spill] sm:$0xff]  ;;  %v659_v42 = vadd.f32 %v3859_v13, %v150_v55 }
  0xfd   :  { %v2685_v0 = vadd.f32 %v2669_v37, %v8706_v20  ;;  %v8708_v24 = vmax.f32 %v8707_v54, 0.0  ;;  %v8710_v44 = vmax.f32 %v8709_v53, 0.0  ;;  %v2689_v10 = vadd.f32 %v2673_v57, %v8714_v50 }
  0xfe   :  { %v2681_v43 = vadd.f32 %v2665_v39, %v8698_v34  ;;  %v8711_v39 = vld [vmem:[#allocation39_spill] sm:$0xff]  ;;  %v2690_v48 = vadd.f32 %v2674_v9, %v8716_v27  ;;  %v661_v37 = vadd.f32 %v3863_v15, %v150_v55  ;;  %v663_v7 = vadd.f32 %v3867_v17, %v150_v55 }
  0xff   :  { %v2686_v40 = vadd.f32 %v2670_v33, %v8708_v24  ;;  %v2687_v41 = vadd.f32 %v2671_v4, %v8710_v44  ;;  %v8712_v34 = vmax.f32 %v8711_v39, 0.0  ;;  %v662_v33 = vadd.f32 %v3865_v16, %v150_v55 }
 0x100   :  { %v664_v4 = vadd.f32 %v3869_v18, %v150_v55  ;;  %v666_v25 = vadd.f32 %v8512_v1, %v150_v55  ;;  %v667_v57 = vadd.f32 %v8514_v2, %v150_v55  ;;  %v668_v9 = vadd.f32 %v8516_v3, %v150_v55 }
 0x101   :  { %v2688_v12 = vadd.f32 %v2672_v38, %v8712_v34  ;;  %v665_v38 = vadd.f32 %v3871_v19, %v150_v55  ;;  %v669_v20 = vadd.f32 %v8518_v23, %v150_v55  ;;  %v670_v54 = vadd.f32 %v8676_v51, %v150_v55 }
 0x102   :  { %v671_v24 = vadd.f32 %v8678_v60, %v150_v55  ;;  %v672_v53 = vadd.f32 %v8680_v32, %v150_v55  ;;  %v673_v44 = vadd.f32 %v8682_v52, %v150_v55  ;;  %v674_v39 = vadd.f32 %v3889_v28, %v150_v55 }
 0x103   :  { %v1683_v34 = vmax.f32 %v659_v42, 0.0  ;;  %v1684_v8 = vmax.f32 %v660_v63, 0.0  ;;  %v1685_v50 = vmax.f32 %v661_v37, 0.0  ;;  %v1686_v26 = vmax.f32 %v662_v33, 0.0 }
 0x104   :  { %v1687_v27 = vmax.f32 %v663_v7, 0.0  ;;  %v1688_v47 = vmax.f32 %v664_v4, 0.0  ;;  %v1689_v61 = vmax.f32 %v665_v38, 0.0  ;;  %v1690_v58 = vmax.f32 %v666_v25, 0.0  ;;  %v165_v7 = vpop.permute.xlu1 %164 }
 0x105   :  { %v1691_v6 = vmax.f32 %v667_v57, 0.0  ;;  %v1692_v62 = vmax.f32 %v668_v9, 0.0  ;;  %v1693_v21 = vmax.f32 %v669_v20, 0.0  ;;  %v1694_v35 = vmax.f32 %v670_v54, 0.0 }
 0x106   :  { %v1695_v29 = vmax.f32 %v671_v24, 0.0  ;;  %v1696_v5 = vmax.f32 %v672_v53, 0.0  ;;  %v1697_v22 = vmax.f32 %v673_v44, 0.0  ;;  %v1698_v32 = vmax.f32 %v674_v39, 0.0 }
 0x107   :  { %v2691_v60 = vadd.f32 %v2675_v30, %v1683_v34  ;;  %v2692_v52 = vadd.f32 %v2676_v36, %v1684_v8  ;;  %v2693_v51 = vadd.f32 %v2677_v59, %v1685_v50  ;;  %v2694_v55 = vadd.f32 %v2678_v49, %v1686_v26  ;;  %v8734_v36 = vld [vmem:[#allocation10_spill] sm:$0xff]  ;;  %v8747_v26 = vld [vmem:[#allocation28_spill] sm:$0xff] }
 0x108   :  { %v2695_v42 = vadd.f32 %v2679_v46, %v1687_v27  ;;  %v2696_v63 = vadd.f32 %v2680_v56, %v1688_v47  ;;  %v2697_v37 = vadd.f32 %v2681_v43, %v1689_v61  ;;  %v2698_v33 = vadd.f32 %v2682_v45, %v1690_v58  ;;  %v8728_v61 = vld [vmem:[#allocation7_spill] sm:$0xff]  ;;  %v8732_v43 = vld [vmem:[#allocation9_spill] sm:$0xff]  ;;  %v8743_v34 = vld [vmem:[#allocation26_spill] sm:$0xff] }
 0x109   :  { %v2699_v4 = vadd.f32 %v2683_v31, %v1691_v6  ;;  %v2700_v38 = vadd.f32 %v2684_v11, %v1692_v62  ;;  %v2701_v25 = vadd.f32 %v2685_v0, %v1693_v21  ;;  %v2702_v57 = vadd.f32 %v2686_v40, %v1694_v35  ;;  %v8741_v11 = vld [vmem:[#allocation25_spill] sm:$0xff] }
 0x10a   :  { %v2703_v9 = vadd.f32 %v2687_v41, %v1695_v29  ;;  %v2704_v20 = vadd.f32 %v2688_v12, %v1696_v5  ;;  %v2705_v54 = vadd.f32 %v2689_v10, %v1697_v22  ;;  %v2706_v24 = vadd.f32 %v2690_v48, %v1698_v32  ;;  %v8730_v10 = vld [vmem:[#allocation8_spill] sm:$0xff]  ;;  %v8737_v41 = vld [vmem:[#allocation23_spill] sm:$0xff] }
 0x10b   :  { %v4612_v53 = vadd.f32 %v3859_v13, %v165_v7  ;;  %v4615_v30 = vadd.f32 %v3861_v14, %v165_v7  ;;  %v4618_v46 = vadd.f32 %v3863_v15, %v165_v7  ;;  %v4621_v58 = vadd.f32 %v3865_v16, %v165_v7  ;;  %v8739_v48 = vld [vmem:[#allocation24_spill] sm:$0xff] }
 0x10c   :  { %v4624_v62 = vadd.f32 %v3867_v17, %v165_v7  ;;  %v4627_v29 = vadd.f32 %v3869_v18, %v165_v7  ;;  %v4630_v22 = vadd.f32 %v3871_v19, %v165_v7  ;;  %v4633_v5 = vadd.f32 %v8512_v1, %v165_v7 }
 0x10d   :  { %8717 = vst [vmem:[#allocation12_spill] sm:$0xff] %v4612_v53  ;;  %8718 = vst [vmem:[#allocation13_spill] sm:$0xff] %v4615_v30  ;;  %v4636_v35 = vadd.f32 %v8514_v2, %v165_v7  ;;  %v4639_v21 = vadd.f32 %v8516_v3, %v165_v7  ;;  %v4642_v6 = vadd.f32 %v8518_v23, %v165_v7  ;;  %v8738_v12 = vmax.f32 %v8737_v41, 0.0  ;;  %v8751_v41 = vld [vmem:[#allocation30_spill] sm:$0xff] }
 0x10e   :  { %8719 = vst [vmem:[#allocation14_spill] sm:$0xff] %v4618_v46  ;;  %8720 = vst [vmem:[#allocation15_spill] sm:$0xff] %v4621_v58  ;;  %v4645_v47 = vadd.f32 %v8728_v61, %v165_v7  ;;  %v4648_v32 = vadd.f32 %v8730_v10, %v165_v7  ;;  %v4651_v59 = vadd.f32 %v8732_v43, %v165_v7  ;;  %v8740_v0 = vmax.f32 %v8739_v48, 0.0  ;;  %v160_v48 = vpop.permute.xlu0 %159 }
 0x10f   :  { %8721 = vst [vmem:[#allocation16_spill] sm:$0xff] %v4624_v62  ;;  %8722 = vst [vmem:[#allocation17_spill] sm:$0xff] %v4627_v29  ;;  %v4654_v49 = vadd.f32 %v8734_v36, %v165_v7  ;;  %v4657_v56 = vadd.f32 %v3889_v28, %v165_v7  ;;  %v2707_v40 = vadd.f32 %v2691_v60, %v8738_v12  ;;  %v8742_v39 = vmax.f32 %v8741_v11, 0.0 }
 0x110   :  { %8723 = vst [vmem:[#allocation18_spill] sm:$0xff] %v4630_v22  ;;  %8724 = vst [vmem:[#allocation19_spill] sm:$0xff] %v4633_v5  ;;  %v2708_v44 = vadd.f32 %v2692_v52, %v8740_v0  ;;  %v8744_v45 = vmax.f32 %v8743_v34, 0.0  ;;  %v8752_v60 = vmax.f32 %v8751_v41, 0.0  ;;  %v8753_v52 = vld [vmem:[#allocation31_spill] sm:$0xff] }
 0x111   :  { %8725 = vst [vmem:[#allocation20_spill] sm:$0xff] %v4636_v35  ;;  %8726 = vst [vmem:[#allocation21_spill] sm:$0xff] %v4639_v21  ;;  %v2709_v31 = vadd.f32 %v2693_v51, %v8742_v39  ;;  %v8754_v0 = vmax.f32 %v8753_v52, 0.0  ;;  %v8755_v51 = vld [vmem:[#allocation32_spill] sm:$0xff]  ;;  %v8767_v52 = vld [vmem:[#allocation38_spill] sm:$0xff] }
 0x112   :  { %8727 = vst [vmem:[#allocation22_spill] sm:$0xff] %v4642_v6  ;;  %8729 = vst [vmem:[#allocation3_spill] sm:$0xff] %v4645_v47  ;;  %v2710_v8 = vadd.f32 %v2694_v55, %v8744_v45  ;;  %v8745_v47 = vld [vmem:[#allocation27_spill] sm:$0xff]  ;;  %v2714_v12 = vadd.f32 %v2698_v33, %v8752_v60  ;;  %v8756_v39 = vmax.f32 %v8755_v51, 0.0  ;;  %v8757_v55 = vld [vmem:[#allocation33_spill] sm:$0xff]  ;;  %v692_v51 = vadd.f32 %v3861_v14, %v160_v48 }
 0x113   :  { %8731 = vst [vmem:[#allocation4_spill] sm:$0xff] %v4648_v32  ;;  %8733 = vst [vmem:[#allocation39_spill] sm:$0xff] %v4651_v59  ;;  %v8746_v50 = vmax.f32 %v8745_v47, 0.0  ;;  %v8748_v59 = vmax.f32 %v8747_v26, 0.0  ;;  %v2715_v11 = vadd.f32 %v2699_v4, %v8754_v0  ;;  %v8758_v45 = vmax.f32 %v8757_v55, 0.0  ;;  %v8765_v33 = vld [vmem:[#allocation37_spill] sm:$0xff] }
 0x114   :  { %8735 = vst [vmem:[#allocation40_spill] sm:$0xff] %v4654_v49  ;;  %8736 = vst [vmem:[#allocation41_spill] sm:$0xff] %v4657_v56  ;;  %v8749_v49 = vld [vmem:[#allocation29_spill] sm:$0xff]  ;;  %v2716_v34 = vadd.f32 %v2700_v38, %v8756_v39  ;;  %v8766_v60 = vmax.f32 %v8765_v33, 0.0  ;;  %v8768_v4 = vmax.f32 %v8767_v52, 0.0  ;;  %v691_v38 = vadd.f32 %v3859_v13, %v160_v48 }
 0x115   :  { %v2711_v32 = vadd.f32 %v2695_v42, %v8746_v50  ;;  %v2712_v27 = vadd.f32 %v2696_v63, %v8748_v59  ;;  %v8750_v7 = vmax.f32 %v8749_v49, 0.0  ;;  %v2717_v47 = vadd.f32 %v2701_v25, %v8758_v45  ;;  %v8759_v42 = vld [vmem:[#allocation34_spill] sm:$0xff]  ;;  %v8761_v63 = vld [vmem:[#allocation35_spill] sm:$0xff] }
 0x116   :  { %v8760_v50 = vmax.f32 %v8759_v42, 0.0  ;;  %v8762_v59 = vmax.f32 %v8761_v63, 0.0  ;;  %v2721_v6 = vadd.f32 %v2705_v54, %v8766_v60  ;;  %v2722_v0 = vadd.f32 %v2706_v24, %v8768_v4 }
 0x117   :  { %v2713_v56 = vadd.f32 %v2697_v37, %v8750_v7  ;;  %v8763_v37 = vld [vmem:[#allocation36_spill] sm:$0xff]  ;;  %v693_v25 = vadd.f32 %v3863_v15, %v160_v48  ;;  %v695_v39 = vadd.f32 %v3867_v17, %v160_v48  ;;  %v698_v55 = vadd.f32 %v8512_v1, %v160_v48 }
 0x118   :  { %v2718_v26 = vadd.f32 %v2702_v57, %v8760_v50  ;;  %v2719_v49 = vadd.f32 %v2703_v9, %v8762_v59  ;;  %v8764_v7 = vmax.f32 %v8763_v37, 0.0  ;;  %v694_v57 = vadd.f32 %v3865_v16, %v160_v48 }
 0x119   :  { %v696_v9 = vadd.f32 %v3869_v18, %v160_v48  ;;  %v699_v54 = vadd.f32 %v8514_v2, %v160_v48  ;;  %v700_v24 = vadd.f32 %v8516_v3, %v160_v48  ;;  %v701_v45 = vadd.f32 %v8518_v23, %v160_v48 }
 0x11a   :  { %v2720_v41 = vadd.f32 %v2704_v20, %v8764_v7  ;;  %v697_v20 = vadd.f32 %v3871_v19, %v160_v48  ;;  %v702_v42 = vadd.f32 %v8728_v61, %v160_v48  ;;  %v703_v50 = vadd.f32 %v8730_v10, %v160_v48 }
 0x11b   :  { %v704_v63 = vadd.f32 %v8732_v43, %v160_v48  ;;  %v705_v59 = vadd.f32 %v8734_v36, %v160_v48  ;;  %v706_v37 = vadd.f32 %v3889_v28, %v160_v48  ;;  %v1715_v7 = vmax.f32 %v691_v38, 0.0 }
 0x11c   :  { %v1716_v33 = vmax.f32 %v692_v51, 0.0  ;;  %v1717_v60 = vmax.f32 %v693_v25, 0.0  ;;  %v1718_v52 = vmax.f32 %v694_v57, 0.0  ;;  %v1719_v4 = vmax.f32 %v695_v39, 0.0  ;;  %v175_v39 = vpop.permute.xlu1 %174 }
 0x11d   :  { %v1720_v21 = vmax.f32 %v696_v9, 0.0  ;;  %v1721_v35 = vmax.f32 %v697_v20, 0.0  ;;  %v1722_v5 = vmax.f32 %v698_v55, 0.0  ;;  %v1723_v22 = vmax.f32 %v699_v54, 0.0 }
 0x11e   :  { %v1724_v29 = vmax.f32 %v700_v24, 0.0  ;;  %v1725_v62 = vmax.f32 %v701_v45, 0.0  ;;  %v1726_v58 = vmax.f32 %v702_v42, 0.0  ;;  %v1727_v46 = vmax.f32 %v703_v50, 0.0 }
 0x11f   :  { %v1728_v30 = vmax.f32 %v704_v63, 0.0  ;;  %v1729_v53 = vmax.f32 %v705_v59, 0.0  ;;  %v1730_v43 = vmax.f32 %v706_v37, 0.0  ;;  %v2723_v10 = vadd.f32 %v2707_v40, %v1715_v7  ;;  %v8795_v7 = vld [vmem:[#allocation15_spill] sm:$0xff] }
 0x120   :  { %v2724_v36 = vadd.f32 %v2708_v44, %v1716_v33  ;;  %v2725_v61 = vadd.f32 %v2709_v31, %v1717_v60  ;;  %v2726_v48 = vadd.f32 %v2710_v8, %v1718_v52  ;;  %v2727_v38 = vadd.f32 %v2711_v32, %v1719_v4  ;;  %v8786_v44 = vld [vmem:[#allocation10_spill] sm:$0xff]  ;;  %v8799_v52 = vld [vmem:[#allocation17_spill] sm:$0xff] }
 0x121   :  { %v2728_v51 = vadd.f32 %v2712_v27, %v1720_v21  ;;  %v2729_v25 = vadd.f32 %v2713_v56, %v1721_v35  ;;  %v2730_v57 = vadd.f32 %v2714_v12, %v1722_v5  ;;  %v2731_v9 = vadd.f32 %v2715_v11, %v1723_v22  ;;  %v8780_v35 = vld [vmem:[#allocation7_spill] sm:$0xff]  ;;  %v8784_v56 = vld [vmem:[#allocation9_spill] sm:$0xff] }
 0x122   :  { %v2732_v20 = vadd.f32 %v2716_v34, %v1724_v29  ;;  %v2733_v55 = vadd.f32 %v2717_v47, %v1725_v62  ;;  %v2734_v54 = vadd.f32 %v2718_v26, %v1726_v58  ;;  %v2735_v24 = vadd.f32 %v2719_v49, %v1727_v46  ;;  %v8789_v49 = vld [vmem:[#allocation12_spill] sm:$0xff]  ;;  %v8793_v34 = vld [vmem:[#allocation14_spill] sm:$0xff] }
 0x123   :  { %v2736_v45 = vadd.f32 %v2720_v41, %v1728_v30  ;;  %v2737_v42 = vadd.f32 %v2721_v6, %v1729_v53  ;;  %v2738_v50 = vadd.f32 %v2722_v0, %v1730_v43  ;;  %v4724_v63 = vadd.f32 %v3859_v13, %v175_v39  ;;  %v8782_v6 = vld [vmem:[#allocation8_spill] sm:$0xff]  ;;  %v8791_v0 = vld [vmem:[#allocation13_spill] sm:$0xff] }
 0x124   :  { %v4727_v40 = vadd.f32 %v3861_v14, %v175_v39  ;;  %v4730_v32 = vadd.f32 %v3863_v15, %v175_v39  ;;  %v4733_v5 = vadd.f32 %v3865_v16, %v175_v39  ;;  %v4736_v29 = vadd.f32 %v3867_v17, %v175_v39 }
 0x125   :  { %8769 = vst [vmem:[#allocation23_spill] sm:$0xff] %v4724_v63  ;;  %v4739_v46 = vadd.f32 %v3869_v18, %v175_v39  ;;  %v4742_v53 = vadd.f32 %v3871_v19, %v175_v39  ;;  %v4745_v30 = vadd.f32 %v8512_v1, %v175_v39  ;;  %v4748_v58 = vadd.f32 %v8514_v2, %v175_v39 }
 0x126   :  { %8770 = vst [vmem:[#allocation24_spill] sm:$0xff] %v4727_v40  ;;  %8771 = vst [vmem:[#allocation25_spill] sm:$0xff] %v4730_v32  ;;  %v4751_v62 = vadd.f32 %v8516_v3, %v175_v39  ;;  %v4754_v22 = vadd.f32 %v8518_v23, %v175_v39  ;;  %v4757_v21 = vadd.f32 %v8780_v35, %v175_v39  ;;  %v8790_v41 = vmax.f32 %v8789_v49, 0.0  ;;  %v8803_v49 = vld [vmem:[#allocation19_spill] sm:$0xff] }
 0x127   :  { %8772 = vst [vmem:[#allocation26_spill] sm:$0xff] %v4733_v5  ;;  %8773 = vst [vmem:[#allocation27_spill] sm:$0xff] %v4736_v29  ;;  %v4760_v43 = vadd.f32 %v8782_v6, %v175_v39  ;;  %v4763_v31 = vadd.f32 %v8784_v56, %v175_v39  ;;  %v4766_v8 = vadd.f32 %v8786_v44, %v175_v39  ;;  %v8792_v47 = vmax.f32 %v8791_v0, 0.0  ;;  %v170_v0 = vpop.permute.xlu0 %169 }
 0x128   :  { %8774 = vst [vmem:[#allocation28_spill] sm:$0xff] %v4739_v46  ;;  %8775 = vst [vmem:[#allocation29_spill] sm:$0xff] %v4742_v53  ;;  %v4769_v27 = vadd.f32 %v3889_v28, %v175_v39  ;;  %v2739_v26 = vadd.f32 %v2723_v10, %v8790_v41  ;;  %v8794_v37 = vmax.f32 %v8793_v34, 0.0  ;;  %v8796_v12 = vmax.f32 %v8795_v7, 0.0 }
 0x129   :  { %8776 = vst [vmem:[#allocation30_spill] sm:$0xff] %v4745_v30  ;;  %8777 = vst [vmem:[#allocation31_spill] sm:$0xff] %v4748_v58  ;;  %v2740_v59 = vadd.f32 %v2724_v36, %v8792_v47  ;;  %v8804_v10 = vmax.f32 %v8803_v49, 0.0  ;;  %v8805_v36 = vld [vmem:[#allocation20_spill] sm:$0xff] }
 0x12a   :  { %8778 = vst [vmem:[#allocation32_spill] sm:$0xff] %v4751_v62  ;;  %8779 = vst [vmem:[#allocation33_spill] sm:$0xff] %v4754_v22  ;;  %v2741_v11 = vadd.f32 %v2725_v61, %v8794_v37  ;;  %v2742_v33 = vadd.f32 %v2726_v48, %v8796_v12  ;;  %v8806_v47 = vmax.f32 %v8805_v36, 0.0  ;;  %v8807_v61 = vld [vmem:[#allocation21_spill] sm:$0xff]  ;;  %v8809_v48 = vld [vmem:[#allocation22_spill] sm:$0xff] }
 0x12b   :  { %8781 = vst [vmem:[#allocation34_spill] sm:$0xff] %v4757_v21  ;;  %8783 = vst [vmem:[#allocation35_spill] sm:$0xff] %v4760_v43  ;;  %v8797_v21 = vld [vmem:[#allocation16_spill] sm:$0xff]  ;;  %v2746_v41 = vadd.f32 %v2730_v57, %v8804_v10  ;;  %v8808_v37 = vmax.f32 %v8807_v61, 0.0  ;;  %v8810_v12 = vmax.f32 %v8809_v48, 0.0  ;;  %v8819_v36 = vld [vmem:[#allocation41_spill] sm:$0xff]  ;;  %v724_v61 = vadd.f32 %v3861_v14, %v170_v0 }
 0x12c   :  { %8785 = vst [vmem:[#allocation36_spill] sm:$0xff] %v4763_v31  ;;  %8787 = vst [vmem:[#allocation37_spill] sm:$0xff] %v4766_v8  ;;  %v8798_v60 = vmax.f32 %v8797_v21, 0.0  ;;  %v8800_v31 = vmax.f32 %v8799_v52, 0.0  ;;  %v8801_v8 = vld [vmem:[#allocation18_spill] sm:$0xff]  ;;  %v2747_v34 = vadd.f32 %v2731_v9, %v8806_v47  ;;  %v8817_v57 = vld [vmem:[#allocation40_spill] sm:$0xff]  ;;  %v730_v48 = vadd.f32 %v8512_v1, %v170_v0 }
 0x12d   :  { %8788 = vst [vmem:[#allocation38_spill] sm:$0xff] %v4769_v27  ;;  %v8802_v39 = vmax.f32 %v8801_v8, 0.0  ;;  %v2748_v7 = vadd.f32 %v2732_v20, %v8808_v37  ;;  %v2749_v21 = vadd.f32 %v2733_v55, %v8810_v12  ;;  %v8818_v10 = vmax.f32 %v8817_v57, 0.0 }
 0x12e   :  { %v2743_v43 = vadd.f32 %v2727_v38, %v8798_v60  ;;  %v2744_v4 = vadd.f32 %v2728_v51, %v8800_v31  ;;  %v8811_v38 = vld [vmem:[#allocation3_spill] sm:$0xff]  ;;  %v8813_v51 = vld [vmem:[#allocation4_spill] sm:$0xff]  ;;  %v8820_v9 = vmax.f32 %v8819_v36, 0.0  ;;  %v723_v20 = vadd.f32 %v3859_v13, %v170_v0 }
 0x12f   :  { %v2745_v27 = vadd.f32 %v2729_v25, %v8802_v39  ;;  %v8812_v60 = vmax.f32 %v8811_v38, 0.0  ;;  %v8814_v31 = vmax.f32 %v8813_v51, 0.0  ;;  %v8815_v25 = vld [vmem:[#allocation39_spill] sm:$0xff]  ;;  %v2753_v22 = vadd.f32 %v2737_v42, %v8818_v10 }
 0x130   :  { %v8816_v39 = vmax.f32 %v8815_v25, 0.0  ;;  %v2754_v47 = vadd.f32 %v2738_v50, %v8820_v9  ;;  %v725_v55 = vadd.f32 %v3863_v15, %v170_v0  ;;  %v727_v37 = vadd.f32 %v3867_v17, %v170_v0 }
 0x131   :  { %v2750_v52 = vadd.f32 %v2734_v54, %v8812_v60  ;;  %v2751_v8 = vadd.f32 %v2735_v24, %v8814_v31  ;;  %v726_v54 = vadd.f32 %v3865_v16, %v170_v0  ;;  %v728_v24 = vadd.f32 %v3869_v18, %v170_v0 }
 0x132   :  { %v2752_v49 = vadd.f32 %v2736_v45, %v8816_v39  ;;  %v729_v45 = vadd.f32 %v3871_v19, %v170_v0  ;;  %v731_v42 = vadd.f32 %v8514_v2, %v170_v0  ;;  %v732_v50 = vadd.f32 %v8516_v3, %v170_v0 }
 0x133   :  { %v733_v12 = vadd.f32 %v8518_v23, %v170_v0  ;;  %v734_v38 = vadd.f32 %v8780_v35, %v170_v0  ;;  %v735_v60 = vadd.f32 %v8782_v6, %v170_v0  ;;  %v736_v51 = vadd.f32 %v8784_v56, %v170_v0 }
 0x134   :  { %v737_v31 = vadd.f32 %v8786_v44, %v170_v0  ;;  %v738_v25 = vadd.f32 %v3889_v28, %v170_v0  ;;  %v1747_v39 = vmax.f32 %v723_v20, 0.0  ;;  %v1748_v57 = vmax.f32 %v724_v61, 0.0 }
 0x135   :  { %v1749_v10 = vmax.f32 %v725_v55, 0.0  ;;  %v1750_v36 = vmax.f32 %v726_v54, 0.0  ;;  %v1751_v9 = vmax.f32 %v727_v37, 0.0  ;;  %v1752_v62 = vmax.f32 %v728_v24, 0.0  ;;  %v185_v37 = vpop.permute.xlu1 %184 }
 0x136   :  { %v1753_v58 = vmax.f32 %v729_v45, 0.0  ;;  %v1754_v30 = vmax.f32 %v730_v48, 0.0  ;;  %v1755_v53 = vmax.f32 %v731_v42, 0.0  ;;  %v1756_v46 = vmax.f32 %v732_v50, 0.0 }
 0x137   :  { %v1757_v29 = vmax.f32 %v733_v12, 0.0  ;;  %v1758_v5 = vmax.f32 %v734_v38, 0.0  ;;  %v1759_v32 = vmax.f32 %v735_v60, 0.0  ;;  %v1760_v40 = vmax.f32 %v736_v51, 0.0 }
 0x138   :  { %v1761_v63 = vmax.f32 %v737_v31, 0.0  ;;  %v1762_v56 = vmax.f32 %v738_v25, 0.0  ;;  %v2755_v6 = vadd.f32 %v2739_v26, %v1747_v39  ;;  %v2756_v44 = vadd.f32 %v2740_v59, %v1748_v57  ;;  %v8838_v59 = vld [vmem:[#allocation10_spill] sm:$0xff] }
 0x139   :  { %v2757_v35 = vadd.f32 %v2741_v11, %v1749_v10  ;;  %v2758_v0 = vadd.f32 %v2742_v33, %v1750_v36  ;;  %v2759_v20 = vadd.f32 %v2743_v43, %v1751_v9  ;;  %v2760_v61 = vadd.f32 %v2744_v4, %v1752_v62  ;;  %v8847_v39 = vld [vmem:[#allocation26_spill] sm:$0xff]  ;;  %v8851_v36 = vld [vmem:[#allocation28_spill] sm:$0xff] }
 0x13a   :  { %v2761_v55 = vadd.f32 %v2745_v27, %v1753_v58  ;;  %v2762_v54 = vadd.f32 %v2746_v41, %v1754_v30  ;;  %v2763_v24 = vadd.f32 %v2747_v34, %v1755_v53  ;;  %v2764_v45 = vadd.f32 %v2748_v7, %v1756_v46  ;;  %v8832_v58 = vld [vmem:[#allocation7_spill] sm:$0xff]  ;;  %v8836_v27 = vld [vmem:[#allocation9_spill] sm:$0xff] }
 0x13b   :  { %v2765_v48 = vadd.f32 %v2749_v21, %v1757_v29  ;;  %v2766_v42 = vadd.f32 %v2750_v52, %v1758_v5  ;;  %v2767_v50 = vadd.f32 %v2751_v8, %v1759_v32  ;;  %v2768_v12 = vadd.f32 %v2752_v49, %v1760_v40  ;;  %v8841_v8 = vld [vmem:[#allocation23_spill] sm:$0xff]  ;;  %v8845_v7 = vld [vmem:[#allocation25_spill] sm:$0xff] }
 0x13c   :  { %v2769_v38 = vadd.f32 %v2753_v22, %v1761_v63  ;;  %v2770_v60 = vadd.f32 %v2754_v47, %v1762_v56  ;;  %v4836_v51 = vadd.f32 %v3859_v13, %v185_v37  ;;  %v4839_v26 = vadd.f32 %v3861_v14, %v185_v37  ;;  %v8834_v22 = vld [vmem:[#allocation8_spill] sm:$0xff] }
 0x13d   :  { %v4842_v43 = vadd.f32 %v3863_v15, %v185_v37  ;;  %v4845_v30 = vadd.f32 %v3865_v16, %v185_v37  ;;  %v4848_v46 = vadd.f32 %v3867_v17, %v185_v37  ;;  %v4851_v32 = vadd.f32 %v3869_v18, %v185_v37  ;;  %v8843_v47 = vld [vmem:[#allocation24_spill] sm:$0xff] }
 0x13e   :  { %8821 = vst [vmem:[#allocation12_spill] sm:$0xff] %v4836_v51  ;;  %8822 = vst [vmem:[#allocation13_spill] sm:$0xff] %v4839_v26  ;;  %v4854_v63 = vadd.f32 %v3871_v19, %v185_v37  ;;  %v4857_v40 = vadd.f32 %v8512_v1, %v185_v37  ;;  %v4860_v5 = vadd.f32 %v8514_v2, %v185_v37  ;;  %v8842_v49 = vmax.f32 %v8841_v8, 0.0  ;;  %v8855_v8 = vld [vmem:[#allocation30_spill] sm:$0xff] }
 0x13f   :  { %8823 = vst [vmem:[#allocation14_spill] sm:$0xff] %v4842_v43  ;;  %8824 = vst [vmem:[#allocation15_spill] sm:$0xff] %v4845_v30  ;;  %v4863_v29 = vadd.f32 %v8516_v3, %v185_v37  ;;  %v4866_v53 = vadd.f32 %v8518_v23, %v185_v37  ;;  %v4869_v62 = vadd.f32 %v8832_v58, %v185_v37  ;;  %v8844_v21 = vmax.f32 %v8843_v47, 0.0  ;;  %v180_v47 = vpop.permute.xlu0 %179 }
 0x140   :  { %8825 = vst [vmem:[#allocation16_spill] sm:$0xff] %v4848_v46  ;;  %8826 = vst [vmem:[#allocation17_spill] sm:$0xff] %v4851_v32  ;;  %v4872_v56 = vadd.f32 %v8834_v22, %v185_v37  ;;  %v4875_v11 = vadd.f32 %v8836_v27, %v185_v37  ;;  %v4878_v33 = vadd.f32 %v8838_v59, %v185_v37  ;;  %v8846_v25 = vmax.f32 %v8845_v7, 0.0 }
 0x141   :  { %8827 = vst [vmem:[#allocation18_spill] sm:$0xff] %v4854_v63  ;;  %8828 = vst [vmem:[#allocation19_spill] sm:$0xff] %v4857_v40  ;;  %v4881_v4 = vadd.f32 %v3889_v28, %v185_v37  ;;  %v2771_v52 = vadd.f32 %v2755_v6, %v8842_v49  ;;  %v2772_v31 = vadd.f32 %v2756_v44, %v8844_v21  ;;  %v8848_v41 = vmax.f32 %v8847_v39, 0.0  ;;  %v8857_v44 = vld [vmem:[#allocation31_spill] sm:$0xff] }
 0x142   :  { %8829 = vst [vmem:[#allocation20_spill] sm:$0xff] %v4860_v5  ;;  %8830 = vst [vmem:[#allocation21_spill] sm:$0xff] %v4863_v29  ;;  %v2773_v34 = vadd.f32 %v2757_v35, %v8846_v25  ;;  %v8856_v6 = vmax.f32 %v8855_v8, 0.0  ;;  %v8858_v21 = vmax.f32 %v8857_v44, 0.0  ;;  %v8859_v35 = vld [vmem:[#allocation32_spill] sm:$0xff]  ;;  %v8871_v44 = vld [vmem:[#allocation38_spill] sm:$0xff] }
 0x143   :  { %8831 = vst [vmem:[#allocation22_spill] sm:$0xff] %v4866_v53  ;;  %8833 = vst [vmem:[#allocation3_spill] sm:$0xff] %v4869_v62  ;;  %v2774_v57 = vadd.f32 %v2758_v0, %v8848_v41  ;;  %v8849_v62 = vld [vmem:[#allocation27_spill] sm:$0xff]  ;;  %v8860_v25 = vmax.f32 %v8859_v35, 0.0  ;;  %v8861_v0 = vld [vmem:[#allocation33_spill] sm:$0xff]  ;;  %v756_v35 = vadd.f32 %v3861_v14, %v180_v47 }
 0x144   :  { %8835 = vst [vmem:[#allocation4_spill] sm:$0xff] %v4872_v56  ;;  %8837 = vst [vmem:[#allocation39_spill] sm:$0xff] %v4875_v11  ;;  %v8850_v10 = vmax.f32 %v8849_v62, 0.0  ;;  %v8852_v11 = vmax.f32 %v8851_v36, 0.0  ;;  %v2778_v49 = vadd.f32 %v2762_v54, %v8856_v6  ;;  %v2779_v7 = vadd.f32 %v2763_v24, %v8858_v21  ;;  %v8869_v54 = vld [vmem:[#allocation37_spill] sm:$0xff] }
 0x145   :  { %8839 = vst [vmem:[#allocation40_spill] sm:$0xff] %v4878_v33  ;;  %8840 = vst [vmem:[#allocation41_spill] sm:$0xff] %v4881_v4  ;;  %v8853_v33 = vld [vmem:[#allocation29_spill] sm:$0xff]  ;;  %v2780_v39 = vadd.f32 %v2764_v45, %v8860_v25  ;;  %v8862_v41 = vmax.f32 %v8861_v0, 0.0  ;;  %v8870_v6 = vmax.f32 %v8869_v54, 0.0  ;;  %v8872_v24 = vmax.f32 %v8871_v44, 0.0 }
 0x146   :  { %v2775_v56 = vadd.f32 %v2759_v20, %v8850_v10  ;;  %v2776_v9 = vadd.f32 %v2760_v61, %v8852_v11  ;;  %v8854_v37 = vmax.f32 %v8853_v33, 0.0  ;;  %v8863_v20 = vld [vmem:[#allocation34_spill] sm:$0xff]  ;;  %v8865_v61 = vld [vmem:[#allocation35_spill] sm:$0xff]  ;;  %v755_v45 = vadd.f32 %v3859_v13, %v180_v47 }
 0x147   :  { %v2781_v62 = vadd.f32 %v2765_v48, %v8862_v41  ;;  %v8864_v10 = vmax.f32 %v8863_v20, 0.0  ;;  %v8866_v11 = vmax.f32 %v8865_v61, 0.0  ;;  %v2785_v53 = vadd.f32 %v2769_v38, %v8870_v6 }
 0x148   :  { %v2777_v4 = vadd.f32 %v2761_v55, %v8854_v37  ;;  %v8867_v55 = vld [vmem:[#allocation36_spill] sm:$0xff]  ;;  %v2786_v21 = vadd.f32 %v2770_v60, %v8872_v24  ;;  %v757_v48 = vadd.f32 %v3863_v15, %v180_v47  ;;  %v759_v25 = vadd.f32 %v3867_v17, %v180_v47 }
 0x149   :  { %v2782_v36 = vadd.f32 %v2766_v42, %v8864_v10  ;;  %v2783_v33 = vadd.f32 %v2767_v50, %v8866_v11  ;;  %v8868_v37 = vmax.f32 %v8867_v55, 0.0  ;;  %v758_v42 = vadd.f32 %v3865_v16, %v180_v47 }
 0x14a   :  { %v760_v50 = vadd.f32 %v3869_v18, %v180_v47  ;;  %v762_v0 = vadd.f32 %v8512_v1, %v180_v47  ;;  %v763_v38 = vadd.f32 %v8514_v2, %v180_v47  ;;  %v764_v60 = vadd.f32 %v8516_v3, %v180_v47 }
 0x14b   :  { %v2784_v8 = vadd.f32 %v2768_v12, %v8868_v37  ;;  %v761_v12 = vadd.f32 %v3871_v19, %v180_v47  ;;  %v765_v41 = vadd.f32 %v8518_v23, %v180_v47  ;;  %v766_v20 = vadd.f32 %v8832_v58, %v180_v47 }
 0x14c   :  { %v767_v10 = vadd.f32 %v8834_v22, %v180_v47  ;;  %v768_v61 = vadd.f32 %v8836_v27, %v180_v47  ;;  %v769_v11 = vadd.f32 %v8838_v59, %v180_v47  ;;  %v770_v55 = vadd.f32 %v3889_v28, %v180_v47 }
 0x14d   :  { %v1779_v37 = vmax.f32 %v755_v45, 0.0  ;;  %v1780_v54 = vmax.f32 %v756_v35, 0.0  ;;  %v1781_v6 = vmax.f32 %v757_v48, 0.0  ;;  %v1782_v44 = vmax.f32 %v758_v42, 0.0 }
 0x14e   :  { %v1783_v24 = vmax.f32 %v759_v25, 0.0  ;;  %v1784_v29 = vmax.f32 %v760_v50, 0.0  ;;  %v1785_v5 = vmax.f32 %v761_v12, 0.0  ;;  %v1786_v40 = vmax.f32 %v762_v0, 0.0  ;;  %v195_v25 = vpop.permute.xlu1 %194 }
 0x14f   :  { %v1787_v63 = vmax.f32 %v763_v38, 0.0  ;;  %v1788_v32 = vmax.f32 %v764_v60, 0.0  ;;  %v1789_v46 = vmax.f32 %v765_v41, 0.0  ;;  %v1790_v30 = vmax.f32 %v766_v20, 0.0 }
 0x150   :  { %v1791_v43 = vmax.f32 %v767_v10, 0.0  ;;  %v1792_v26 = vmax.f32 %v768_v61, 0.0  ;;  %v1793_v51 = vmax.f32 %v769_v11, 0.0  ;;  %v1794_v27 = vmax.f32 %v770_v55, 0.0 }
 0x151   :  { %v2787_v22 = vadd.f32 %v2771_v52, %v1779_v37  ;;  %v2788_v59 = vadd.f32 %v2772_v31, %v1780_v54  ;;  %v2789_v58 = vadd.f32 %v2773_v34, %v1781_v6  ;;  %v2790_v47 = vadd.f32 %v2774_v57, %v1782_v44  ;;  %v8890_v31 = vld [vmem:[#allocation10_spill] sm:$0xff]  ;;  %v8899_v37 = vld [vmem:[#allocation15_spill] sm:$0xff]  ;;  %v8903_v44 = vld [vmem:[#allocation17_spill] sm:$0xff] }
 0x152   :  { %v2791_v45 = vadd.f32 %v2775_v56, %v1783_v24  ;;  %v2792_v35 = vadd.f32 %v2776_v9, %v1784_v29  ;;  %v2793_v48 = vadd.f32 %v2777_v4, %v1785_v5  ;;  %v2794_v42 = vadd.f32 %v2778_v49, %v1786_v40  ;;  %v8884_v5 = vld [vmem:[#allocation7_spill] sm:$0xff]  ;;  %v8888_v4 = vld [vmem:[#allocation9_spill] sm:$0xff] }
 0x153   :  { %v2795_v50 = vadd.f32 %v2779_v7, %v1787_v63  ;;  %v2796_v12 = vadd.f32 %v2780_v39, %v1788_v32  ;;  %v2797_v0 = vadd.f32 %v2781_v62, %v1789_v46  ;;  %v2798_v38 = vadd.f32 %v2782_v36, %v1790_v30  ;;  %v8897_v39 = vld [vmem:[#allocation14_spill] sm:$0xff] }
 0x154   :  { %v2799_v60 = vadd.f32 %v2783_v33, %v1791_v43  ;;  %v2800_v41 = vadd.f32 %v2784_v8, %v1792_v26  ;;  %v2801_v20 = vadd.f32 %v2785_v53, %v1793_v51  ;;  %v2802_v10 = vadd.f32 %v2786_v21, %v1794_v27  ;;  %v8886_v53 = vld [vmem:[#allocation8_spill] sm:$0xff]  ;;  %v8895_v21 = vld [vmem:[#allocation13_spill] sm:$0xff] }
 0x155   :  { %v4948_v61 = vadd.f32 %v3859_v13, %v195_v25  ;;  %v4951_v52 = vadd.f32 %v3861_v14, %v195_v25  ;;  %v4954_v56 = vadd.f32 %v3863_v15, %v195_v25  ;;  %v4957_v40 = vadd.f32 %v3865_v16, %v195_v25  ;;  %v8893_v33 = vld [vmem:[#allocation12_spill] sm:$0xff] }
 0x156   :  { %v4960_v32 = vadd.f32 %v3867_v17, %v195_v25  ;;  %v4963_v43 = vadd.f32 %v3869_v18, %v195_v25  ;;  %v4966_v51 = vadd.f32 %v3871_v19, %v195_v25  ;;  %v4969_v26 = vadd.f32 %v8512_v1, %v195_v25 }
 0x157   :  { %8873 = vst [vmem:[#allocation23_spill] sm:$0xff] %v4948_v61  ;;  %8874 = vst [vmem:[#allocation24_spill] sm:$0xff] %v4951_v52  ;;  %v4972_v30 = vadd.f32 %v8514_v2, %v195_v25  ;;  %v4975_v46 = vadd.f32 %v8516_v3, %v195_v25  ;;  %v4978_v63 = vadd.f32 %v8518_v23, %v195_v25  ;;  %v8894_v8 = vmax.f32 %v8893_v33, 0.0  ;;  %v8907_v33 = vld [vmem:[#allocation19_spill] sm:$0xff] }
 0x158   :  { %8875 = vst [vmem:[#allocation25_spill] sm:$0xff] %v4954_v56  ;;  %8876 = vst [vmem:[#allocation26_spill] sm:$0xff] %v4957_v40  ;;  %v4981_v29 = vadd.f32 %v8884_v5, %v195_v25  ;;  %v4984_v27 = vadd.f32 %v8886_v53, %v195_v25  ;;  %v4987_v34 = vadd.f32 %v8888_v4, %v195_v25  ;;  %v8896_v62 = vmax.f32 %v8895_v21, 0.0  ;;  %v190_v21 = vpop.permute.xlu0 %189 }
 0x159   :  { %8877 = vst [vmem:[#allocation27_spill] sm:$0xff] %v4960_v32  ;;  %8878 = vst [vmem:[#allocation28_spill] sm:$0xff] %v4963_v43  ;;  %v4990_v57 = vadd.f32 %v8890_v31, %v195_v25  ;;  %v4993_v9 = vadd.f32 %v3889_v28, %v195_v25  ;;  %v2803_v36 = vadd.f32 %v2787_v22, %v8894_v8  ;;  %v8898_v55 = vmax.f32 %v8897_v39, 0.0 }
 0x15a   :  { %8879 = vst [vmem:[#allocation29_spill] sm:$0xff] %v4966_v51  ;;  %8880 = vst [vmem:[#allocation30_spill] sm:$0xff] %v4969_v26  ;;  %v2804_v11 = vadd.f32 %v2788_v59, %v8896_v62  ;;  %v8900_v49 = vmax.f32 %v8899_v37, 0.0  ;;  %v8908_v22 = vmax.f32 %v8907_v33, 0.0  ;;  %v8909_v59 = vld [vmem:[#allocation20_spill] sm:$0xff] }
 0x15b   :  { %8881 = vst [vmem:[#allocation31_spill] sm:$0xff] %v4972_v30  ;;  %8882 = vst [vmem:[#allocation32_spill] sm:$0xff] %v4975_v46  ;;  %v2805_v7 = vadd.f32 %v2789_v58, %v8898_v55  ;;  %v8910_v62 = vmax.f32 %v8909_v59, 0.0  ;;  %v8911_v58 = vld [vmem:[#allocation21_spill] sm:$0xff] }
 0x15c   :  { %8883 = vst [vmem:[#allocation33_spill] sm:$0xff] %v4978_v63  ;;  %8885 = vst [vmem:[#allocation34_spill] sm:$0xff] %v4981_v29  ;;  %v2806_v54 = vadd.f32 %v2790_v47, %v8900_v49  ;;  %v8901_v29 = vld [vmem:[#allocation16_spill] sm:$0xff]  ;;  %v2810_v8 = vadd.f32 %v2794_v42, %v8908_v22  ;;  %v8912_v55 = vmax.f32 %v8911_v58, 0.0  ;;  %v8913_v47 = vld [vmem:[#allocation22_spill] sm:$0xff]  ;;  %v788_v58 = vadd.f32 %v3861_v14, %v190_v21 }
 0x15d   :  { %8887 = vst [vmem:[#allocation35_spill] sm:$0xff] %v4984_v27  ;;  %8889 = vst [vmem:[#allocation36_spill] sm:$0xff] %v4987_v34  ;;  %v8902_v6 = vmax.f32 %v8901_v29, 0.0  ;;  %v8904_v34 = vmax.f32 %v8903_v44, 0.0  ;;  %v2811_v39 = vadd.f32 %v2795_v50, %v8910_v62  ;;  %v8914_v49 = vmax.f32 %v8913_v47, 0.0  ;;  %v8921_v42 = vld [vmem:[#allocation40_spill] sm:$0xff] }
 0x15e   :  { %8891 = vst [vmem:[#allocation37_spill] sm:$0xff] %v4990_v57  ;;  %8892 = vst [vmem:[#allocation38_spill] sm:$0xff] %v4993_v9  ;;  %v8905_v57 = vld [vmem:[#allocation18_spill] sm:$0xff]  ;;  %v2812_v37 = vadd.f32 %v2796_v12, %v8912_v55  ;;  %v8922_v22 = vmax.f32 %v8921_v42, 0.0  ;;  %v8923_v59 = vld [vmem:[#allocation41_spill] sm:$0xff]  ;;  %v787_v12 = vadd.f32 %v3859_v13, %v190_v21  ;;  %v791_v55 = vadd.f32 %v3867_v17, %v190_v21 }
 0x15f   :  { %v2807_v27 = vadd.f32 %v2791_v45, %v8902_v6  ;;  %v2808_v24 = vadd.f32 %v2792_v35, %v8904_v34  ;;  %v8906_v25 = vmax.f32 %v8905_v57, 0.0  ;;  %v2813_v29 = vadd.f32 %v2797_v0, %v8914_v49  ;;  %v8915_v45 = vld [vmem:[#allocation3_spill] sm:$0xff]  ;;  %v8917_v35 = vld [vmem:[#allocation4_spill] sm:$0xff] }
 0x160   :  { %v8916_v6 = vmax.f32 %v8915_v45, 0.0  ;;  %v8918_v34 = vmax.f32 %v8917_v35, 0.0  ;;  %v2817_v63 = vadd.f32 %v2801_v20, %v8922_v22  ;;  %v8924_v50 = vmax.f32 %v8923_v59, 0.0 }
 0x161   :  { %v2809_v9 = vadd.f32 %v2793_v48, %v8906_v25  ;;  %v8919_v48 = vld [vmem:[#allocation39_spill] sm:$0xff]  ;;  %v789_v0 = vadd.f32 %v3863_v15, %v190_v21  ;;  %v794_v47 = vadd.f32 %v8512_v1, %v190_v21  ;;  %v795_v20 = vadd.f32 %v8514_v2, %v190_v21 }
 0x162   :  { %v2814_v44 = vadd.f32 %v2798_v38, %v8916_v6  ;;  %v2815_v57 = vadd.f32 %v2799_v60, %v8918_v34  ;;  %v8920_v25 = vmax.f32 %v8919_v48, 0.0  ;;  %v2818_v62 = vadd.f32 %v2802_v10, %v8924_v50 }
 0x163   :  { %v790_v38 = vadd.f32 %v3865_v16, %v190_v21  ;;  %v792_v60 = vadd.f32 %v3869_v18, %v190_v21  ;;  %v796_v10 = vadd.f32 %v8516_v3, %v190_v21  ;;  %v797_v49 = vadd.f32 %v8518_v23, %v190_v21 }
 0x164   :  { %v2816_v33 = vadd.f32 %v2800_v41, %v8920_v25  ;;  %v793_v41 = vadd.f32 %v3871_v19, %v190_v21  ;;  %v798_v45 = vadd.f32 %v8884_v5, %v190_v21  ;;  %v799_v6 = vadd.f32 %v8886_v53, %v190_v21 }
 0x165   :  { %v800_v35 = vadd.f32 %v8888_v4, %v190_v21  ;;  %v801_v34 = vadd.f32 %v8890_v31, %v190_v21  ;;  %v802_v48 = vadd.f32 %v3889_v28, %v190_v21  ;;  %v1811_v25 = vmax.f32 %v787_v12, 0.0 }
 0x166   :  { %v1812_v42 = vmax.f32 %v788_v58, 0.0  ;;  %v1813_v22 = vmax.f32 %v789_v0, 0.0  ;;  %v1814_v59 = vmax.f32 %v790_v38, 0.0  ;;  %v1815_v50 = vmax.f32 %v791_v55, 0.0  ;;  %v205_v55 = vpop.permute.xlu1 %204 }
 0x167   :  { %v1816_v46 = vmax.f32 %v792_v60, 0.0  ;;  %v1817_v30 = vmax.f32 %v793_v41, 0.0  ;;  %v1818_v26 = vmax.f32 %v794_v47, 0.0  ;;  %v1819_v51 = vmax.f32 %v795_v20, 0.0 }
 0x168   :  { %v1820_v43 = vmax.f32 %v796_v10, 0.0  ;;  %v1821_v32 = vmax.f32 %v797_v49, 0.0  ;;  %v1822_v40 = vmax.f32 %v798_v45, 0.0  ;;  %v1823_v56 = vmax.f32 %v799_v6, 0.0 }
 0x169   :  { %v1824_v52 = vmax.f32 %v800_v35, 0.0  ;;  %v1825_v61 = vmax.f32 %v801_v34, 0.0  ;;  %v1826_v4 = vmax.f32 %v802_v48, 0.0  ;;  %v2819_v53 = vadd.f32 %v2803_v36, %v1811_v25  ;;  %v8951_v25 = vld [vmem:[#allocation26_spill] sm:$0xff] }
 0x16a   :  { %v2820_v31 = vadd.f32 %v2804_v11, %v1812_v42  ;;  %v2821_v5 = vadd.f32 %v2805_v7, %v1813_v22  ;;  %v2822_v21 = vadd.f32 %v2806_v54, %v1814_v59  ;;  %v2823_v12 = vadd.f32 %v2807_v27, %v1815_v50  ;;  %v8942_v11 = vld [vmem:[#allocation10_spill] sm:$0xff]  ;;  %v8955_v59 = vld [vmem:[#allocation28_spill] sm:$0xff] }
 0x16b   :  { %v2824_v58 = vadd.f32 %v2808_v24, %v1816_v46  ;;  %v2825_v0 = vadd.f32 %v2809_v9, %v1817_v30  ;;  %v2826_v38 = vadd.f32 %v2810_v8, %v1818_v26  ;;  %v2827_v60 = vadd.f32 %v2811_v39, %v1819_v51  ;;  %v8936_v30 = vld [vmem:[#allocation7_spill] sm:$0xff]  ;;  %v8940_v9 = vld [vmem:[#allocation9_spill] sm:$0xff] }
 0x16c   :  { %v2828_v41 = vadd.f32 %v2812_v37, %v1820_v43  ;;  %v2829_v47 = vadd.f32 %v2813_v29, %v1821_v32  ;;  %v2830_v20 = vadd.f32 %v2814_v44, %v1822_v40  ;;  %v2831_v10 = vadd.f32 %v2815_v57, %v1823_v56  ;;  %v8945_v57 = vld [vmem:[#allocation23_spill] sm:$0xff]  ;;  %v8949_v37 = vld [vmem:[#allocation25_spill] sm:$0xff] }
 0x16d   :  { %v2832_v49 = vadd.f32 %v2816_v33, %v1824_v52  ;;  %v2833_v45 = vadd.f32 %v2817_v63, %v1825_v61  ;;  %v2834_v6 = vadd.f32 %v2818_v62, %v1826_v4  ;;  %v5060_v35 = vadd.f32 %v3859_v13, %v205_v55  ;;  %v8938_v63 = vld [vmem:[#allocation8_spill] sm:$0xff] }
 0x16e   :  { %v5063_v36 = vadd.f32 %v3861_v14, %v205_v55  ;;  %v5066_v27 = vadd.f32 %v3863_v15, %v205_v55  ;;  %v5069_v26 = vadd.f32 %v3865_v16, %v205_v55  ;;  %v5072_v43 = vadd.f32 %v3867_v17, %v205_v55  ;;  %v8947_v62 = vld [vmem:[#allocation24_spill] sm:$0xff] }
 0x16f   :  { %8925 = vst [vmem:[#allocation12_spill] sm:$0xff] %v5060_v35  ;;  %v5075_v56 = vadd.f32 %v3869_v18, %v205_v55  ;;  %v5078_v61 = vadd.f32 %v3871_v19, %v205_v55  ;;  %v5081_v52 = vadd.f32 %v8512_v1, %v205_v55  ;;  %v5084_v40 = vadd.f32 %v8514_v2, %v205_v55 }
 0x170   :  { %8926 = vst [vmem:[#allocation13_spill] sm:$0xff] %v5063_v36  ;;  %8927 = vst [vmem:[#allocation14_spill] sm:$0xff] %v5066_v27  ;;  %v5087_v32 = vadd.f32 %v8516_v3, %v205_v55  ;;  %v5090_v51 = vadd.f32 %v8518_v23, %v205_v55  ;;  %v5093_v46 = vadd.f32 %v8936_v30, %v205_v55  ;;  %v8946_v33 = vmax.f32 %v8945_v57, 0.0  ;;  %v8959_v57 = vld [vmem:[#allocation30_spill] sm:$0xff] }
 0x171   :  { %8928 = vst [vmem:[#allocation15_spill] sm:$0xff] %v5069_v26  ;;  %8929 = vst [vmem:[#allocation16_spill] sm:$0xff] %v5072_v43  ;;  %v5096_v4 = vadd.f32 %v8938_v63, %v205_v55  ;;  %v5099_v7 = vadd.f32 %v8940_v9, %v205_v55  ;;  %v5102_v54 = vadd.f32 %v8942_v11, %v205_v55  ;;  %v8948_v29 = vmax.f32 %v8947_v62, 0.0  ;;  %v200_v62 = vpop.permute.xlu0 %199 }
 0x172   :  { %8930 = vst [vmem:[#allocation17_spill] sm:$0xff] %v5075_v56  ;;  %8931 = vst [vmem:[#allocation18_spill] sm:$0xff] %v5078_v61  ;;  %v5105_v24 = vadd.f32 %v3889_v28, %v205_v55  ;;  %v2835_v44 = vadd.f32 %v2819_v53, %v8946_v33  ;;  %v8950_v48 = vmax.f32 %v8949_v37, 0.0  ;;  %v8952_v8 = vmax.f32 %v8951_v25, 0.0 }
 0x173   :  { %8932 = vst [vmem:[#allocation19_spill] sm:$0xff] %v5081_v52  ;;  %8933 = vst [vmem:[#allocation20_spill] sm:$0xff] %v5084_v40  ;;  %v2836_v34 = vadd.f32 %v2820_v31, %v8948_v29  ;;  %v8960_v53 = vmax.f32 %v8959_v57, 0.0  ;;  %v8961_v31 = vld [vmem:[#allocation31_spill] sm:$0xff] }
 0x174   :  { %8934 = vst [vmem:[#allocation21_spill] sm:$0xff] %v5087_v32  ;;  %8935 = vst [vmem:[#allocation22_spill] sm:$0xff] %v5090_v51  ;;  %v2837_v39 = vadd.f32 %v2821_v5, %v8950_v48  ;;  %v2838_v42 = vadd.f32 %v2822_v21, %v8952_v8  ;;  %v8962_v29 = vmax.f32 %v8961_v31, 0.0  ;;  %v8963_v5 = vld [vmem:[#allocation32_spill] sm:$0xff]  ;;  %v8965_v21 = vld [vmem:[#allocation33_spill] sm:$0xff] }
 0x175   :  { %8937 = vst [vmem:[#allocation3_spill] sm:$0xff] %v5093_v46  ;;  %8939 = vst [vmem:[#allocation4_spill] sm:$0xff] %v5096_v4  ;;  %v8953_v46 = vld [vmem:[#allocation27_spill] sm:$0xff]  ;;  %v2842_v33 = vadd.f32 %v2826_v38, %v8960_v53  ;;  %v8964_v48 = vmax.f32 %v8963_v5, 0.0  ;;  %v8966_v8 = vmax.f32 %v8965_v21, 0.0  ;;  %v8973_v38 = vld [vmem:[#allocation37_spill] sm:$0xff]  ;;  %v820_v5 = vadd.f32 %v3861_v14, %v200_v62 }
 0x176   :  { %8941 = vst [vmem:[#allocation39_spill] sm:$0xff] %v5099_v7  ;;  %8943 = vst [vmem:[#allocation40_spill] sm:$0xff] %v5102_v54  ;;  %v8954_v22 = vmax.f32 %v8953_v46, 0.0  ;;  %v8956_v7 = vmax.f32 %v8955_v59, 0.0  ;;  %v8957_v54 = vld [vmem:[#allocation29_spill] sm:$0xff]  ;;  %v2843_v37 = vadd.f32 %v2827_v60, %v8962_v29  ;;  %v8974_v53 = vmax.f32 %v8973_v38, 0.0 }
 0x177   :  { %8944 = vst [vmem:[#allocation41_spill] sm:$0xff] %v5105_v24  ;;  %v8958_v55 = vmax.f32 %v8957_v54, 0.0  ;;  %v2844_v25 = vadd.f32 %v2828_v41, %v8964_v48  ;;  %v2845_v46 = vadd.f32 %v2829_v47, %v8966_v8  ;;  %v8975_v31 = vld [vmem:[#allocation38_spill] sm:$0xff]  ;;  %v819_v41 = vadd.f32 %v3859_v13, %v200_v62 }
 0x178   :  { %v2839_v4 = vadd.f32 %v2823_v12, %v8954_v22  ;;  %v2840_v50 = vadd.f32 %v2824_v58, %v8956_v7  ;;  %v8967_v12 = vld [vmem:[#allocation34_spill] sm:$0xff]  ;;  %v8969_v58 = vld [vmem:[#allocation35_spill] sm:$0xff]  ;;  %v2849_v51 = vadd.f32 %v2833_v45, %v8974_v53  ;;  %v8976_v60 = vmax.f32 %v8975_v31, 0.0 }
 0x179   :  { %v2841_v24 = vadd.f32 %v2825_v0, %v8958_v55  ;;  %v8968_v22 = vmax.f32 %v8967_v12, 0.0  ;;  %v8970_v7 = vmax.f32 %v8969_v58, 0.0  ;;  %v8971_v0 = vld [vmem:[#allocation36_spill] sm:$0xff]  ;;  %v821_v47 = vadd.f32 %v3863_v15, %v200_v62 }
 0x17a   :  { %v8972_v55 = vmax.f32 %v8971_v0, 0.0  ;;  %v2850_v29 = vadd.f32 %v2834_v6, %v8976_v60  ;;  %v823_v48 = vadd.f32 %v3867_v17, %v200_v62  ;;  %v826_v21 = vadd.f32 %v8512_v1, %v200_v62 }
 0x17b   :  { %v2846_v59 = vadd.f32 %v2830_v20, %v8968_v22  ;;  %v2847_v54 = vadd.f32 %v2831_v10, %v8970_v7  ;;  %v822_v20 = vadd.f32 %v3865_v16, %v200_v62  ;;  %v824_v10 = vadd.f32 %v3869_v18, %v200_v62 }
 0x17c   :  { %v2848_v57 = vadd.f32 %v2832_v49, %v8972_v55  ;;  %v825_v49 = vadd.f32 %v3871_v19, %v200_v62  ;;  %v827_v45 = vadd.f32 %v8514_v2, %v200_v62  ;;  %v828_v6 = vadd.f32 %v8516_v3, %v200_v62 }
 0x17d   :  { %v829_v8 = vadd.f32 %v8518_v23, %v200_v62  ;;  %v830_v12 = vadd.f32 %v8936_v30, %v200_v62  ;;  %v831_v22 = vadd.f32 %v8938_v63, %v200_v62  ;;  %v832_v58 = vadd.f32 %v8940_v9, %v200_v62 }
 0x17e   :  { %v833_v7 = vadd.f32 %v8942_v11, %v200_v62  ;;  %v834_v0 = vadd.f32 %v3889_v28, %v200_v62  ;;  %v1843_v55 = vmax.f32 %v819_v41, 0.0  ;;  %v1844_v38 = vmax.f32 %v820_v5, 0.0 }
 0x17f   :  { %v1845_v53 = vmax.f32 %v821_v47, 0.0  ;;  %v1846_v31 = vmax.f32 %v822_v20, 0.0  ;;  %v1847_v60 = vmax.f32 %v823_v48, 0.0  ;;  %v1848_v32 = vmax.f32 %v824_v10, 0.0  ;;  %v215_v48 = vpop.permute.xlu1 %214 }
 0x180   :  { %v1849_v40 = vmax.f32 %v825_v49, 0.0  ;;  %v1850_v52 = vmax.f32 %v826_v21, 0.0  ;;  %v1851_v61 = vmax.f32 %v827_v45, 0.0  ;;  %v1852_v56 = vmax.f32 %v828_v6, 0.0 }
 0x181   :  { %v1853_v43 = vmax.f32 %v829_v8, 0.0  ;;  %v1854_v26 = vmax.f32 %v830_v12, 0.0  ;;  %v1855_v27 = vmax.f32 %v831_v22, 0.0  ;;  %v1856_v36 = vmax.f32 %v832_v58, 0.0 }
 0x182   :  { %v1857_v35 = vmax.f32 %v833_v7, 0.0  ;;  %v1858_v9 = vmax.f32 %v834_v0, 0.0  ;;  %v2851_v63 = vadd.f32 %v2835_v44, %v1843_v55  ;;  %v2852_v11 = vadd.f32 %v2836_v34, %v1844_v38  ;;  %v8994_v34 = vld [vmem:[#allocation10_spill] sm:$0xff]  ;;  %v9003_v55 = vld [vmem:[#allocation15_spill] sm:$0xff] }
 0x183   :  { %v2853_v30 = vadd.f32 %v2837_v39, %v1845_v53  ;;  %v2854_v62 = vadd.f32 %v2838_v42, %v1846_v31  ;;  %v2855_v41 = vadd.f32 %v2839_v4, %v1847_v60  ;;  %v2856_v5 = vadd.f32 %v2840_v50, %v1848_v32  ;;  %v9007_v31 = vld [vmem:[#allocation17_spill] sm:$0xff] }
 0x184   :  { %v2857_v47 = vadd.f32 %v2841_v24, %v1849_v40  ;;  %v2858_v20 = vadd.f32 %v2842_v33, %v1850_v52  ;;  %v2859_v10 = vadd.f32 %v2843_v37, %v1851_v61  ;;  %v2860_v49 = vadd.f32 %v2844_v25, %v1852_v56  ;;  %v8988_v40 = vld [vmem:[#allocation7_spill] sm:$0xff]  ;;  %v8992_v24 = vld [vmem:[#allocation9_spill] sm:$0xff]  ;;  %v9001_v25 = vld [vmem:[#allocation14_spill] sm:$0xff] }
 0x185   :  { %v2861_v21 = vadd.f32 %v2845_v46, %v1853_v43  ;;  %v2862_v45 = vadd.f32 %v2846_v59, %v1854_v26  ;;  %v2863_v6 = vadd.f32 %v2847_v54, %v1855_v27  ;;  %v2864_v8 = vadd.f32 %v2848_v57, %v1856_v36  ;;  %v8997_v54 = vld [vmem:[#allocation12_spill] sm:$0xff] }
 0x186   :  { %v2865_v12 = vadd.f32 %v2849_v51, %v1857_v35  ;;  %v2866_v22 = vadd.f32 %v2850_v29, %v1858_v9  ;;  %v5172_v58 = vadd.f32 %v3859_v13, %v215_v48  ;;  %v5175_v44 = vadd.f32 %v3861_v14, %v215_v48  ;;  %v8990_v51 = vld [vmem:[#allocation8_spill] sm:$0xff]  ;;  %v8999_v29 = vld [vmem:[#allocation13_spill] sm:$0xff] }
 0x187   :  { %v5178_v4 = vadd.f32 %v3863_v15, %v215_v48  ;;  %v5181_v52 = vadd.f32 %v3865_v16, %v215_v48  ;;  %v5184_v56 = vadd.f32 %v3867_v17, %v215_v48  ;;  %v5187_v27 = vadd.f32 %v3869_v18, %v215_v48 }
 0x188   :  { %8977 = vst [vmem:[#allocation23_spill] sm:$0xff] %v5172_v58  ;;  %8978 = vst [vmem:[#allocation24_spill] sm:$0xff] %v5175_v44  ;;  %v5190_v35 = vadd.f32 %v3871_v19, %v215_v48  ;;  %v5193_v36 = vadd.f32 %v8512_v1, %v215_v48  ;;  %v5196_v26 = vadd.f32 %v8514_v2, %v215_v48  ;;  %v8998_v57 = vmax.f32 %v8997_v54, 0.0  ;;  %v9011_v54 = vld [vmem:[#allocation19_spill] sm:$0xff] }
 0x189   :  { %8979 = vst [vmem:[#allocation25_spill] sm:$0xff] %v5178_v4  ;;  %8980 = vst [vmem:[#allocation26_spill] sm:$0xff] %v5181_v52  ;;  %v5199_v43 = vadd.f32 %v8516_v3, %v215_v48  ;;  %v5202_v61 = vadd.f32 %v8518_v23, %v215_v48  ;;  %v5205_v32 = vadd.f32 %v8988_v40, %v215_v48  ;;  %v9000_v46 = vmax.f32 %v8999_v29, 0.0  ;;  %v210_v29 = vpop.permute.xlu0 %209 }
 0x18a   :  { %8981 = vst [vmem:[#allocation27_spill] sm:$0xff] %v5184_v56  ;;  %8982 = vst [vmem:[#allocation28_spill] sm:$0xff] %v5187_v27  ;;  %v5208_v9 = vadd.f32 %v8990_v51, %v215_v48  ;;  %v5211_v39 = vadd.f32 %v8992_v24, %v215_v48  ;;  %v5214_v42 = vadd.f32 %v8994_v34, %v215_v48  ;;  %v9002_v0 = vmax.f32 %v9001_v25, 0.0 }
 0x18b   :  { %8983 = vst [vmem:[#allocation29_spill] sm:$0xff] %v5190_v35  ;;  %8984 = vst [vmem:[#allocation30_spill] sm:$0xff] %v5193_v36  ;;  %v5217_v50 = vadd.f32 %v3889_v28, %v215_v48  ;;  %v2867_v59 = vadd.f32 %v2851_v63, %v8998_v57  ;;  %v2868_v7 = vadd.f32 %v2852_v11, %v9000_v46  ;;  %v9004_v33 = vmax.f32 %v9003_v55, 0.0  ;;  %v9013_v11 = vld [vmem:[#allocation20_spill] sm:$0xff] }
 0x18c   :  { %8985 = vst [vmem:[#allocation31_spill] sm:$0xff] %v5196_v26  ;;  %8986 = vst [vmem:[#allocation32_spill] sm:$0xff] %v5199_v43  ;;  %v2869_v37 = vadd.f32 %v2853_v30, %v9002_v0  ;;  %v9012_v63 = vmax.f32 %v9011_v54, 0.0  ;;  %v9014_v46 = vmax.f32 %v9013_v11, 0.0  ;;  %v9015_v30 = vld [vmem:[#allocation21_spill] sm:$0xff] }
 0x18d   :  { %8987 = vst [vmem:[#allocation33_spill] sm:$0xff] %v5202_v61  ;;  %8989 = vst [vmem:[#allocation34_spill] sm:$0xff] %v5205_v32  ;;  %v2870_v38 = vadd.f32 %v2854_v62, %v9004_v33  ;;  %v9005_v32 = vld [vmem:[#allocation16_spill] sm:$0xff]  ;;  %v9016_v0 = vmax.f32 %v9015_v30, 0.0  ;;  %v9017_v62 = vld [vmem:[#allocation22_spill] sm:$0xff]  ;;  %v852_v30 = vadd.f32 %v3861_v14, %v210_v29 }
 0x18e   :  { %8991 = vst [vmem:[#allocation35_spill] sm:$0xff] %v5208_v9  ;;  %8993 = vst [vmem:[#allocation36_spill] sm:$0xff] %v5211_v39  ;;  %v9006_v53 = vmax.f32 %v9005_v32, 0.0  ;;  %v9008_v39 = vmax.f32 %v9007_v31, 0.0  ;;  %v2874_v57 = vadd.f32 %v2858_v20, %v9012_v63  ;;  %v2875_v25 = vadd.f32 %v2859_v10, %v9014_v46  ;;  %v9025_v20 = vld [vmem:[#allocation40_spill] sm:$0xff]  ;;  %v9027_v11 = vld [vmem:[#allocation41_spill] sm:$0xff] }
 0x18f   :  { %8995 = vst [vmem:[#allocation37_spill] sm:$0xff] %v5214_v42  ;;  %8996 = vst [vmem:[#allocation38_spill] sm:$0xff] %v5217_v50  ;;  %v9009_v42 = vld [vmem:[#allocation18_spill] sm:$0xff]  ;;  %v2876_v55 = vadd.f32 %v2860_v49, %v9016_v0  ;;  %v9018_v33 = vmax.f32 %v9017_v62, 0.0  ;;  %v9026_v63 = vmax.f32 %v9025_v20, 0.0  ;;  %v9028_v10 = vmax.f32 %v9027_v11, 0.0 }
 0x190   :  { %v2871_v9 = vadd.f32 %v2855_v41, %v9006_v53  ;;  %v2872_v60 = vadd.f32 %v2856_v5, %v9008_v39  ;;  %v9010_v48 = vmax.f32 %v9009_v42, 0.0  ;;  %v9019_v41 = vld [vmem:[#allocation3_spill] sm:$0xff]  ;;  %v9021_v5 = vld [vmem:[#allocation4_spill] sm:$0xff]  ;;  %v851_v49 = vadd.f32 %v3859_v13, %v210_v29 }
 0x191   :  { %v2877_v32 = vadd.f32 %v2861_v21, %v9018_v33  ;;  %v9020_v53 = vmax.f32 %v9019_v41, 0.0  ;;  %v9022_v39 = vmax.f32 %v9021_v5, 0.0  ;;  %v2881_v61 = vadd.f32 %v2865_v12, %v9026_v63 }
 0x192   :  { %v2873_v50 = vadd.f32 %v2857_v47, %v9010_v48  ;;  %v9023_v47 = vld [vmem:[#allocation39_spill] sm:$0xff]  ;;  %v2882_v46 = vadd.f32 %v2866_v22, %v9028_v10  ;;  %v853_v21 = vadd.f32 %v3863_v15, %v210_v29  ;;  %v855_v0 = vadd.f32 %v3867_v17, %v210_v29 }
 0x193   :  { %v2878_v31 = vadd.f32 %v2862_v45, %v9020_v53  ;;  %v2879_v42 = vadd.f32 %v2863_v6, %v9022_v39  ;;  %v9024_v48 = vmax.f32 %v9023_v47, 0.0  ;;  %v854_v45 = vadd.f32 %v3865_v16, %v210_v29 }
 0x194   :  { %v856_v6 = vadd.f32 %v3869_v18, %v210_v29  ;;  %v858_v62 = vadd.f32 %v8512_v1, %v210_v29  ;;  %v859_v12 = vadd.f32 %v8514_v2, %v210_v29  ;;  %v860_v22 = vadd.f32 %v8516_v3, %v210_v29 }
 0x195   :  { %v2880_v54 = vadd.f32 %v2864_v8, %v9024_v48  ;;  %v857_v8 = vadd.f32 %v3871_v19, %v210_v29  ;;  %v861_v33 = vadd.f32 %v8518_v23, %v210_v29  ;;  %v862_v41 = vadd.f32 %v8988_v40, %v210_v29 }
 0x196   :  { %v863_v53 = vadd.f32 %v8990_v51, %v210_v29  ;;  %v864_v5 = vadd.f32 %v8992_v24, %v210_v29  ;;  %v865_v39 = vadd.f32 %v8994_v34, %v210_v29  ;;  %v866_v47 = vadd.f32 %v3889_v28, %v210_v29 }
 0x197   :  { %v1875_v48 = vmax.f32 %v851_v49, 0.0  ;;  %v1876_v20 = vmax.f32 %v852_v30, 0.0  ;;  %v1877_v63 = vmax.f32 %v853_v21, 0.0  ;;  %v1878_v11 = vmax.f32 %v854_v45, 0.0 }
 0x198   :  { %v1879_v10 = vmax.f32 %v855_v0, 0.0  ;;  %v1880_v43 = vmax.f32 %v856_v6, 0.0  ;;  %v1881_v26 = vmax.f32 %v857_v8, 0.0  ;;  %v1882_v36 = vmax.f32 %v858_v62, 0.0  ;;  %v225_v0 = vpop.permute.xlu1 %224 }
 0x199   :  { %v1883_v35 = vmax.f32 %v859_v12, 0.0  ;;  %v1884_v27 = vmax.f32 %v860_v22, 0.0  ;;  %v1885_v56 = vmax.f32 %v861_v33, 0.0  ;;  %v1886_v52 = vmax.f32 %v862_v41, 0.0 }
 0x19a   :  { %v1887_v4 = vmax.f32 %v863_v53, 0.0  ;;  %v1888_v44 = vmax.f32 %v864_v5, 0.0  ;;  %v1889_v58 = vmax.f32 %v865_v39, 0.0  ;;  %v1890_v24 = vmax.f32 %v866_v47, 0.0 }
 0x19b   :  { %v2883_v51 = vadd.f32 %v2867_v59, %v1875_v48  ;;  %v2884_v34 = vadd.f32 %v2868_v7, %v1876_v20  ;;  %v2885_v40 = vadd.f32 %v2869_v37, %v1877_v63  ;;  %v2886_v29 = vadd.f32 %v2870_v38, %v1878_v11  ;;  %v9046_v7 = vld [vmem:[#allocation10_spill] sm:$0xff]  ;;  %v9059_v11 = vld [vmem:[#allocation28_spill] sm:$0xff] }
 0x19c   :  { %v2887_v49 = vadd.f32 %v2871_v9, %v1879_v10  ;;  %v2888_v30 = vadd.f32 %v2872_v60, %v1880_v43  ;;  %v2889_v21 = vadd.f32 %v2873_v50, %v1881_v26  ;;  %v2890_v45 = vadd.f32 %v2874_v57, %v1882_v36  ;;  %v9040_v26 = vld [vmem:[#allocation7_spill] sm:$0xff]  ;;  %v9044_v50 = vld [vmem:[#allocation9_spill] sm:$0xff]  ;;  %v9055_v48 = vld [vmem:[#allocation26_spill] sm:$0xff] }
 0x19d   :  { %v2891_v6 = vadd.f32 %v2875_v25, %v1883_v35  ;;  %v2892_v8 = vadd.f32 %v2876_v55, %v1884_v27  ;;  %v2893_v62 = vadd.f32 %v2877_v32, %v1885_v56  ;;  %v2894_v12 = vadd.f32 %v2878_v31, %v1886_v52  ;;  %v9053_v55 = vld [vmem:[#allocation25_spill] sm:$0xff] }
 0x19e   :  { %v2895_v22 = vadd.f32 %v2879_v42, %v1887_v4  ;;  %v2896_v33 = vadd.f32 %v2880_v54, %v1888_v44  ;;  %v2897_v41 = vadd.f32 %v2881_v61, %v1889_v58  ;;  %v2898_v53 = vadd.f32 %v2882_v46, %v1890_v24  ;;  %v9042_v61 = vld [vmem:[#allocation8_spill] sm:$0xff]  ;;  %v9049_v42 = vld [vmem:[#allocation23_spill] sm:$0xff] }
 0x19f   :  { %v5284_v5 = vadd.f32 %v3859_v13, %v225_v0  ;;  %v5287_v59 = vadd.f32 %v3861_v14, %v225_v0  ;;  %v5290_v9 = vadd.f32 %v3863_v15, %v225_v0  ;;  %v5293_v36 = vadd.f32 %v3865_v16, %v225_v0  ;;  %v9051_v46 = vld [vmem:[#allocation24_spill] sm:$0xff] }
 0x1a0   :  { %v5296_v27 = vadd.f32 %v3867_v17, %v225_v0  ;;  %v5299_v4 = vadd.f32 %v3869_v18, %v225_v0  ;;  %v5302_v58 = vadd.f32 %v3871_v19, %v225_v0  ;;  %v5305_v44 = vadd.f32 %v8512_v1, %v225_v0 }
 0x1a1   :  { %9029 = vst [vmem:[#allocation12_spill] sm:$0xff] %v5284_v5  ;;  %9030 = vst [vmem:[#allocation13_spill] sm:$0xff] %v5287_v59  ;;  %v5308_v52 = vadd.f32 %v8514_v2, %v225_v0  ;;  %v5311_v56 = vadd.f32 %v8516_v3, %v225_v0  ;;  %v5314_v35 = vadd.f32 %v8518_v23, %v225_v0  ;;  %v9050_v54 = vmax.f32 %v9049_v42, 0.0  ;;  %v9063_v42 = vld [vmem:[#allocation30_spill] sm:$0xff] }
 0x1a2   :  { %9031 = vst [vmem:[#allocation14_spill] sm:$0xff] %v5290_v9  ;;  %9032 = vst [vmem:[#allocation15_spill] sm:$0xff] %v5293_v36  ;;  %v5317_v43 = vadd.f32 %v9040_v26, %v225_v0  ;;  %v5320_v24 = vadd.f32 %v9042_v61, %v225_v0  ;;  %v5323_v37 = vadd.f32 %v9044_v50, %v225_v0  ;;  %v9052_v32 = vmax.f32 %v9051_v46, 0.0  ;;  %v220_v46 = vpop.permute.xlu0 %219 }
 0x1a3   :  { %9033 = vst [vmem:[#allocation16_spill] sm:$0xff] %v5296_v27  ;;  %9034 = vst [vmem:[#allocation17_spill] sm:$0xff] %v5299_v4  ;;  %v5326_v38 = vadd.f32 %v9046_v7, %v225_v0  ;;  %v5329_v60 = vadd.f32 %v3889_v28, %v225_v0  ;;  %v2899_v31 = vadd.f32 %v2883_v51, %v9050_v54  ;;  %v9054_v47 = vmax.f32 %v9053_v55, 0.0 }
 0x1a4   :  { %9035 = vst [vmem:[#allocation18_spill] sm:$0xff] %v5302_v58  ;;  %9036 = vst [vmem:[#allocation19_spill] sm:$0xff] %v5305_v44  ;;  %v2900_v39 = vadd.f32 %v2884_v34, %v9052_v32  ;;  %v9056_v57 = vmax.f32 %v9055_v48, 0.0  ;;  %v9064_v51 = vmax.f32 %v9063_v42, 0.0  ;;  %v9065_v34 = vld [vmem:[#allocation31_spill] sm:$0xff] }
 0x1a5   :  { %9037 = vst [vmem:[#allocation20_spill] sm:$0xff] %v5308_v52  ;;  %9038 = vst [vmem:[#allocation21_spill] sm:$0xff] %v5311_v56  ;;  %v2901_v25 = vadd.f32 %v2885_v40, %v9054_v47  ;;  %v9066_v32 = vmax.f32 %v9065_v34, 0.0  ;;  %v9067_v40 = vld [vmem:[#allocation32_spill] sm:$0xff]  ;;  %v9079_v34 = vld [vmem:[#allocation38_spill] sm:$0xff] }
 0x1a6   :  { %9039 = vst [vmem:[#allocation22_spill] sm:$0xff] %v5314_v35  ;;  %9041 = vst [vmem:[#allocation3_spill] sm:$0xff] %v5317_v43  ;;  %v2902_v20 = vadd.f32 %v2886_v29, %v9056_v57  ;;  %v9057_v43 = vld [vmem:[#allocation27_spill] sm:$0xff]  ;;  %v2906_v54 = vadd.f32 %v2890_v45, %v9064_v51  ;;  %v9068_v47 = vmax.f32 %v9067_v40, 0.0  ;;  %v9069_v29 = vld [vmem:[#allocation33_spill] sm:$0xff]  ;;  %v884_v40 = vadd.f32 %v3861_v14, %v220_v46 }
 0x1a7   :  { %9043 = vst [vmem:[#allocation4_spill] sm:$0xff] %v5320_v24  ;;  %9045 = vst [vmem:[#allocation39_spill] sm:$0xff] %v5323_v37  ;;  %v9058_v63 = vmax.f32 %v9057_v43, 0.0  ;;  %v9060_v37 = vmax.f32 %v9059_v11, 0.0  ;;  %v2907_v55 = vadd.f32 %v2891_v6, %v9066_v32  ;;  %v9070_v57 = vmax.f32 %v9069_v29, 0.0  ;;  %v9077_v45 = vld [vmem:[#allocation37_spill] sm:$0xff] }
 0x1a8   :  { %9047 = vst [vmem:[#allocation40_spill] sm:$0xff] %v5326_v38  ;;  %9048 = vst [vmem:[#allocation41_spill] sm:$0xff] %v5329_v60  ;;  %v9061_v38 = vld [vmem:[#allocation29_spill] sm:$0xff]  ;;  %v2908_v48 = vadd.f32 %v2892_v8, %v9068_v47  ;;  %v9078_v51 = vmax.f32 %v9077_v45, 0.0  ;;  %v9080_v6 = vmax.f32 %v9079_v34, 0.0  ;;  %v883_v8 = vadd.f32 %v3859_v13, %v220_v46 }
 0x1a9   :  { %v2903_v24 = vadd.f32 %v2887_v49, %v9058_v63  ;;  %v2904_v10 = vadd.f32 %v2888_v30, %v9060_v37  ;;  %v9062_v0 = vmax.f32 %v9061_v38, 0.0  ;;  %v2909_v43 = vadd.f32 %v2893_v62, %v9070_v57  ;;  %v9071_v49 = vld [vmem:[#allocation34_spill] sm:$0xff]  ;;  %v9073_v30 = vld [vmem:[#allocation35_spill] sm:$0xff] }
 0x1aa   :  { %v9072_v63 = vmax.f32 %v9071_v49, 0.0  ;;  %v9074_v37 = vmax.f32 %v9073_v30, 0.0  ;;  %v2913_v35 = vadd.f32 %v2897_v41, %v9078_v51  ;;  %v2914_v32 = vadd.f32 %v2898_v53, %v9080_v6 }
 0x1ab   :  { %v2905_v60 = vadd.f32 %v2889_v21, %v9062_v0  ;;  %v9075_v21 = vld [vmem:[#allocation36_spill] sm:$0xff]  ;;  %v885_v62 = vadd.f32 %v3863_v15, %v220_v46  ;;  %v887_v47 = vadd.f32 %v3867_v17, %v220_v46  ;;  %v890_v29 = vadd.f32 %v8512_v1, %v220_v46 }
 0x1ac   :  { %v2910_v11 = vadd.f32 %v2894_v12, %v9072_v63  ;;  %v2911_v38 = vadd.f32 %v2895_v22, %v9074_v37  ;;  %v9076_v0 = vmax.f32 %v9075_v21, 0.0  ;;  %v886_v12 = vadd.f32 %v3865_v16, %v220_v46 }
 0x1ad   :  { %v888_v22 = vadd.f32 %v3869_v18, %v220_v46  ;;  %v891_v41 = vadd.f32 %v8514_v2, %v220_v46  ;;  %v892_v53 = vadd.f32 %v8516_v3, %v220_v46  ;;  %v893_v57 = vadd.f32 %v8518_v23, %v220_v46 }
 0x1ae   :  { %v2912_v42 = vadd.f32 %v2896_v33, %v9076_v0  ;;  %v889_v33 = vadd.f32 %v3871_v19, %v220_v46  ;;  %v894_v49 = vadd.f32 %v9040_v26, %v220_v46  ;;  %v895_v63 = vadd.f32 %v9042_v61, %v220_v46 }
 0x1af   :  { %v896_v30 = vadd.f32 %v9044_v50, %v220_v46  ;;  %v897_v37 = vadd.f32 %v9046_v7, %v220_v46  ;;  %v898_v21 = vadd.f32 %v3889_v28, %v220_v46  ;;  %v1907_v0 = vmax.f32 %v883_v8, 0.0 }
 0x1b0   :  { %v1908_v45 = vmax.f32 %v884_v40, 0.0  ;;  %v1909_v51 = vmax.f32 %v885_v62, 0.0  ;;  %v1910_v34 = vmax.f32 %v886_v12, 0.0  ;;  %v1911_v6 = vmax.f32 %v887_v47, 0.0  ;;  %v235_v47 = vpop.permute.xlu1 %234 }
 0x1b1   :  { %v1912_v56 = vmax.f32 %v888_v22, 0.0  ;;  %v1913_v52 = vmax.f32 %v889_v33, 0.0  ;;  %v1914_v44 = vmax.f32 %v890_v29, 0.0  ;;  %v1915_v58 = vmax.f32 %v891_v41, 0.0 }
 0x1b2   :  { %v1916_v4 = vmax.f32 %v892_v53, 0.0  ;;  %v1917_v27 = vmax.f32 %v893_v57, 0.0  ;;  %v1918_v36 = vmax.f32 %v894_v49, 0.0  ;;  %v1919_v9 = vmax.f32 %v895_v63, 0.0 }
 0x1b3   :  { %v1920_v59 = vmax.f32 %v896_v30, 0.0  ;;  %v1921_v5 = vmax.f32 %v897_v37, 0.0  ;;  %v1922_v50 = vmax.f32 %v898_v21, 0.0  ;;  %v2915_v61 = vadd.f32 %v2899_v31, %v1907_v0  ;;  %v9107_v0 = vld [vmem:[#allocation15_spill] sm:$0xff] }
 0x1b4   :  { %v2916_v7 = vadd.f32 %v2900_v39, %v1908_v45  ;;  %v2917_v26 = vadd.f32 %v2901_v25, %v1909_v51  ;;  %v2918_v46 = vadd.f32 %v2902_v20, %v1910_v34  ;;  %v2919_v8 = vadd.f32 %v2903_v24, %v1911_v6  ;;  %v9098_v39 = vld [vmem:[#allocation10_spill] sm:$0xff]  ;;  %v9111_v34 = vld [vmem:[#allocation17_spill] sm:$0xff] }
 0x1b5   :  { %v2920_v40 = vadd.f32 %v2904_v10, %v1912_v56  ;;  %v2921_v62 = vadd.f32 %v2905_v60, %v1913_v52  ;;  %v2922_v12 = vadd.f32 %v2906_v54, %v1914_v44  ;;  %v2923_v22 = vadd.f32 %v2907_v55, %v1915_v58  ;;  %v9092_v52 = vld [vmem:[#allocation7_spill] sm:$0xff]  ;;  %v9096_v60 = vld [vmem:[#allocation9_spill] sm:$0xff] }
 0x1b6   :  { %v2924_v33 = vadd.f32 %v2908_v48, %v1916_v4  ;;  %v2925_v29 = vadd.f32 %v2909_v43, %v1917_v27  ;;  %v2926_v41 = vadd.f32 %v2910_v11, %v1918_v36  ;;  %v2927_v53 = vadd.f32 %v2911_v38, %v1919_v9  ;;  %v9101_v38 = vld [vmem:[#allocation12_spill] sm:$0xff]  ;;  %v9105_v48 = vld [vmem:[#allocation14_spill] sm:$0xff] }
 0x1b7   :  { %v2928_v57 = vadd.f32 %v2912_v42, %v1920_v59  ;;  %v2929_v49 = vadd.f32 %v2913_v35, %v1921_v5  ;;  %v2930_v63 = vadd.f32 %v2914_v32, %v1922_v50  ;;  %v5396_v30 = vadd.f32 %v3859_v13, %v235_v47  ;;  %v9094_v35 = vld [vmem:[#allocation8_spill] sm:$0xff]  ;;  %v9103_v32 = vld [vmem:[#allocation13_spill] sm:$0xff] }
 0x1b8   :  { %v5399_v31 = vadd.f32 %v3861_v14, %v235_v47  ;;  %v5402_v24 = vadd.f32 %v3863_v15, %v235_v47  ;;  %v5405_v44 = vadd.f32 %v3865_v16, %v235_v47  ;;  %v5408_v4 = vadd.f32 %v3867_v17, %v235_v47 }
 0x1b9   :  { %9081 = vst [vmem:[#allocation23_spill] sm:$0xff] %v5396_v30  ;;  %v5411_v9 = vadd.f32 %v3869_v18, %v235_v47  ;;  %v5414_v5 = vadd.f32 %v3871_v19, %v235_v47  ;;  %v5417_v59 = vadd.f32 %v8512_v1, %v235_v47  ;;  %v5420_v36 = vadd.f32 %v8514_v2, %v235_v47 }
 0x1ba   :  { %9082 = vst [vmem:[#allocation24_spill] sm:$0xff] %v5399_v31  ;;  %9083 = vst [vmem:[#allocation25_spill] sm:$0xff] %v5402_v24  ;;  %v5423_v27 = vadd.f32 %v8516_v3, %v235_v47  ;;  %v5426_v58 = vadd.f32 %v8518_v23, %v235_v47  ;;  %v5429_v56 = vadd.f32 %v9092_v52, %v235_v47  ;;  %v9102_v42 = vmax.f32 %v9101_v38, 0.0  ;;  %v9115_v38 = vld [vmem:[#allocation19_spill] sm:$0xff] }
 0x1bb   :  { %9084 = vst [vmem:[#allocation26_spill] sm:$0xff] %v5405_v44  ;;  %9085 = vst [vmem:[#allocation27_spill] sm:$0xff] %v5408_v4  ;;  %v5432_v50 = vadd.f32 %v9094_v35, %v235_v47  ;;  %v5435_v25 = vadd.f32 %v9096_v60, %v235_v47  ;;  %v5438_v20 = vadd.f32 %v9098_v39, %v235_v47  ;;  %v9104_v43 = vmax.f32 %v9103_v32, 0.0  ;;  %v230_v32 = vpop.permute.xlu0 %229 }
 0x1bc   :  { %9086 = vst [vmem:[#allocation28_spill] sm:$0xff] %v5411_v9  ;;  %9087 = vst [vmem:[#allocation29_spill] sm:$0xff] %v5414_v5  ;;  %v5441_v10 = vadd.f32 %v3889_v28, %v235_v47  ;;  %v2931_v11 = vadd.f32 %v2915_v61, %v9102_v42  ;;  %v9106_v21 = vmax.f32 %v9105_v48, 0.0  ;;  %v9108_v54 = vmax.f32 %v9107_v0, 0.0 }
 0x1bd   :  { %9088 = vst [vmem:[#allocation30_spill] sm:$0xff] %v5417_v59  ;;  %9089 = vst [vmem:[#allocation31_spill] sm:$0xff] %v5420_v36  ;;  %v2932_v37 = vadd.f32 %v2916_v7, %v9104_v43  ;;  %v9116_v61 = vmax.f32 %v9115_v38, 0.0  ;;  %v9117_v7 = vld [vmem:[#allocation20_spill] sm:$0xff] }
 0x1be   :  { %9090 = vst [vmem:[#allocation32_spill] sm:$0xff] %v5423_v27  ;;  %9091 = vst [vmem:[#allocation33_spill] sm:$0xff] %v5426_v58  ;;  %v2933_v55 = vadd.f32 %v2917_v26, %v9106_v21  ;;  %v2934_v45 = vadd.f32 %v2918_v46, %v9108_v54  ;;  %v9118_v43 = vmax.f32 %v9117_v7, 0.0  ;;  %v9119_v26 = vld [vmem:[#allocation21_spill] sm:$0xff]  ;;  %v9121_v46 = vld [vmem:[#allocation22_spill] sm:$0xff] }
 0x1bf   :  { %9093 = vst [vmem:[#allocation34_spill] sm:$0xff] %v5429_v56  ;;  %9095 = vst [vmem:[#allocation35_spill] sm:$0xff] %v5432_v50  ;;  %v9109_v56 = vld [vmem:[#allocation16_spill] sm:$0xff]  ;;  %v2938_v42 = vadd.f32 %v2922_v12, %v9116_v61  ;;  %v9120_v21 = vmax.f32 %v9119_v26, 0.0  ;;  %v9122_v54 = vmax.f32 %v9121_v46, 0.0  ;;  %v9131_v7 = vld [vmem:[#allocation41_spill] sm:$0xff]  ;;  %v916_v26 = vadd.f32 %v3861_v14, %v230_v32 }
 0x1c0   :  { %9097 = vst [vmem:[#allocation36_spill] sm:$0xff] %v5435_v25  ;;  %9099 = vst [vmem:[#allocation37_spill] sm:$0xff] %v5438_v20  ;;  %v9110_v51 = vmax.f32 %v9109_v56, 0.0  ;;  %v9112_v25 = vmax.f32 %v9111_v34, 0.0  ;;  %v9113_v20 = vld [vmem:[#allocation18_spill] sm:$0xff]  ;;  %v2939_v48 = vadd.f32 %v2923_v22, %v9118_v43  ;;  %v9129_v12 = vld [vmem:[#allocation40_spill] sm:$0xff]  ;;  %v922_v46 = vadd.f32 %v8512_v1, %v230_v32 }
 0x1c1   :  { %9100 = vst [vmem:[#allocation38_spill] sm:$0xff] %v5441_v10  ;;  %v9114_v47 = vmax.f32 %v9113_v20, 0.0  ;;  %v2940_v0 = vadd.f32 %v2924_v33, %v9120_v21  ;;  %v2941_v56 = vadd.f32 %v2925_v29, %v9122_v54  ;;  %v9130_v61 = vmax.f32 %v9129_v12, 0.0 }
 0x1c2   :  { %v2935_v50 = vadd.f32 %v2919_v8, %v9110_v51  ;;  %v2936_v6 = vadd.f32 %v2920_v40, %v9112_v25  ;;  %v9123_v8 = vld [vmem:[#allocation3_spill] sm:$0xff]  ;;  %v9125_v40 = vld [vmem:[#allocation4_spill] sm:$0xff]  ;;  %v9132_v22 = vmax.f32 %v9131_v7, 0.0  ;;  %v915_v33 = vadd.f32 %v3859_v13, %v230_v32 }
 0x1c3   :  { %v2937_v10 = vadd.f32 %v2921_v62, %v9114_v47  ;;  %v9124_v51 = vmax.f32 %v9123_v8, 0.0  ;;  %v9126_v25 = vmax.f32 %v9125_v40, 0.0  ;;  %v9127_v62 = vld [vmem:[#allocation39_spill] sm:$0xff]  ;;  %v2945_v58 = vadd.f32 %v2929_v49, %v9130_v61 }
 0x1c4   :  { %v9128_v47 = vmax.f32 %v9127_v62, 0.0  ;;  %v2946_v43 = vadd.f32 %v2930_v63, %v9132_v22  ;;  %v917_v29 = vadd.f32 %v3863_v15, %v230_v32  ;;  %v919_v21 = vadd.f32 %v3867_v17, %v230_v32 }
 0x1c5   :  { %v2942_v34 = vadd.f32 %v2926_v41, %v9124_v51  ;;  %v2943_v20 = vadd.f32 %v2927_v53, %v9126_v25  ;;  %v918_v41 = vadd.f32 %v3865_v16, %v230_v32  ;;  %v920_v53 = vadd.f32 %v3869_v18, %v230_v32 }
 0x1c6   :  { %v2944_v38 = vadd.f32 %v2928_v57, %v9128_v47  ;;  %v921_v57 = vadd.f32 %v3871_v19, %v230_v32  ;;  %v923_v49 = vadd.f32 %v8514_v2, %v230_v32  ;;  %v924_v63 = vadd.f32 %v8516_v3, %v230_v32 }
 0x1c7   :  { %v925_v54 = vadd.f32 %v8518_v23, %v230_v32  ;;  %v926_v8 = vadd.f32 %v9092_v52, %v230_v32  ;;  %v927_v51 = vadd.f32 %v9094_v35, %v230_v32  ;;  %v928_v40 = vadd.f32 %v9096_v60, %v230_v32 }
 0x1c8   :  { %v929_v25 = vadd.f32 %v9098_v39, %v230_v32  ;;  %v930_v62 = vadd.f32 %v3889_v28, %v230_v32  ;;  %v1939_v47 = vmax.f32 %v915_v33, 0.0  ;;  %v1940_v12 = vmax.f32 %v916_v26, 0.0 }
 0x1c9   :  { %v1941_v61 = vmax.f32 %v917_v29, 0.0  ;;  %v1942_v7 = vmax.f32 %v918_v41, 0.0  ;;  %v1943_v22 = vmax.f32 %v919_v21, 0.0  ;;  %v1944_v27 = vmax.f32 %v920_v53, 0.0  ;;  %v245_v21 = vpop.permute.xlu1 %244 }
 0x1ca   :  { %v1945_v36 = vmax.f32 %v921_v57, 0.0  ;;  %v1946_v59 = vmax.f32 %v922_v46, 0.0  ;;  %v1947_v5 = vmax.f32 %v923_v49, 0.0  ;;  %v1948_v9 = vmax.f32 %v924_v63, 0.0 }
 0x1cb   :  { %v1949_v4 = vmax.f32 %v925_v54, 0.0  ;;  %v1950_v44 = vmax.f32 %v926_v8, 0.0  ;;  %v1951_v24 = vmax.f32 %v927_v51, 0.0  ;;  %v1952_v31 = vmax.f32 %v928_v40, 0.0 }
 0x1cc   :  { %v1953_v30 = vmax.f32 %v929_v25, 0.0  ;;  %v1954_v60 = vmax.f32 %v930_v62, 0.0  ;;  %v2947_v35 = vadd.f32 %v2931_v11, %v1939_v47  ;;  %v2948_v39 = vadd.f32 %v2932_v37, %v1940_v12  ;;  %v9150_v37 = vld [vmem:[#allocation10_spill] sm:$0xff] }
 0x1cd   :  { %v2949_v52 = vadd.f32 %v2933_v55, %v1941_v61  ;;  %v2950_v32 = vadd.f32 %v2934_v45, %v1942_v7  ;;  %v2951_v33 = vadd.f32 %v2935_v50, %v1943_v22  ;;  %v2952_v26 = vadd.f32 %v2936_v6, %v1944_v27  ;;  %v9159_v47 = vld [vmem:[#allocation26_spill] sm:$0xff]  ;;  %v9163_v7 = vld [vmem:[#allocation28_spill] sm:$0xff] }
 0x1ce   :  { %v2953_v29 = vadd.f32 %v2937_v10, %v1945_v36  ;;  %v2954_v41 = vadd.f32 %v2938_v42, %v1946_v59  ;;  %v2955_v53 = vadd.f32 %v2939_v48, %v1947_v5  ;;  %v2956_v57 = vadd.f32 %v2940_v0, %v1948_v9  ;;  %v9144_v36 = vld [vmem:[#allocation7_spill] sm:$0xff]  ;;  %v9148_v10 = vld [vmem:[#allocation9_spill] sm:$0xff] }
 0x1cf   :  { %v2957_v46 = vadd.f32 %v2941_v56, %v1949_v4  ;;  %v2958_v49 = vadd.f32 %v2942_v34, %v1950_v44  ;;  %v2959_v63 = vadd.f32 %v2943_v20, %v1951_v24  ;;  %v2960_v54 = vadd.f32 %v2944_v38, %v1952_v31  ;;  %v9153_v20 = vld [vmem:[#allocation23_spill] sm:$0xff]  ;;  %v9157_v0 = vld [vmem:[#allocation25_spill] sm:$0xff] }
 0x1d0   :  { %v2961_v8 = vadd.f32 %v2945_v58, %v1953_v30  ;;  %v2962_v51 = vadd.f32 %v2946_v43, %v1954_v60  ;;  %v5508_v40 = vadd.f32 %v3859_v13, %v245_v21  ;;  %v5511_v11 = vadd.f32 %v3861_v14, %v245_v21  ;;  %v9146_v58 = vld [vmem:[#allocation8_spill] sm:$0xff] }
 0x1d1   :  { %v5514_v50 = vadd.f32 %v3863_v15, %v245_v21  ;;  %v5517_v59 = vadd.f32 %v3865_v16, %v245_v21  ;;  %v5520_v9 = vadd.f32 %v3867_v17, %v245_v21  ;;  %v5523_v24 = vadd.f32 %v3869_v18, %v245_v21  ;;  %v9155_v43 = vld [vmem:[#allocation24_spill] sm:$0xff] }
 0x1d2   :  { %9133 = vst [vmem:[#allocation12_spill] sm:$0xff] %v5508_v40  ;;  %9134 = vst [vmem:[#allocation13_spill] sm:$0xff] %v5511_v11  ;;  %v5526_v30 = vadd.f32 %v3871_v19, %v245_v21  ;;  %v5529_v31 = vadd.f32 %v8512_v1, %v245_v21  ;;  %v5532_v44 = vadd.f32 %v8514_v2, %v245_v21  ;;  %v9154_v38 = vmax.f32 %v9153_v20, 0.0  ;;  %v9167_v20 = vld [vmem:[#allocation30_spill] sm:$0xff] }
 0x1d3   :  { %9135 = vst [vmem:[#allocation14_spill] sm:$0xff] %v5514_v50  ;;  %9136 = vst [vmem:[#allocation15_spill] sm:$0xff] %v5517_v59  ;;  %v5535_v4 = vadd.f32 %v8516_v3, %v245_v21  ;;  %v5538_v5 = vadd.f32 %v8518_v23, %v245_v21  ;;  %v5541_v27 = vadd.f32 %v9144_v36, %v245_v21  ;;  %v9156_v56 = vmax.f32 %v9155_v43, 0.0  ;;  %v240_v43 = vpop.permute.xlu0 %239 }
 0x1d4   :  { %9137 = vst [vmem:[#allocation16_spill] sm:$0xff] %v5520_v9  ;;  %9138 = vst [vmem:[#allocation17_spill] sm:$0xff] %v5523_v24  ;;  %v5544_v60 = vadd.f32 %v9146_v58, %v245_v21  ;;  %v5547_v55 = vadd.f32 %v9148_v10, %v245_v21  ;;  %v5550_v45 = vadd.f32 %v9150_v37, %v245_v21  ;;  %v9158_v62 = vmax.f32 %v9157_v0, 0.0 }
 0x1d5   :  { %9139 = vst [vmem:[#allocation18_spill] sm:$0xff] %v5526_v30  ;;  %9140 = vst [vmem:[#allocation19_spill] sm:$0xff] %v5529_v31  ;;  %v5553_v6 = vadd.f32 %v3889_v28, %v245_v21  ;;  %v2963_v34 = vadd.f32 %v2947_v35, %v9154_v38  ;;  %v2964_v25 = vadd.f32 %v2948_v39, %v9156_v56  ;;  %v9160_v42 = vmax.f32 %v9159_v47, 0.0  ;;  %v9169_v39 = vld [vmem:[#allocation31_spill] sm:$0xff] }
 0x1d6   :  { %9141 = vst [vmem:[#allocation20_spill] sm:$0xff] %v5532_v44  ;;  %9142 = vst [vmem:[#allocation21_spill] sm:$0xff] %v5535_v4  ;;  %v2965_v48 = vadd.f32 %v2949_v52, %v9158_v62  ;;  %v9168_v35 = vmax.f32 %v9167_v20, 0.0  ;;  %v9170_v56 = vmax.f32 %v9169_v39, 0.0  ;;  %v9171_v52 = vld [vmem:[#allocation32_spill] sm:$0xff]  ;;  %v9183_v39 = vld [vmem:[#allocation38_spill] sm:$0xff] }
 0x1d7   :  { %9143 = vst [vmem:[#allocation22_spill] sm:$0xff] %v5538_v5  ;;  %9145 = vst [vmem:[#allocation3_spill] sm:$0xff] %v5541_v27  ;;  %v2966_v12 = vadd.f32 %v2950_v32, %v9160_v42  ;;  %v9161_v27 = vld [vmem:[#allocation27_spill] sm:$0xff]  ;;  %v9172_v62 = vmax.f32 %v9171_v52, 0.0  ;;  %v9173_v32 = vld [vmem:[#allocation33_spill] sm:$0xff]  ;;  %v948_v52 = vadd.f32 %v3861_v14, %v240_v43 }
 0x1d8   :  { %9147 = vst [vmem:[#allocation4_spill] sm:$0xff] %v5544_v60  ;;  %9149 = vst [vmem:[#allocation39_spill] sm:$0xff] %v5547_v55  ;;  %v9162_v61 = vmax.f32 %v9161_v27, 0.0  ;;  %v9164_v55 = vmax.f32 %v9163_v7, 0.0  ;;  %v2970_v38 = vadd.f32 %v2954_v41, %v9168_v35  ;;  %v2971_v0 = vadd.f32 %v2955_v53, %v9170_v56  ;;  %v9181_v41 = vld [vmem:[#allocation37_spill] sm:$0xff] }
 0x1d9   :  { %9151 = vst [vmem:[#allocation40_spill] sm:$0xff] %v5550_v45  ;;  %9152 = vst [vmem:[#allocation41_spill] sm:$0xff] %v5553_v6  ;;  %v9165_v45 = vld [vmem:[#allocation29_spill] sm:$0xff]  ;;  %v2972_v47 = vadd.f32 %v2956_v57, %v9172_v62  ;;  %v9174_v42 = vmax.f32 %v9173_v32, 0.0  ;;  %v9182_v35 = vmax.f32 %v9181_v41, 0.0  ;;  %v9184_v53 = vmax.f32 %v9183_v39, 0.0 }
 0x1da   :  { %v2967_v60 = vadd.f32 %v2951_v33, %v9162_v61  ;;  %v2968_v22 = vadd.f32 %v2952_v26, %v9164_v55  ;;  %v9166_v21 = vmax.f32 %v9165_v45, 0.0  ;;  %v9175_v33 = vld [vmem:[#allocation34_spill] sm:$0xff]  ;;  %v9177_v26 = vld [vmem:[#allocation35_spill] sm:$0xff]  ;;  %v947_v57 = vadd.f32 %v3859_v13, %v240_v43 }
 0x1db   :  { %v2973_v27 = vadd.f32 %v2957_v46, %v9174_v42  ;;  %v9176_v61 = vmax.f32 %v9175_v33, 0.0  ;;  %v9178_v55 = vmax.f32 %v9177_v26, 0.0  ;;  %v2977_v5 = vadd.f32 %v2961_v8, %v9182_v35 }
 0x1dc   :  { %v2969_v6 = vadd.f32 %v2953_v29, %v9166_v21  ;;  %v9179_v29 = vld [vmem:[#allocation36_spill] sm:$0xff]  ;;  %v2978_v56 = vadd.f32 %v2962_v51, %v9184_v53  ;;  %v949_v46 = vadd.f32 %v3863_v15, %v240_v43  ;;  %v951_v62 = vadd.f32 %v3867_v17, %v240_v43 }
 0x1dd   :  { %v2974_v7 = vadd.f32 %v2958_v49, %v9176_v61  ;;  %v2975_v45 = vadd.f32 %v2959_v63, %v9178_v55  ;;  %v9180_v21 = vmax.f32 %v9179_v29, 0.0  ;;  %v950_v49 = vadd.f32 %v3865_v16, %v240_v43 }
 0x1de   :  { %v952_v63 = vadd.f32 %v3869_v18, %v240_v43  ;;  %v954_v32 = vadd.f32 %v8512_v1, %v240_v43  ;;  %v955_v8 = vadd.f32 %v8514_v2, %v240_v43  ;;  %v956_v51 = vadd.f32 %v8516_v3, %v240_v43 }
 0x1df   :  { %v2976_v20 = vadd.f32 %v2960_v54, %v9180_v21  ;;  %v953_v54 = vadd.f32 %v3871_v19, %v240_v43  ;;  %v957_v42 = vadd.f32 %v8518_v23, %v240_v43  ;;  %v958_v33 = vadd.f32 %v9144_v36, %v240_v43 }
 0x1e0   :  { %v959_v61 = vadd.f32 %v9146_v58, %v240_v43  ;;  %v960_v26 = vadd.f32 %v9148_v10, %v240_v43  ;;  %v961_v55 = vadd.f32 %v9150_v37, %v240_v43  ;;  %v962_v29 = vadd.f32 %v3889_v28, %v240_v43 }
 0x1e1   :  { %v1971_v21 = vmax.f32 %v947_v57, 0.0  ;;  %v1972_v41 = vmax.f32 %v948_v52, 0.0  ;;  %v1973_v35 = vmax.f32 %v949_v46, 0.0  ;;  %v1974_v39 = vmax.f32 %v950_v49, 0.0 }
 0x1e2   :  { %v1975_v53 = vmax.f32 %v951_v62, 0.0  ;;  %v1976_v4 = vmax.f32 %v952_v63, 0.0  ;;  %v1977_v44 = vmax.f32 %v953_v54, 0.0  ;;  %v1978_v31 = vmax.f32 %v954_v32, 0.0  ;;  %v255_v62 = vpop.permute.xlu1 %254 }
 0x1e3   :  { %v1979_v30 = vmax.f32 %v955_v8, 0.0  ;;  %v1980_v24 = vmax.f32 %v956_v51, 0.0  ;;  %v1981_v9 = vmax.f32 %v957_v42, 0.0  ;;  %v1982_v59 = vmax.f32 %v958_v33, 0.0 }
 0x1e4   :  { %v1983_v50 = vmax.f32 %v959_v61, 0.0  ;;  %v1984_v11 = vmax.f32 %v960_v26, 0.0  ;;  %v1985_v40 = vmax.f32 %v961_v55, 0.0  ;;  %v1986_v10 = vmax.f32 %v962_v29, 0.0 }
 0x1e5   :  { %v2979_v58 = vadd.f32 %v2963_v34, %v1971_v21  ;;  %v2980_v37 = vadd.f32 %v2964_v25, %v1972_v41  ;;  %v2981_v36 = vadd.f32 %v2965_v48, %v1973_v35  ;;  %v2982_v43 = vadd.f32 %v2966_v12, %v1974_v39  ;;  %v9202_v25 = vld [vmem:[#allocation10_spill] sm:$0xff]  ;;  %v9211_v21 = vld [vmem:[#allocation15_spill] sm:$0xff]  ;;  %v9215_v39 = vld [vmem:[#allocation17_spill] sm:$0xff] }
 0x1e6   :  { %v2983_v57 = vadd.f32 %v2967_v60, %v1975_v53  ;;  %v2984_v52 = vadd.f32 %v2968_v22, %v1976_v4  ;;  %v2985_v46 = vadd.f32 %v2969_v6, %v1977_v44  ;;  %v2986_v49 = vadd.f32 %v2970_v38, %v1978_v31  ;;  %v9196_v44 = vld [vmem:[#allocation7_spill] sm:$0xff]  ;;  %v9200_v6 = vld [vmem:[#allocation9_spill] sm:$0xff] }
 0x1e7   :  { %v2987_v63 = vadd.f32 %v2971_v0, %v1979_v30  ;;  %v2988_v54 = vadd.f32 %v2972_v47, %v1980_v24  ;;  %v2989_v32 = vadd.f32 %v2973_v27, %v1981_v9  ;;  %v2990_v8 = vadd.f32 %v2974_v7, %v1982_v59  ;;  %v9209_v47 = vld [vmem:[#allocation14_spill] sm:$0xff] }
 0x1e8   :  { %v2991_v51 = vadd.f32 %v2975_v45, %v1983_v50  ;;  %v2992_v42 = vadd.f32 %v2976_v20, %v1984_v11  ;;  %v2993_v33 = vadd.f32 %v2977_v5, %v1985_v40  ;;  %v2994_v61 = vadd.f32 %v2978_v56, %v1986_v10  ;;  %v9198_v5 = vld [vmem:[#allocation8_spill] sm:$0xff]  ;;  %v9207_v56 = vld [vmem:[#allocation13_spill] sm:$0xff] }
 0x1e9   :  { %v5620_v26 = vadd.f32 %v3859_v13, %v255_v62  ;;  %v5623_v34 = vadd.f32 %v3861_v14, %v255_v62  ;;  %v5626_v60 = vadd.f32 %v3863_v15, %v255_v62  ;;  %v5629_v31 = vadd.f32 %v3865_v16, %v255_v62  ;;  %v9205_v45 = vld [vmem:[#allocation12_spill] sm:$0xff] }
 0x1ea   :  { %v5632_v24 = vadd.f32 %v3867_v17, %v255_v62  ;;  %v5635_v50 = vadd.f32 %v3869_v18, %v255_v62  ;;  %v5638_v40 = vadd.f32 %v3871_v19, %v255_v62  ;;  %v5641_v11 = vadd.f32 %v8512_v1, %v255_v62 }
 0x1eb   :  { %9185 = vst [vmem:[#allocation23_spill] sm:$0xff] %v5620_v26  ;;  %9186 = vst [vmem:[#allocation24_spill] sm:$0xff] %v5623_v34  ;;  %v5644_v59 = vadd.f32 %v8514_v2, %v255_v62  ;;  %v5647_v9 = vadd.f32 %v8516_v3, %v255_v62  ;;  %v5650_v30 = vadd.f32 %v8518_v23, %v255_v62  ;;  %v9206_v20 = vmax.f32 %v9205_v45, 0.0  ;;  %v9219_v45 = vld [vmem:[#allocation19_spill] sm:$0xff] }
 0x1ec   :  { %9187 = vst [vmem:[#allocation25_spill] sm:$0xff] %v5626_v60  ;;  %9188 = vst [vmem:[#allocation26_spill] sm:$0xff] %v5629_v31  ;;  %v5653_v4 = vadd.f32 %v9196_v44, %v255_v62  ;;  %v5656_v10 = vadd.f32 %v9198_v5, %v255_v62  ;;  %v5659_v48 = vadd.f32 %v9200_v6, %v255_v62  ;;  %v9208_v27 = vmax.f32 %v9207_v56, 0.0  ;;  %v250_v56 = vpop.permute.xlu0 %249 }
 0x1ed   :  { %9189 = vst [vmem:[#allocation27_spill] sm:$0xff] %v5632_v24  ;;  %9190 = vst [vmem:[#allocation28_spill] sm:$0xff] %v5635_v50  ;;  %v5662_v12 = vadd.f32 %v9202_v25, %v255_v62  ;;  %v5665_v22 = vadd.f32 %v3889_v28, %v255_v62  ;;  %v2995_v7 = vadd.f32 %v2979_v58, %v9206_v20  ;;  %v9210_v29 = vmax.f32 %v9209_v47, 0.0 }
 0x1ee   :  { %9191 = vst [vmem:[#allocation29_spill] sm:$0xff] %v5638_v40  ;;  %9192 = vst [vmem:[#allocation30_spill] sm:$0xff] %v5641_v11  ;;  %v2996_v55 = vadd.f32 %v2980_v37, %v9208_v27  ;;  %v9212_v38 = vmax.f32 %v9211_v21, 0.0  ;;  %v9220_v58 = vmax.f32 %v9219_v45, 0.0  ;;  %v9221_v37 = vld [vmem:[#allocation20_spill] sm:$0xff] }
 0x1ef   :  { %9193 = vst [vmem:[#allocation31_spill] sm:$0xff] %v5644_v59  ;;  %9194 = vst [vmem:[#allocation32_spill] sm:$0xff] %v5647_v9  ;;  %v2997_v0 = vadd.f32 %v2981_v36, %v9210_v29  ;;  %v9222_v27 = vmax.f32 %v9221_v37, 0.0  ;;  %v9223_v36 = vld [vmem:[#allocation21_spill] sm:$0xff] }
 0x1f0   :  { %9195 = vst [vmem:[#allocation33_spill] sm:$0xff] %v5650_v30  ;;  %9197 = vst [vmem:[#allocation34_spill] sm:$0xff] %v5653_v4  ;;  %v2998_v41 = vadd.f32 %v2982_v43, %v9212_v38  ;;  %v9213_v4 = vld [vmem:[#allocation16_spill] sm:$0xff]  ;;  %v3002_v20 = vadd.f32 %v2986_v49, %v9220_v58  ;;  %v9224_v29 = vmax.f32 %v9223_v36, 0.0  ;;  %v9225_v43 = vld [vmem:[#allocation22_spill] sm:$0xff]  ;;  %v980_v36 = vadd.f32 %v3861_v14, %v250_v56 }
 0x1f1   :  { %9199 = vst [vmem:[#allocation35_spill] sm:$0xff] %v5656_v10  ;;  %9201 = vst [vmem:[#allocation36_spill] sm:$0xff] %v5659_v48  ;;  %v9214_v35 = vmax.f32 %v9213_v4, 0.0  ;;  %v9216_v48 = vmax.f32 %v9215_v39, 0.0  ;;  %v3003_v47 = vadd.f32 %v2987_v63, %v9222_v27  ;;  %v9226_v38 = vmax.f32 %v9225_v43, 0.0  ;;  %v9233_v49 = vld [vmem:[#allocation40_spill] sm:$0xff] }
 0x1f2   :  { %9203 = vst [vmem:[#allocation37_spill] sm:$0xff] %v5662_v12  ;;  %9204 = vst [vmem:[#allocation38_spill] sm:$0xff] %v5665_v22  ;;  %v9217_v12 = vld [vmem:[#allocation18_spill] sm:$0xff]  ;;  %v3004_v21 = vadd.f32 %v2988_v54, %v9224_v29  ;;  %v9234_v58 = vmax.f32 %v9233_v49, 0.0  ;;  %v9235_v37 = vld [vmem:[#allocation41_spill] sm:$0xff]  ;;  %v979_v54 = vadd.f32 %v3859_v13, %v250_v56  ;;  %v983_v29 = vadd.f32 %v3867_v17, %v250_v56 }
 0x1f3   :  { %v2999_v10 = vadd.f32 %v2983_v57, %v9214_v35  ;;  %v3000_v53 = vadd.f32 %v2984_v52, %v9216_v48  ;;  %v9218_v62 = vmax.f32 %v9217_v12, 0.0  ;;  %v3005_v4 = vadd.f32 %v2989_v32, %v9226_v38  ;;  %v9227_v57 = vld [vmem:[#allocation3_spill] sm:$0xff]  ;;  %v9229_v52 = vld [vmem:[#allocation4_spill] sm:$0xff] }
 0x1f4   :  { %v9228_v35 = vmax.f32 %v9227_v57, 0.0  ;;  %v9230_v48 = vmax.f32 %v9229_v52, 0.0  ;;  %v3009_v30 = vadd.f32 %v2993_v33, %v9234_v58  ;;  %v9236_v63 = vmax.f32 %v9235_v37, 0.0 }
 0x1f5   :  { %v3001_v22 = vadd.f32 %v2985_v46, %v9218_v62  ;;  %v9231_v46 = vld [vmem:[#allocation39_spill] sm:$0xff]  ;;  %v981_v32 = vadd.f32 %v3863_v15, %v250_v56  ;;  %v986_v43 = vadd.f32 %v8512_v1, %v250_v56  ;;  %v987_v33 = vadd.f32 %v8514_v2, %v250_v56 }
 0x1f6   :  { %v3006_v39 = vadd.f32 %v2990_v8, %v9228_v35  ;;  %v3007_v12 = vadd.f32 %v2991_v51, %v9230_v48  ;;  %v9232_v62 = vmax.f32 %v9231_v46, 0.0  ;;  %v3010_v27 = vadd.f32 %v2994_v61, %v9236_v63 }
 0x1f7   :  { %v982_v8 = vadd.f32 %v3865_v16, %v250_v56  ;;  %v984_v51 = vadd.f32 %v3869_v18, %v250_v56  ;;  %v988_v61 = vadd.f32 %v8516_v3, %v250_v56  ;;  %v989_v38 = vadd.f32 %v8518_v23, %v250_v56 }
 0x1f8   :  { %v3008_v45 = vadd.f32 %v2992_v42, %v9232_v62  ;;  %v985_v42 = vadd.f32 %v3871_v19, %v250_v56  ;;  %v990_v57 = vadd.f32 %v9196_v44, %v250_v56  ;;  %v991_v35 = vadd.f32 %v9198_v5, %v250_v56 }
 0x1f9   :  { %v992_v52 = vadd.f32 %v9200_v6, %v250_v56  ;;  %v993_v48 = vadd.f32 %v9202_v25, %v250_v56  ;;  %v994_v46 = vadd.f32 %v3889_v28, %v250_v56  ;;  %v2003_v62 = vmax.f32 %v979_v54, 0.0 }
 0x1fa   :  { %v2004_v49 = vmax.f32 %v980_v36, 0.0  ;;  %v2005_v58 = vmax.f32 %v981_v32, 0.0  ;;  %v2006_v37 = vmax.f32 %v982_v8, 0.0  ;;  %v2007_v63 = vmax.f32 %v983_v29, 0.0  ;;  %v265_v29 = vpop.permute.xlu1 %264 }
 0x1fb   :  { %v2008_v9 = vmax.f32 %v984_v51, 0.0  ;;  %v2009_v59 = vmax.f32 %v985_v42, 0.0  ;;  %v2010_v11 = vmax.f32 %v986_v43, 0.0  ;;  %v2011_v40 = vmax.f32 %v987_v33, 0.0 }
 0x1fc   :  { %v2012_v50 = vmax.f32 %v988_v61, 0.0  ;;  %v2013_v24 = vmax.f32 %v989_v38, 0.0  ;;  %v2014_v31 = vmax.f32 %v990_v57, 0.0  ;;  %v2015_v60 = vmax.f32 %v991_v35, 0.0 }
 0x1fd   :  { %v2016_v34 = vmax.f32 %v992_v52, 0.0  ;;  %v2017_v26 = vmax.f32 %v993_v48, 0.0  ;;  %v2018_v6 = vmax.f32 %v994_v46, 0.0  ;;  %v3011_v5 = vadd.f32 %v2995_v7, %v2003_v62  ;;  %v9263_v62 = vld [vmem:[#allocation26_spill] sm:$0xff] }
 0x1fe   :  { %v3012_v25 = vadd.f32 %v2996_v55, %v2004_v49  ;;  %v3013_v44 = vadd.f32 %v2997_v0, %v2005_v58  ;;  %v3014_v56 = vadd.f32 %v2998_v41, %v2006_v37  ;;  %v3015_v54 = vadd.f32 %v2999_v10, %v2007_v63  ;;  %v9254_v55 = vld [vmem:[#allocation10_spill] sm:$0xff]  ;;  %v9267_v37 = vld [vmem:[#allocation28_spill] sm:$0xff] }
 0x1ff   :  { %v3016_v36 = vadd.f32 %v3000_v53, %v2008_v9  ;;  %v3017_v32 = vadd.f32 %v3001_v22, %v2009_v59  ;;  %v3018_v8 = vadd.f32 %v3002_v20, %v2010_v11  ;;  %v3019_v51 = vadd.f32 %v3003_v47, %v2011_v40  ;;  %v9248_v59 = vld [vmem:[#allocation7_spill] sm:$0xff]  ;;  %v9252_v22 = vld [vmem:[#allocation9_spill] sm:$0xff] }
 0x200   :  { %v3020_v42 = vadd.f32 %v3004_v21, %v2012_v50  ;;  %v3021_v43 = vadd.f32 %v3005_v4, %v2013_v24  ;;  %v3022_v33 = vadd.f32 %v3006_v39, %v2014_v31  ;;  %v3023_v61 = vadd.f32 %v3007_v12, %v2015_v60  ;;  %v9257_v12 = vld [vmem:[#allocation23_spill] sm:$0xff]  ;;  %v9261_v21 = vld [vmem:[#allocation25_spill] sm:$0xff] }
 0x201   :  { %v3024_v38 = vadd.f32 %v3008_v45, %v2016_v34  ;;  %v3025_v57 = vadd.f32 %v3009_v30, %v2017_v26  ;;  %v3026_v35 = vadd.f32 %v3010_v27, %v2018_v6  ;;  %v5732_v52 = vadd.f32 %v3859_v13, %v265_v29  ;;  %v9250_v30 = vld [vmem:[#allocation8_spill] sm:$0xff] }
 0x202   :  { %v5735_v7 = vadd.f32 %v3861_v14, %v265_v29  ;;  %v5738_v10 = vadd.f32 %v3863_v15, %v265_v29  ;;  %v5741_v11 = vadd.f32 %v3865_v16, %v265_v29  ;;  %v5744_v50 = vadd.f32 %v3867_v17, %v265_v29  ;;  %v9259_v27 = vld [vmem:[#allocation24_spill] sm:$0xff] }
 0x203   :  { %9237 = vst [vmem:[#allocation12_spill] sm:$0xff] %v5732_v52  ;;  %v5747_v60 = vadd.f32 %v3869_v18, %v265_v29  ;;  %v5750_v26 = vadd.f32 %v3871_v19, %v265_v29  ;;  %v5753_v34 = vadd.f32 %v8512_v1, %v265_v29  ;;  %v5756_v31 = vadd.f32 %v8514_v2, %v265_v29 }
 0x204   :  { %9238 = vst [vmem:[#allocation13_spill] sm:$0xff] %v5735_v7  ;;  %9239 = vst [vmem:[#allocation14_spill] sm:$0xff] %v5738_v10  ;;  %v5759_v24 = vadd.f32 %v8516_v3, %v265_v29  ;;  %v5762_v40 = vadd.f32 %v8518_v23, %v265_v29  ;;  %v5765_v9 = vadd.f32 %v9248_v59, %v265_v29  ;;  %v9258_v45 = vmax.f32 %v9257_v12, 0.0  ;;  %v9271_v12 = vld [vmem:[#allocation30_spill] sm:$0xff] }
 0x205   :  { %9240 = vst [vmem:[#allocation15_spill] sm:$0xff] %v5741_v11  ;;  %9241 = vst [vmem:[#allocation16_spill] sm:$0xff] %v5744_v50  ;;  %v5768_v6 = vadd.f32 %v9250_v30, %v265_v29  ;;  %v5771_v0 = vadd.f32 %v9252_v22, %v265_v29  ;;  %v5774_v41 = vadd.f32 %v9254_v55, %v265_v29  ;;  %v9260_v4 = vmax.f32 %v9259_v27, 0.0  ;;  %v260_v27 = vpop.permute.xlu0 %259 }
 0x206   :  { %9242 = vst [vmem:[#allocation17_spill] sm:$0xff] %v5747_v60  ;;  %9243 = vst [vmem:[#allocation18_spill] sm:$0xff] %v5750_v26  ;;  %v5777_v53 = vadd.f32 %v3889_v28, %v265_v29  ;;  %v3027_v39 = vadd.f32 %v3011_v5, %v9258_v45  ;;  %v9262_v46 = vmax.f32 %v9261_v21, 0.0  ;;  %v9264_v20 = vmax.f32 %v9263_v62, 0.0 }
 0x207   :  { %9244 = vst [vmem:[#allocation19_spill] sm:$0xff] %v5753_v34  ;;  %9245 = vst [vmem:[#allocation20_spill] sm:$0xff] %v5756_v31  ;;  %v3028_v48 = vadd.f32 %v3012_v25, %v9260_v4  ;;  %v9272_v5 = vmax.f32 %v9271_v12, 0.0  ;;  %v9273_v25 = vld [vmem:[#allocation31_spill] sm:$0xff] }
 0x208   :  { %9246 = vst [vmem:[#allocation21_spill] sm:$0xff] %v5759_v24  ;;  %9247 = vst [vmem:[#allocation22_spill] sm:$0xff] %v5762_v40  ;;  %v3029_v47 = vadd.f32 %v3013_v44, %v9262_v46  ;;  %v3030_v49 = vadd.f32 %v3014_v56, %v9264_v20  ;;  %v9274_v4 = vmax.f32 %v9273_v25, 0.0  ;;  %v9275_v44 = vld [vmem:[#allocation32_spill] sm:$0xff]  ;;  %v9277_v56 = vld [vmem:[#allocation33_spill] sm:$0xff] }
 0x209   :  { %9249 = vst [vmem:[#allocation3_spill] sm:$0xff] %v5765_v9  ;;  %9251 = vst [vmem:[#allocation4_spill] sm:$0xff] %v5768_v6  ;;  %v9265_v9 = vld [vmem:[#allocation27_spill] sm:$0xff]  ;;  %v3034_v45 = vadd.f32 %v3018_v8, %v9272_v5  ;;  %v9276_v46 = vmax.f32 %v9275_v44, 0.0  ;;  %v9278_v20 = vmax.f32 %v9277_v56, 0.0  ;;  %v9285_v8 = vld [vmem:[#allocation37_spill] sm:$0xff]  ;;  %v1012_v44 = vadd.f32 %v3861_v14, %v260_v27 }
 0x20a   :  { %9253 = vst [vmem:[#allocation39_spill] sm:$0xff] %v5771_v0  ;;  %9255 = vst [vmem:[#allocation40_spill] sm:$0xff] %v5774_v41  ;;  %v9266_v58 = vmax.f32 %v9265_v9, 0.0  ;;  %v9268_v0 = vmax.f32 %v9267_v37, 0.0  ;;  %v9269_v41 = vld [vmem:[#allocation29_spill] sm:$0xff]  ;;  %v3035_v21 = vadd.f32 %v3019_v51, %v9274_v4  ;;  %v9286_v5 = vmax.f32 %v9285_v8, 0.0 }
 0x20b   :  { %9256 = vst [vmem:[#allocation41_spill] sm:$0xff] %v5777_v53  ;;  %v9270_v29 = vmax.f32 %v9269_v41, 0.0  ;;  %v3036_v62 = vadd.f32 %v3020_v42, %v9276_v46  ;;  %v3037_v9 = vadd.f32 %v3021_v43, %v9278_v20  ;;  %v9287_v25 = vld [vmem:[#allocation38_spill] sm:$0xff]  ;;  %v1011_v42 = vadd.f32 %v3859_v13, %v260_v27 }
 0x20c   :  { %v3031_v6 = vadd.f32 %v3015_v54, %v9266_v58  ;;  %v3032_v63 = vadd.f32 %v3016_v36, %v9268_v0  ;;  %v9279_v54 = vld [vmem:[#allocation34_spill] sm:$0xff]  ;;  %v9281_v36 = vld [vmem:[#allocation35_spill] sm:$0xff]  ;;  %v3041_v40 = vadd.f32 %v3025_v57, %v9286_v5  ;;  %v9288_v51 = vmax.f32 %v9287_v25, 0.0 }
 0x20d   :  { %v3033_v53 = vadd.f32 %v3017_v32, %v9270_v29  ;;  %v9280_v58 = vmax.f32 %v9279_v54, 0.0  ;;  %v9282_v0 = vmax.f32 %v9281_v36, 0.0  ;;  %v9283_v32 = vld [vmem:[#allocation36_spill] sm:$0xff]  ;;  %v1013_v43 = vadd.f32 %v3863_v15, %v260_v27 }
 0x20e   :  { %v9284_v29 = vmax.f32 %v9283_v32, 0.0  ;;  %v3042_v4 = vadd.f32 %v3026_v35, %v9288_v51  ;;  %v1015_v46 = vadd.f32 %v3867_v17, %v260_v27  ;;  %v1018_v56 = vadd.f32 %v8512_v1, %v260_v27 }
 0x20f   :  { %v3038_v37 = vadd.f32 %v3022_v33, %v9280_v58  ;;  %v3039_v41 = vadd.f32 %v3023_v61, %v9282_v0  ;;  %v1014_v33 = vadd.f32 %v3865_v16, %v260_v27  ;;  %v1016_v61 = vadd.f32 %v3869_v18, %v260_v27 }
 0x210   :  { %v3040_v12 = vadd.f32 %v3024_v38, %v9284_v29  ;;  %v1017_v38 = vadd.f32 %v3871_v19, %v260_v27  ;;  %v1019_v57 = vadd.f32 %v8514_v2, %v260_v27  ;;  %v1020_v35 = vadd.f32 %v8516_v3, %v260_v27 }
 0x211   :  { %v1021_v20 = vadd.f32 %v8518_v23, %v260_v27  ;;  %v1022_v54 = vadd.f32 %v9248_v59, %v260_v27  ;;  %v1023_v58 = vadd.f32 %v9250_v30, %v260_v27  ;;  %v1024_v36 = vadd.f32 %v9252_v22, %v260_v27 }
 0x212   :  { %v1025_v0 = vadd.f32 %v9254_v55, %v260_v27  ;;  %v1026_v32 = vadd.f32 %v3889_v28, %v260_v27  ;;  %v2035_v29 = vmax.f32 %v1011_v42, 0.0  ;;  %v2036_v8 = vmax.f32 %v1012_v44, 0.0 }
 0x213   :  { %v2037_v5 = vmax.f32 %v1013_v43, 0.0  ;;  %v2038_v25 = vmax.f32 %v1014_v33, 0.0  ;;  %v2039_v51 = vmax.f32 %v1015_v46, 0.0  ;;  %v2040_v24 = vmax.f32 %v1016_v61, 0.0  ;;  %v275_v46 = vpop.permute.xlu1 %274 }
 0x214   :  { %v2041_v31 = vmax.f32 %v1017_v38, 0.0  ;;  %v2042_v34 = vmax.f32 %v1018_v56, 0.0  ;;  %v2043_v26 = vmax.f32 %v1019_v57, 0.0  ;;  %v2044_v60 = vmax.f32 %v1020_v35, 0.0 }
 0x215   :  { %v2045_v50 = vmax.f32 %v1021_v20, 0.0  ;;  %v2046_v11 = vmax.f32 %v1022_v54, 0.0  ;;  %v2047_v10 = vmax.f32 %v1023_v58, 0.0  ;;  %v2048_v7 = vmax.f32 %v1024_v36, 0.0 }
 0x216   :  { %v2049_v52 = vmax.f32 %v1025_v0, 0.0  ;;  %v2050_v22 = vmax.f32 %v1026_v32, 0.0  ;;  %v3043_v30 = vadd.f32 %v3027_v39, %v2035_v29  ;;  %v3044_v55 = vadd.f32 %v3028_v48, %v2036_v8  ;;  %v9306_v48 = vld [vmem:[#allocation10_spill] sm:$0xff]  ;;  %v9315_v29 = vld [vmem:[#allocation15_spill] sm:$0xff] }
 0x217   :  { %v3045_v59 = vadd.f32 %v3029_v47, %v2037_v5  ;;  %v3046_v27 = vadd.f32 %v3030_v49, %v2038_v25  ;;  %v3047_v42 = vadd.f32 %v3031_v6, %v2039_v51  ;;  %v3048_v44 = vadd.f32 %v3032_v63, %v2040_v24  ;;  %v9319_v25 = vld [vmem:[#allocation17_spill] sm:$0xff] }
 0x218   :  { %v3049_v43 = vadd.f32 %v3033_v53, %v2041_v31  ;;  %v3050_v33 = vadd.f32 %v3034_v45, %v2042_v34  ;;  %v3051_v61 = vadd.f32 %v3035_v21, %v2043_v26  ;;  %v3052_v38 = vadd.f32 %v3036_v62, %v2044_v60  ;;  %v9300_v31 = vld [vmem:[#allocation7_spill] sm:$0xff]  ;;  %v9304_v53 = vld [vmem:[#allocation9_spill] sm:$0xff]  ;;  %v9313_v62 = vld [vmem:[#allocation14_spill] sm:$0xff] }
 0x219   :  { %v3053_v56 = vadd.f32 %v3037_v9, %v2045_v50  ;;  %v3054_v57 = vadd.f32 %v3038_v37, %v2046_v11  ;;  %v3055_v35 = vadd.f32 %v3039_v41, %v2047_v10  ;;  %v3056_v20 = vadd.f32 %v3040_v12, %v2048_v7  ;;  %v9309_v41 = vld [vmem:[#allocation12_spill] sm:$0xff] }
 0x21a   :  { %v3057_v54 = vadd.f32 %v3041_v40, %v2049_v52  ;;  %v3058_v58 = vadd.f32 %v3042_v4, %v2050_v22  ;;  %v5844_v36 = vadd.f32 %v3859_v13, %v275_v46  ;;  %v5847_v39 = vadd.f32 %v3861_v14, %v275_v46  ;;  %v9302_v40 = vld [vmem:[#allocation8_spill] sm:$0xff]  ;;  %v9311_v4 = vld [vmem:[#allocation13_spill] sm:$0xff] }
 0x21b   :  { %v5850_v6 = vadd.f32 %v3863_v15, %v275_v46  ;;  %v5853_v34 = vadd.f32 %v3865_v16, %v275_v46  ;;  %v5856_v60 = vadd.f32 %v3867_v17, %v275_v46  ;;  %v5859_v10 = vadd.f32 %v3869_v18, %v275_v46 }
 0x21c   :  { %9289 = vst [vmem:[#allocation23_spill] sm:$0xff] %v5844_v36  ;;  %9290 = vst [vmem:[#allocation24_spill] sm:$0xff] %v5847_v39  ;;  %v5862_v52 = vadd.f32 %v3871_v19, %v275_v46  ;;  %v5865_v7 = vadd.f32 %v8512_v1, %v275_v46  ;;  %v5868_v11 = vadd.f32 %v8514_v2, %v275_v46  ;;  %v9310_v12 = vmax.f32 %v9309_v41, 0.0  ;;  %v9323_v41 = vld [vmem:[#allocation19_spill] sm:$0xff] }
 0x21d   :  { %9291 = vst [vmem:[#allocation25_spill] sm:$0xff] %v5850_v6  ;;  %9292 = vst [vmem:[#allocation26_spill] sm:$0xff] %v5853_v34  ;;  %v5871_v50 = vadd.f32 %v8516_v3, %v275_v46  ;;  %v5874_v26 = vadd.f32 %v8518_v23, %v275_v46  ;;  %v5877_v24 = vadd.f32 %v9300_v31, %v275_v46  ;;  %v9312_v9 = vmax.f32 %v9311_v4, 0.0  ;;  %v270_v4 = vpop.permute.xlu0 %269 }
 0x21e   :  { %9293 = vst [vmem:[#allocation27_spill] sm:$0xff] %v5856_v60  ;;  %9294 = vst [vmem:[#allocation28_spill] sm:$0xff] %v5859_v10  ;;  %v5880_v22 = vadd.f32 %v9302_v40, %v275_v46  ;;  %v5883_v47 = vadd.f32 %v9304_v53, %v275_v46  ;;  %v5886_v49 = vadd.f32 %v9306_v48, %v275_v46  ;;  %v9314_v32 = vmax.f32 %v9313_v62, 0.0 }
 0x21f   :  { %9295 = vst [vmem:[#allocation29_spill] sm:$0xff] %v5862_v52  ;;  %9296 = vst [vmem:[#allocation30_spill] sm:$0xff] %v5865_v7  ;;  %v5889_v63 = vadd.f32 %v3889_v28, %v275_v46  ;;  %v3059_v37 = vadd.f32 %v3043_v30, %v9310_v12  ;;  %v3060_v0 = vadd.f32 %v3044_v55, %v9312_v9  ;;  %v9316_v45 = vmax.f32 %v9315_v29, 0.0  ;;  %v9325_v55 = vld [vmem:[#allocation20_spill] sm:$0xff] }
 0x220   :  { %9297 = vst [vmem:[#allocation31_spill] sm:$0xff] %v5868_v11  ;;  %9298 = vst [vmem:[#allocation32_spill] sm:$0xff] %v5871_v50  ;;  %v3061_v21 = vadd.f32 %v3045_v59, %v9314_v32  ;;  %v9324_v30 = vmax.f32 %v9323_v41, 0.0  ;;  %v9326_v9 = vmax.f32 %v9325_v55, 0.0  ;;  %v9327_v59 = vld [vmem:[#allocation21_spill] sm:$0xff] }
 0x221   :  { %9299 = vst [vmem:[#allocation33_spill] sm:$0xff] %v5874_v26  ;;  %9301 = vst [vmem:[#allocation34_spill] sm:$0xff] %v5877_v24  ;;  %v3062_v8 = vadd.f32 %v3046_v27, %v9316_v45  ;;  %v9317_v24 = vld [vmem:[#allocation16_spill] sm:$0xff]  ;;  %v9328_v32 = vmax.f32 %v9327_v59, 0.0  ;;  %v9329_v27 = vld [vmem:[#allocation22_spill] sm:$0xff]  ;;  %v1044_v59 = vadd.f32 %v3861_v14, %v270_v4 }
 0x222   :  { %9303 = vst [vmem:[#allocation35_spill] sm:$0xff] %v5880_v22  ;;  %9305 = vst [vmem:[#allocation36_spill] sm:$0xff] %v5883_v47  ;;  %v9318_v5 = vmax.f32 %v9317_v24, 0.0  ;;  %v9320_v47 = vmax.f32 %v9319_v25, 0.0  ;;  %v3066_v12 = vadd.f32 %v3050_v33, %v9324_v30  ;;  %v3067_v62 = vadd.f32 %v3051_v61, %v9326_v9  ;;  %v9337_v33 = vld [vmem:[#allocation40_spill] sm:$0xff]  ;;  %v9339_v55 = vld [vmem:[#allocation41_spill] sm:$0xff] }
 0x223   :  { %9307 = vst [vmem:[#allocation37_spill] sm:$0xff] %v5886_v49  ;;  %9308 = vst [vmem:[#allocation38_spill] sm:$0xff] %v5889_v63  ;;  %v9321_v49 = vld [vmem:[#allocation18_spill] sm:$0xff]  ;;  %v3068_v29 = vadd.f32 %v3052_v38, %v9328_v32  ;;  %v9330_v45 = vmax.f32 %v9329_v27, 0.0  ;;  %v9338_v30 = vmax.f32 %v9337_v33, 0.0  ;;  %v9340_v61 = vmax.f32 %v9339_v55, 0.0 }
 0x224   :  { %v3063_v22 = vadd.f32 %v3047_v42, %v9318_v5  ;;  %v3064_v51 = vadd.f32 %v3048_v44, %v9320_v47  ;;  %v9322_v46 = vmax.f32 %v9321_v49, 0.0  ;;  %v9331_v42 = vld [vmem:[#allocation3_spill] sm:$0xff]  ;;  %v9333_v44 = vld [vmem:[#allocation4_spill] sm:$0xff]  ;;  %v1043_v38 = vadd.f32 %v3859_v13, %v270_v4 }
 0x225   :  { %v3069_v24 = vadd.f32 %v3053_v56, %v9330_v45  ;;  %v9332_v5 = vmax.f32 %v9331_v42, 0.0  ;;  %v9334_v47 = vmax.f32 %v9333_v44, 0.0  ;;  %v3073_v26 = vadd.f32 %v3057_v54, %v9338_v30 }
 0x226   :  { %v3065_v63 = vadd.f32 %v3049_v43, %v9322_v46  ;;  %v9335_v43 = vld [vmem:[#allocation39_spill] sm:$0xff]  ;;  %v3074_v9 = vadd.f32 %v3058_v58, %v9340_v61  ;;  %v1045_v56 = vadd.f32 %v3863_v15, %v270_v4  ;;  %v1047_v32 = vadd.f32 %v3867_v17, %v270_v4 }
 0x227   :  { %v3070_v25 = vadd.f32 %v3054_v57, %v9332_v5  ;;  %v3071_v49 = vadd.f32 %v3055_v35, %v9334_v47  ;;  %v9336_v46 = vmax.f32 %v9335_v43, 0.0  ;;  %v1046_v57 = vadd.f32 %v3865_v16, %v270_v4 }
 0x228   :  { %v1048_v35 = vadd.f32 %v3869_v18, %v270_v4  ;;  %v1050_v27 = vadd.f32 %v8512_v1, %v270_v4  ;;  %v1051_v54 = vadd.f32 %v8514_v2, %v270_v4  ;;  %v1052_v58 = vadd.f32 %v8516_v3, %v270_v4 }
 0x229   :  { %v3072_v41 = vadd.f32 %v3056_v20, %v9336_v46  ;;  %v1049_v20 = vadd.f32 %v3871_v19, %v270_v4  ;;  %v1053_v45 = vadd.f32 %v8518_v23, %v270_v4  ;;  %v1054_v42 = vadd.f32 %v9300_v31, %v270_v4 }
 0x22a   :  { %v1055_v5 = vadd.f32 %v9302_v40, %v270_v4  ;;  %v1056_v44 = vadd.f32 %v9304_v53, %v270_v4  ;;  %v1057_v47 = vadd.f32 %v9306_v48, %v270_v4  ;;  %v1058_v43 = vadd.f32 %v3889_v28, %v270_v4 }
 0x22b   :  { %v2067_v46 = vmax.f32 %v1043_v38, 0.0  ;;  %v2068_v33 = vmax.f32 %v1044_v59, 0.0  ;;  %v2069_v30 = vmax.f32 %v1045_v56, 0.0  ;;  %v2070_v55 = vmax.f32 %v1046_v57, 0.0 }
 0x22c   :  { %v2071_v61 = vmax.f32 %v1047_v32, 0.0  ;;  %v2072_v50 = vmax.f32 %v1048_v35, 0.0  ;;  %v2073_v11 = vmax.f32 %v1049_v20, 0.0  ;;  %v2074_v7 = vmax.f32 %v1050_v27, 0.0  ;;  %v285_v32 = vpop.permute.xlu1 %284 }
 0x22d   :  { %v2075_v52 = vmax.f32 %v1051_v54, 0.0  ;;  %v2076_v10 = vmax.f32 %v1052_v58, 0.0  ;;  %v2077_v60 = vmax.f32 %v1053_v45, 0.0  ;;  %v2078_v34 = vmax.f32 %v1054_v42, 0.0 }
 0x22e   :  { %v2079_v6 = vmax.f32 %v1055_v5, 0.0  ;;  %v2080_v39 = vmax.f32 %v1056_v44, 0.0  ;;  %v2081_v36 = vmax.f32 %v1057_v47, 0.0  ;;  %v2082_v53 = vmax.f32 %v1058_v43, 0.0 }
 0x22f   :  { %v3075_v40 = vadd.f32 %v3059_v37, %v2067_v46  ;;  %v3076_v48 = vadd.f32 %v3060_v0, %v2068_v33  ;;  %v3077_v31 = vadd.f32 %v3061_v21, %v2069_v30  ;;  %v3078_v4 = vadd.f32 %v3062_v8, %v2070_v55  ;;  %v9358_v0 = vld [vmem:[#allocation10_spill] sm:$0xff]  ;;  %v9371_v55 = vld [vmem:[#allocation28_spill] sm:$0xff] }
 0x230   :  { %v3079_v38 = vadd.f32 %v3063_v22, %v2071_v61  ;;  %v3080_v59 = vadd.f32 %v3064_v51, %v2072_v50  ;;  %v3081_v56 = vadd.f32 %v3065_v63, %v2073_v11  ;;  %v3082_v57 = vadd.f32 %v3066_v12, %v2074_v7  ;;  %v9352_v11 = vld [vmem:[#allocation7_spill] sm:$0xff]  ;;  %v9356_v63 = vld [vmem:[#allocation9_spill] sm:$0xff]  ;;  %v9367_v46 = vld [vmem:[#allocation26_spill] sm:$0xff] }
 0x231   :  { %v3083_v35 = vadd.f32 %v3067_v62, %v2075_v52  ;;  %v3084_v20 = vadd.f32 %v3068_v29, %v2076_v10  ;;  %v3085_v27 = vadd.f32 %v3069_v24, %v2077_v60  ;;  %v3086_v54 = vadd.f32 %v3070_v25, %v2078_v34  ;;  %v9365_v29 = vld [vmem:[#allocation25_spill] sm:$0xff] }
 0x232   :  { %v3087_v58 = vadd.f32 %v3071_v49, %v2079_v6  ;;  %v3088_v45 = vadd.f32 %v3072_v41, %v2080_v39  ;;  %v3089_v42 = vadd.f32 %v3073_v26, %v2081_v36  ;;  %v3090_v5 = vadd.f32 %v3074_v9, %v2082_v53  ;;  %v9354_v26 = vld [vmem:[#allocation8_spill] sm:$0xff]  ;;  %v9361_v49 = vld [vmem:[#allocation23_spill] sm:$0xff] }
 0x233   :  { %v5956_v44 = vadd.f32 %v3859_v13, %v285_v32  ;;  %v5959_v37 = vadd.f32 %v3861_v14, %v285_v32  ;;  %v5962_v22 = vadd.f32 %v3863_v15, %v285_v32  ;;  %v5965_v7 = vadd.f32 %v3865_v16, %v285_v32  ;;  %v9363_v9 = vld [vmem:[#allocation24_spill] sm:$0xff] }
 0x234   :  { %v5968_v10 = vadd.f32 %v3867_v17, %v285_v32  ;;  %v5971_v6 = vadd.f32 %v3869_v18, %v285_v32  ;;  %v5974_v36 = vadd.f32 %v3871_v19, %v285_v32  ;;  %v5977_v39 = vadd.f32 %v8512_v1, %v285_v32 }
 0x235   :  { %9341 = vst [vmem:[#allocation12_spill] sm:$0xff] %v5956_v44  ;;  %9342 = vst [vmem:[#allocation13_spill] sm:$0xff] %v5959_v37  ;;  %v5980_v34 = vadd.f32 %v8514_v2, %v285_v32  ;;  %v5983_v60 = vadd.f32 %v8516_v3, %v285_v32  ;;  %v5986_v52 = vadd.f32 %v8518_v23, %v285_v32  ;;  %v9362_v41 = vmax.f32 %v9361_v49, 0.0  ;;  %v9375_v49 = vld [vmem:[#allocation30_spill] sm:$0xff] }
 0x236   :  { %9343 = vst [vmem:[#allocation14_spill] sm:$0xff] %v5962_v22  ;;  %9344 = vst [vmem:[#allocation15_spill] sm:$0xff] %v5965_v7  ;;  %v5989_v50 = vadd.f32 %v9352_v11, %v285_v32  ;;  %v5992_v53 = vadd.f32 %v9354_v26, %v285_v32  ;;  %v5995_v21 = vadd.f32 %v9356_v63, %v285_v32  ;;  %v9364_v24 = vmax.f32 %v9363_v9, 0.0  ;;  %v280_v9 = vpop.permute.xlu0 %279 }
 0x237   :  { %9345 = vst [vmem:[#allocation16_spill] sm:$0xff] %v5968_v10  ;;  %9346 = vst [vmem:[#allocation17_spill] sm:$0xff] %v5971_v6  ;;  %v5998_v8 = vadd.f32 %v9358_v0, %v285_v32  ;;  %v6001_v51 = vadd.f32 %v3889_v28, %v285_v32  ;;  %v3091_v25 = vadd.f32 %v3075_v40, %v9362_v41  ;;  %v9366_v43 = vmax.f32 %v9365_v29, 0.0 }
 0x238   :  { %9347 = vst [vmem:[#allocation18_spill] sm:$0xff] %v5974_v36  ;;  %9348 = vst [vmem:[#allocation19_spill] sm:$0xff] %v5977_v39  ;;  %v3092_v47 = vadd.f32 %v3076_v48, %v9364_v24  ;;  %v9368_v12 = vmax.f32 %v9367_v46, 0.0  ;;  %v9376_v40 = vmax.f32 %v9375_v49, 0.0  ;;  %v9377_v48 = vld [vmem:[#allocation31_spill] sm:$0xff] }
 0x239   :  { %9349 = vst [vmem:[#allocation20_spill] sm:$0xff] %v5980_v34  ;;  %9350 = vst [vmem:[#allocation21_spill] sm:$0xff] %v5983_v60  ;;  %v3093_v62 = vadd.f32 %v3077_v31, %v9366_v43  ;;  %v9378_v24 = vmax.f32 %v9377_v48, 0.0  ;;  %v9379_v31 = vld [vmem:[#allocation32_spill] sm:$0xff]  ;;  %v9391_v48 = vld [vmem:[#allocation38_spill] sm:$0xff] }
 0x23a   :  { %9351 = vst [vmem:[#allocation22_spill] sm:$0xff] %v5986_v52  ;;  %9353 = vst [vmem:[#allocation3_spill] sm:$0xff] %v5989_v50  ;;  %v3094_v33 = vadd.f32 %v3078_v4, %v9368_v12  ;;  %v9369_v50 = vld [vmem:[#allocation27_spill] sm:$0xff]  ;;  %v3098_v41 = vadd.f32 %v3082_v57, %v9376_v40  ;;  %v9380_v43 = vmax.f32 %v9379_v31, 0.0  ;;  %v9381_v4 = vld [vmem:[#allocation33_spill] sm:$0xff]  ;;  %v1076_v31 = vadd.f32 %v3861_v14, %v280_v9 }
 0x23b   :  { %9355 = vst [vmem:[#allocation4_spill] sm:$0xff] %v5992_v53  ;;  %9357 = vst [vmem:[#allocation39_spill] sm:$0xff] %v5995_v21  ;;  %v9370_v30 = vmax.f32 %v9369_v50, 0.0  ;;  %v9372_v21 = vmax.f32 %v9371_v55, 0.0  ;;  %v3099_v29 = vadd.f32 %v3083_v35, %v9378_v24  ;;  %v9382_v12 = vmax.f32 %v9381_v4, 0.0  ;;  %v9389_v57 = vld [vmem:[#allocation37_spill] sm:$0xff] }
 0x23c   :  { %9359 = vst [vmem:[#allocation40_spill] sm:$0xff] %v5998_v8  ;;  %9360 = vst [vmem:[#allocation41_spill] sm:$0xff] %v6001_v51  ;;  %v9373_v8 = vld [vmem:[#allocation29_spill] sm:$0xff]  ;;  %v3100_v46 = vadd.f32 %v3084_v20, %v9380_v43  ;;  %v9390_v40 = vmax.f32 %v9389_v57, 0.0  ;;  %v9392_v35 = vmax.f32 %v9391_v48, 0.0  ;;  %v1075_v20 = vadd.f32 %v3859_v13, %v280_v9 }
 0x23d   :  { %v3095_v53 = vadd.f32 %v3079_v38, %v9370_v30  ;;  %v3096_v61 = vadd.f32 %v3080_v59, %v9372_v21  ;;  %v9374_v32 = vmax.f32 %v9373_v8, 0.0  ;;  %v3101_v50 = vadd.f32 %v3085_v27, %v9382_v12  ;;  %v9383_v38 = vld [vmem:[#allocation34_spill] sm:$0xff]  ;;  %v9385_v59 = vld [vmem:[#allocation35_spill] sm:$0xff] }
 0x23e   :  { %v9384_v30 = vmax.f32 %v9383_v38, 0.0  ;;  %v9386_v21 = vmax.f32 %v9385_v59, 0.0  ;;  %v3105_v52 = vadd.f32 %v3089_v42, %v9390_v40  ;;  %v3106_v24 = vadd.f32 %v3090_v5, %v9392_v35 }
 0x23f   :  { %v3097_v51 = vadd.f32 %v3081_v56, %v9374_v32  ;;  %v9387_v56 = vld [vmem:[#allocation36_spill] sm:$0xff]  ;;  %v1077_v27 = vadd.f32 %v3863_v15, %v280_v9  ;;  %v1079_v43 = vadd.f32 %v3867_v17, %v280_v9  ;;  %v1082_v4 = vadd.f32 %v8512_v1, %v280_v9 }
 0x240   :  { %v3102_v55 = vadd.f32 %v3086_v54, %v9384_v30  ;;  %v3103_v8 = vadd.f32 %v3087_v58, %v9386_v21  ;;  %v9388_v32 = vmax.f32 %v9387_v56, 0.0  ;;  %v1078_v54 = vadd.f32 %v3865_v16, %v280_v9 }
 0x241   :  { %v1080_v58 = vadd.f32 %v3869_v18, %v280_v9  ;;  %v1083_v42 = vadd.f32 %v8514_v2, %v280_v9  ;;  %v1084_v5 = vadd.f32 %v8516_v3, %v280_v9  ;;  %v1085_v12 = vadd.f32 %v8518_v23, %v280_v9 }
 0x242   :  { %v3104_v49 = vadd.f32 %v3088_v45, %v9388_v32  ;;  %v1081_v45 = vadd.f32 %v3871_v19, %v280_v9  ;;  %v1086_v38 = vadd.f32 %v9352_v11, %v280_v9  ;;  %v1087_v30 = vadd.f32 %v9354_v26, %v280_v9 }
 0x243   :  { %v1088_v59 = vadd.f32 %v9356_v63, %v280_v9  ;;  %v1089_v21 = vadd.f32 %v9358_v0, %v280_v9  ;;  %v1090_v56 = vadd.f32 %v3889_v28, %v280_v9  ;;  %v2099_v32 = vmax.f32 %v1075_v20, 0.0 }
 0x244   :  { %v2100_v57 = vmax.f32 %v1076_v31, 0.0  ;;  %v2101_v40 = vmax.f32 %v1077_v27, 0.0  ;;  %v2102_v48 = vmax.f32 %v1078_v54, 0.0  ;;  %v2103_v35 = vmax.f32 %v1079_v43, 0.0  ;;  %v295_v43 = vpop.permute.xlu1 %294 }
 0x245   :  { %v2104_v60 = vmax.f32 %v1080_v58, 0.0  ;;  %v2105_v34 = vmax.f32 %v1081_v45, 0.0  ;;  %v2106_v39 = vmax.f32 %v1082_v4, 0.0  ;;  %v2107_v36 = vmax.f32 %v1083_v42, 0.0 }
 0x246   :  { %v2108_v6 = vmax.f32 %v1084_v5, 0.0  ;;  %v2109_v10 = vmax.f32 %v1085_v12, 0.0  ;;  %v2110_v7 = vmax.f32 %v1086_v38, 0.0  ;;  %v2111_v22 = vmax.f32 %v1087_v30, 0.0 }
 0x247   :  { %v2112_v37 = vmax.f32 %v1088_v59, 0.0  ;;  %v2113_v44 = vmax.f32 %v1089_v21, 0.0  ;;  %v2114_v63 = vmax.f32 %v1090_v56, 0.0  ;;  %v3107_v26 = vadd.f32 %v3091_v25, %v2099_v32  ;;  %v9419_v32 = vld [vmem:[#allocation15_spill] sm:$0xff] }
 0x248   :  { %v3108_v0 = vadd.f32 %v3092_v47, %v2100_v57  ;;  %v3109_v11 = vadd.f32 %v3093_v62, %v2101_v40  ;;  %v3110_v9 = vadd.f32 %v3094_v33, %v2102_v48  ;;  %v3111_v20 = vadd.f32 %v3095_v53, %v2103_v35  ;;  %v9410_v47 = vld [vmem:[#allocation10_spill] sm:$0xff]  ;;  %v9423_v48 = vld [vmem:[#allocation17_spill] sm:$0xff] }
 0x249   :  { %v3112_v31 = vadd.f32 %v3096_v61, %v2104_v60  ;;  %v3113_v27 = vadd.f32 %v3097_v51, %v2105_v34  ;;  %v3114_v54 = vadd.f32 %v3098_v41, %v2106_v39  ;;  %v3115_v58 = vadd.f32 %v3099_v29, %v2107_v36  ;;  %v9404_v34 = vld [vmem:[#allocation7_spill] sm:$0xff]  ;;  %v9408_v51 = vld [vmem:[#allocation9_spill] sm:$0xff] }
 0x24a   :  { %v3116_v45 = vadd.f32 %v3100_v46, %v2108_v6  ;;  %v3117_v4 = vadd.f32 %v3101_v50, %v2109_v10  ;;  %v3118_v42 = vadd.f32 %v3102_v55, %v2110_v7  ;;  %v3119_v5 = vadd.f32 %v3103_v8, %v2111_v22  ;;  %v9413_v8 = vld [vmem:[#allocation12_spill] sm:$0xff]  ;;  %v9417_v46 = vld [vmem:[#allocation14_spill] sm:$0xff] }
 0x24b   :  { %v3120_v12 = vadd.f32 %v3104_v49, %v2112_v37  ;;  %v3121_v38 = vadd.f32 %v3105_v52, %v2113_v44  ;;  %v3122_v30 = vadd.f32 %v3106_v24, %v2114_v63  ;;  %v6068_v59 = vadd.f32 %v3859_v13, %v295_v43  ;;  %v9406_v52 = vld [vmem:[#allocation8_spill] sm:$0xff]  ;;  %v9415_v24 = vld [vmem:[#allocation13_spill] sm:$0xff] }
 0x24c   :  { %v6071_v25 = vadd.f32 %v3861_v14, %v295_v43  ;;  %v6074_v53 = vadd.f32 %v3863_v15, %v295_v43  ;;  %v6077_v39 = vadd.f32 %v3865_v16, %v295_v43  ;;  %v6080_v6 = vadd.f32 %v3867_v17, %v295_v43 }
 0x24d   :  { %9393 = vst [vmem:[#allocation23_spill] sm:$0xff] %v6068_v59  ;;  %v6083_v22 = vadd.f32 %v3869_v18, %v295_v43  ;;  %v6086_v44 = vadd.f32 %v3871_v19, %v295_v43  ;;  %v6089_v37 = vadd.f32 %v8512_v1, %v295_v43  ;;  %v6092_v7 = vadd.f32 %v8514_v2, %v295_v43 }
 0x24e   :  { %9394 = vst [vmem:[#allocation24_spill] sm:$0xff] %v6071_v25  ;;  %9395 = vst [vmem:[#allocation25_spill] sm:$0xff] %v6074_v53  ;;  %v6095_v10 = vadd.f32 %v8516_v3, %v295_v43  ;;  %v6098_v36 = vadd.f32 %v8518_v23, %v295_v43  ;;  %v6101_v60 = vadd.f32 %v9404_v34, %v295_v43  ;;  %v9414_v49 = vmax.f32 %v9413_v8, 0.0  ;;  %v9427_v8 = vld [vmem:[#allocation19_spill] sm:$0xff] }
 0x24f   :  { %9396 = vst [vmem:[#allocation26_spill] sm:$0xff] %v6077_v39  ;;  %9397 = vst [vmem:[#allocation27_spill] sm:$0xff] %v6080_v6  ;;  %v6104_v63 = vadd.f32 %v9406_v52, %v295_v43  ;;  %v6107_v62 = vadd.f32 %v9408_v51, %v295_v43  ;;  %v6110_v33 = vadd.f32 %v9410_v47, %v295_v43  ;;  %v9416_v50 = vmax.f32 %v9415_v24, 0.0  ;;  %v290_v24 = vpop.permute.xlu0 %289 }
 0x250   :  { %9398 = vst [vmem:[#allocation28_spill] sm:$0xff] %v6083_v22  ;;  %9399 = vst [vmem:[#allocation29_spill] sm:$0xff] %v6086_v44  ;;  %v6113_v61 = vadd.f32 %v3889_v28, %v295_v43  ;;  %v3123_v55 = vadd.f32 %v3107_v26, %v9414_v49  ;;  %v9418_v56 = vmax.f32 %v9417_v46, 0.0  ;;  %v9420_v41 = vmax.f32 %v9419_v32, 0.0 }
 0x251   :  { %9400 = vst [vmem:[#allocation30_spill] sm:$0xff] %v6089_v37  ;;  %9401 = vst [vmem:[#allocation31_spill] sm:$0xff] %v6092_v7  ;;  %v3124_v21 = vadd.f32 %v3108_v0, %v9416_v50  ;;  %v9428_v26 = vmax.f32 %v9427_v8, 0.0  ;;  %v9429_v0 = vld [vmem:[#allocation20_spill] sm:$0xff] }
 0x252   :  { %9402 = vst [vmem:[#allocation32_spill] sm:$0xff] %v6095_v10  ;;  %9403 = vst [vmem:[#allocation33_spill] sm:$0xff] %v6098_v36  ;;  %v3125_v29 = vadd.f32 %v3109_v11, %v9418_v56  ;;  %v3126_v57 = vadd.f32 %v3110_v9, %v9420_v41  ;;  %v9430_v50 = vmax.f32 %v9429_v0, 0.0  ;;  %v9431_v11 = vld [vmem:[#allocation21_spill] sm:$0xff]  ;;  %v9433_v9 = vld [vmem:[#allocation22_spill] sm:$0xff] }
 0x253   :  { %9405 = vst [vmem:[#allocation34_spill] sm:$0xff] %v6101_v60  ;;  %9407 = vst [vmem:[#allocation35_spill] sm:$0xff] %v6104_v63  ;;  %v9421_v60 = vld [vmem:[#allocation16_spill] sm:$0xff]  ;;  %v3130_v49 = vadd.f32 %v3114_v54, %v9428_v26  ;;  %v9432_v56 = vmax.f32 %v9431_v11, 0.0  ;;  %v9434_v41 = vmax.f32 %v9433_v9, 0.0  ;;  %v9443_v0 = vld [vmem:[#allocation41_spill] sm:$0xff]  ;;  %v1108_v11 = vadd.f32 %v3861_v14, %v290_v24 }
 0x254   :  { %9409 = vst [vmem:[#allocation36_spill] sm:$0xff] %v6107_v62  ;;  %9411 = vst [vmem:[#allocation37_spill] sm:$0xff] %v6110_v33  ;;  %v9422_v40 = vmax.f32 %v9421_v60, 0.0  ;;  %v9424_v62 = vmax.f32 %v9423_v48, 0.0  ;;  %v9425_v33 = vld [vmem:[#allocation18_spill] sm:$0xff]  ;;  %v3131_v46 = vadd.f32 %v3115_v58, %v9430_v50  ;;  %v9441_v54 = vld [vmem:[#allocation40_spill] sm:$0xff]  ;;  %v1114_v9 = vadd.f32 %v8512_v1, %v290_v24 }
 0x255   :  { %9412 = vst [vmem:[#allocation38_spill] sm:$0xff] %v6113_v61  ;;  %v9426_v43 = vmax.f32 %v9425_v33, 0.0  ;;  %v3132_v32 = vadd.f32 %v3116_v45, %v9432_v56  ;;  %v3133_v60 = vadd.f32 %v3117_v4, %v9434_v41  ;;  %v9442_v26 = vmax.f32 %v9441_v54, 0.0 }
 0x256   :  { %v3127_v63 = vadd.f32 %v3111_v20, %v9422_v40  ;;  %v3128_v35 = vadd.f32 %v3112_v31, %v9424_v62  ;;  %v9435_v20 = vld [vmem:[#allocation3_spill] sm:$0xff]  ;;  %v9437_v31 = vld [vmem:[#allocation4_spill] sm:$0xff]  ;;  %v9444_v58 = vmax.f32 %v9443_v0, 0.0  ;;  %v1107_v45 = vadd.f32 %v3859_v13, %v290_v24 }
 0x257   :  { %v3129_v61 = vadd.f32 %v3113_v27, %v9426_v43  ;;  %v9436_v40 = vmax.f32 %v9435_v20, 0.0  ;;  %v9438_v62 = vmax.f32 %v9437_v31, 0.0  ;;  %v9439_v27 = vld [vmem:[#allocation39_spill] sm:$0xff]  ;;  %v3137_v36 = vadd.f32 %v3121_v38, %v9442_v26 }
 0x258   :  { %v9440_v43 = vmax.f32 %v9439_v27, 0.0  ;;  %v3138_v50 = vadd.f32 %v3122_v30, %v9444_v58  ;;  %v1109_v4 = vadd.f32 %v3863_v15, %v290_v24  ;;  %v1111_v56 = vadd.f32 %v3867_v17, %v290_v24 }
 0x259   :  { %v3134_v48 = vadd.f32 %v3118_v42, %v9436_v40  ;;  %v3135_v33 = vadd.f32 %v3119_v5, %v9438_v62  ;;  %v1110_v42 = vadd.f32 %v3865_v16, %v290_v24  ;;  %v1112_v5 = vadd.f32 %v3869_v18, %v290_v24 }
 0x25a   :  { %v3136_v8 = vadd.f32 %v3120_v12, %v9440_v43  ;;  %v1113_v12 = vadd.f32 %v3871_v19, %v290_v24  ;;  %v1115_v38 = vadd.f32 %v8514_v2, %v290_v24  ;;  %v1116_v30 = vadd.f32 %v8516_v3, %v290_v24 }
 0x25b   :  { %v1117_v41 = vadd.f32 %v8518_v23, %v290_v24  ;;  %v1118_v20 = vadd.f32 %v9404_v34, %v290_v24  ;;  %v1119_v40 = vadd.f32 %v9406_v52, %v290_v24  ;;  %v1120_v31 = vadd.f32 %v9408_v51, %v290_v24 }
 0x25c   :  { %v1121_v62 = vadd.f32 %v9410_v47, %v290_v24  ;;  %v1122_v27 = vadd.f32 %v3889_v28, %v290_v24  ;;  %v2131_v43 = vmax.f32 %v1107_v45, 0.0  ;;  %v2132_v54 = vmax.f32 %v1108_v11, 0.0 }
 0x25d   :  { %v2133_v26 = vmax.f32 %v1109_v4, 0.0  ;;  %v2134_v0 = vmax.f32 %v1110_v42, 0.0  ;;  %v2135_v58 = vmax.f32 %v1111_v56, 0.0  ;;  %v2136_v10 = vmax.f32 %v1112_v5, 0.0  ;;  %v305_v56 = vpop.permute.xlu1 %304 }
 0x25e   :  { %v2137_v7 = vmax.f32 %v1113_v12, 0.0  ;;  %v2138_v37 = vmax.f32 %v1114_v9, 0.0  ;;  %v2139_v44 = vmax.f32 %v1115_v38, 0.0  ;;  %v2140_v22 = vmax.f32 %v1116_v30, 0.0 }
 0x25f   :  { %v2141_v6 = vmax.f32 %v1117_v41, 0.0  ;;  %v2142_v39 = vmax.f32 %v1118_v20, 0.0  ;;  %v2143_v53 = vmax.f32 %v1119_v40, 0.0  ;;  %v2144_v25 = vmax.f32 %v1120_v31, 0.0 }
 0x260   :  { %v2145_v59 = vmax.f32 %v1121_v62, 0.0  ;;  %v2146_v51 = vmax.f32 %v1122_v27, 0.0  ;;  %v3139_v52 = vadd.f32 %v3123_v55, %v2131_v43  ;;  %v3140_v47 = vadd.f32 %v3124_v21, %v2132_v54  ;;  %v9462_v21 = vld [vmem:[#allocation10_spill] sm:$0xff] }
 0x261   :  { %v3141_v34 = vadd.f32 %v3125_v29, %v2133_v26  ;;  %v3142_v24 = vadd.f32 %v3126_v57, %v2134_v0  ;;  %v3143_v45 = vadd.f32 %v3127_v63, %v2135_v58  ;;  %v3144_v11 = vadd.f32 %v3128_v35, %v2136_v10  ;;  %v9471_v43 = vld [vmem:[#allocation26_spill] sm:$0xff]  ;;  %v9475_v0 = vld [vmem:[#allocation28_spill] sm:$0xff] }
 0x262   :  { %v3145_v4 = vadd.f32 %v3129_v61, %v2137_v7  ;;  %v3146_v42 = vadd.f32 %v3130_v49, %v2138_v37  ;;  %v3147_v5 = vadd.f32 %v3131_v46, %v2139_v44  ;;  %v3148_v12 = vadd.f32 %v3132_v32, %v2140_v22  ;;  %v9456_v7 = vld [vmem:[#allocation7_spill] sm:$0xff]  ;;  %v9460_v61 = vld [vmem:[#allocation9_spill] sm:$0xff] }
 0x263   :  { %v3149_v9 = vadd.f32 %v3133_v60, %v2141_v6  ;;  %v3150_v38 = vadd.f32 %v3134_v48, %v2142_v39  ;;  %v3151_v30 = vadd.f32 %v3135_v33, %v2143_v53  ;;  %v3152_v41 = vadd.f32 %v3136_v8, %v2144_v25  ;;  %v9465_v33 = vld [vmem:[#allocation23_spill] sm:$0xff]  ;;  %v9469_v32 = vld [vmem:[#allocation25_spill] sm:$0xff] }
 0x264   :  { %v3153_v20 = vadd.f32 %v3137_v36, %v2145_v59  ;;  %v3154_v40 = vadd.f32 %v3138_v50, %v2146_v51  ;;  %v6180_v31 = vadd.f32 %v3859_v13, %v305_v56  ;;  %v6183_v55 = vadd.f32 %v3861_v14, %v305_v56  ;;  %v9458_v36 = vld [vmem:[#allocation8_spill] sm:$0xff] }
 0x265   :  { %v6186_v63 = vadd.f32 %v3863_v15, %v305_v56  ;;  %v6189_v37 = vadd.f32 %v3865_v16, %v305_v56  ;;  %v6192_v22 = vadd.f32 %v3867_v17, %v305_v56  ;;  %v6195_v53 = vadd.f32 %v3869_v18, %v305_v56  ;;  %v9467_v50 = vld [vmem:[#allocation24_spill] sm:$0xff] }
 0x266   :  { %9445 = vst [vmem:[#allocation12_spill] sm:$0xff] %v6180_v31  ;;  %9446 = vst [vmem:[#allocation13_spill] sm:$0xff] %v6183_v55  ;;  %v6198_v59 = vadd.f32 %v3871_v19, %v305_v56  ;;  %v6201_v25 = vadd.f32 %v8512_v1, %v305_v56  ;;  %v6204_v39 = vadd.f32 %v8514_v2, %v305_v56  ;;  %v9466_v8 = vmax.f32 %v9465_v33, 0.0  ;;  %v9479_v33 = vld [vmem:[#allocation30_spill] sm:$0xff] }
 0x267   :  { %9447 = vst [vmem:[#allocation14_spill] sm:$0xff] %v6186_v63  ;;  %9448 = vst [vmem:[#allocation15_spill] sm:$0xff] %v6189_v37  ;;  %v6207_v6 = vadd.f32 %v8516_v3, %v305_v56  ;;  %v6210_v44 = vadd.f32 %v8518_v23, %v305_v56  ;;  %v6213_v10 = vadd.f32 %v9456_v7, %v305_v56  ;;  %v9468_v60 = vmax.f32 %v9467_v50, 0.0  ;;  %v300_v50 = vpop.permute.xlu0 %299 }
 0x268   :  { %9449 = vst [vmem:[#allocation16_spill] sm:$0xff] %v6192_v22  ;;  %9450 = vst [vmem:[#allocation17_spill] sm:$0xff] %v6195_v53  ;;  %v6216_v51 = vadd.f32 %v9458_v36, %v305_v56  ;;  %v6219_v29 = vadd.f32 %v9460_v61, %v305_v56  ;;  %v6222_v57 = vadd.f32 %v9462_v21, %v305_v56  ;;  %v9470_v27 = vmax.f32 %v9469_v32, 0.0 }
 0x269   :  { %9451 = vst [vmem:[#allocation18_spill] sm:$0xff] %v6198_v59  ;;  %9452 = vst [vmem:[#allocation19_spill] sm:$0xff] %v6201_v25  ;;  %v6225_v35 = vadd.f32 %v3889_v28, %v305_v56  ;;  %v3155_v48 = vadd.f32 %v3139_v52, %v9466_v8  ;;  %v3156_v62 = vadd.f32 %v3140_v47, %v9468_v60  ;;  %v9472_v49 = vmax.f32 %v9471_v43, 0.0  ;;  %v9481_v47 = vld [vmem:[#allocation31_spill] sm:$0xff] }
 0x26a   :  { %9453 = vst [vmem:[#allocation20_spill] sm:$0xff] %v6204_v39  ;;  %9454 = vst [vmem:[#allocation21_spill] sm:$0xff] %v6207_v6  ;;  %v3157_v46 = vadd.f32 %v3141_v34, %v9470_v27  ;;  %v9480_v52 = vmax.f32 %v9479_v33, 0.0  ;;  %v9482_v60 = vmax.f32 %v9481_v47, 0.0  ;;  %v9483_v34 = vld [vmem:[#allocation32_spill] sm:$0xff]  ;;  %v9495_v47 = vld [vmem:[#allocation38_spill] sm:$0xff] }
 0x26b   :  { %9455 = vst [vmem:[#allocation22_spill] sm:$0xff] %v6210_v44  ;;  %9457 = vst [vmem:[#allocation3_spill] sm:$0xff] %v6213_v10  ;;  %v3158_v54 = vadd.f32 %v3142_v24, %v9472_v49  ;;  %v9473_v10 = vld [vmem:[#allocation27_spill] sm:$0xff]  ;;  %v9484_v27 = vmax.f32 %v9483_v34, 0.0  ;;  %v9485_v24 = vld [vmem:[#allocation33_spill] sm:$0xff]  ;;  %v1140_v34 = vadd.f32 %v3861_v14, %v300_v50 }
 0x26c   :  { %9459 = vst [vmem:[#allocation4_spill] sm:$0xff] %v6216_v51  ;;  %9461 = vst [vmem:[#allocation39_spill] sm:$0xff] %v6219_v29  ;;  %v9474_v26 = vmax.f32 %v9473_v10, 0.0  ;;  %v9476_v29 = vmax.f32 %v9475_v0, 0.0  ;;  %v3162_v8 = vadd.f32 %v3146_v42, %v9480_v52  ;;  %v3163_v32 = vadd.f32 %v3147_v5, %v9482_v60  ;;  %v9493_v42 = vld [vmem:[#allocation37_spill] sm:$0xff] }
 0x26d   :  { %9463 = vst [vmem:[#allocation40_spill] sm:$0xff] %v6222_v57  ;;  %9464 = vst [vmem:[#allocation41_spill] sm:$0xff] %v6225_v35  ;;  %v9477_v57 = vld [vmem:[#allocation29_spill] sm:$0xff]  ;;  %v3164_v43 = vadd.f32 %v3148_v12, %v9484_v27  ;;  %v9486_v49 = vmax.f32 %v9485_v24, 0.0  ;;  %v9494_v52 = vmax.f32 %v9493_v42, 0.0  ;;  %v9496_v5 = vmax.f32 %v9495_v47, 0.0 }
 0x26e   :  { %v3159_v51 = vadd.f32 %v3143_v45, %v9474_v26  ;;  %v3160_v58 = vadd.f32 %v3144_v11, %v9476_v29  ;;  %v9478_v56 = vmax.f32 %v9477_v57, 0.0  ;;  %v9487_v45 = vld [vmem:[#allocation34_spill] sm:$0xff]  ;;  %v9489_v11 = vld [vmem:[#allocation35_spill] sm:$0xff]  ;;  %v1139_v12 = vadd.f32 %v3859_v13, %v300_v50 }
 0x26f   :  { %v3165_v10 = vadd.f32 %v3149_v9, %v9486_v49  ;;  %v9488_v26 = vmax.f32 %v9487_v45, 0.0  ;;  %v9490_v29 = vmax.f32 %v9489_v11, 0.0  ;;  %v3169_v44 = vadd.f32 %v3153_v20, %v9494_v52 }
 0x270   :  { %v3161_v35 = vadd.f32 %v3145_v4, %v9478_v56  ;;  %v9491_v4 = vld [vmem:[#allocation36_spill] sm:$0xff]  ;;  %v3170_v60 = vadd.f32 %v3154_v40, %v9496_v5  ;;  %v1141_v9 = vadd.f32 %v3863_v15, %v300_v50  ;;  %v1143_v27 = vadd.f32 %v3867_v17, %v300_v50 }
 0x271   :  { %v3166_v0 = vadd.f32 %v3150_v38, %v9488_v26  ;;  %v3167_v57 = vadd.f32 %v3151_v30, %v9490_v29  ;;  %v9492_v56 = vmax.f32 %v9491_v4, 0.0  ;;  %v1142_v38 = vadd.f32 %v3865_v16, %v300_v50 }
 0x272   :  { %v1144_v30 = vadd.f32 %v3869_v18, %v300_v50  ;;  %v1146_v24 = vadd.f32 %v8512_v1, %v300_v50  ;;  %v1147_v20 = vadd.f32 %v8514_v2, %v300_v50  ;;  %v1148_v40 = vadd.f32 %v8516_v3, %v300_v50 }
 0x273   :  { %v3168_v33 = vadd.f32 %v3152_v41, %v9492_v56  ;;  %v1145_v41 = vadd.f32 %v3871_v19, %v300_v50  ;;  %v1149_v49 = vadd.f32 %v8518_v23, %v300_v50  ;;  %v1150_v45 = vadd.f32 %v9456_v7, %v300_v50 }
 0x274   :  { %v1151_v26 = vadd.f32 %v9458_v36, %v300_v50  ;;  %v1152_v11 = vadd.f32 %v9460_v61, %v300_v50  ;;  %v1153_v29 = vadd.f32 %v9462_v21, %v300_v50  ;;  %v1154_v4 = vadd.f32 %v3889_v28, %v300_v50 }
 0x275   :  { %v2163_v56 = vmax.f32 %v1139_v12, 0.0  ;;  %v2164_v42 = vmax.f32 %v1140_v34, 0.0  ;;  %v2165_v52 = vmax.f32 %v1141_v9, 0.0  ;;  %v2166_v47 = vmax.f32 %v1142_v38, 0.0 }
 0x276   :  { %v2167_v5 = vmax.f32 %v1143_v27, 0.0  ;;  %v2168_v6 = vmax.f32 %v1144_v30, 0.0  ;;  %v2169_v39 = vmax.f32 %v1145_v41, 0.0  ;;  %v2170_v25 = vmax.f32 %v1146_v24, 0.0  ;;  %v315_v27 = vpop.permute.xlu1 %314 }
 0x277   :  { %v2171_v59 = vmax.f32 %v1147_v20, 0.0  ;;  %v2172_v53 = vmax.f32 %v1148_v40, 0.0  ;;  %v2173_v22 = vmax.f32 %v1149_v49, 0.0  ;;  %v2174_v37 = vmax.f32 %v1150_v45, 0.0 }
 0x278   :  { %v2175_v63 = vmax.f32 %v1151_v26, 0.0  ;;  %v2176_v55 = vmax.f32 %v1152_v11, 0.0  ;;  %v2177_v31 = vmax.f32 %v1153_v29, 0.0  ;;  %v2178_v61 = vmax.f32 %v1154_v4, 0.0 }
 0x279   :  { %v3171_v36 = vadd.f32 %v3155_v48, %v2163_v56  ;;  %v3172_v21 = vadd.f32 %v3156_v62, %v2164_v42  ;;  %v3173_v7 = vadd.f32 %v3157_v46, %v2165_v52  ;;  %v3174_v50 = vadd.f32 %v3158_v54, %v2166_v47  ;;  %v9514_v62 = vld [vmem:[#allocation10_spill] sm:$0xff]  ;;  %v9523_v56 = vld [vmem:[#allocation15_spill] sm:$0xff]  ;;  %v9527_v47 = vld [vmem:[#allocation17_spill] sm:$0xff] }
 0x27a   :  { %v3175_v12 = vadd.f32 %v3159_v51, %v2167_v5  ;;  %v3176_v34 = vadd.f32 %v3160_v58, %v2168_v6  ;;  %v3177_v9 = vadd.f32 %v3161_v35, %v2169_v39  ;;  %v3178_v38 = vadd.f32 %v3162_v8, %v2170_v25  ;;  %v9508_v39 = vld [vmem:[#allocation7_spill] sm:$0xff]  ;;  %v9512_v35 = vld [vmem:[#allocation9_spill] sm:$0xff] }
 0x27b   :  { %v3179_v30 = vadd.f32 %v3163_v32, %v2171_v59  ;;  %v3180_v41 = vadd.f32 %v3164_v43, %v2172_v53  ;;  %v3181_v24 = vadd.f32 %v3165_v10, %v2173_v22  ;;  %v3182_v20 = vadd.f32 %v3166_v0, %v2174_v37  ;;  %v9521_v43 = vld [vmem:[#allocation14_spill] sm:$0xff] }
 0x27c   :  { %v3183_v40 = vadd.f32 %v3167_v57, %v2175_v63  ;;  %v3184_v49 = vadd.f32 %v3168_v33, %v2176_v55  ;;  %v3185_v45 = vadd.f32 %v3169_v44, %v2177_v31  ;;  %v3186_v26 = vadd.f32 %v3170_v60, %v2178_v61  ;;  %v9510_v44 = vld [vmem:[#allocation8_spill] sm:$0xff]  ;;  %v9519_v60 = vld [vmem:[#allocation13_spill] sm:$0xff] }
 0x27d   :  { %v6292_v11 = vadd.f32 %v3859_v13, %v315_v27  ;;  %v6295_v48 = vadd.f32 %v3861_v14, %v315_v27  ;;  %v6298_v51 = vadd.f32 %v3863_v15, %v315_v27  ;;  %v6301_v25 = vadd.f32 %v3865_v16, %v315_v27  ;;  %v9517_v57 = vld [vmem:[#allocation12_spill] sm:$0xff] }
 0x27e   :  { %v6304_v53 = vadd.f32 %v3867_v17, %v315_v27  ;;  %v6307_v63 = vadd.f32 %v3869_v18, %v315_v27  ;;  %v6310_v31 = vadd.f32 %v3871_v19, %v315_v27  ;;  %v6313_v55 = vadd.f32 %v8512_v1, %v315_v27 }
 0x27f   :  { %9497 = vst [vmem:[#allocation23_spill] sm:$0xff] %v6292_v11  ;;  %9498 = vst [vmem:[#allocation24_spill] sm:$0xff] %v6295_v48  ;;  %v6316_v37 = vadd.f32 %v8514_v2, %v315_v27  ;;  %v6319_v22 = vadd.f32 %v8516_v3, %v315_v27  ;;  %v6322_v59 = vadd.f32 %v8518_v23, %v315_v27  ;;  %v9518_v33 = vmax.f32 %v9517_v57, 0.0  ;;  %v9531_v57 = vld [vmem:[#allocation19_spill] sm:$0xff] }
 0x280   :  { %9499 = vst [vmem:[#allocation25_spill] sm:$0xff] %v6298_v51  ;;  %9500 = vst [vmem:[#allocation26_spill] sm:$0xff] %v6301_v25  ;;  %v6325_v6 = vadd.f32 %v9508_v39, %v315_v27  ;;  %v6328_v61 = vadd.f32 %v9510_v44, %v315_v27  ;;  %v6331_v46 = vadd.f32 %v9512_v35, %v315_v27  ;;  %v9520_v10 = vmax.f32 %v9519_v60, 0.0  ;;  %v310_v60 = vpop.permute.xlu0 %309 }
 0x281   :  { %9501 = vst [vmem:[#allocation27_spill] sm:$0xff] %v6304_v53  ;;  %9502 = vst [vmem:[#allocation28_spill] sm:$0xff] %v6307_v63  ;;  %v6334_v54 = vadd.f32 %v9514_v62, %v315_v27  ;;  %v6337_v58 = vadd.f32 %v3889_v28, %v315_v27  ;;  %v3187_v0 = vadd.f32 %v3171_v36, %v9518_v33  ;;  %v9522_v4 = vmax.f32 %v9521_v43, 0.0 }
 0x282   :  { %9503 = vst [vmem:[#allocation29_spill] sm:$0xff] %v6310_v31  ;;  %9504 = vst [vmem:[#allocation30_spill] sm:$0xff] %v6313_v55  ;;  %v3188_v29 = vadd.f32 %v3172_v21, %v9520_v10  ;;  %v9524_v8 = vmax.f32 %v9523_v56, 0.0  ;;  %v9532_v36 = vmax.f32 %v9531_v57, 0.0  ;;  %v9533_v21 = vld [vmem:[#allocation20_spill] sm:$0xff] }
 0x283   :  { %9505 = vst [vmem:[#allocation31_spill] sm:$0xff] %v6316_v37  ;;  %9506 = vst [vmem:[#allocation32_spill] sm:$0xff] %v6319_v22  ;;  %v3189_v32 = vadd.f32 %v3173_v7, %v9522_v4  ;;  %v9534_v10 = vmax.f32 %v9533_v21, 0.0  ;;  %v9535_v7 = vld [vmem:[#allocation21_spill] sm:$0xff] }
 0x284   :  { %9507 = vst [vmem:[#allocation33_spill] sm:$0xff] %v6322_v59  ;;  %9509 = vst [vmem:[#allocation34_spill] sm:$0xff] %v6325_v6  ;;  %v3190_v42 = vadd.f32 %v3174_v50, %v9524_v8  ;;  %v9525_v6 = vld [vmem:[#allocation16_spill] sm:$0xff]  ;;  %v3194_v33 = vadd.f32 %v3178_v38, %v9532_v36  ;;  %v9536_v4 = vmax.f32 %v9535_v7, 0.0  ;;  %v9537_v50 = vld [vmem:[#allocation22_spill] sm:$0xff]  ;;  %v1172_v7 = vadd.f32 %v3861_v14, %v310_v60 }
 0x285   :  { %9511 = vst [vmem:[#allocation35_spill] sm:$0xff] %v6328_v61  ;;  %9513 = vst [vmem:[#allocation36_spill] sm:$0xff] %v6331_v46  ;;  %v9526_v52 = vmax.f32 %v9525_v6, 0.0  ;;  %v9528_v46 = vmax.f32 %v9527_v47, 0.0  ;;  %v3195_v43 = vadd.f32 %v3179_v30, %v9534_v10  ;;  %v9538_v8 = vmax.f32 %v9537_v50, 0.0  ;;  %v9545_v38 = vld [vmem:[#allocation40_spill] sm:$0xff] }
 0x286   :  { %9515 = vst [vmem:[#allocation37_spill] sm:$0xff] %v6334_v54  ;;  %9516 = vst [vmem:[#allocation38_spill] sm:$0xff] %v6337_v58  ;;  %v9529_v54 = vld [vmem:[#allocation18_spill] sm:$0xff]  ;;  %v3196_v56 = vadd.f32 %v3180_v41, %v9536_v4  ;;  %v9546_v36 = vmax.f32 %v9545_v38, 0.0  ;;  %v9547_v21 = vld [vmem:[#allocation41_spill] sm:$0xff]  ;;  %v1171_v41 = vadd.f32 %v3859_v13, %v310_v60  ;;  %v1175_v4 = vadd.f32 %v3867_v17, %v310_v60 }
 0x287   :  { %v3191_v61 = vadd.f32 %v3175_v12, %v9526_v52  ;;  %v3192_v5 = vadd.f32 %v3176_v34, %v9528_v46  ;;  %v9530_v27 = vmax.f32 %v9529_v54, 0.0  ;;  %v3197_v6 = vadd.f32 %v3181_v24, %v9538_v8  ;;  %v9539_v12 = vld [vmem:[#allocation3_spill] sm:$0xff]  ;;  %v9541_v34 = vld [vmem:[#allocation4_spill] sm:$0xff] }
 0x288   :  { %v9540_v52 = vmax.f32 %v9539_v12, 0.0  ;;  %v9542_v46 = vmax.f32 %v9541_v34, 0.0  ;;  %v3201_v59 = vadd.f32 %v3185_v45, %v9546_v36  ;;  %v9548_v30 = vmax.f32 %v9547_v21, 0.0 }
 0x289   :  { %v3193_v58 = vadd.f32 %v3177_v9, %v9530_v27  ;;  %v9543_v9 = vld [vmem:[#allocation39_spill] sm:$0xff]  ;;  %v1173_v24 = vadd.f32 %v3863_v15, %v310_v60  ;;  %v1178_v50 = vadd.f32 %v8512_v1, %v310_v60  ;;  %v1179_v45 = vadd.f32 %v8514_v2, %v310_v60 }
 0x28a   :  { %v3198_v47 = vadd.f32 %v3182_v20, %v9540_v52  ;;  %v3199_v54 = vadd.f32 %v3183_v40, %v9542_v46  ;;  %v9544_v27 = vmax.f32 %v9543_v9, 0.0  ;;  %v3202_v10 = vadd.f32 %v3186_v26, %v9548_v30 }
 0x28b   :  { %v1174_v20 = vadd.f32 %v3865_v16, %v310_v60  ;;  %v1176_v40 = vadd.f32 %v3869_v18, %v310_v60  ;;  %v1180_v26 = vadd.f32 %v8516_v3, %v310_v60  ;;  %v1181_v8 = vadd.f32 %v8518_v23, %v310_v60 }
 0x28c   :  { %v3200_v57 = vadd.f32 %v3184_v49, %v9544_v27  ;;  %v1177_v49 = vadd.f32 %v3871_v19, %v310_v60  ;;  %v1182_v12 = vadd.f32 %v9508_v39, %v310_v60  ;;  %v1183_v52 = vadd.f32 %v9510_v44, %v310_v60 }
 0x28d   :  { %v1184_v34 = vadd.f32 %v9512_v35, %v310_v60  ;;  %v1185_v46 = vadd.f32 %v9514_v62, %v310_v60  ;;  %v1186_v9 = vadd.f32 %v3889_v28, %v310_v60  ;;  %v2195_v27 = vmax.f32 %v1171_v41, 0.0 }
 0x28e   :  { %v2196_v38 = vmax.f32 %v1172_v7, 0.0  ;;  %v2197_v36 = vmax.f32 %v1173_v24, 0.0  ;;  %v2198_v21 = vmax.f32 %v1174_v20, 0.0  ;;  %v2199_v30 = vmax.f32 %v1175_v4, 0.0  ;;  %v325_v4 = vpop.permute.xlu1 %324 }
 0x28f   :  { %v2200_v22 = vmax.f32 %v1176_v40, 0.0  ;;  %v2201_v37 = vmax.f32 %v1177_v49, 0.0  ;;  %v2202_v55 = vmax.f32 %v1178_v50, 0.0  ;;  %v2203_v31 = vmax.f32 %v1179_v45, 0.0 }
 0x290   :  { %v2204_v63 = vmax.f32 %v1180_v26, 0.0  ;;  %v2205_v53 = vmax.f32 %v1181_v8, 0.0  ;;  %v2206_v25 = vmax.f32 %v1182_v12, 0.0  ;;  %v2207_v51 = vmax.f32 %v1183_v52, 0.0 }
 0x291   :  { %v2208_v48 = vmax.f32 %v1184_v34, 0.0  ;;  %v2209_v11 = vmax.f32 %v1185_v46, 0.0  ;;  %v2210_v35 = vmax.f32 %v1186_v9, 0.0  ;;  %v3203_v44 = vadd.f32 %v3187_v0, %v2195_v27  ;;  %v9575_v27 = vld [vmem:[#allocation26_spill] sm:$0xff] }
 0x292   :  { %v3204_v62 = vadd.f32 %v3188_v29, %v2196_v38  ;;  %v3205_v39 = vadd.f32 %v3189_v32, %v2197_v36  ;;  %v3206_v60 = vadd.f32 %v3190_v42, %v2198_v21  ;;  %v3207_v41 = vadd.f32 %v3191_v61, %v2199_v30  ;;  %v9566_v29 = vld [vmem:[#allocation10_spill] sm:$0xff]  ;;  %v9579_v21 = vld [vmem:[#allocation28_spill] sm:$0xff] }
 0x293   :  { %v3208_v7 = vadd.f32 %v3192_v5, %v2200_v22  ;;  %v3209_v24 = vadd.f32 %v3193_v58, %v2201_v37  ;;  %v3210_v20 = vadd.f32 %v3194_v33, %v2202_v55  ;;  %v3211_v40 = vadd.f32 %v3195_v43, %v2203_v31  ;;  %v9560_v37 = vld [vmem:[#allocation7_spill] sm:$0xff]  ;;  %v9564_v58 = vld [vmem:[#allocation9_spill] sm:$0xff] }
 0x294   :  { %v3212_v49 = vadd.f32 %v3196_v56, %v2204_v63  ;;  %v3213_v50 = vadd.f32 %v3197_v6, %v2205_v53  ;;  %v3214_v45 = vadd.f32 %v3198_v47, %v2206_v25  ;;  %v3215_v26 = vadd.f32 %v3199_v54, %v2207_v51  ;;  %v9569_v54 = vld [vmem:[#allocation23_spill] sm:$0xff]  ;;  %v9573_v56 = vld [vmem:[#allocation25_spill] sm:$0xff] }
 0x295   :  { %v3216_v8 = vadd.f32 %v3200_v57, %v2208_v48  ;;  %v3217_v12 = vadd.f32 %v3201_v59, %v2209_v11  ;;  %v3218_v52 = vadd.f32 %v3202_v10, %v2210_v35  ;;  %v6404_v34 = vadd.f32 %v3859_v13, %v325_v4  ;;  %v9562_v59 = vld [vmem:[#allocation8_spill] sm:$0xff] }
 0x296   :  { %v6407_v0 = vadd.f32 %v3861_v14, %v325_v4  ;;  %v6410_v61 = vadd.f32 %v3863_v15, %v325_v4  ;;  %v6413_v55 = vadd.f32 %v3865_v16, %v325_v4  ;;  %v6416_v63 = vadd.f32 %v3867_v17, %v325_v4  ;;  %v9571_v10 = vld [vmem:[#allocation24_spill] sm:$0xff] }
 0x297   :  { %9549 = vst [vmem:[#allocation12_spill] sm:$0xff] %v6404_v34  ;;  %v6419_v51 = vadd.f32 %v3869_v18, %v325_v4  ;;  %v6422_v11 = vadd.f32 %v3871_v19, %v325_v4  ;;  %v6425_v48 = vadd.f32 %v8512_v1, %v325_v4  ;;  %v6428_v25 = vadd.f32 %v8514_v2, %v325_v4 }
 0x298   :  { %9550 = vst [vmem:[#allocation13_spill] sm:$0xff] %v6407_v0  ;;  %9551 = vst [vmem:[#allocation14_spill] sm:$0xff] %v6410_v61  ;;  %v6431_v53 = vadd.f32 %v8516_v3, %v325_v4  ;;  %v6434_v31 = vadd.f32 %v8518_v23, %v325_v4  ;;  %v6437_v22 = vadd.f32 %v9560_v37, %v325_v4  ;;  %v9570_v57 = vmax.f32 %v9569_v54, 0.0  ;;  %v9583_v54 = vld [vmem:[#allocation30_spill] sm:$0xff] }
 0x299   :  { %9552 = vst [vmem:[#allocation15_spill] sm:$0xff] %v6413_v55  ;;  %9553 = vst [vmem:[#allocation16_spill] sm:$0xff] %v6416_v63  ;;  %v6440_v35 = vadd.f32 %v9562_v59, %v325_v4  ;;  %v6443_v32 = vadd.f32 %v9564_v58, %v325_v4  ;;  %v6446_v42 = vadd.f32 %v9566_v29, %v325_v4  ;;  %v9572_v6 = vmax.f32 %v9571_v10, 0.0  ;;  %v320_v10 = vpop.permute.xlu0 %319 }
 0x29a   :  { %9554 = vst [vmem:[#allocation17_spill] sm:$0xff] %v6419_v51  ;;  %9555 = vst [vmem:[#allocation18_spill] sm:$0xff] %v6422_v11  ;;  %v6449_v5 = vadd.f32 %v3889_v28, %v325_v4  ;;  %v3219_v47 = vadd.f32 %v3203_v44, %v9570_v57  ;;  %v9574_v9 = vmax.f32 %v9573_v56, 0.0  ;;  %v9576_v33 = vmax.f32 %v9575_v27, 0.0 }
 0x29b   :  { %9556 = vst [vmem:[#allocation19_spill] sm:$0xff] %v6425_v48  ;;  %9557 = vst [vmem:[#allocation20_spill] sm:$0xff] %v6428_v25  ;;  %v3220_v46 = vadd.f32 %v3204_v62, %v9572_v6  ;;  %v9584_v44 = vmax.f32 %v9583_v54, 0.0  ;;  %v9585_v62 = vld [vmem:[#allocation31_spill] sm:$0xff] }
 0x29c   :  { %9558 = vst [vmem:[#allocation21_spill] sm:$0xff] %v6431_v53  ;;  %9559 = vst [vmem:[#allocation22_spill] sm:$0xff] %v6434_v31  ;;  %v3221_v43 = vadd.f32 %v3205_v39, %v9574_v9  ;;  %v3222_v38 = vadd.f32 %v3206_v60, %v9576_v33  ;;  %v9586_v6 = vmax.f32 %v9585_v62, 0.0  ;;  %v9587_v39 = vld [vmem:[#allocation32_spill] sm:$0xff]  ;;  %v9589_v60 = vld [vmem:[#allocation33_spill] sm:$0xff] }
 0x29d   :  { %9561 = vst [vmem:[#allocation3_spill] sm:$0xff] %v6437_v22  ;;  %9563 = vst [vmem:[#allocation4_spill] sm:$0xff] %v6440_v35  ;;  %v9577_v22 = vld [vmem:[#allocation27_spill] sm:$0xff]  ;;  %v3226_v57 = vadd.f32 %v3210_v20, %v9584_v44  ;;  %v9588_v9 = vmax.f32 %v9587_v39, 0.0  ;;  %v9590_v33 = vmax.f32 %v9589_v60, 0.0  ;;  %v9597_v20 = vld [vmem:[#allocation37_spill] sm:$0xff]  ;;  %v1204_v39 = vadd.f32 %v3861_v14, %v320_v10 }
 0x29e   :  { %9565 = vst [vmem:[#allocation39_spill] sm:$0xff] %v6443_v32  ;;  %9567 = vst [vmem:[#allocation40_spill] sm:$0xff] %v6446_v42  ;;  %v9578_v36 = vmax.f32 %v9577_v22, 0.0  ;;  %v9580_v32 = vmax.f32 %v9579_v21, 0.0  ;;  %v9581_v42 = vld [vmem:[#allocation29_spill] sm:$0xff]  ;;  %v3227_v56 = vadd.f32 %v3211_v40, %v9586_v6  ;;  %v9598_v44 = vmax.f32 %v9597_v20, 0.0 }
 0x29f   :  { %9568 = vst [vmem:[#allocation41_spill] sm:$0xff] %v6449_v5  ;;  %v9582_v4 = vmax.f32 %v9581_v42, 0.0  ;;  %v3228_v27 = vadd.f32 %v3212_v49, %v9588_v9  ;;  %v3229_v22 = vadd.f32 %v3213_v50, %v9590_v33  ;;  %v9599_v62 = vld [vmem:[#allocation38_spill] sm:$0xff]  ;;  %v1203_v49 = vadd.f32 %v3859_v13, %v320_v10 }
 0x2a0   :  { %v3223_v35 = vadd.f32 %v3207_v41, %v9578_v36  ;;  %v3224_v30 = vadd.f32 %v3208_v7, %v9580_v32  ;;  %v9591_v41 = vld [vmem:[#allocation34_spill] sm:$0xff]  ;;  %v9593_v7 = vld [vmem:[#allocation35_spill] sm:$0xff]  ;;  %v3233_v31 = vadd.f32 %v3217_v12, %v9598_v44  ;;  %v9600_v40 = vmax.f32 %v9599_v62, 0.0 }
 0x2a1   :  { %v3225_v5 = vadd.f32 %v3209_v24, %v9582_v4  ;;  %v9592_v36 = vmax.f32 %v9591_v41, 0.0  ;;  %v9594_v32 = vmax.f32 %v9593_v7, 0.0  ;;  %v9595_v24 = vld [vmem:[#allocation36_spill] sm:$0xff]  ;;  %v1205_v50 = vadd.f32 %v3863_v15, %v320_v10 }
 0x2a2   :  { %v9596_v4 = vmax.f32 %v9595_v24, 0.0  ;;  %v3234_v6 = vadd.f32 %v3218_v52, %v9600_v40  ;;  %v1207_v9 = vadd.f32 %v3867_v17, %v320_v10  ;;  %v1210_v60 = vadd.f32 %v8512_v1, %v320_v10 }
 0x2a3   :  { %v3230_v21 = vadd.f32 %v3214_v45, %v9592_v36  ;;  %v3231_v42 = vadd.f32 %v3215_v26, %v9594_v32  ;;  %v1206_v45 = vadd.f32 %v3865_v16, %v320_v10  ;;  %v1208_v26 = vadd.f32 %v3869_v18, %v320_v10 }
 0x2a4   :  { %v3232_v54 = vadd.f32 %v3216_v8, %v9596_v4  ;;  %v1209_v8 = vadd.f32 %v3871_v19, %v320_v10  ;;  %v1211_v12 = vadd.f32 %v8514_v2, %v320_v10  ;;  %v1212_v52 = vadd.f32 %v8516_v3, %v320_v10 }
 0x2a5   :  { %v1213_v33 = vadd.f32 %v8518_v23, %v320_v10  ;;  %v1214_v41 = vadd.f32 %v9560_v37, %v320_v10  ;;  %v1215_v36 = vadd.f32 %v9562_v59, %v320_v10  ;;  %v1216_v7 = vadd.f32 %v9564_v58, %v320_v10 }
 0x2a6   :  { %v1217_v32 = vadd.f32 %v9566_v29, %v320_v10  ;;  %v1218_v24 = vadd.f32 %v3889_v28, %v320_v10  ;;  %v2227_v4 = vmax.f32 %v1203_v49, 0.0  ;;  %v2228_v20 = vmax.f32 %v1204_v39, 0.0 }
 0x2a7   :  { %v2229_v44 = vmax.f32 %v1205_v50, 0.0  ;;  %v2230_v62 = vmax.f32 %v1206_v45, 0.0  ;;  %v2231_v40 = vmax.f32 %v1207_v9, 0.0  ;;  %v2232_v53 = vmax.f32 %v1208_v26, 0.0  ;;  %v335_v9 = vpop.permute.xlu1 %334 }
 0x2a8   :  { %v2233_v25 = vmax.f32 %v1209_v8, 0.0  ;;  %v2234_v48 = vmax.f32 %v1210_v60, 0.0  ;;  %v2235_v11 = vmax.f32 %v1211_v12, 0.0  ;;  %v2236_v51 = vmax.f32 %v1212_v52, 0.0 }
 0x2a9   :  { %v2237_v63 = vmax.f32 %v1213_v33, 0.0  ;;  %v2238_v55 = vmax.f32 %v1214_v41, 0.0  ;;  %v2239_v61 = vmax.f32 %v1215_v36, 0.0  ;;  %v2240_v0 = vmax.f32 %v1216_v7, 0.0 }
 0x2aa   :  { %v2241_v34 = vmax.f32 %v1217_v32, 0.0  ;;  %v2242_v58 = vmax.f32 %v1218_v24, 0.0  ;;  %v3235_v59 = vadd.f32 %v3219_v47, %v2227_v4  ;;  %v3236_v29 = vadd.f32 %v3220_v46, %v2228_v20  ;;  %v9618_v46 = vld [vmem:[#allocation10_spill] sm:$0xff]  ;;  %v9627_v4 = vld [vmem:[#allocation15_spill] sm:$0xff] }
 0x2ab   :  { %v3237_v37 = vadd.f32 %v3221_v43, %v2229_v44  ;;  %v3238_v10 = vadd.f32 %v3222_v38, %v2230_v62  ;;  %v3239_v49 = vadd.f32 %v3223_v35, %v2231_v40  ;;  %v3240_v39 = vadd.f32 %v3224_v30, %v2232_v53  ;;  %v9631_v62 = vld [vmem:[#allocation17_spill] sm:$0xff] }
 0x2ac   :  { %v3241_v50 = vadd.f32 %v3225_v5, %v2233_v25  ;;  %v3242_v45 = vadd.f32 %v3226_v57, %v2234_v48  ;;  %v3243_v26 = vadd.f32 %v3227_v56, %v2235_v11  ;;  %v3244_v8 = vadd.f32 %v3228_v27, %v2236_v51  ;;  %v9612_v25 = vld [vmem:[#allocation7_spill] sm:$0xff]  ;;  %v9616_v5 = vld [vmem:[#allocation9_spill] sm:$0xff]  ;;  %v9625_v27 = vld [vmem:[#allocation14_spill] sm:$0xff] }
 0x2ad   :  { %v3245_v60 = vadd.f32 %v3229_v22, %v2237_v63  ;;  %v3246_v12 = vadd.f32 %v3230_v21, %v2238_v55  ;;  %v3247_v52 = vadd.f32 %v3231_v42, %v2239_v61  ;;  %v3248_v33 = vadd.f32 %v3232_v54, %v2240_v0  ;;  %v9621_v42 = vld [vmem:[#allocation12_spill] sm:$0xff] }
 0x2ae   :  { %v3249_v41 = vadd.f32 %v3233_v31, %v2241_v34  ;;  %v3250_v36 = vadd.f32 %v3234_v6, %v2242_v58  ;;  %v6516_v7 = vadd.f32 %v3859_v13, %v335_v9  ;;  %v6519_v47 = vadd.f32 %v3861_v14, %v335_v9  ;;  %v9614_v31 = vld [vmem:[#allocation8_spill] sm:$0xff]  ;;  %v9623_v6 = vld [vmem:[#allocation13_spill] sm:$0xff] }
 0x2af   :  { %v6522_v35 = vadd.f32 %v3863_v15, %v335_v9  ;;  %v6525_v48 = vadd.f32 %v3865_v16, %v335_v9  ;;  %v6528_v51 = vadd.f32 %v3867_v17, %v335_v9  ;;  %v6531_v61 = vadd.f32 %v3869_v18, %v335_v9 }
 0x2b0   :  { %9601 = vst [vmem:[#allocation23_spill] sm:$0xff] %v6516_v7  ;;  %9602 = vst [vmem:[#allocation24_spill] sm:$0xff] %v6519_v47  ;;  %v6534_v34 = vadd.f32 %v3871_v19, %v335_v9  ;;  %v6537_v0 = vadd.f32 %v8512_v1, %v335_v9  ;;  %v6540_v55 = vadd.f32 %v8514_v2, %v335_v9  ;;  %v9622_v54 = vmax.f32 %v9621_v42, 0.0  ;;  %v9635_v42 = vld [vmem:[#allocation19_spill] sm:$0xff] }
 0x2b1   :  { %9603 = vst [vmem:[#allocation25_spill] sm:$0xff] %v6522_v35  ;;  %9604 = vst [vmem:[#allocation26_spill] sm:$0xff] %v6525_v48  ;;  %v6543_v63 = vadd.f32 %v8516_v3, %v335_v9  ;;  %v6546_v11 = vadd.f32 %v8518_v23, %v335_v9  ;;  %v6549_v53 = vadd.f32 %v9612_v25, %v335_v9  ;;  %v9624_v22 = vmax.f32 %v9623_v6, 0.0  ;;  %v330_v6 = vpop.permute.xlu0 %329 }
 0x2b2   :  { %9605 = vst [vmem:[#allocation27_spill] sm:$0xff] %v6528_v51  ;;  %9606 = vst [vmem:[#allocation28_spill] sm:$0xff] %v6531_v61  ;;  %v6552_v58 = vadd.f32 %v9614_v31, %v335_v9  ;;  %v6555_v43 = vadd.f32 %v9616_v5, %v335_v9  ;;  %v6558_v38 = vadd.f32 %v9618_v46, %v335_v9  ;;  %v9626_v24 = vmax.f32 %v9625_v27, 0.0 }
 0x2b3   :  { %9607 = vst [vmem:[#allocation29_spill] sm:$0xff] %v6534_v34  ;;  %9608 = vst [vmem:[#allocation30_spill] sm:$0xff] %v6537_v0  ;;  %v6561_v30 = vadd.f32 %v3889_v28, %v335_v9  ;;  %v3251_v21 = vadd.f32 %v3235_v59, %v9622_v54  ;;  %v3252_v32 = vadd.f32 %v3236_v29, %v9624_v22  ;;  %v9628_v57 = vmax.f32 %v9627_v4, 0.0  ;;  %v9637_v29 = vld [vmem:[#allocation20_spill] sm:$0xff] }
 0x2b4   :  { %9609 = vst [vmem:[#allocation31_spill] sm:$0xff] %v6540_v55  ;;  %9610 = vst [vmem:[#allocation32_spill] sm:$0xff] %v6543_v63  ;;  %v3253_v56 = vadd.f32 %v3237_v37, %v9626_v24  ;;  %v9636_v59 = vmax.f32 %v9635_v42, 0.0  ;;  %v9638_v22 = vmax.f32 %v9637_v29, 0.0  ;;  %v9639_v37 = vld [vmem:[#allocation21_spill] sm:$0xff] }
 0x2b5   :  { %9611 = vst [vmem:[#allocation33_spill] sm:$0xff] %v6546_v11  ;;  %9613 = vst [vmem:[#allocation34_spill] sm:$0xff] %v6549_v53  ;;  %v3254_v20 = vadd.f32 %v3238_v10, %v9628_v57  ;;  %v9629_v53 = vld [vmem:[#allocation16_spill] sm:$0xff]  ;;  %v9640_v24 = vmax.f32 %v9639_v37, 0.0  ;;  %v9641_v10 = vld [vmem:[#allocation22_spill] sm:$0xff]  ;;  %v1236_v37 = vadd.f32 %v3861_v14, %v330_v6 }
 0x2b6   :  { %9615 = vst [vmem:[#allocation35_spill] sm:$0xff] %v6552_v58  ;;  %9617 = vst [vmem:[#allocation36_spill] sm:$0xff] %v6555_v43  ;;  %v9630_v44 = vmax.f32 %v9629_v53, 0.0  ;;  %v9632_v43 = vmax.f32 %v9631_v62, 0.0  ;;  %v3258_v54 = vadd.f32 %v3242_v45, %v9636_v59  ;;  %v3259_v27 = vadd.f32 %v3243_v26, %v9638_v22  ;;  %v9649_v45 = vld [vmem:[#allocation40_spill] sm:$0xff]  ;;  %v9651_v29 = vld [vmem:[#allocation41_spill] sm:$0xff] }
 0x2b7   :  { %9619 = vst [vmem:[#allocation37_spill] sm:$0xff] %v6558_v38  ;;  %9620 = vst [vmem:[#allocation38_spill] sm:$0xff] %v6561_v30  ;;  %v9633_v38 = vld [vmem:[#allocation18_spill] sm:$0xff]  ;;  %v3260_v4 = vadd.f32 %v3244_v8, %v9640_v24  ;;  %v9642_v57 = vmax.f32 %v9641_v10, 0.0  ;;  %v9650_v59 = vmax.f32 %v9649_v45, 0.0  ;;  %v9652_v26 = vmax.f32 %v9651_v29, 0.0 }
 0x2b8   :  { %v3255_v58 = vadd.f32 %v3239_v49, %v9630_v44  ;;  %v3256_v40 = vadd.f32 %v3240_v39, %v9632_v43  ;;  %v9634_v9 = vmax.f32 %v9633_v38, 0.0  ;;  %v9643_v49 = vld [vmem:[#allocation3_spill] sm:$0xff]  ;;  %v9645_v39 = vld [vmem:[#allocation4_spill] sm:$0xff]  ;;  %v1235_v8 = vadd.f32 %v3859_v13, %v330_v6 }
 0x2b9   :  { %v3261_v53 = vadd.f32 %v3245_v60, %v9642_v57  ;;  %v9644_v44 = vmax.f32 %v9643_v49, 0.0  ;;  %v9646_v43 = vmax.f32 %v9645_v39, 0.0  ;;  %v3265_v11 = vadd.f32 %v3249_v41, %v9650_v59 }
 0x2ba   :  { %v3257_v30 = vadd.f32 %v3241_v50, %v9634_v9  ;;  %v9647_v50 = vld [vmem:[#allocation39_spill] sm:$0xff]  ;;  %v3266_v22 = vadd.f32 %v3250_v36, %v9652_v26  ;;  %v1237_v60 = vadd.f32 %v3863_v15, %v330_v6  ;;  %v1239_v24 = vadd.f32 %v3867_v17, %v330_v6 }
 0x2bb   :  { %v3262_v62 = vadd.f32 %v3246_v12, %v9644_v44  ;;  %v3263_v38 = vadd.f32 %v3247_v52, %v9646_v43  ;;  %v9648_v9 = vmax.f32 %v9647_v50, 0.0  ;;  %v1238_v12 = vadd.f32 %v3865_v16, %v330_v6 }
 0x2bc   :  { %v1240_v52 = vadd.f32 %v3869_v18, %v330_v6  ;;  %v1242_v10 = vadd.f32 %v8512_v1, %v330_v6  ;;  %v1243_v41 = vadd.f32 %v8514_v2, %v330_v6  ;;  %v1244_v36 = vadd.f32 %v8516_v3, %v330_v6 }
 0x2bd   :  { %v3264_v42 = vadd.f32 %v3248_v33, %v9648_v9  ;;  %v1241_v33 = vadd.f32 %v3871_v19, %v330_v6  ;;  %v1245_v57 = vadd.f32 %v8518_v23, %v330_v6  ;;  %v1246_v49 = vadd.f32 %v9612_v25, %v330_v6 }
 0x2be   :  { %v1247_v44 = vadd.f32 %v9614_v31, %v330_v6  ;;  %v1248_v39 = vadd.f32 %v9616_v5, %v330_v6  ;;  %v1249_v43 = vadd.f32 %v9618_v46, %v330_v6  ;;  %v1250_v50 = vadd.f32 %v3889_v28, %v330_v6 }
 0x2bf   :  { %v2259_v9 = vmax.f32 %v1235_v8, 0.0  ;;  %v2260_v45 = vmax.f32 %v1236_v37, 0.0  ;;  %v2261_v59 = vmax.f32 %v1237_v60, 0.0  ;;  %v2262_v29 = vmax.f32 %v1238_v12, 0.0 }
 0x2c0   :  { %v2263_v26 = vmax.f32 %v1239_v24, 0.0  ;;  %v2264_v63 = vmax.f32 %v1240_v52, 0.0  ;;  %v2265_v55 = vmax.f32 %v1241_v33, 0.0  ;;  %v2266_v0 = vmax.f32 %v1242_v10, 0.0  ;;  %v345_v24 = vpop.permute.xlu1 %344 }
 0x2c1   :  { %v2267_v34 = vmax.f32 %v1243_v41, 0.0  ;;  %v2268_v61 = vmax.f32 %v1244_v36, 0.0  ;;  %v2269_v51 = vmax.f32 %v1245_v57, 0.0  ;;  %v2270_v48 = vmax.f32 %v1246_v49, 0.0 }
 0x2c2   :  { %v2271_v35 = vmax.f32 %v1247_v44, 0.0  ;;  %v2272_v47 = vmax.f32 %v1248_v39, 0.0  ;;  %v2273_v7 = vmax.f32 %v1249_v43, 0.0  ;;  %v2274_v5 = vmax.f32 %v1250_v50, 0.0 }
 0x2c3   :  { %v3267_v31 = vadd.f32 %v3251_v21, %v2259_v9  ;;  %v3268_v46 = vadd.f32 %v3252_v32, %v2260_v45  ;;  %v3269_v25 = vadd.f32 %v3253_v56, %v2261_v59  ;;  %v3270_v6 = vadd.f32 %v3254_v20, %v2262_v29  ;;  %v9670_v32 = vld [vmem:[#allocation10_spill] sm:$0xff]  ;;  %v9683_v29 = vld [vmem:[#allocation28_spill] sm:$0xff] }
 0x2c4   :  { %v3271_v8 = vadd.f32 %v3255_v58, %v2263_v26  ;;  %v3272_v37 = vadd.f32 %v3256_v40, %v2264_v63  ;;  %v3273_v60 = vadd.f32 %v3257_v30, %v2265_v55  ;;  %v3274_v12 = vadd.f32 %v3258_v54, %v2266_v0  ;;  %v9664_v55 = vld [vmem:[#allocation7_spill] sm:$0xff]  ;;  %v9668_v30 = vld [vmem:[#allocation9_spill] sm:$0xff]  ;;  %v9679_v9 = vld [vmem:[#allocation26_spill] sm:$0xff] }
 0x2c5   :  { %v3275_v52 = vadd.f32 %v3259_v27, %v2267_v34  ;;  %v3276_v33 = vadd.f32 %v3260_v4, %v2268_v61  ;;  %v3277_v10 = vadd.f32 %v3261_v53, %v2269_v51  ;;  %v3278_v41 = vadd.f32 %v3262_v62, %v2270_v48  ;;  %v9677_v4 = vld [vmem:[#allocation25_spill] sm:$0xff] }
 0x2c6   :  { %v3279_v36 = vadd.f32 %v3263_v38, %v2271_v35  ;;  %v3280_v57 = vadd.f32 %v3264_v42, %v2272_v47  ;;  %v3281_v49 = vadd.f32 %v3265_v11, %v2273_v7  ;;  %v3282_v44 = vadd.f32 %v3266_v22, %v2274_v5  ;;  %v9666_v11 = vld [vmem:[#allocation8_spill] sm:$0xff]  ;;  %v9673_v38 = vld [vmem:[#allocation23_spill] sm:$0xff] }
 0x2c7   :  { %v6628_v39 = vadd.f32 %v3859_v13, %v345_v24  ;;  %v6631_v21 = vadd.f32 %v3861_v14, %v345_v24  ;;  %v6634_v58 = vadd.f32 %v3863_v15, %v345_v24  ;;  %v6637_v0 = vadd.f32 %v3865_v16, %v345_v24  ;;  %v9675_v22 = vld [vmem:[#allocation24_spill] sm:$0xff] }
 0x2c8   :  { %v6640_v61 = vadd.f32 %v3867_v17, %v345_v24  ;;  %v6643_v35 = vadd.f32 %v3869_v18, %v345_v24  ;;  %v6646_v7 = vadd.f32 %v3871_v19, %v345_v24  ;;  %v6649_v47 = vadd.f32 %v8512_v1, %v345_v24 }
 0x2c9   :  { %9653 = vst [vmem:[#allocation12_spill] sm:$0xff] %v6628_v39  ;;  %9654 = vst [vmem:[#allocation13_spill] sm:$0xff] %v6631_v21  ;;  %v6652_v48 = vadd.f32 %v8514_v2, %v345_v24  ;;  %v6655_v51 = vadd.f32 %v8516_v3, %v345_v24  ;;  %v6658_v34 = vadd.f32 %v8518_v23, %v345_v24  ;;  %v9674_v42 = vmax.f32 %v9673_v38, 0.0  ;;  %v9687_v38 = vld [vmem:[#allocation30_spill] sm:$0xff] }
 0x2ca   :  { %9655 = vst [vmem:[#allocation14_spill] sm:$0xff] %v6634_v58  ;;  %9656 = vst [vmem:[#allocation15_spill] sm:$0xff] %v6637_v0  ;;  %v6661_v63 = vadd.f32 %v9664_v55, %v345_v24  ;;  %v6664_v5 = vadd.f32 %v9666_v11, %v345_v24  ;;  %v6667_v56 = vadd.f32 %v9668_v30, %v345_v24  ;;  %v9676_v53 = vmax.f32 %v9675_v22, 0.0  ;;  %v340_v22 = vpop.permute.xlu0 %339 }
 0x2cb   :  { %9657 = vst [vmem:[#allocation16_spill] sm:$0xff] %v6640_v61  ;;  %9658 = vst [vmem:[#allocation17_spill] sm:$0xff] %v6643_v35  ;;  %v6670_v20 = vadd.f32 %v9670_v32, %v345_v24  ;;  %v6673_v40 = vadd.f32 %v3889_v28, %v345_v24  ;;  %v3283_v62 = vadd.f32 %v3267_v31, %v9674_v42  ;;  %v9678_v50 = vmax.f32 %v9677_v4, 0.0 }
 0x2cc   :  { %9659 = vst [vmem:[#allocation18_spill] sm:$0xff] %v6646_v7  ;;  %9660 = vst [vmem:[#allocation19_spill] sm:$0xff] %v6649_v47  ;;  %v3284_v43 = vadd.f32 %v3268_v46, %v9676_v53  ;;  %v9680_v54 = vmax.f32 %v9679_v9, 0.0  ;;  %v9688_v31 = vmax.f32 %v9687_v38, 0.0  ;;  %v9689_v46 = vld [vmem:[#allocation31_spill] sm:$0xff] }
 0x2cd   :  { %9661 = vst [vmem:[#allocation20_spill] sm:$0xff] %v6652_v48  ;;  %9662 = vst [vmem:[#allocation21_spill] sm:$0xff] %v6655_v51  ;;  %v3285_v27 = vadd.f32 %v3269_v25, %v9678_v50  ;;  %v9690_v53 = vmax.f32 %v9689_v46, 0.0  ;;  %v9691_v25 = vld [vmem:[#allocation32_spill] sm:$0xff]  ;;  %v9703_v46 = vld [vmem:[#allocation38_spill] sm:$0xff] }
 0x2ce   :  { %9663 = vst [vmem:[#allocation22_spill] sm:$0xff] %v6658_v34  ;;  %9665 = vst [vmem:[#allocation3_spill] sm:$0xff] %v6661_v63  ;;  %v3286_v45 = vadd.f32 %v3270_v6, %v9680_v54  ;;  %v9681_v63 = vld [vmem:[#allocation27_spill] sm:$0xff]  ;;  %v3290_v42 = vadd.f32 %v3274_v12, %v9688_v31  ;;  %v9692_v50 = vmax.f32 %v9691_v25, 0.0  ;;  %v9693_v6 = vld [vmem:[#allocation33_spill] sm:$0xff]  ;;  %v1268_v25 = vadd.f32 %v3861_v14, %v340_v22 }
 0x2cf   :  { %9667 = vst [vmem:[#allocation4_spill] sm:$0xff] %v6664_v5  ;;  %9669 = vst [vmem:[#allocation39_spill] sm:$0xff] %v6667_v56  ;;  %v9682_v59 = vmax.f32 %v9681_v63, 0.0  ;;  %v9684_v56 = vmax.f32 %v9683_v29, 0.0  ;;  %v3291_v4 = vadd.f32 %v3275_v52, %v9690_v53  ;;  %v9694_v54 = vmax.f32 %v9693_v6, 0.0  ;;  %v9701_v12 = vld [vmem:[#allocation37_spill] sm:$0xff] }
 0x2d0   :  { %9671 = vst [vmem:[#allocation40_spill] sm:$0xff] %v6670_v20  ;;  %9672 = vst [vmem:[#allocation41_spill] sm:$0xff] %v6673_v40  ;;  %v9685_v20 = vld [vmem:[#allocation29_spill] sm:$0xff]  ;;  %v3292_v9 = vadd.f32 %v3276_v33, %v9692_v50  ;;  %v9702_v31 = vmax.f32 %v9701_v12, 0.0  ;;  %v9704_v52 = vmax.f32 %v9703_v46, 0.0  ;;  %v1267_v33 = vadd.f32 %v3859_v13, %v340_v22 }
 0x2d1   :  { %v3287_v5 = vadd.f32 %v3271_v8, %v9682_v59  ;;  %v3288_v26 = vadd.f32 %v3272_v37, %v9684_v56  ;;  %v9686_v24 = vmax.f32 %v9685_v20, 0.0  ;;  %v3293_v63 = vadd.f32 %v3277_v10, %v9694_v54  ;;  %v9695_v8 = vld [vmem:[#allocation34_spill] sm:$0xff]  ;;  %v9697_v37 = vld [vmem:[#allocation35_spill] sm:$0xff] }
 0x2d2   :  { %v9696_v59 = vmax.f32 %v9695_v8, 0.0  ;;  %v9698_v56 = vmax.f32 %v9697_v37, 0.0  ;;  %v3297_v34 = vadd.f32 %v3281_v49, %v9702_v31  ;;  %v3298_v53 = vadd.f32 %v3282_v44, %v9704_v52 }
 0x2d3   :  { %v3289_v40 = vadd.f32 %v3273_v60, %v9686_v24  ;;  %v9699_v60 = vld [vmem:[#allocation36_spill] sm:$0xff]  ;;  %v1269_v10 = vadd.f32 %v3863_v15, %v340_v22  ;;  %v1271_v50 = vadd.f32 %v3867_v17, %v340_v22  ;;  %v1274_v6 = vadd.f32 %v8512_v1, %v340_v22 }
 0x2d4   :  { %v3294_v29 = vadd.f32 %v3278_v41, %v9696_v59  ;;  %v3295_v20 = vadd.f32 %v3279_v36, %v9698_v56  ;;  %v9700_v24 = vmax.f32 %v9699_v60, 0.0  ;;  %v1270_v41 = vadd.f32 %v3865_v16, %v340_v22 }
 0x2d5   :  { %v1272_v36 = vadd.f32 %v3869_v18, %v340_v22  ;;  %v1275_v49 = vadd.f32 %v8514_v2, %v340_v22  ;;  %v1276_v44 = vadd.f32 %v8516_v3, %v340_v22  ;;  %v1277_v54 = vadd.f32 %v8518_v23, %v340_v22 }
 0x2d6   :  { %v3296_v38 = vadd.f32 %v3280_v57, %v9700_v24  ;;  %v1273_v57 = vadd.f32 %v3871_v19, %v340_v22  ;;  %v1278_v8 = vadd.f32 %v9664_v55, %v340_v22  ;;  %v1279_v59 = vadd.f32 %v9666_v11, %v340_v22 }
 0x2d7   :  { %v1280_v37 = vadd.f32 %v9668_v30, %v340_v22  ;;  %v1281_v56 = vadd.f32 %v9670_v32, %v340_v22  ;;  %v1282_v60 = vadd.f32 %v3889_v28, %v340_v22  ;;  %v2291_v24 = vmax.f32 %v1267_v33, 0.0 }
 0x2d8   :  { %v2292_v12 = vmax.f32 %v1268_v25, 0.0  ;;  %v2293_v31 = vmax.f32 %v1269_v10, 0.0  ;;  %v2294_v46 = vmax.f32 %v1270_v41, 0.0  ;;  %v2295_v52 = vmax.f32 %v1271_v50, 0.0  ;;  %v355_v50 = vpop.permute.xlu1 %354 }
 0x2d9   :  { %v2296_v51 = vmax.f32 %v1272_v36, 0.0  ;;  %v2297_v48 = vmax.f32 %v1273_v57, 0.0  ;;  %v2298_v47 = vmax.f32 %v1274_v6, 0.0  ;;  %v2299_v7 = vmax.f32 %v1275_v49, 0.0 }
 0x2da   :  { %v2300_v35 = vmax.f32 %v1276_v44, 0.0  ;;  %v2301_v61 = vmax.f32 %v1277_v54, 0.0  ;;  %v2302_v0 = vmax.f32 %v1278_v8, 0.0  ;;  %v2303_v58 = vmax.f32 %v1279_v59, 0.0 }
 0x2db   :  { %v2304_v21 = vmax.f32 %v1280_v37, 0.0  ;;  %v2305_v39 = vmax.f32 %v1281_v56, 0.0  ;;  %v2306_v30 = vmax.f32 %v1282_v60, 0.0  ;;  %v3299_v11 = vadd.f32 %v3283_v62, %v2291_v24  ;;  %v9731_v24 = vld [vmem:[#allocation15_spill] sm:$0xff] }
 0x2dc   :  { %v3300_v32 = vadd.f32 %v3284_v43, %v2292_v12  ;;  %v3301_v55 = vadd.f32 %v3285_v27, %v2293_v31  ;;  %v3302_v22 = vadd.f32 %v3286_v45, %v2294_v46  ;;  %v3303_v33 = vadd.f32 %v3287_v5, %v2295_v52  ;;  %v9722_v43 = vld [vmem:[#allocation10_spill] sm:$0xff]  ;;  %v9735_v46 = vld [vmem:[#allocation17_spill] sm:$0xff] }
 0x2dd   :  { %v3304_v25 = vadd.f32 %v3288_v26, %v2296_v51  ;;  %v3305_v10 = vadd.f32 %v3289_v40, %v2297_v48  ;;  %v3306_v41 = vadd.f32 %v3290_v42, %v2298_v47  ;;  %v3307_v36 = vadd.f32 %v3291_v4, %v2299_v7  ;;  %v9716_v48 = vld [vmem:[#allocation7_spill] sm:$0xff]  ;;  %v9720_v40 = vld [vmem:[#allocation9_spill] sm:$0xff] }
 0x2de   :  { %v3308_v57 = vadd.f32 %v3292_v9, %v2300_v35  ;;  %v3309_v6 = vadd.f32 %v3293_v63, %v2301_v61  ;;  %v3310_v49 = vadd.f32 %v3294_v29, %v2302_v0  ;;  %v3311_v44 = vadd.f32 %v3295_v20, %v2303_v58  ;;  %v9725_v20 = vld [vmem:[#allocation12_spill] sm:$0xff]  ;;  %v9729_v9 = vld [vmem:[#allocation14_spill] sm:$0xff] }
 0x2df   :  { %v3312_v54 = vadd.f32 %v3296_v38, %v2304_v21  ;;  %v3313_v8 = vadd.f32 %v3297_v34, %v2305_v39  ;;  %v3314_v59 = vadd.f32 %v3298_v53, %v2306_v30  ;;  %v6740_v37 = vadd.f32 %v3859_v13, %v355_v50  ;;  %v9718_v34 = vld [vmem:[#allocation8_spill] sm:$0xff]  ;;  %v9727_v53 = vld [vmem:[#allocation13_spill] sm:$0xff] }
 0x2e0   :  { %v6743_v62 = vadd.f32 %v3861_v14, %v355_v50  ;;  %v6746_v5 = vadd.f32 %v3863_v15, %v355_v50  ;;  %v6749_v47 = vadd.f32 %v3865_v16, %v355_v50  ;;  %v6752_v35 = vadd.f32 %v3867_v17, %v355_v50 }
 0x2e1   :  { %9705 = vst [vmem:[#allocation23_spill] sm:$0xff] %v6740_v37  ;;  %v6755_v58 = vadd.f32 %v3869_v18, %v355_v50  ;;  %v6758_v39 = vadd.f32 %v3871_v19, %v355_v50  ;;  %v6761_v21 = vadd.f32 %v8512_v1, %v355_v50  ;;  %v6764_v0 = vadd.f32 %v8514_v2, %v355_v50 }
 0x2e2   :  { %9706 = vst [vmem:[#allocation24_spill] sm:$0xff] %v6743_v62  ;;  %9707 = vst [vmem:[#allocation25_spill] sm:$0xff] %v6746_v5  ;;  %v6767_v61 = vadd.f32 %v8516_v3, %v355_v50  ;;  %v6770_v7 = vadd.f32 %v8518_v23, %v355_v50  ;;  %v6773_v51 = vadd.f32 %v9716_v48, %v355_v50  ;;  %v9726_v38 = vmax.f32 %v9725_v20, 0.0  ;;  %v9739_v20 = vld [vmem:[#allocation19_spill] sm:$0xff] }
 0x2e3   :  { %9708 = vst [vmem:[#allocation26_spill] sm:$0xff] %v6749_v47  ;;  %9709 = vst [vmem:[#allocation27_spill] sm:$0xff] %v6752_v35  ;;  %v6776_v30 = vadd.f32 %v9718_v34, %v355_v50  ;;  %v6779_v27 = vadd.f32 %v9720_v40, %v355_v50  ;;  %v6782_v45 = vadd.f32 %v9722_v43, %v355_v50  ;;  %v9728_v63 = vmax.f32 %v9727_v53, 0.0  ;;  %v350_v53 = vpop.permute.xlu0 %349 }
 0x2e4   :  { %9710 = vst [vmem:[#allocation28_spill] sm:$0xff] %v6755_v58  ;;  %9711 = vst [vmem:[#allocation29_spill] sm:$0xff] %v6758_v39  ;;  %v6785_v26 = vadd.f32 %v3889_v28, %v355_v50  ;;  %v3315_v29 = vadd.f32 %v3299_v11, %v9726_v38  ;;  %v9730_v60 = vmax.f32 %v9729_v9, 0.0  ;;  %v9732_v42 = vmax.f32 %v9731_v24, 0.0 }
 0x2e5   :  { %9712 = vst [vmem:[#allocation30_spill] sm:$0xff] %v6761_v21  ;;  %9713 = vst [vmem:[#allocation31_spill] sm:$0xff] %v6764_v0  ;;  %v3316_v56 = vadd.f32 %v3300_v32, %v9728_v63  ;;  %v9740_v11 = vmax.f32 %v9739_v20, 0.0  ;;  %v9741_v32 = vld [vmem:[#allocation20_spill] sm:$0xff] }
 0x2e6   :  { %9714 = vst [vmem:[#allocation32_spill] sm:$0xff] %v6767_v61  ;;  %9715 = vst [vmem:[#allocation33_spill] sm:$0xff] %v6770_v7  ;;  %v3317_v4 = vadd.f32 %v3301_v55, %v9730_v60  ;;  %v3318_v12 = vadd.f32 %v3302_v22, %v9732_v42  ;;  %v9742_v63 = vmax.f32 %v9741_v32, 0.0  ;;  %v9743_v55 = vld [vmem:[#allocation21_spill] sm:$0xff]  ;;  %v9745_v22 = vld [vmem:[#allocation22_spill] sm:$0xff] }
 0x2e7   :  { %9717 = vst [vmem:[#allocation34_spill] sm:$0xff] %v6773_v51  ;;  %9719 = vst [vmem:[#allocation35_spill] sm:$0xff] %v6776_v30  ;;  %v9733_v51 = vld [vmem:[#allocation16_spill] sm:$0xff]  ;;  %v3322_v38 = vadd.f32 %v3306_v41, %v9740_v11  ;;  %v9744_v60 = vmax.f32 %v9743_v55, 0.0  ;;  %v9746_v42 = vmax.f32 %v9745_v22, 0.0  ;;  %v9755_v32 = vld [vmem:[#allocation41_spill] sm:$0xff]  ;;  %v1300_v55 = vadd.f32 %v3861_v14, %v350_v53 }
 0x2e8   :  { %9721 = vst [vmem:[#allocation36_spill] sm:$0xff] %v6779_v27  ;;  %9723 = vst [vmem:[#allocation37_spill] sm:$0xff] %v6782_v45  ;;  %v9734_v31 = vmax.f32 %v9733_v51, 0.0  ;;  %v9736_v27 = vmax.f32 %v9735_v46, 0.0  ;;  %v9737_v45 = vld [vmem:[#allocation18_spill] sm:$0xff]  ;;  %v3323_v9 = vadd.f32 %v3307_v36, %v9742_v63  ;;  %v9753_v41 = vld [vmem:[#allocation40_spill] sm:$0xff]  ;;  %v1306_v22 = vadd.f32 %v8512_v1, %v350_v53 }
 0x2e9   :  { %9724 = vst [vmem:[#allocation38_spill] sm:$0xff] %v6785_v26  ;;  %v9738_v50 = vmax.f32 %v9737_v45, 0.0  ;;  %v3324_v24 = vadd.f32 %v3308_v57, %v9744_v60  ;;  %v3325_v51 = vadd.f32 %v3309_v6, %v9746_v42  ;;  %v9754_v11 = vmax.f32 %v9753_v41, 0.0 }
 0x2ea   :  { %v3319_v30 = vadd.f32 %v3303_v33, %v9734_v31  ;;  %v3320_v52 = vadd.f32 %v3304_v25, %v9736_v27  ;;  %v9747_v33 = vld [vmem:[#allocation3_spill] sm:$0xff]  ;;  %v9749_v25 = vld [vmem:[#allocation4_spill] sm:$0xff]  ;;  %v9756_v36 = vmax.f32 %v9755_v32, 0.0  ;;  %v1299_v57 = vadd.f32 %v3859_v13, %v350_v53 }
 0x2eb   :  { %v3321_v26 = vadd.f32 %v3305_v10, %v9738_v50  ;;  %v9748_v31 = vmax.f32 %v9747_v33, 0.0  ;;  %v9750_v27 = vmax.f32 %v9749_v25, 0.0  ;;  %v9751_v10 = vld [vmem:[#allocation39_spill] sm:$0xff]  ;;  %v3329_v7 = vadd.f32 %v3313_v8, %v9754_v11 }
 0x2ec   :  { %v9752_v50 = vmax.f32 %v9751_v10, 0.0  ;;  %v3330_v63 = vadd.f32 %v3314_v59, %v9756_v36  ;;  %v1301_v6 = vadd.f32 %v3863_v15, %v350_v53  ;;  %v1303_v60 = vadd.f32 %v3867_v17, %v350_v53 }
 0x2ed   :  { %v3326_v46 = vadd.f32 %v3310_v49, %v9748_v31  ;;  %v3327_v45 = vadd.f32 %v3311_v44, %v9750_v27  ;;  %v1302_v49 = vadd.f32 %v3865_v16, %v350_v53  ;;  %v1304_v44 = vadd.f32 %v3869_v18, %v350_v53 }
 0x2ee   :  { %v3328_v20 = vadd.f32 %v3312_v54, %v9752_v50  ;;  %v1305_v54 = vadd.f32 %v3871_v19, %v350_v53  ;;  %v1307_v8 = vadd.f32 %v8514_v2, %v350_v53  ;;  %v1308_v59 = vadd.f32 %v8516_v3, %v350_v53 }
 0x2ef   :  { %v1309_v42 = vadd.f32 %v8518_v23, %v350_v53  ;;  %v1310_v33 = vadd.f32 %v9716_v48, %v350_v53  ;;  %v1311_v31 = vadd.f32 %v9718_v34, %v350_v53  ;;  %v1312_v25 = vadd.f32 %v9720_v40, %v350_v53 }
 0x2f0   :  { %v1313_v27 = vadd.f32 %v9722_v43, %v350_v53  ;;  %v1314_v10 = vadd.f32 %v3889_v28, %v350_v53  ;;  %v2323_v50 = vmax.f32 %v1299_v57, 0.0  ;;  %v2324_v41 = vmax.f32 %v1300_v55, 0.0 }
 0x2f1   :  { %v2325_v11 = vmax.f32 %v1301_v6, 0.0  ;;  %v2326_v32 = vmax.f32 %v1302_v49, 0.0  ;;  %v2327_v36 = vmax.f32 %v1303_v60, 0.0  ;;  %v2328_v61 = vmax.f32 %v1304_v44, 0.0  ;;  %v365_v60 = vpop.permute.xlu1 %364 }
 0x2f2   :  { %v2329_v0 = vmax.f32 %v1305_v54, 0.0  ;;  %v2330_v21 = vmax.f32 %v1306_v22, 0.0  ;;  %v2331_v39 = vmax.f32 %v1307_v8, 0.0  ;;  %v2332_v58 = vmax.f32 %v1308_v59, 0.0 }
 0x2f3   :  { %v2333_v35 = vmax.f32 %v1309_v42, 0.0  ;;  %v2334_v47 = vmax.f32 %v1310_v33, 0.0  ;;  %v2335_v5 = vmax.f32 %v1311_v31, 0.0  ;;  %v2336_v62 = vmax.f32 %v1312_v25, 0.0 }
 0x2f4   :  { %v2337_v37 = vmax.f32 %v1313_v27, 0.0  ;;  %v2338_v40 = vmax.f32 %v1314_v10, 0.0  ;;  %v3331_v34 = vadd.f32 %v3315_v29, %v2323_v50  ;;  %v3332_v43 = vadd.f32 %v3316_v56, %v2324_v41  ;;  %v9774_v56 = vld [vmem:[#allocation10_spill] sm:$0xff] }
 0x2f5   :  { %v3333_v48 = vadd.f32 %v3317_v4, %v2325_v11  ;;  %v3334_v53 = vadd.f32 %v3318_v12, %v2326_v32  ;;  %v3335_v57 = vadd.f32 %v3319_v30, %v2327_v36  ;;  %v3336_v55 = vadd.f32 %v3320_v52, %v2328_v61  ;;  %v9783_v50 = vld [vmem:[#allocation26_spill] sm:$0xff]  ;;  %v9787_v32 = vld [vmem:[#allocation28_spill] sm:$0xff] }
 0x2f6   :  { %v3337_v6 = vadd.f32 %v3321_v26, %v2329_v0  ;;  %v3338_v49 = vadd.f32 %v3322_v38, %v2330_v21  ;;  %v3339_v44 = vadd.f32 %v3323_v9, %v2331_v39  ;;  %v3340_v54 = vadd.f32 %v3324_v24, %v2332_v58  ;;  %v9768_v0 = vld [vmem:[#allocation7_spill] sm:$0xff]  ;;  %v9772_v26 = vld [vmem:[#allocation9_spill] sm:$0xff] }
 0x2f7   :  { %v3341_v22 = vadd.f32 %v3325_v51, %v2333_v35  ;;  %v3342_v8 = vadd.f32 %v3326_v46, %v2334_v47  ;;  %v3343_v59 = vadd.f32 %v3327_v45, %v2335_v5  ;;  %v3344_v42 = vadd.f32 %v3328_v20, %v2336_v62  ;;  %v9777_v45 = vld [vmem:[#allocation23_spill] sm:$0xff]  ;;  %v9781_v24 = vld [vmem:[#allocation25_spill] sm:$0xff] }
 0x2f8   :  { %v3345_v33 = vadd.f32 %v3329_v7, %v2337_v37  ;;  %v3346_v31 = vadd.f32 %v3330_v63, %v2338_v40  ;;  %v6852_v25 = vadd.f32 %v3859_v13, %v365_v60  ;;  %v6855_v29 = vadd.f32 %v3861_v14, %v365_v60  ;;  %v9770_v7 = vld [vmem:[#allocation8_spill] sm:$0xff] }
 0x2f9   :  { %v6858_v30 = vadd.f32 %v3863_v15, %v365_v60  ;;  %v6861_v21 = vadd.f32 %v3865_v16, %v365_v60  ;;  %v6864_v58 = vadd.f32 %v3867_v17, %v365_v60  ;;  %v6867_v5 = vadd.f32 %v3869_v18, %v365_v60  ;;  %v9779_v63 = vld [vmem:[#allocation24_spill] sm:$0xff] }
 0x2fa   :  { %9757 = vst [vmem:[#allocation12_spill] sm:$0xff] %v6852_v25  ;;  %9758 = vst [vmem:[#allocation13_spill] sm:$0xff] %v6855_v29  ;;  %v6870_v37 = vadd.f32 %v3871_v19, %v365_v60  ;;  %v6873_v62 = vadd.f32 %v8512_v1, %v365_v60  ;;  %v6876_v47 = vadd.f32 %v8514_v2, %v365_v60  ;;  %v9778_v20 = vmax.f32 %v9777_v45, 0.0  ;;  %v9791_v45 = vld [vmem:[#allocation30_spill] sm:$0xff] }
 0x2fb   :  { %9759 = vst [vmem:[#allocation14_spill] sm:$0xff] %v6858_v30  ;;  %9760 = vst [vmem:[#allocation15_spill] sm:$0xff] %v6861_v21  ;;  %v6879_v35 = vadd.f32 %v8516_v3, %v365_v60  ;;  %v6882_v39 = vadd.f32 %v8518_v23, %v365_v60  ;;  %v6885_v61 = vadd.f32 %v9768_v0, %v365_v60  ;;  %v9780_v51 = vmax.f32 %v9779_v63, 0.0  ;;  %v360_v63 = vpop.permute.xlu0 %359 }
 0x2fc   :  { %9761 = vst [vmem:[#allocation16_spill] sm:$0xff] %v6864_v58  ;;  %9762 = vst [vmem:[#allocation17_spill] sm:$0xff] %v6867_v5  ;;  %v6888_v40 = vadd.f32 %v9770_v7, %v365_v60  ;;  %v6891_v4 = vadd.f32 %v9772_v26, %v365_v60  ;;  %v6894_v12 = vadd.f32 %v9774_v56, %v365_v60  ;;  %v9782_v10 = vmax.f32 %v9781_v24, 0.0 }
 0x2fd   :  { %9763 = vst [vmem:[#allocation18_spill] sm:$0xff] %v6870_v37  ;;  %9764 = vst [vmem:[#allocation19_spill] sm:$0xff] %v6873_v62  ;;  %v6897_v52 = vadd.f32 %v3889_v28, %v365_v60  ;;  %v3347_v46 = vadd.f32 %v3331_v34, %v9778_v20  ;;  %v3348_v27 = vadd.f32 %v3332_v43, %v9780_v51  ;;  %v9784_v38 = vmax.f32 %v9783_v50, 0.0  ;;  %v9793_v43 = vld [vmem:[#allocation31_spill] sm:$0xff] }
 0x2fe   :  { %9765 = vst [vmem:[#allocation20_spill] sm:$0xff] %v6876_v47  ;;  %9766 = vst [vmem:[#allocation21_spill] sm:$0xff] %v6879_v35  ;;  %v3349_v9 = vadd.f32 %v3333_v48, %v9782_v10  ;;  %v9792_v34 = vmax.f32 %v9791_v45, 0.0  ;;  %v9794_v51 = vmax.f32 %v9793_v43, 0.0  ;;  %v9795_v48 = vld [vmem:[#allocation32_spill] sm:$0xff]  ;;  %v9807_v43 = vld [vmem:[#allocation38_spill] sm:$0xff] }
 0x2ff   :  { %9767 = vst [vmem:[#allocation22_spill] sm:$0xff] %v6882_v39  ;;  %9769 = vst [vmem:[#allocation3_spill] sm:$0xff] %v6885_v61  ;;  %v3350_v41 = vadd.f32 %v3334_v53, %v9784_v38  ;;  %v9785_v61 = vld [vmem:[#allocation27_spill] sm:$0xff]  ;;  %v9796_v10 = vmax.f32 %v9795_v48, 0.0  ;;  %v9797_v53 = vld [vmem:[#allocation33_spill] sm:$0xff]  ;;  %v1332_v48 = vadd.f32 %v3861_v14, %v360_v63 }
 0x300   :  { %9771 = vst [vmem:[#allocation4_spill] sm:$0xff] %v6888_v40  ;;  %9773 = vst [vmem:[#allocation39_spill] sm:$0xff] %v6891_v4  ;;  %v9786_v11 = vmax.f32 %v9785_v61, 0.0  ;;  %v9788_v4 = vmax.f32 %v9787_v32, 0.0  ;;  %v3354_v20 = vadd.f32 %v3338_v49, %v9792_v34  ;;  %v3355_v24 = vadd.f32 %v3339_v44, %v9794_v51  ;;  %v9805_v49 = vld [vmem:[#allocation37_spill] sm:$0xff] }
 0x301   :  { %9775 = vst [vmem:[#allocation40_spill] sm:$0xff] %v6894_v12  ;;  %9776 = vst [vmem:[#allocation41_spill] sm:$0xff] %v6897_v52  ;;  %v9789_v12 = vld [vmem:[#allocation29_spill] sm:$0xff]  ;;  %v3356_v50 = vadd.f32 %v3340_v54, %v9796_v10  ;;  %v9798_v38 = vmax.f32 %v9797_v53, 0.0  ;;  %v9806_v34 = vmax.f32 %v9805_v49, 0.0  ;;  %v9808_v44 = vmax.f32 %v9807_v43, 0.0 }
 0x302   :  { %v3351_v40 = vadd.f32 %v3335_v57, %v9786_v11  ;;  %v3352_v36 = vadd.f32 %v3336_v55, %v9788_v4  ;;  %v9790_v60 = vmax.f32 %v9789_v12, 0.0  ;;  %v9799_v57 = vld [vmem:[#allocation34_spill] sm:$0xff]  ;;  %v9801_v55 = vld [vmem:[#allocation35_spill] sm:$0xff]  ;;  %v1331_v54 = vadd.f32 %v3859_v13, %v360_v63 }
 0x303   :  { %v3357_v61 = vadd.f32 %v3341_v22, %v9798_v38  ;;  %v9800_v11 = vmax.f32 %v9799_v57, 0.0  ;;  %v9802_v4 = vmax.f32 %v9801_v55, 0.0  ;;  %v3361_v39 = vadd.f32 %v3345_v33, %v9806_v34 }
 0x304   :  { %v3353_v52 = vadd.f32 %v3337_v6, %v9790_v60  ;;  %v9803_v6 = vld [vmem:[#allocation36_spill] sm:$0xff]  ;;  %v3362_v51 = vadd.f32 %v3346_v31, %v9808_v44  ;;  %v1333_v22 = vadd.f32 %v3863_v15, %v360_v63  ;;  %v1335_v10 = vadd.f32 %v3867_v17, %v360_v63 }
 0x305   :  { %v3358_v32 = vadd.f32 %v3342_v8, %v9800_v11  ;;  %v3359_v12 = vadd.f32 %v3343_v59, %v9802_v4  ;;  %v9804_v60 = vmax.f32 %v9803_v6, 0.0  ;;  %v1334_v8 = vadd.f32 %v3865_v16, %v360_v63 }
 0x306   :  { %v1336_v59 = vadd.f32 %v3869_v18, %v360_v63  ;;  %v1338_v53 = vadd.f32 %v8512_v1, %v360_v63  ;;  %v1339_v33 = vadd.f32 %v8514_v2, %v360_v63  ;;  %v1340_v31 = vadd.f32 %v8516_v3, %v360_v63 }
 0x307   :  { %v3360_v45 = vadd.f32 %v3344_v42, %v9804_v60  ;;  %v1337_v42 = vadd.f32 %v3871_v19, %v360_v63  ;;  %v1341_v38 = vadd.f32 %v8518_v23, %v360_v63  ;;  %v1342_v57 = vadd.f32 %v9768_v0, %v360_v63 }
 0x308   :  { %v1343_v11 = vadd.f32 %v9770_v7, %v360_v63  ;;  %v1344_v55 = vadd.f32 %v9772_v26, %v360_v63  ;;  %v1345_v4 = vadd.f32 %v9774_v56, %v360_v63  ;;  %v1346_v6 = vadd.f32 %v3889_v28, %v360_v63 }
 0x309   :  { %v2355_v60 = vmax.f32 %v1331_v54, 0.0  ;;  %v2356_v49 = vmax.f32 %v1332_v48, 0.0  ;;  %v2357_v34 = vmax.f32 %v1333_v22, 0.0  ;;  %v2358_v43 = vmax.f32 %v1334_v8, 0.0 }
 0x30a   :  { %v2359_v44 = vmax.f32 %v1335_v10, 0.0  ;;  %v2360_v35 = vmax.f32 %v1336_v59, 0.0  ;;  %v2361_v47 = vmax.f32 %v1337_v42, 0.0  ;;  %v2362_v62 = vmax.f32 %v1338_v53, 0.0  ;;  %v375_v10 = vpop.permute.xlu1 %374 }
 0x30b   :  { %v2363_v37 = vmax.f32 %v1339_v33, 0.0  ;;  %v2364_v5 = vmax.f32 %v1340_v31, 0.0  ;;  %v2365_v58 = vmax.f32 %v1341_v38, 0.0  ;;  %v2366_v21 = vmax.f32 %v1342_v57, 0.0 }
 0x30c   :  { %v2367_v30 = vmax.f32 %v1343_v11, 0.0  ;;  %v2368_v29 = vmax.f32 %v1344_v55, 0.0  ;;  %v2369_v25 = vmax.f32 %v1345_v4, 0.0  ;;  %v2370_v26 = vmax.f32 %v1346_v6, 0.0 }
 0x30d   :  { %v3363_v7 = vadd.f32 %v3347_v46, %v2355_v60  ;;  %v3364_v56 = vadd.f32 %v3348_v27, %v2356_v49  ;;  %v3365_v0 = vadd.f32 %v3349_v9, %v2357_v34  ;;  %v3366_v63 = vadd.f32 %v3350_v41, %v2358_v43  ;;  %v9826_v27 = vld [vmem:[#allocation10_spill] sm:$0xff]  ;;  %v9835_v60 = vld [vmem:[#allocation15_spill] sm:$0xff]  ;;  %v9839_v43 = vld [vmem:[#allocation17_spill] sm:$0xff] }
 0x30e   :  { %v3367_v54 = vadd.f32 %v3351_v40, %v2359_v44  ;;  %v3368_v48 = vadd.f32 %v3352_v36, %v2360_v35  ;;  %v3369_v22 = vadd.f32 %v3353_v52, %v2361_v47  ;;  %v3370_v8 = vadd.f32 %v3354_v20, %v2362_v62  ;;  %v9820_v47 = vld [vmem:[#allocation7_spill] sm:$0xff]  ;;  %v9824_v52 = vld [vmem:[#allocation9_spill] sm:$0xff] }
 0x30f   :  { %v3371_v59 = vadd.f32 %v3355_v24, %v2363_v37  ;;  %v3372_v42 = vadd.f32 %v3356_v50, %v2364_v5  ;;  %v3373_v53 = vadd.f32 %v3357_v61, %v2365_v58  ;;  %v3374_v33 = vadd.f32 %v3358_v32, %v2366_v21  ;;  %v9833_v50 = vld [vmem:[#allocation14_spill] sm:$0xff] }
 0x310   :  { %v3375_v31 = vadd.f32 %v3359_v12, %v2367_v30  ;;  %v3376_v38 = vadd.f32 %v3360_v45, %v2368_v29  ;;  %v3377_v57 = vadd.f32 %v3361_v39, %v2369_v25  ;;  %v3378_v11 = vadd.f32 %v3362_v51, %v2370_v26  ;;  %v9822_v39 = vld [vmem:[#allocation8_spill] sm:$0xff]  ;;  %v9831_v51 = vld [vmem:[#allocation13_spill] sm:$0xff] }
 0x311   :  { %v6964_v55 = vadd.f32 %v3859_v13, %v375_v10  ;;  %v6967_v46 = vadd.f32 %v3861_v14, %v375_v10  ;;  %v6970_v40 = vadd.f32 %v3863_v15, %v375_v10  ;;  %v6973_v62 = vadd.f32 %v3865_v16, %v375_v10  ;;  %v9829_v12 = vld [vmem:[#allocation12_spill] sm:$0xff] }
 0x312   :  { %v6976_v5 = vadd.f32 %v3867_v17, %v375_v10  ;;  %v6979_v30 = vadd.f32 %v3869_v18, %v375_v10  ;;  %v6982_v25 = vadd.f32 %v3871_v19, %v375_v10  ;;  %v6985_v29 = vadd.f32 %v8512_v1, %v375_v10 }
 0x313   :  { %9809 = vst [vmem:[#allocation23_spill] sm:$0xff] %v6964_v55  ;;  %9810 = vst [vmem:[#allocation24_spill] sm:$0xff] %v6967_v46  ;;  %v6988_v21 = vadd.f32 %v8514_v2, %v375_v10  ;;  %v6991_v58 = vadd.f32 %v8516_v3, %v375_v10  ;;  %v6994_v37 = vadd.f32 %v8518_v23, %v375_v10  ;;  %v9830_v45 = vmax.f32 %v9829_v12, 0.0  ;;  %v9843_v12 = vld [vmem:[#allocation19_spill] sm:$0xff] }
 0x314   :  { %9811 = vst [vmem:[#allocation25_spill] sm:$0xff] %v6970_v40  ;;  %9812 = vst [vmem:[#allocation26_spill] sm:$0xff] %v6973_v62  ;;  %v6997_v35 = vadd.f32 %v9820_v47, %v375_v10  ;;  %v7000_v26 = vadd.f32 %v9822_v39, %v375_v10  ;;  %v7003_v9 = vadd.f32 %v9824_v52, %v375_v10  ;;  %v9832_v61 = vmax.f32 %v9831_v51, 0.0  ;;  %v370_v51 = vpop.permute.xlu0 %369 }
 0x315   :  { %9813 = vst [vmem:[#allocation27_spill] sm:$0xff] %v6976_v5  ;;  %9814 = vst [vmem:[#allocation28_spill] sm:$0xff] %v6979_v30  ;;  %v7006_v41 = vadd.f32 %v9826_v27, %v375_v10  ;;  %v7009_v36 = vadd.f32 %v3889_v28, %v375_v10  ;;  %v3379_v32 = vadd.f32 %v3363_v7, %v9830_v45  ;;  %v9834_v6 = vmax.f32 %v9833_v50, 0.0 }
 0x316   :  { %9815 = vst [vmem:[#allocation29_spill] sm:$0xff] %v6982_v25  ;;  %9816 = vst [vmem:[#allocation30_spill] sm:$0xff] %v6985_v29  ;;  %v3380_v4 = vadd.f32 %v3364_v56, %v9832_v61  ;;  %v9836_v20 = vmax.f32 %v9835_v60, 0.0  ;;  %v9844_v7 = vmax.f32 %v9843_v12, 0.0  ;;  %v9845_v56 = vld [vmem:[#allocation20_spill] sm:$0xff] }
 0x317   :  { %9817 = vst [vmem:[#allocation31_spill] sm:$0xff] %v6988_v21  ;;  %9818 = vst [vmem:[#allocation32_spill] sm:$0xff] %v6991_v58  ;;  %v3381_v24 = vadd.f32 %v3365_v0, %v9834_v6  ;;  %v9846_v61 = vmax.f32 %v9845_v56, 0.0  ;;  %v9847_v0 = vld [vmem:[#allocation21_spill] sm:$0xff] }
 0x318   :  { %9819 = vst [vmem:[#allocation33_spill] sm:$0xff] %v6994_v37  ;;  %9821 = vst [vmem:[#allocation34_spill] sm:$0xff] %v6997_v35  ;;  %v3382_v49 = vadd.f32 %v3366_v63, %v9836_v20  ;;  %v9837_v35 = vld [vmem:[#allocation16_spill] sm:$0xff]  ;;  %v3386_v45 = vadd.f32 %v3370_v8, %v9844_v7  ;;  %v9848_v6 = vmax.f32 %v9847_v0, 0.0  ;;  %v9849_v63 = vld [vmem:[#allocation22_spill] sm:$0xff]  ;;  %v1364_v0 = vadd.f32 %v3861_v14, %v370_v51 }
 0x319   :  { %9823 = vst [vmem:[#allocation35_spill] sm:$0xff] %v7000_v26  ;;  %9825 = vst [vmem:[#allocation36_spill] sm:$0xff] %v7003_v9  ;;  %v9838_v34 = vmax.f32 %v9837_v35, 0.0  ;;  %v9840_v9 = vmax.f32 %v9839_v43, 0.0  ;;  %v3387_v50 = vadd.f32 %v3371_v59, %v9846_v61  ;;  %v9850_v20 = vmax.f32 %v9849_v63, 0.0  ;;  %v9857_v8 = vld [vmem:[#allocation40_spill] sm:$0xff] }
 0x31a   :  { %9827 = vst [vmem:[#allocation37_spill] sm:$0xff] %v7006_v41  ;;  %9828 = vst [vmem:[#allocation38_spill] sm:$0xff] %v7009_v36  ;;  %v9841_v41 = vld [vmem:[#allocation18_spill] sm:$0xff]  ;;  %v3388_v60 = vadd.f32 %v3372_v42, %v9848_v6  ;;  %v9858_v7 = vmax.f32 %v9857_v8, 0.0  ;;  %v9859_v56 = vld [vmem:[#allocation41_spill] sm:$0xff]  ;;  %v1363_v42 = vadd.f32 %v3859_v13, %v370_v51  ;;  %v1367_v6 = vadd.f32 %v3867_v17, %v370_v51 }
 0x31b   :  { %v3383_v26 = vadd.f32 %v3367_v54, %v9838_v34  ;;  %v3384_v44 = vadd.f32 %v3368_v48, %v9840_v9  ;;  %v9842_v10 = vmax.f32 %v9841_v41, 0.0  ;;  %v3389_v35 = vadd.f32 %v3373_v53, %v9850_v20  ;;  %v9851_v54 = vld [vmem:[#allocation3_spill] sm:$0xff]  ;;  %v9853_v48 = vld [vmem:[#allocation4_spill] sm:$0xff] }
 0x31c   :  { %v9852_v34 = vmax.f32 %v9851_v54, 0.0  ;;  %v9854_v9 = vmax.f32 %v9853_v48, 0.0  ;;  %v3393_v37 = vadd.f32 %v3377_v57, %v9858_v7  ;;  %v9860_v59 = vmax.f32 %v9859_v56, 0.0 }
 0x31d   :  { %v3385_v36 = vadd.f32 %v3369_v22, %v9842_v10  ;;  %v9855_v22 = vld [vmem:[#allocation39_spill] sm:$0xff]  ;;  %v1365_v53 = vadd.f32 %v3863_v15, %v370_v51  ;;  %v1370_v63 = vadd.f32 %v8512_v1, %v370_v51  ;;  %v1371_v57 = vadd.f32 %v8514_v2, %v370_v51 }
 0x31e   :  { %v3390_v43 = vadd.f32 %v3374_v33, %v9852_v34  ;;  %v3391_v41 = vadd.f32 %v3375_v31, %v9854_v9  ;;  %v9856_v10 = vmax.f32 %v9855_v22, 0.0  ;;  %v3394_v61 = vadd.f32 %v3378_v11, %v9860_v59 }
 0x31f   :  { %v1366_v33 = vadd.f32 %v3865_v16, %v370_v51  ;;  %v1368_v31 = vadd.f32 %v3869_v18, %v370_v51  ;;  %v1372_v11 = vadd.f32 %v8516_v3, %v370_v51  ;;  %v1373_v20 = vadd.f32 %v8518_v23, %v370_v51 }
 0x320   :  { %v3392_v12 = vadd.f32 %v3376_v38, %v9856_v10  ;;  %v1369_v38 = vadd.f32 %v3871_v19, %v370_v51  ;;  %v1374_v54 = vadd.f32 %v9820_v47, %v370_v51  ;;  %v1375_v34 = vadd.f32 %v9822_v39, %v370_v51 }
 0x321   :  { %v1376_v48 = vadd.f32 %v9824_v52, %v370_v51  ;;  %v1377_v9 = vadd.f32 %v9826_v27, %v370_v51  ;;  %v1378_v22 = vadd.f32 %v3889_v28, %v370_v51  ;;  %v2387_v10 = vmax.f32 %v1363_v42, 0.0 }
 0x322   :  { %v2388_v8 = vmax.f32 %v1364_v0, 0.0  ;;  %v2389_v7 = vmax.f32 %v1365_v53, 0.0  ;;  %v2390_v56 = vmax.f32 %v1366_v33, 0.0  ;;  %v2391_v59 = vmax.f32 %v1367_v6, 0.0  ;;  %v385_v6 = vpop.permute.xlu1 %384 }
 0x323   :  { %v2392_v58 = vmax.f32 %v1368_v31, 0.0  ;;  %v2393_v21 = vmax.f32 %v1369_v38, 0.0  ;;  %v2394_v29 = vmax.f32 %v1370_v63, 0.0  ;;  %v2395_v25 = vmax.f32 %v1371_v57, 0.0 }
 0x324   :  { %v2396_v30 = vmax.f32 %v1372_v11, 0.0  ;;  %v2397_v5 = vmax.f32 %v1373_v20, 0.0  ;;  %v2398_v62 = vmax.f32 %v1374_v54, 0.0  ;;  %v2399_v40 = vmax.f32 %v1375_v34, 0.0 }
 0x325   :  { %v2400_v46 = vmax.f32 %v1376_v48, 0.0  ;;  %v2401_v55 = vmax.f32 %v1377_v9, 0.0  ;;  %v2402_v52 = vmax.f32 %v1378_v22, 0.0  ;;  %v3395_v39 = vadd.f32 %v3379_v32, %v2387_v10  ;;  %v9887_v10 = vld [vmem:[#allocation26_spill] sm:$0xff] }
 0x326   :  { %v3396_v27 = vadd.f32 %v3380_v4, %v2388_v8  ;;  %v3397_v47 = vadd.f32 %v3381_v24, %v2389_v7  ;;  %v3398_v51 = vadd.f32 %v3382_v49, %v2390_v56  ;;  %v3399_v42 = vadd.f32 %v3383_v26, %v2391_v59  ;;  %v9878_v4 = vld [vmem:[#allocation10_spill] sm:$0xff]  ;;  %v9891_v56 = vld [vmem:[#allocation28_spill] sm:$0xff] }
 0x327   :  { %v3400_v0 = vadd.f32 %v3384_v44, %v2392_v58  ;;  %v3401_v53 = vadd.f32 %v3385_v36, %v2393_v21  ;;  %v3402_v33 = vadd.f32 %v3386_v45, %v2394_v29  ;;  %v3403_v31 = vadd.f32 %v3387_v50, %v2395_v25  ;;  %v9872_v21 = vld [vmem:[#allocation7_spill] sm:$0xff]  ;;  %v9876_v36 = vld [vmem:[#allocation9_spill] sm:$0xff] }
 0x328   :  { %v3404_v38 = vadd.f32 %v3388_v60, %v2396_v30  ;;  %v3405_v63 = vadd.f32 %v3389_v35, %v2397_v5  ;;  %v3406_v57 = vadd.f32 %v3390_v43, %v2398_v62  ;;  %v3407_v11 = vadd.f32 %v3391_v41, %v2399_v40  ;;  %v9881_v41 = vld [vmem:[#allocation23_spill] sm:$0xff]  ;;  %v9885_v60 = vld [vmem:[#allocation25_spill] sm:$0xff] }
 0x329   :  { %v3408_v20 = vadd.f32 %v3392_v12, %v2400_v46  ;;  %v3409_v54 = vadd.f32 %v3393_v37, %v2401_v55  ;;  %v3410_v34 = vadd.f32 %v3394_v61, %v2402_v52  ;;  %v7076_v48 = vadd.f32 %v3859_v13, %v385_v6  ;;  %v9874_v37 = vld [vmem:[#allocation8_spill] sm:$0xff] }
 0x32a   :  { %v7079_v32 = vadd.f32 %v3861_v14, %v385_v6  ;;  %v7082_v26 = vadd.f32 %v3863_v15, %v385_v6  ;;  %v7085_v29 = vadd.f32 %v3865_v16, %v385_v6  ;;  %v7088_v30 = vadd.f32 %v3867_v17, %v385_v6  ;;  %v9883_v61 = vld [vmem:[#allocation24_spill] sm:$0xff] }
 0x32b   :  { %9861 = vst [vmem:[#allocation12_spill] sm:$0xff] %v7076_v48  ;;  %v7091_v40 = vadd.f32 %v3869_v18, %v385_v6  ;;  %v7094_v55 = vadd.f32 %v3871_v19, %v385_v6  ;;  %v7097_v46 = vadd.f32 %v8512_v1, %v385_v6  ;;  %v7100_v62 = vadd.f32 %v8514_v2, %v385_v6 }
 0x32c   :  { %9862 = vst [vmem:[#allocation13_spill] sm:$0xff] %v7079_v32  ;;  %9863 = vst [vmem:[#allocation14_spill] sm:$0xff] %v7082_v26  ;;  %v7103_v5 = vadd.f32 %v8516_v3, %v385_v6  ;;  %v7106_v25 = vadd.f32 %v8518_v23, %v385_v6  ;;  %v7109_v58 = vadd.f32 %v9872_v21, %v385_v6  ;;  %v9882_v12 = vmax.f32 %v9881_v41, 0.0  ;;  %v9895_v41 = vld [vmem:[#allocation30_spill] sm:$0xff] }
 0x32d   :  { %9864 = vst [vmem:[#allocation15_spill] sm:$0xff] %v7085_v29  ;;  %9865 = vst [vmem:[#allocation16_spill] sm:$0xff] %v7088_v30  ;;  %v7112_v52 = vadd.f32 %v9874_v37, %v385_v6  ;;  %v7115_v24 = vadd.f32 %v9876_v36, %v385_v6  ;;  %v7118_v49 = vadd.f32 %v9878_v4, %v385_v6  ;;  %v9884_v35 = vmax.f32 %v9883_v61, 0.0  ;;  %v380_v61 = vpop.permute.xlu0 %379 }
 0x32e   :  { %9866 = vst [vmem:[#allocation17_spill] sm:$0xff] %v7091_v40  ;;  %9867 = vst [vmem:[#allocation18_spill] sm:$0xff] %v7094_v55  ;;  %v7121_v44 = vadd.f32 %v3889_v28, %v385_v6  ;;  %v3411_v43 = vadd.f32 %v3395_v39, %v9882_v12  ;;  %v9886_v22 = vmax.f32 %v9885_v60, 0.0  ;;  %v9888_v45 = vmax.f32 %v9887_v10, 0.0 }
 0x32f   :  { %9868 = vst [vmem:[#allocation19_spill] sm:$0xff] %v7097_v46  ;;  %9869 = vst [vmem:[#allocation20_spill] sm:$0xff] %v7100_v62  ;;  %v3412_v9 = vadd.f32 %v3396_v27, %v9884_v35  ;;  %v9896_v39 = vmax.f32 %v9895_v41, 0.0  ;;  %v9897_v27 = vld [vmem:[#allocation31_spill] sm:$0xff] }
 0x330   :  { %9870 = vst [vmem:[#allocation21_spill] sm:$0xff] %v7103_v5  ;;  %9871 = vst [vmem:[#allocation22_spill] sm:$0xff] %v7106_v25  ;;  %v3413_v50 = vadd.f32 %v3397_v47, %v9886_v22  ;;  %v3414_v8 = vadd.f32 %v3398_v51, %v9888_v45  ;;  %v9898_v35 = vmax.f32 %v9897_v27, 0.0  ;;  %v9899_v47 = vld [vmem:[#allocation32_spill] sm:$0xff]  ;;  %v9901_v51 = vld [vmem:[#allocation33_spill] sm:$0xff] }
 0x331   :  { %9873 = vst [vmem:[#allocation3_spill] sm:$0xff] %v7109_v58  ;;  %9875 = vst [vmem:[#allocation4_spill] sm:$0xff] %v7112_v52  ;;  %v9889_v58 = vld [vmem:[#allocation27_spill] sm:$0xff]  ;;  %v3418_v12 = vadd.f32 %v3402_v33, %v9896_v39  ;;  %v9900_v22 = vmax.f32 %v9899_v47, 0.0  ;;  %v9902_v45 = vmax.f32 %v9901_v51, 0.0  ;;  %v9909_v33 = vld [vmem:[#allocation37_spill] sm:$0xff]  ;;  %v1396_v47 = vadd.f32 %v3861_v14, %v380_v61 }
 0x332   :  { %9877 = vst [vmem:[#allocation39_spill] sm:$0xff] %v7115_v24  ;;  %9879 = vst [vmem:[#allocation40_spill] sm:$0xff] %v7118_v49  ;;  %v9890_v7 = vmax.f32 %v9889_v58, 0.0  ;;  %v9892_v24 = vmax.f32 %v9891_v56, 0.0  ;;  %v9893_v49 = vld [vmem:[#allocation29_spill] sm:$0xff]  ;;  %v3419_v60 = vadd.f32 %v3403_v31, %v9898_v35  ;;  %v9910_v39 = vmax.f32 %v9909_v33, 0.0 }
 0x333   :  { %9880 = vst [vmem:[#allocation41_spill] sm:$0xff] %v7121_v44  ;;  %v9894_v6 = vmax.f32 %v9893_v49, 0.0  ;;  %v3420_v10 = vadd.f32 %v3404_v38, %v9900_v22  ;;  %v3421_v58 = vadd.f32 %v3405_v63, %v9902_v45  ;;  %v9911_v27 = vld [vmem:[#allocation38_spill] sm:$0xff]  ;;  %v1395_v38 = vadd.f32 %v3859_v13, %v380_v61 }
 0x334   :  { %v3415_v52 = vadd.f32 %v3399_v42, %v9890_v7  ;;  %v3416_v59 = vadd.f32 %v3400_v0, %v9892_v24  ;;  %v9903_v42 = vld [vmem:[#allocation34_spill] sm:$0xff]  ;;  %v9905_v0 = vld [vmem:[#allocation35_spill] sm:$0xff]  ;;  %v3425_v25 = vadd.f32 %v3409_v54, %v9910_v39  ;;  %v9912_v31 = vmax.f32 %v9911_v27, 0.0 }
 0x335   :  { %v3417_v44 = vadd.f32 %v3401_v53, %v9894_v6  ;;  %v9904_v7 = vmax.f32 %v9903_v42, 0.0  ;;  %v9906_v24 = vmax.f32 %v9905_v0, 0.0  ;;  %v9907_v53 = vld [vmem:[#allocation36_spill] sm:$0xff]  ;;  %v1397_v63 = vadd.f32 %v3863_v15, %v380_v61 }
 0x336   :  { %v9908_v6 = vmax.f32 %v9907_v53, 0.0  ;;  %v3426_v35 = vadd.f32 %v3410_v34, %v9912_v31  ;;  %v1399_v22 = vadd.f32 %v3867_v17, %v380_v61  ;;  %v1402_v51 = vadd.f32 %v8512_v1, %v380_v61 }
 0x337   :  { %v3422_v56 = vadd.f32 %v3406_v57, %v9904_v7  ;;  %v3423_v49 = vadd.f32 %v3407_v11, %v9906_v24  ;;  %v1398_v57 = vadd.f32 %v3865_v16, %v380_v61  ;;  %v1400_v11 = vadd.f32 %v3869_v18, %v380_v61 }
 0x338   :  { %v3424_v41 = vadd.f32 %v3408_v20, %v9908_v6  ;;  %v1401_v20 = vadd.f32 %v3871_v19, %v380_v61  ;;  %v1403_v54 = vadd.f32 %v8514_v2, %v380_v61  ;;  %v1404_v34 = vadd.f32 %v8516_v3, %v380_v61 }
 0x339   :  { %v1405_v45 = vadd.f32 %v8518_v23, %v380_v61  ;;  %v1406_v42 = vadd.f32 %v9872_v21, %v380_v61  ;;  %v1407_v7 = vadd.f32 %v9874_v37, %v380_v61  ;;  %v1408_v0 = vadd.f32 %v9876_v36, %v380_v61 }
 0x33a   :  { %v1409_v24 = vadd.f32 %v9878_v4, %v380_v61  ;;  %v1410_v53 = vadd.f32 %v3889_v28, %v380_v61  ;;  %v2419_v6 = vmax.f32 %v1395_v38, 0.0  ;;  %v2420_v33 = vmax.f32 %v1396_v47, 0.0 }
 0x33b   :  { %v2421_v39 = vmax.f32 %v1397_v63, 0.0  ;;  %v2422_v27 = vmax.f32 %v1398_v57, 0.0  ;;  %v2423_v31 = vmax.f32 %v1399_v22, 0.0  ;;  %v2424_v5 = vmax.f32 %v1400_v11, 0.0  ;;  %v395_v11 = vpop.permute.xlu1 %394 }
 0x33c   :  { %v2425_v62 = vmax.f32 %v1401_v20, 0.0  ;;  %v2426_v46 = vmax.f32 %v1402_v51, 0.0  ;;  %v2427_v55 = vmax.f32 %v1403_v54, 0.0  ;;  %v2428_v40 = vmax.f32 %v1404_v34, 0.0 }
 0x33d   :  { %v2429_v30 = vmax.f32 %v1405_v45, 0.0  ;;  %v2430_v29 = vmax.f32 %v1406_v42, 0.0  ;;  %v2431_v26 = vmax.f32 %v1407_v7, 0.0  ;;  %v2432_v32 = vmax.f32 %v1408_v0, 0.0 }
 0x33e   :  { %v2433_v48 = vmax.f32 %v1409_v24, 0.0  ;;  %v2434_v36 = vmax.f32 %v1410_v53, 0.0  ;;  %v7187_v37 = vadd.f32 %v3411_v43, %v2419_v6  ;;  %v7189_v4 = vadd.f32 %v3412_v9, %v2420_v33  ;;  %v390_v24 = vpop.permute.xlu0 %389 }
 0x33f   :  { %v7191_v61 = vadd.f32 %v3413_v50, %v2421_v39  ;;  %v7193_v38 = vadd.f32 %v3414_v8, %v2422_v27  ;;  %v7195_v47 = vadd.f32 %v3415_v52, %v2423_v31  ;;  %v7197_v63 = vadd.f32 %v3416_v59, %v2424_v5  ;;  %v9935_v59 = vld [vmem:[#allocation8_spill] sm:$0xff]  ;;  %v7319_v54 = vpop.permute.xlu1 %404 }
 0x340   :  { %v7199_v57 = vadd.f32 %v3417_v44, %v2425_v62  ;;  %v7201_v22 = vadd.f32 %v3418_v12, %v2426_v46  ;;  %v7203_v20 = vadd.f32 %v3419_v60, %v2427_v55  ;;  %v7205_v51 = vadd.f32 %v3420_v10, %v2428_v40  ;;  %v9937_v60 = vld [vmem:[#allocation9_spill] sm:$0xff] }
 0x341   :  { %9913 = vst [vmem:[#allocation23_spill] sm:$0xff] %v7197_v63  ;;  %v7207_v43 = vadd.f32 %v3421_v58, %v2429_v30  ;;  %v7209_v9 = vadd.f32 %v3422_v56, %v2430_v29  ;;  %v7211_v50 = vadd.f32 %v3423_v49, %v2431_v26  ;;  %v7213_v8 = vadd.f32 %v3424_v41, %v2432_v32  ;;  %v9939_v58 = vld [vmem:[#allocation10_spill] sm:$0xff] }
 0x342   :  { %9914 = vst [vmem:[#allocation24_spill] sm:$0xff] %v7199_v57  ;;  %9915 = vst [vmem:[#allocation25_spill] sm:$0xff] %v7201_v22  ;;  %v7215_v52 = vadd.f32 %v3425_v25, %v2433_v48  ;;  %v7217_v5 = vadd.f32 %v3426_v35, %v2434_v36  ;;  %v7220_v46 = vadd.f32 %v3859_v13, %v395_v11 }
 0x343   :  { %9916 = vst [vmem:[#allocation26_spill] sm:$0xff] %v7203_v20  ;;  %9917 = vst [vmem:[#allocation27_spill] sm:$0xff] %v7205_v51  ;;  %v7223_v55 = vadd.f32 %v3861_v14, %v395_v11  ;;  %v7226_v40 = vadd.f32 %v3863_v15, %v395_v11  ;;  %v7229_v29 = vadd.f32 %v3865_v16, %v395_v11 }
 0x344   :  { %9918 = vst [vmem:[#allocation28_spill] sm:$0xff] %v7207_v43  ;;  %9919 = vst [vmem:[#allocation29_spill] sm:$0xff] %v7209_v9  ;;  %v7232_v26 = vadd.f32 %v3867_v17, %v395_v11  ;;  %v7235_v48 = vadd.f32 %v3869_v18, %v395_v11  ;;  %v7238_v32 = vadd.f32 %v3871_v19, %v395_v11 }
 0x345   :  { %9920 = vst [vmem:[#allocation30_spill] sm:$0xff] %v7211_v50  ;;  %9921 = vst [vmem:[#allocation31_spill] sm:$0xff] %v7213_v8  ;;  %v7241_v30 = vadd.f32 %v8512_v1, %v395_v11  ;;  %v7244_v62 = vadd.f32 %v8514_v2, %v395_v11  ;;  %v7247_v25 = vadd.f32 %v8516_v3, %v395_v11 }
 0x346   :  { %9922 = vst [vmem:[#allocation32_spill] sm:$0xff] %v7215_v52  ;;  %9923 = vst [vmem:[#allocation33_spill] sm:$0xff] %v7217_v5  ;;  %v7250_v36 = vadd.f32 %v8518_v23, %v395_v11  ;;  %v7253_v44 = vadd.f32 %v9872_v21, %v395_v11  ;;  %v7256_v12 = vadd.f32 %v9935_v59, %v395_v11 }
 0x347   :  { %9924 = vst [vmem:[#allocation34_spill] sm:$0xff] %v7223_v55  ;;  %9925 = vst [vmem:[#allocation35_spill] sm:$0xff] %v7226_v40  ;;  %v7259_v10 = vadd.f32 %v9937_v60, %v395_v11  ;;  %v7262_v56 = vadd.f32 %v9939_v58, %v395_v11  ;;  %v7265_v49 = vadd.f32 %v3889_v28, %v395_v11 }
 0x348   :  { %9926 = vst [vmem:[#allocation36_spill] sm:$0xff] %v7229_v29  ;;  %9927 = vst [vmem:[#allocation37_spill] sm:$0xff] %v7232_v26  ;;  %v7284_v7 = vadd.f32 %v3859_v13, %v390_v24  ;;  %v7287_v0 = vadd.f32 %v3861_v14, %v390_v24  ;;  %v7290_v6 = vadd.f32 %v3863_v15, %v390_v24 }
 0x349   :  { %9928 = vst [vmem:[#allocation38_spill] sm:$0xff] %v7235_v48  ;;  %9929 = vst [vmem:[#allocation42_spill] sm:$0xff] %v7238_v32  ;;  %v7293_v33 = vadd.f32 %v3865_v16, %v390_v24  ;;  %v7296_v27 = vadd.f32 %v3867_v17, %v390_v24  ;;  %v7299_v31 = vadd.f32 %v3869_v18, %v390_v24  ;;  %v400_v48 = vpop.permute.xlu0 %399 }
 0x34a   :  { %9930 = vst [vmem:[#allocation43_spill] sm:$0xff] %v7241_v30  ;;  %9931 = vst [vmem:[#allocation44_spill] sm:$0xff] %v7244_v62  ;;  %v7302_v42 = vadd.f32 %v3871_v19, %v390_v24  ;;  %v7305_v11 = vadd.f32 %v8512_v1, %v390_v24  ;;  %v7308_v39 = vadd.f32 %v8514_v2, %v390_v24 }
 0x34b   :  { %9932 = vst [vmem:[#allocation45_spill] sm:$0xff] %v7247_v25  ;;  %9933 = vst [vmem:[#allocation46_spill] sm:$0xff] %v7250_v36  ;;  %v7311_v53 = vadd.f32 %v8516_v3, %v390_v24  ;;  %v7314_v45 = vadd.f32 %v8518_v23, %v390_v24  ;;  %v7317_v34 = vadd.f32 %v9872_v21, %v390_v24 }
 0x34c   :  { %9934 = vst [vmem:[#allocation47_spill] sm:$0xff] %v7253_v44  ;;  %9936 = vst [vmem:[#allocation48_spill] sm:$0xff] %v7256_v12  ;;  %v7322_v35 = vadd.f32 %v9935_v59, %v390_v24  ;;  %v7325_v41 = vadd.f32 %v9937_v60, %v390_v24  ;;  %v7350_v30 = vadd.f32 %v3859_v13, %v400_v48  ;;  %v7361_v12 = vpop.permute.xlu1 %414 }
 0x34d   :  { %9938 = vst [vmem:[#allocation49_spill] sm:$0xff] %v7259_v10  ;;  %9940 = vst [vmem:[#allocation50_spill] sm:$0xff] %v7262_v56  ;;  %v7331_v56 = vadd.f32 %v3889_v28, %v390_v24  ;;  %v7353_v32 = vadd.f32 %v3861_v14, %v400_v48  ;;  %v7356_v5 = vadd.f32 %v3863_v15, %v400_v48 }
 0x34e   :  { %9941 = vst [vmem:[#allocation51_spill] sm:$0xff] %v7265_v49  ;;  %9942 = vst [vmem:[#allocation52_spill] sm:$0xff] %v7293_v33  ;;  %v7328_v49 = vadd.f32 %v9939_v58, %v390_v24  ;;  %v7359_v10 = vadd.f32 %v3865_v16, %v400_v48  ;;  %v7364_v36 = vadd.f32 %v3867_v17, %v400_v48 }
 0x34f   :  { %9943 = vst [vmem:[#allocation53_spill] sm:$0xff] %v7296_v27  ;;  %9944 = vst [vmem:[#allocation54_spill] sm:$0xff] %v7299_v31  ;;  %v7367_v25 = vadd.f32 %v3869_v18, %v400_v48  ;;  %v7370_v62 = vadd.f32 %v3871_v19, %v400_v48  ;;  %v7373_v44 = vadd.f32 %v8512_v1, %v400_v48 }
 0x350   :  { %9945 = vst [vmem:[#allocation55_spill] sm:$0xff] %v7302_v42  ;;  %9946 = vst [vmem:[#allocation56_spill] sm:$0xff] %v7305_v11  ;;  %v7376_v24 = vadd.f32 %v8514_v2, %v400_v48  ;;  %v7407_v11 = vadd.f32 %v3865_v16, %v7361_v12  ;;  %v7411_v52 = vadd.f32 %v3867_v17, %v7361_v12 }
 0x351   :  { %9947 = vst [vmem:[#allocation57_spill] sm:$0xff] %v7308_v39  ;;  %9948 = vst [vmem:[#allocation58_spill] sm:$0xff] %v7311_v53  ;;  %v7399_v53 = vadd.f32 %v3861_v14, %v7361_v12  ;;  %v7403_v39 = vadd.f32 %v3863_v15, %v7361_v12  ;;  %v7415_v26 = vadd.f32 %v3869_v18, %v7361_v12 }
 0x352   :  { %9949 = vst [vmem:[#allocation59_spill] sm:$0xff] %v7314_v45  ;;  %9950 = vst [vmem:[#allocation60_spill] sm:$0xff] %v7317_v34  ;;  %v7391_v34 = vadd.f32 %v9937_v60, %v400_v48  ;;  %v7395_v45 = vadd.f32 %v3859_v13, %v7361_v12  ;;  %v7419_v42 = vadd.f32 %v3871_v19, %v7361_v12 }
 0x353   :  { %9951 = vst [vmem:[#allocation61_spill] sm:$0xff] %v7322_v35  ;;  %9952 = vst [vmem:[#allocation62_spill] sm:$0xff] %v7325_v41  ;;  %v7385_v41 = vadd.f32 %v9872_v21, %v400_v48  ;;  %v7388_v35 = vadd.f32 %v9935_v59, %v400_v48  ;;  %v7423_v8 = vadd.f32 %v8512_v1, %v7361_v12 }
 0x354   :  { %9953 = vst [vmem:[#allocation63_spill] sm:$0xff] %v7328_v49  ;;  %9954 = vst [vmem:[#allocation64_spill] sm:$0xff] %v7331_v56  ;;  %v7379_v56 = vadd.f32 %v8516_v3, %v400_v48  ;;  %v7382_v49 = vadd.f32 %v8518_v23, %v400_v48  ;;  %v7427_v50 = vadd.f32 %v8514_v2, %v7361_v12 }
 0x355   :  { %9955 = vst [vmem:[#allocation65_spill] sm:$0xff] %v7361_v12  ;;  %9957 = vst [vmem:[#allocation67_spill] sm:$0xff] %v7385_v41  ;;  %v7431_v29 = vadd.f32 %v8516_v3, %v7361_v12  ;;  %v7434_v9 = vadd.f32 %v9939_v58, %v400_v48  ;;  %v7437_v31 = vadd.f32 %v3889_v28, %v400_v48 }
 0x356   :  { %9956 = vst [vmem:[#allocation66_spill] sm:$0xff] %v7382_v49  ;;  %9958 = vst [vmem:[#allocation68_spill] sm:$0xff] %v7388_v35  ;;  %v7441_v43 = vadd.f32 %v8518_v23, %v7361_v12  ;;  %v7445_v51 = vadd.f32 %v9872_v21, %v7361_v12  ;;  %v7449_v20 = vadd.f32 %v9935_v59, %v7361_v12 }
 0x357   :  { %9959 = vst [vmem:[#allocation69_spill] sm:$0xff] %v7391_v34  ;;  %9960 = vst [vmem:[#allocation70_spill] sm:$0xff] %v7407_v11  ;;  %v7453_v40 = vadd.f32 %v9937_v60, %v7361_v12  ;;  %v7468_v48 = vadd.f32 %v3859_v13, %v7319_v54  ;;  %v7472_v57 = vadd.f32 %v3861_v14, %v7319_v54  ;;  %v10015_v34 = vld [vmem:[#allocation21_spill] sm:$0xff] }
 0x358   :  { %9961 = vst [vmem:[#allocation71_spill] sm:$0xff] %v7411_v52  ;;  %9962 = vst [vmem:[#allocation72_spill] sm:$0xff] %v7415_v26  ;;  %v7488_v22 = vadd.f32 %v3869_v18, %v7319_v54  ;;  %v7492_v55 = vadd.f32 %v3871_v19, %v7319_v54  ;;  %v7496_v63 = vadd.f32 %v8512_v1, %v7319_v54  ;;  %v9980_v26 = vld [vmem:[#allocation13_spill] sm:$0xff] }
 0x359   :  { %9963 = vst [vmem:[#allocation73_spill] sm:$0xff] %v7419_v42  ;;  %9964 = vst [vmem:[#allocation74_spill] sm:$0xff] %v7423_v8  ;;  %v7500_v33 = vadd.f32 %v8514_v2, %v7319_v54  ;;  %v7504_v27 = vadd.f32 %v8516_v3, %v7319_v54  ;;  %v7508_v12 = vadd.f32 %v8518_v23, %v7319_v54  ;;  %v9981_v52 = vmax.f32 %v9980_v26, 0.0  ;;  %v9995_v26 = vld [vmem:[#allocation34_spill] sm:$0xff] }
 0x35a   :  { %9965 = vst [vmem:[#allocation75_spill] sm:$0xff] %v7427_v50  ;;  %9966 = vst [vmem:[#allocation76_spill] sm:$0xff] %v7431_v29  ;;  %v7516_v29 = vadd.f32 %v9935_v59, %v7319_v54  ;;  %v9978_v50 = vld [vmem:[#allocation12_spill] sm:$0xff]  ;;  %v7526_v23 = vadd.f32 %v9937_v60, %v7319_v54  ;;  %v7534_v59 = vadd.f32 %v3889_v28, %v7319_v54  ;;  %v9985_v28 = vld [vmem:[#allocation14_spill] sm:$0xff] }
 0x35b   :  { %9967 = vst [vmem:[#allocation77_spill] sm:$0xff] %v7434_v9  ;;  %9968 = vst [vmem:[#allocation78_spill] sm:$0xff] %v7437_v31  ;;  %v9979_v8 = vmax.f32 %v9978_v50, 0.0  ;;  %v3444_v3 = vadd.f32 %v7189_v4, %v9981_v52  ;;  %v2483_v50 = vmax.f32 %v7350_v30, 0.0  ;;  %v9986_v30 = vmax.f32 %v9985_v28, 0.0  ;;  %v10009_v9 = vld [vmem:[#allocation25_spill] sm:$0xff] }
 0x35c   :  { %9969 = vst [vmem:[#allocation79_spill] sm:$0xff] %v7441_v43  ;;  %9970 = vst [vmem:[#allocation80_spill] sm:$0xff] %v7445_v51  ;;  %v7476_v51 = vadd.f32 %v3863_v15, %v7319_v54  ;;  %v7512_v43 = vadd.f32 %v9872_v21, %v7319_v54  ;;  %v7530_v21 = vadd.f32 %v9939_v58, %v7319_v54  ;;  %v9988_v4 = vmax.f32 %v7287_v0, 0.0 }
 0x35d   :  { %9971 = vst [vmem:[#allocation81_spill] sm:$0xff] %v7449_v20  ;;  %9972 = vst [vmem:[#allocation82_spill] sm:$0xff] %v7453_v40  ;;  %v7480_v20 = vadd.f32 %v3865_v16, %v7319_v54  ;;  %v7484_v40 = vadd.f32 %v3867_v17, %v7319_v54  ;;  %v3443_v42 = vadd.f32 %v7187_v37, %v9979_v8  ;;  %v2484_v37 = vmax.f32 %v7353_v32, 0.0  ;;  %v10007_v54 = vld [vmem:[#allocation19_spill] sm:$0xff] }
 0x35e   :  { %9973 = vst [vmem:[#allocation83_spill] sm:$0xff] %v7500_v33  ;;  %9974 = vst [vmem:[#allocation84_spill] sm:$0xff] %v7504_v27  ;;  %v2485_v8 = vmax.f32 %v7356_v5, 0.0  ;;  %v3445_v32 = vadd.f32 %v7191_v61, %v9986_v30  ;;  %v9987_v5 = vmax.f32 %v7284_v7, 0.0  ;;  %v3460_v52 = vadd.f32 %v3444_v3, %v9988_v4  ;;  %v9989_v30 = vld [vmem:[#allocation15_spill] sm:$0xff] }
 0x35f   :  { %9975 = vst [vmem:[#allocation85_spill] sm:$0xff] %v7508_v12  ;;  %9976 = vst [vmem:[#allocation86_spill] sm:$0xff] %v7512_v43  ;;  %v2499_v61 = vmax.f32 %v7468_v48, 0.0  ;;  %v9990_v7 = vmax.f32 %v9989_v30, 0.0  ;;  %v2500_v3 = vmax.f32 %v7472_v57, 0.0  ;;  %v2501_v0 = vmax.f32 %v7476_v51, 0.0 }
 0x360   :  { %9977 = vst [vmem:[#allocation87_spill] sm:$0xff] %v7516_v29  ;;  %9982 = vst [vmem:[#allocation12_spill] sm:$0xff] %v7526_v23  ;;  %v2502_v4 = vmax.f32 %v7480_v20, 0.0  ;;  %v9993_v28 = vmax.f32 %v7290_v6, 0.0  ;;  %v9994_v48 = vmax.f32 %v7220_v46, 0.0  ;;  %v10004_v20 = vld [vmem:[#allocation24_spill] sm:$0xff] }
 0x361   :  { %9983 = vst [vmem:[#allocation13_spill] sm:$0xff] %v7530_v21  ;;  %9984 = vst [vmem:[#allocation88_spill] sm:$0xff] %v7534_v59  ;;  %v3459_v59 = vadd.f32 %v3443_v42, %v9987_v5  ;;  %v3446_v42 = vadd.f32 %v7193_v38, %v9990_v7  ;;  %v9991_v5 = vld [vmem:[#allocation16_spill] sm:$0xff]  ;;  %v9996_v38 = vmax.f32 %v9995_v26, 0.0  ;;  %v10008_v6 = vmax.f32 %v10007_v54, 0.0  ;;  %v10010_v23 = vld [vmem:[#allocation35_spill] sm:$0xff] }
 0x362   :  { %v9992_v58 = vmax.f32 %v9991_v5, 0.0  ;;  %v3461_v60 = vadd.f32 %v3445_v32, %v9993_v28  ;;  %v9997_v5 = vld [vmem:[#allocation17_spill] sm:$0xff]  ;;  %v10012_v43 = vld [vmem:[#allocation20_spill] sm:$0xff]  ;;  %v10014_v29 = vld [vmem:[#allocation26_spill] sm:$0xff] }
 0x363   :  { %v3475_v30 = vadd.f32 %v3459_v59, %v9994_v48  ;;  %v3476_v7 = vadd.f32 %v3460_v52, %v9996_v38  ;;  %v9998_v31 = vmax.f32 %v9997_v5, 0.0  ;;  %v10000_v59 = vld [vmem:[#allocation52_spill] sm:$0xff]  ;;  %v10002_v48 = vld [vmem:[#allocation18_spill] sm:$0xff]  ;;  %v10005_v5 = vld [vmem:[#allocation53_spill] sm:$0xff]  ;;  %v3450_v46 = vadd.f32 %v10009_v9, %v10008_v6 }
 0x364   :  { %v3447_v21 = vadd.f32 %v7195_v47, %v9992_v58  ;;  %v9999_v47 = vld [vmem:[#allocation23_spill] sm:$0xff]  ;;  %v10001_v32 = vmax.f32 %v10000_v59, 0.0  ;;  %v10003_v38 = vmax.f32 %v10002_v48, 0.0  ;;  %v10006_v57 = vmax.f32 %v10005_v5, 0.0  ;;  %v10020_v12 = vld [vmem:[#allocation28_spill] sm:$0xff]  ;;  %v10021_v54 = vld [vmem:[#allocation54_spill] sm:$0xff] }
 0x365   :  { %v3448_v58 = vadd.f32 %v9999_v47, %v9998_v31  ;;  %v7594_v47 = vpop.permute.xlu0 %409  ;;  %v10011_v59 = vmax.f32 %v10010_v23, 0.0  ;;  %v3492_v52 = vadd.f32 %v3476_v7, %v2484_v37  ;;  %v10013_v28 = vmax.f32 %v10012_v43, 0.0  ;;  %v10023_v6 = vld [vmem:[#allocation3_spill] sm:$0xff]  ;;  %v10026_v37 = vld [vmem:[#allocation36_spill] sm:$0xff] }
 0x366   :  { %v3462_v26 = vadd.f32 %v3446_v42, %v10001_v32  ;;  %v3449_v51 = vadd.f32 %v10004_v20, %v10003_v38  ;;  %v3463_v31 = vadd.f32 %v3447_v21, %v10006_v57  ;;  %v3491_v32 = vadd.f32 %v3475_v30, %v2483_v50  ;;  %v10017_v38 = vld [vmem:[#allocation27_spill] sm:$0xff]  ;;  %v10018_v21 = vld [vmem:[#allocation22_spill] sm:$0xff]  ;;  %v10028_v7 = vld [vmem:[#allocation4_spill] sm:$0xff] }
 0x367   :  { %v3477_v42 = vadd.f32 %v3461_v60, %v10011_v59  ;;  %v3451_v48 = vadd.f32 %v10014_v29, %v10013_v28  ;;  %v10016_v20 = vmax.f32 %v10015_v34, 0.0  ;;  %v10019_v57 = vmax.f32 %v10018_v21, 0.0  ;;  %v10025_v60 = vld [vmem:[#allocation29_spill] sm:$0xff]  ;;  %v10030_v59 = vld [vmem:[#allocation30_spill] sm:$0xff]  ;;  %v10034_v21 = vld [vmem:[#allocation55_spill] sm:$0xff] }
 0x368   :  { %v10022_v27 = vmax.f32 %v10021_v54, 0.0  ;;  %v10024_v23 = vmax.f32 %v10023_v6, 0.0  ;;  %v10027_v30 = vmax.f32 %v10026_v37, 0.0  ;;  %v1491_v29 = vadd.f32 %v3859_v13, %v7594_v47  ;;  %v10036_v6 = vld [vmem:[#allocation37_spill] sm:$0xff]  ;;  %v10040_v13 = vld [vmem:[#allocation32_spill] sm:$0xff] }
 0x369   :  { %v3452_v5 = vadd.f32 %v10017_v38, %v10016_v20  ;;  %v3453_v35 = vadd.f32 %v10020_v12, %v10019_v57  ;;  %v1492_v34 = vadd.f32 %v3861_v14, %v7594_v47  ;;  %v10029_v28 = vmax.f32 %v10028_v7, 0.0  ;;  %v10031_v20 = vld [vmem:[#allocation39_spill] sm:$0xff]  ;;  %v10041_v7 = vld [vmem:[#allocation41_spill] sm:$0xff] }
 0x36a   :  { %v3464_v9 = vadd.f32 %v3448_v58, %v10022_v27  ;;  %v3454_v50 = vadd.f32 %v10025_v60, %v10024_v23  ;;  %v3478_v43 = vadd.f32 %v3462_v26, %v10027_v30  ;;  %v10032_v38 = vmax.f32 %v10031_v20, 0.0  ;;  %v10033_v27 = vld [vmem:[#allocation31_spill] sm:$0xff]  ;;  %v10038_v60 = vld [vmem:[#allocation40_spill] sm:$0xff] }
 0x36b   :  { %v3455_v12 = vadd.f32 %v10030_v59, %v10029_v28  ;;  %v10035_v57 = vmax.f32 %v10034_v21, 0.0  ;;  %v10037_v23 = vmax.f32 %v10036_v6, 0.0  ;;  %v10039_v37 = vmax.f32 %v10038_v60, 0.0  ;;  %v10043_v28 = vld [vmem:[#allocation33_spill] sm:$0xff]  ;;  %v10044_v20 = vld [vmem:[#allocation56_spill] sm:$0xff] }
 0x36c   :  { %v3456_v58 = vadd.f32 %v10033_v27, %v10032_v38  ;;  %v3493_v41 = vadd.f32 %v3477_v42, %v2485_v8  ;;  %v3507_v14 = vadd.f32 %v3491_v32, %v2499_v61  ;;  %v3508_v33 = vadd.f32 %v3492_v52, %v2500_v3  ;;  %v10046_v27 = vld [vmem:[#allocation57_spill] sm:$0xff]  ;;  %v10051_v52 = vld [vmem:[#allocation58_spill] sm:$0xff]  ;;  %v10053_v32 = vld [vmem:[#allocation59_spill] sm:$0xff] }
 0x36d   :  { %v3465_v54 = vadd.f32 %v3449_v51, %v10035_v57  ;;  %v3479_v26 = vadd.f32 %v3463_v31, %v10037_v23  ;;  %v3457_v30 = vadd.f32 %v10040_v13, %v10039_v37  ;;  %v10042_v49 = vmax.f32 %v10041_v7, 0.0  ;;  %v10048_v57 = vld [vmem:[#allocation38_spill] sm:$0xff] }
 0x36e   :  { %v10045_v11 = vmax.f32 %v10044_v20, 0.0  ;;  %v10047_v21 = vmax.f32 %v10046_v27, 0.0  ;;  %v10049_v6 = vmax.f32 %v10048_v57, 0.0  ;;  %v10050_v23 = vmax.f32 %v7359_v10, 0.0  ;;  %v10060_v27 = vld [vmem:[#allocation61_spill] sm:$0xff]  ;;  %v10062_v57 = vld [vmem:[#allocation62_spill] sm:$0xff] }
 0x36f   :  { %v3458_v59 = vadd.f32 %v10043_v28, %v10042_v49  ;;  %v1493_v8 = vadd.f32 %v3863_v15, %v7594_v47  ;;  %v2515_v61 = vmax.f32 %v1491_v29, 0.0  ;;  %v2516_v3 = vmax.f32 %v1492_v34, 0.0  ;;  %v10058_v29 = vld [vmem:[#allocation60_spill] sm:$0xff] }
 0x370   :  { %v3466_v38 = vadd.f32 %v3450_v46, %v10045_v11  ;;  %v3467_v51 = vadd.f32 %v3451_v48, %v10047_v21  ;;  %v3480_v31 = vadd.f32 %v3464_v9, %v10049_v6  ;;  %v3494_v60 = vadd.f32 %v3478_v43, %v10050_v23  ;;  %v10055_v46 = vld [vmem:[#allocation42_spill] sm:$0xff]  ;;  %v10064_v23 = vld [vmem:[#allocation43_spill] sm:$0xff] }
 0x371   :  { %v10052_v42 = vmax.f32 %v10051_v52, 0.0  ;;  %v10054_v37 = vmax.f32 %v10053_v32, 0.0  ;;  %v10056_v13 = vmax.f32 %v10055_v46, 0.0  ;;  %v10057_v7 = vmax.f32 %v7364_v36, 0.0 }
 0x372   :  { %v3509_v28 = vadd.f32 %v3493_v41, %v2501_v0  ;;  %v1494_v10 = vadd.f32 %v3865_v16, %v7594_v47  ;;  %v3523_v43 = vadd.f32 %v3507_v14, %v2515_v61  ;;  %v3524_v15 = vadd.f32 %v3508_v33, %v2516_v3 }
 0x373   :  { %v3468_v49 = vadd.f32 %v3452_v5, %v10052_v42  ;;  %v3469_v11 = vadd.f32 %v3453_v35, %v10054_v37  ;;  %v3481_v48 = vadd.f32 %v3465_v54, %v10056_v13  ;;  %v3495_v9 = vadd.f32 %v3479_v26, %v10057_v7  ;;  %v10067_v26 = vld [vmem:[#allocation44_spill] sm:$0xff]  ;;  %v10077_v13 = vld [vmem:[#allocation45_spill] sm:$0xff] }
 0x374   :  { %v10059_v34 = vmax.f32 %v10058_v29, 0.0  ;;  %v10061_v5 = vmax.f32 %v10060_v27, 0.0  ;;  %v10063_v35 = vmax.f32 %v10062_v57, 0.0  ;;  %v10065_v54 = vmax.f32 %v10064_v23, 0.0  ;;  %v10075_v37 = vld [vmem:[#allocation64_spill] sm:$0xff] }
 0x375   :  { %v10066_v36 = vmax.f32 %v7367_v25, 0.0  ;;  %v3510_v0 = vadd.f32 %v3494_v60, %v2502_v4  ;;  %v1495_v16 = vadd.f32 %v3867_v17, %v7594_v47  ;;  %v2517_v33 = vmax.f32 %v1493_v8, 0.0  ;;  %v10073_v8 = vld [vmem:[#allocation63_spill] sm:$0xff] }
 0x376   :  { %v3470_v20 = vadd.f32 %v3454_v50, %v10059_v34  ;;  %v3471_v21 = vadd.f32 %v3455_v12, %v10061_v5  ;;  %v3472_v6 = vadd.f32 %v3456_v58, %v10063_v35  ;;  %v3482_v52 = vadd.f32 %v3466_v38, %v10065_v54  ;;  %v10086_v35 = vld [vmem:[#allocation47_spill] sm:$0xff] }
 0x377   :  { %v3496_v41 = vadd.f32 %v3480_v31, %v10066_v36  ;;  %v10068_v14 = vmax.f32 %v10067_v26, 0.0  ;;  %v10069_v61 = vmax.f32 %v7370_v62, 0.0  ;;  %v10070_v3 = vmax.f32 %v7484_v40, 0.0  ;;  %v10092_v26 = vld [vmem:[#allocation48_spill] sm:$0xff] }
 0x378   :  { %v1496_v38 = vadd.f32 %v3869_v18, %v7594_v47  ;;  %v2518_v42 = vmax.f32 %v1494_v10, 0.0  ;;  %v3525_v25 = vadd.f32 %v3509_v28, %v2517_v33  ;;  %v10071_v4 = vmax.f32 %v7395_v45, 0.0 }
 0x379   :  { %v3483_v50 = vadd.f32 %v3467_v51, %v10068_v14  ;;  %v3497_v12 = vadd.f32 %v3481_v48, %v10069_v61  ;;  %v3511_v58 = vadd.f32 %v3495_v9, %v10070_v3  ;;  %v10072_v17 = vmax.f32 %v7399_v53, 0.0  ;;  %v10094_v61 = vld [vmem:[#allocation66_spill] sm:$0xff] }
 0x37a   :  { %v3539_v31 = vadd.f32 %v3523_v43, %v10071_v4  ;;  %v10074_v32 = vmax.f32 %v10073_v8, 0.0  ;;  %v10076_v62 = vmax.f32 %v10075_v37, 0.0  ;;  %v10078_v40 = vmax.f32 %v10077_v13, 0.0  ;;  %v10081_v43 = vld [vmem:[#allocation46_spill] sm:$0xff]  ;;  %v10103_v37 = vld [vmem:[#allocation67_spill] sm:$0xff]  ;;  %v10105_v13 = vld [vmem:[#allocation84_spill] sm:$0xff] }
 0x37b   :  { %v3540_v60 = vadd.f32 %v3524_v15, %v10072_v17  ;;  %v10079_v7 = vmax.f32 %v7373_v44, 0.0  ;;  %v10080_v9 = vmax.f32 %v7488_v22, 0.0  ;;  %v1497_v45 = vadd.f32 %v3871_v19, %v7594_v47 }
 0x37c   :  { %v3473_v51 = vadd.f32 %v3457_v30, %v10074_v32  ;;  %v3474_v46 = vadd.f32 %v3458_v59, %v10076_v62  ;;  %v3484_v48 = vadd.f32 %v3468_v49, %v10078_v40  ;;  %v2519_v53 = vmax.f32 %v1495_v16, 0.0 }
 0x37d   :  { %v3498_v18 = vadd.f32 %v3482_v52, %v10079_v7  ;;  %v3512_v28 = vadd.f32 %v3496_v41, %v10080_v9  ;;  %v3526_v10 = vadd.f32 %v3510_v0, %v2518_v42  ;;  %v10082_v15 = vmax.f32 %v10081_v43, 0.0  ;;  %v10090_v0 = vld [vmem:[#allocation70_spill] sm:$0xff] }
 0x37e   :  { %v10083_v29 = vmax.f32 %v7376_v24, 0.0  ;;  %v10084_v34 = vmax.f32 %v7492_v55, 0.0  ;;  %v1498_v44 = vadd.f32 %v8512_v1, %v7594_v47  ;;  %v2520_v27 = vmax.f32 %v1496_v38, 0.0  ;;  %v10107_v7 = vld [vmem:[#allocation6_spill] sm:$0xff] }
 0x37f   :  { %v3485_v30 = vadd.f32 %v3469_v11, %v10082_v15  ;;  %v3527_v22 = vadd.f32 %v3511_v58, %v2519_v53  ;;  %v10085_v5 = vmax.f32 %v7403_v39, 0.0  ;;  %v3622_v19 = vadd.f32 %v3540_v60, %v3539_v31  ;;  %v10101_v60 = vld [vmem:[#allocation49_spill] sm:$0xff]  ;;  %v10110_v15 = vld [vmem:[#allocation50_spill] sm:$0xff] }
 0x380   :  { %v3499_v59 = vadd.f32 %v3483_v50, %v10083_v29  ;;  %v3513_v49 = vadd.f32 %v3497_v12, %v10084_v34  ;;  %v10087_v23 = vmax.f32 %v10086_v35, 0.0  ;;  %v10088_v11 = vmax.f32 %v7379_v56, 0.0  ;;  %v10096_v56 = vld [vmem:[#allocation83_spill] sm:$0xff]  ;;  %v10117_v35 = vld [vmem:[#allocation73_spill] sm:$0xff] }
 0x381   :  { %v3541_v57 = vadd.f32 %v3525_v25, %v10085_v5  ;;  %v10089_v24 = vmax.f32 %v7496_v63, 0.0  ;;  %v1499_v55 = vadd.f32 %v8514_v2, %v7594_v47  ;;  %v2521_v41 = vmax.f32 %v1497_v45, 0.0  ;;  %v10098_v63 = vld [vmem:[#allocation5_spill] sm:$0xff]  ;;  %v10099_v25 = vld [vmem:[#allocation71_spill] sm:$0xff]  ;;  %v10108_v45 = vld [vmem:[#allocation72_spill] sm:$0xff] }
 0x382   :  { %v3486_v54 = vadd.f32 %v3470_v20, %v10087_v23  ;;  %v3500_v52 = vadd.f32 %v3484_v48, %v10088_v11  ;;  %v3528_v1 = vadd.f32 %v3512_v28, %v2520_v27  ;;  %v10091_v16 = vmax.f32 %v10090_v0, 0.0 }
 0x383   :  { %v3514_v36 = vadd.f32 %v3498_v18, %v10089_v24  ;;  %v3623_v39 = vadd.f32 %v3622_v19, %v3541_v57  ;;  %v10093_v14 = vmax.f32 %v10092_v26, 0.0  ;;  %v10095_v20 = vmax.f32 %v10094_v61, 0.0 }
 0x384   :  { %v3542_v33 = vadd.f32 %v3526_v10, %v10091_v16  ;;  %v10097_v3 = vmax.f32 %v10096_v56, 0.0  ;;  %v1500_v38 = vadd.f32 %v10098_v63, %v7594_v47  ;;  %v2522_v42 = vmax.f32 %v1498_v44, 0.0  ;;  %v10128_v56 = vld [vmem:[#allocation12_spill] sm:$0xff] }
 0x385   :  { %v3487_v50 = vadd.f32 %v3471_v21, %v10093_v14  ;;  %v3501_v12 = vadd.f32 %v3485_v30, %v10095_v20  ;;  %v3529_v2 = vadd.f32 %v3513_v49, %v2521_v41  ;;  %v10100_v4 = vmax.f32 %v10099_v25, 0.0  ;;  %v10114_v49 = vld [vmem:[#allocation85_spill] sm:$0xff] }
 0x386   :  { %v3515_v58 = vadd.f32 %v3499_v59, %v10097_v3  ;;  %v3624_v17 = vadd.f32 %v3623_v39, %v3542_v33  ;;  %v10102_v8 = vmax.f32 %v10101_v60, 0.0  ;;  %v10104_v21 = vmax.f32 %v10103_v37, 0.0  ;;  %v10112_v59 = vld [vmem:[#allocation68_spill] sm:$0xff]  ;;  %v10133_v25 = vld [vmem:[#allocation9_spill] sm:$0xff]  ;;  %v10134_v60 = vld [vmem:[#allocation75_spill] sm:$0xff] }
 0x387   :  { %v3543_v31 = vadd.f32 %v3527_v22, %v10100_v4  ;;  %v10106_v40 = vmax.f32 %v10105_v13, 0.0  ;;  %v1501_v18 = vadd.f32 %v10107_v7, %v7594_v47  ;;  %v2523_v9 = vmax.f32 %v1499_v55, 0.0  ;;  %v10116_v22 = vld [vmem:[#allocation7_spill] sm:$0xff]  ;;  %v10121_v55 = vld [vmem:[#allocation69_spill] sm:$0xff]  ;;  %v10125_v33 = vld [vmem:[#allocation8_spill] sm:$0xff] }
 0x388   :  { %v3488_v32 = vadd.f32 %v3472_v6, %v10102_v8  ;;  %v3502_v62 = vadd.f32 %v3486_v54, %v10104_v21  ;;  %v3530_v28 = vadd.f32 %v3514_v36, %v2522_v42  ;;  %v10109_v53 = vmax.f32 %v10108_v45, 0.0  ;;  %v10136_v21 = vld [vmem:[#allocation13_spill] sm:$0xff]  ;;  %v10137_v13 = vld [vmem:[#allocation78_spill] sm:$0xff] }
 0x389   :  { %v3516_v48 = vadd.f32 %v3500_v52, %v10106_v40  ;;  %v3625_v43 = vadd.f32 %v3624_v17, %v3543_v31  ;;  %v10111_v30 = vmax.f32 %v10110_v15, 0.0  ;;  %v10113_v6 = vmax.f32 %v10112_v59, 0.0  ;;  %v10119_v52 = vld [vmem:[#allocation51_spill] sm:$0xff]  ;;  %v10143_v59 = vld [vmem:[#allocation88_spill] sm:$0xff] }
 0x38a   :  { %v3544_v10 = vadd.f32 %v3528_v1, %v10109_v53  ;;  %v10115_v44 = vmax.f32 %v10114_v49, 0.0  ;;  %v1502_v5 = vadd.f32 %v10116_v22, %v7594_v47  ;;  %v2524_v57 = vmax.f32 %v1500_v38, 0.0  ;;  %v10123_v1 = vld [vmem:[#allocation86_spill] sm:$0xff]  ;;  %v10131_v38 = vld [vmem:[#allocation87_spill] sm:$0xff]  ;;  %v10140_v53 = vld [vmem:[#allocation76_spill] sm:$0xff] }
 0x38b   :  { %v3489_v29 = vadd.f32 %v3473_v51, %v10111_v30  ;;  %v3503_v34 = vadd.f32 %v3487_v50, %v10113_v6  ;;  %v3531_v19 = vadd.f32 %v3515_v58, %v2523_v9  ;;  %v10118_v23 = vmax.f32 %v10117_v35, 0.0  ;;  %v10126_v50 = vld [vmem:[#allocation74_spill] sm:$0xff]  ;;  %v10129_v58 = vld [vmem:[#allocation77_spill] sm:$0xff]  ;;  %v10142_v30 = vld [vmem:[#allocation80_spill] sm:$0xff] }
 0x38c   :  { %v3517_v27 = vadd.f32 %v3501_v12, %v10115_v44  ;;  %v3626_v11 = vadd.f32 %v3625_v43, %v3544_v10  ;;  %v10120_v24 = vmax.f32 %v10119_v52, 0.0  ;;  %v10122_v51 = vmax.f32 %v10121_v55, 0.0  ;;  %v10144_v49 = vld [vmem:[#allocation11_spill] sm:$0xff] }
 0x38d   :  { %v3545_v54 = vadd.f32 %v3529_v2, %v10118_v23  ;;  %v10124_v0 = vmax.f32 %v10123_v1, 0.0  ;;  %v1503_v39 = vadd.f32 %v10125_v33, %v7594_v47  ;;  %v2525_v26 = vmax.f32 %v1501_v18, 0.0  ;;  %v10139_v18 = vld [vmem:[#allocation10_spill] sm:$0xff]  ;;  %v10147_v23 = vld [vmem:[#allocation65_spill] sm:$0xff] }
 0x38e   :  { %v3490_v36 = vadd.f32 %v3474_v46, %v10120_v24  ;;  %v3504_v41 = vadd.f32 %v3488_v32, %v10122_v51  ;;  %v3532_v14 = vadd.f32 %v3516_v48, %v2524_v57  ;;  %v10127_v61 = vmax.f32 %v10126_v50, 0.0 }
 0x38f   :  { %v3518_v16 = vadd.f32 %v3502_v62, %v10124_v0  ;;  %v3627_v12 = vadd.f32 %v3626_v11, %v3545_v54  ;;  %v2512_v3 = vmax.f32 %v10128_v56, 0.0  ;;  %v10130_v63 = vmax.f32 %v10129_v58, 0.0  ;;  %v10148_v11 = vld [vmem:[#allocation81_spill] sm:$0xff] }
 0x390   :  { %v3546_v20 = vadd.f32 %v3530_v28, %v10127_v61  ;;  %v10132_v42 = vmax.f32 %v10131_v38, 0.0  ;;  %v1504_v4 = vadd.f32 %v10133_v25, %v7594_v47  ;;  %v2526_v31 = vmax.f32 %v1502_v5, 0.0  ;;  %v10145_v5 = vld [vmem:[#allocation79_spill] sm:$0xff] }
 0x391   :  { %v3505_v46 = vadd.f32 %v3489_v29, %v10130_v63  ;;  %v3533_v17 = vadd.f32 %v3517_v27, %v2525_v26  ;;  %v10135_v8 = vmax.f32 %v10134_v60, 0.0  ;;  %v2513_v62 = vmax.f32 %v10136_v21, 0.0 }
 0x392   :  { %v3519_v2 = vadd.f32 %v3503_v34, %v10132_v42  ;;  %v3628_v37 = vadd.f32 %v3627_v12, %v3546_v20  ;;  %v10138_v40 = vmax.f32 %v10137_v13, 0.0  ;;  %v3520_v7 = vadd.f32 %v3504_v41, %v2512_v3 }
 0x393   :  { %v3547_v32 = vadd.f32 %v3531_v19, %v10135_v8  ;;  %v1505_v9 = vadd.f32 %v10139_v18, %v7594_v47  ;;  %v2527_v28 = vmax.f32 %v1503_v39, 0.0  ;;  %v3534_v45 = vadd.f32 %v3518_v16, %v2526_v31 }
 0x394   :  { %v3506_v48 = vadd.f32 %v3490_v36, %v10138_v40  ;;  %v10141_v10 = vmax.f32 %v10140_v53, 0.0  ;;  %v2542_v29 = vmax.f32 %v10142_v30, 0.0  ;;  %v2514_v6 = vmax.f32 %v10143_v59, 0.0 }
 0x395   :  { %v3629_v15 = vadd.f32 %v3628_v37, %v3547_v32  ;;  %v3521_v34 = vadd.f32 %v3505_v46, %v2513_v62  ;;  %v1506_v44 = vadd.f32 %v10144_v49, %v7594_v47  ;;  %v2528_v27 = vmax.f32 %v1504_v4, 0.0  ;;  %v10149_v47 = vld [vmem:[#allocation82_spill] sm:$0xff] }
 0x396   :  { %v3548_v43 = vadd.f32 %v3532_v14, %v10141_v10  ;;  %v3535_v22 = vadd.f32 %v3519_v2, %v2527_v28  ;;  %v10146_v57 = vmax.f32 %v10145_v5, 0.0  ;;  %v1521_v54 = vadd.f32 %v10139_v18, %v10147_v23 }
 0x397   :  { %v2543_v52 = vmax.f32 %v10148_v11, 0.0  ;;  %v3522_v24 = vadd.f32 %v3506_v48, %v2514_v6  ;;  %v2529_v36 = vmax.f32 %v1505_v9, 0.0  ;;  %v3536_v55 = vadd.f32 %v3520_v7, %v2528_v27 }
 0x398   :  { %v3549_v19 = vadd.f32 %v3533_v17, %v10146_v57  ;;  %v3630_v35 = vadd.f32 %v3629_v15, %v3548_v43  ;;  %v3550_v51 = vadd.f32 %v3534_v45, %v2542_v29  ;;  %v1522_v1 = vadd.f32 %v10144_v49, %v10147_v23 }
 0x399   :  { %v2544_v0 = vmax.f32 %v10149_v47, 0.0  ;;  %v2530_v16 = vmax.f32 %v1506_v44, 0.0  ;;  %v3537_v33 = vadd.f32 %v3521_v34, %v2529_v36  ;;  %v3551_v39 = vadd.f32 %v3535_v22, %v2543_v52 }
 0x39a   :  { %v3631_v41 = vadd.f32 %v3630_v35, %v3549_v19  ;;  %v2545_v14 = vmax.f32 %v1521_v54, 0.0  ;;  %v2546_v12 = vmax.f32 %v1522_v1, 0.0 }
 0x39b   :  { %v3538_v50 = vadd.f32 %v3522_v24, %v2530_v16  ;;  %v3552_v61 = vadd.f32 %v3536_v55, %v2544_v0 }
 0x39c   :  { %v3632_v26 = vadd.f32 %v3631_v41, %v3550_v51  ;;  %v3553_v56 = vadd.f32 %v3537_v33, %v2545_v14 }
 0x39d   :  { %v3554_v58 = vadd.f32 %v3538_v50, %v2546_v12 }
 0x39e   :  { %v3633_v20 = vadd.f32 %v3632_v26, %v3551_v39 }
 0x3a0   :  { %v3634_v3 = vadd.f32 %v3633_v20, %v3552_v61 }
 0x3a2   :  { %v3635_v63 = vadd.f32 %v3634_v3, %v3553_v56 }
 0x3a4   :  { %v3636_v46 = vadd.f32 %v3635_v63, %v3554_v58 }
 0x3a6   :  { %3637 = vst [vmem:[%s7786_s2] sm:$0xff] %v3636_v46 }

</bundles_post_ra>
